<compile_context>
chip_gen: v6e
topology: v6e:2x2x1
jax: 0.10.0
libtpu: 0.0.40
codegen_flags: <defaults>
</compile_context>

<pallas_src>
import functools

import jax
import jax.numpy as jnp
import numpy as np
from jax.experimental import pallas as pl
from jax.experimental.pallas import tpu as pltpu


# ----------------------------------------------------------------------------
# Kernel 1: tiled grad-norm reduction  sqrt(mean(x**2))
# ----------------------------------------------------------------------------
def _sumsq_kernel(x_ref, o_ref, acc_ref, *, inv_n, total_rows, block_rows):
    i = pl.program_id(0)

    @pl.when(i == 0)
    def _():
        acc_ref[...] = jnp.zeros_like(acc_ref)

    xb = x_ref[...]                                            # (block_rows, lane_w) f32
    # Mask the out-of-bounds tail rows of the last (partial) block.
    row = jax.lax.broadcasted_iota(jnp.int32, xb.shape, 0) + i * block_rows
    x2 = jnp.where(row < total_rows, xb * xb, 0.0)

    if block_rows % 8 == 0:
        # Pure-VPU accumulation into an (8, lane_w) vector partial; the expensive
        # cross-lane/sublane reduce is deferred to the final grid step.
        acc_ref[...] += x2.reshape(block_rows // 8, 8, xb.shape[-1]).sum(axis=0)
    else:
        acc_ref[...] += x2                                     # tiny-input single-step case

    @pl.when(i == pl.num_programs(0) - 1)
    def _():
        o_ref[...] = jnp.sqrt(jnp.sum(acc_ref[...], keepdims=True) * inv_n)


def compute_grad_norm(x, *, max_block_bytes=2 << 20):
    """sqrt(mean(x**2)) as a tiled Pallas reduction. Returns (1, 1) float32."""
    flat = x.reshape(-1).astype(jnp.float32)
    n = int(flat.size)

    # Pick the widest lane dim that divides n exactly (no pre-pad copy of x) and
    # keeps >= 8 sublane rows; relax the row constraint if needed; only in the
    # rare case that n is not a multiple of 128 do we pay one small pad copy.
    lane_w = next((w for w in (1024, 512, 256, 128) if n % w == 0 and n // w >= 8), None)
    if lane_w is None:
        lane_w = next((w for w in (1024, 512, 256, 128) if n % w == 0), None)
    if lane_w is None:
        lane_w = 128
        flat = jnp.pad(flat, (0, (-n) % lane_w))               # zeros don't affect sum-sq

    rows = int(flat.size) // lane_w
    x2d = flat.reshape(rows, lane_w)

    max_block_rows = max(8, (max_block_bytes // (4 * lane_w)) // 8 * 8)
    if rows >= 8:
        block_rows = min(max_block_rows, (rows // 8) * 8)      # multiple of 8, <= rows
    else:
        block_rows = rows                                      # single tiny block
    grid = (pl.cdiv(rows, block_rows),)
    acc_rows = 8 if block_rows % 8 == 0 else block_rows

    return pl.pallas_call(
        functools.partial(_sumsq_kernel, inv_n=1.0 / n,
                          total_rows=rows, block_rows=block_rows),
        out_shape=jax.ShapeDtypeStruct((1, 1), jnp.float32),
        grid=grid,
        in_specs=[pl.BlockSpec((block_rows, lane_w), lambda i: (i, 0))],
        out_specs=pl.BlockSpec((1, 1), lambda i: (0, 0)),
        scratch_shapes=[pltpu.VMEM((acc_rows, lane_w), jnp.float32)],
        compiler_params=pltpu.CompilerParams(dimension_semantics=("arbitrary",)),
    )(x2d)


# ----------------------------------------------------------------------------
# Kernel 2: fused ConvLSTM cell (batch-blocked)
# ----------------------------------------------------------------------------
def _convlstm_kernel(inv_norm_ref, xhp_ref, cell_ref, wg_ref, bg_ref, wo_ref, bo_ref,
                     out_ref, hpad_ref, *, H, W, Cin, Ch, BB):
    HW = H * W
    M = BB * HW
    Cxh = Cin + Ch
    taps = [(dy, dx) for dy in range(3) for dx in range(3)]

    # ---- fold 1/grad_norm into the x-channel rows of the gate weights, in-kernel.
    # (x/g) conv W == x conv (W with x-input rows scaled by 1/g).  Doing the scale
    # here keeps the packed weights norm-independent (hoistable/cacheable across
    # calls) and removes the per-call XLA rescale+repack chain.
    inv_g = inv_norm_ref[0, 0]
    cidx = jax.lax.broadcasted_iota(jnp.int32, wg_ref.shape, 1)
    wg_s = (wg_ref[...].astype(jnp.float32) *
            jnp.where(cidx < Cin, inv_g, 1.0)).astype(jnp.bfloat16)    # (9, Cxh, 4*Ch)

    # ---- gates conv: 9 accumulating matmuls over 3x3 im2col taps read straight
    # from the spatially padded cat(x, hidden) block (bf16 operands, f32 acc).
    acc = None
    for t, (dy, dx) in enumerate(taps):
        xt = xhp_ref[:, dy:dy + H, dx:dx + W, :].reshape(M, Cxh)       # bf16
        part = jnp.dot(xt, wg_s[t], preferred_element_type=jnp.float32)
        acc = part if acc is None else acc + part
    acc = acc + bg_ref[...]                                            # (M, 4*Ch) f32

    # ---- one full-width transcendental pass ----
    # lanes [0, 3*Ch): sigmoid ; lanes [3*Ch, 4*Ch): tanh = 2*sigmoid(2x) - 1
    lane = jax.lax.broadcasted_iota(jnp.int32, acc.shape, 1)
    is_sig = lane < 3 * Ch
    s = jax.nn.sigmoid(jnp.where(is_sig, acc, 2.0 * acc))
    g = jnp.where(is_sig, s, 2.0 * s - 1.0)

    in_g = g[:, 0 * Ch:1 * Ch]
    rem_g = g[:, 1 * Ch:2 * Ch]
    out_g = g[:, 2 * Ch:3 * Ch]
    cg = g[:, 3 * Ch:4 * Ch]

    new_cell = rem_g * cell_ref[...].reshape(M, Ch) + in_g * cg
    new_hidden = out_g * jnp.tanh(new_cell)                            # (M, Ch) f32

    # ---- zero-pad new hidden (bf16) into scratch.  The border is re-zeroed every
    # step: scratch is per-core and with a "parallel" grid a one-time
    # pl.when(program_id==0) init would be skipped on the second megacore.
    hpad_ref[:, 0:1, :, :] = jnp.zeros((BB, 1, W + 2, Ch), jnp.bfloat16)
    hpad_ref[:, H + 1:H + 2, :, :] = jnp.zeros((BB, 1, W + 2, Ch), jnp.bfloat16)
    hpad_ref[:, :, 0:1, :] = jnp.zeros((BB, H + 2, 1, Ch), jnp.bfloat16)
    hpad_ref[:, :, W + 1:W + 2, :] = jnp.zeros((BB, H + 2, 1, Ch), jnp.bfloat16)
    hpad_ref[:, 1:H + 1, 1:W + 1, :] = (
        new_hidden.reshape(BB, H, W, Ch).astype(jnp.bfloat16))

    # ---- conv_out: 9 accumulating matmuls straight off the padded hidden (no
    # im2col scratch / masked narrow scatter + reload).
    acc_o = None
    for t, (dy, dx) in enumerate(taps):
        ht = hpad_ref[:, dy:dy + H, dx:dx + W, :].reshape(M, Ch)       # bf16
        part = jnp.dot(ht, wo_ref[t], preferred_element_type=jnp.float32)
        acc_o = part if acc_o is None else acc_o + part
    acc_o = acc_o + bo_ref[...]                                        # (M, COUT_PAD)

    # Narrow, exact-size writeback: only the Cin real output channels go to HBM.
    out_ref[...] = acc_o[:, :Cin].reshape(BB, HW, Cin)


def _pick_batch_block(B, max_bb=8):
    """Largest divisor of B that is <= max_bb while leaving >= 2 grid steps (so both
    v7x TensorCores get work); falls back to the largest divisor <= max_bb."""
    divs = [d for d in range(1, B + 1) if B % d == 0 and d <= max_bb]
    for d in reversed(divs):
        if B // d >= 2:
            return d
    return divs[-1]


def convlstm_forward(x_nchw, hidden_nchw, cell_nchw,
                     w_gates, b_gates, w_out, b_out, *, max_batch_block=8):
    """Forward pass of ConvLstmGradModel (downsamp=None, eval-mode dropout).

    x_nchw:      (B, Cin, H, W)   float32   (PyTorch NCHW)
    hidden/cell: (B, Ch,  H, W)   float32   (module state)
    w_gates:     (4*Ch, Cin+Ch, 3, 3), b_gates: (4*Ch,)
    w_out:       (Cin, Ch, 3, 3),      b_out:   (Cin,)
    Returns (out in NCHW, grad_norm (1,1)).
    """
    x = jnp.transpose(x_nchw, (0, 2, 3, 1)).astype(jnp.float32)        # NHWC
    h = jnp.transpose(hidden_nchw, (0, 2, 3, 1)).astype(jnp.float32)
    c = jnp.transpose(cell_nchw, (0, 2, 3, 1)).astype(jnp.float32)
    B, H, W, Cin = x.shape
    Ch = h.shape[-1]
    HW = H * W
    Cxh = Cin + Ch
    COUT_PAD = max(128, -(-Cin // 128) * 128)   # lane-dense N for the conv_out matmul

    # grad_norm = sqrt(mean(x**2))  (Pallas tiled reduction on the raw input)
    norm = compute_grad_norm(x_nchw)                                    # (1, 1)
    inv_norm = (1.0 / norm).astype(jnp.float32)                         # (1, 1) SMEM scalar

    # TODO(synk): nn.Dropout is identity here (eval mode); stochastic dropout not implemented.

    # Gates input: cat(x, hidden), spatially zero-padded, bf16.  The kernel does the
    # 3x3 im2col internally, so HBM carries ~1x the raw data instead of a
    # 9x-expanded f32 patch tensor.
    xh = jnp.concatenate([x, h], axis=-1)                               # (B,H,W,Cxh)
    xhp = jnp.pad(xh, ((0, 0), (1, 1), (1, 1), (0, 0))).astype(jnp.bfloat16)

    # Weight packs are norm-independent (1/grad_norm applied in-kernel) -> hoistable.
    wg = jnp.transpose(w_gates, (2, 3, 1, 0)).reshape(9, Cxh, 4 * Ch).astype(jnp.bfloat16)
    bg = b_gates.reshape(1, 4 * Ch).astype(jnp.float32)
    wo = jnp.transpose(w_out, (2, 3, 1, 0)).reshape(9, Ch, Cin)
    wo = jnp.pad(wo, ((0, 0), (0, 0), (0, COUT_PAD - Cin))).astype(jnp.bfloat16)
    bo = jnp.pad(b_out.reshape(1, Cin), ((0, 0), (0, COUT_PAD - Cin))).astype(jnp.float32)

    cellf = c.reshape(B, HW, Ch)

    BB = _pick_batch_block(B, max_batch_block)                          # batch block size
    kernel = functools.partial(_convlstm_kernel, H=H, W=W, Cin=Cin, Ch=Ch, BB=BB)

    out_flat = pl.pallas_call(
        kernel,
        out_shape=jax.ShapeDtypeStruct((B, HW, Cin), jnp.float32),
        grid=(B // BB,),
        in_specs=[
            pl.BlockSpec(memory_space=pltpu.MemorySpace.SMEM),                 # 1/grad_norm
            pl.BlockSpec((BB, H + 2, W + 2, Cxh), lambda b: (b, 0, 0, 0)),     # padded cat(x,h) bf16
            pl.BlockSpec((BB, HW, Ch), lambda b: (b, 0, 0)),                   # cell state f32
            pl.BlockSpec((9, Cxh, 4 * Ch), lambda b: (0, 0, 0)),               # gate weights bf16
            pl.BlockSpec((1, 4 * Ch), lambda b: (0, 0)),                       # gate bias
            pl.BlockSpec((9, Ch, COUT_PAD), lambda b: (0, 0, 0)),              # conv_out weights bf16
            pl.BlockSpec((1, COUT_PAD), lambda b: (0, 0)),                     # conv_out bias
        ],
        out_specs=pl.BlockSpec((BB, HW, Cin), lambda b: (b, 0, 0)),
        scratch_shapes=[pltpu.VMEM((BB, H + 2, W + 2, Ch), jnp.bfloat16)],     # padded hidden
        compiler_params=pltpu.CompilerParams(dimension_semantics=("parallel",)),
    )(inv_norm, xhp, cellf, wg, bg, wo, bo)

    out = out_flat.reshape(B, H, W, Cin)
    return jnp.transpose(out, (0, 3, 1, 2)), norm


# ----------------------------------------------------------------------------
# Pure-JAX reference (mirrors the PyTorch forward) for correctness check
# ----------------------------------------------------------------------------
def _conv2d_nchw(x, w, b):
    out = jax.lax.conv_general_dilated(
        x, w, window_strides=(1, 1), padding=((1, 1), (1, 1)),
        dimension_numbers=('NCHW', 'OIHW', 'NCHW'))
    return out + b.reshape(1, -1, 1, 1)


def reference_forward(x, hidden, cell, w_gates, b_gates, w_out, b_out):
    grad_norm = jnp.sqrt(jnp.mean(x ** 2))
    xn = x / grad_norm
    gates = _conv2d_nchw(jnp.concatenate([xn, hidden], axis=1), w_gates, b_gates)
    in_g, rem_g, out_g, cg = jnp.split(gates, 4, axis=1)
    in_g, rem_g, out_g = map(jax.nn.sigmoid, (in_g, rem_g, out_g))
    cg = jnp.tanh(cg)
    cell = rem_g * cell + in_g * cg
    hidden = out_g * jnp.tanh(cell)
    return _conv2d_nchw(hidden, w_out, b_out)


if __name__ == "__main__":
    B, Cin, H, W = 2, 4, 16, 16
    Ch = 32  # dim_hidden

    key = jax.random.PRNGKey(0)
    kx, kh, kc, kw1, kb1, kw2, kb2 = jax.random.split(key, 7)
    x = jax.random.normal(kx, (B, Cin, H, W), jnp.float32)
    w_gates = 0.1 * jax.random.normal(kw1, (4 * Ch, Cin + Ch, 3, 3), jnp.float32)
    b_gates = 0.1 * jax.random.normal(kb1, (4 * Ch,), jnp.float32)
    w_out = 0.1 * jax.random.normal(kw2, (Cin, Ch, 3, 3), jnp.float32)
    b_out = 0.1 * jax.random.normal(kb2, (Cin,), jnp.float32)

    # reset_state(x) would give zeros; use small random state so the hidden/cell
    # paths of the kernel are actually exercised by the correctness check.
    hidden = 0.5 * jax.random.normal(kh, (B, Ch, H, W), jnp.float32)
    cell = 0.5 * jax.random.normal(kc, (B, Ch, H, W), jnp.float32)

    fwd = jax.jit(convlstm_forward)
    out, norm = fwd(x, hidden, cell, w_gates, b_gates, w_out, b_out)
    out = jax.block_until_ready(out)

    ref = reference_forward(x, hidden, cell, w_gates, b_gates, w_out, b_out)
    ref_norm = jnp.sqrt(jnp.mean(x ** 2))
    np.testing.assert_allclose(np.asarray(norm)[0, 0], float(ref_norm), rtol=1e-5)
    # bf16 MXU operands (f32 accumulation) -> slightly looser absolute tolerance
    np.testing.assert_allclose(np.asarray(out), np.asarray(ref),
                               rtol=2e-2, atol=3e-2)
    print("KERNEL_OK")
</pallas_src>

<mosaic_0001>
module attributes {stable_mosaic.version = 11 : i64} {
  func.func @_sumsq_kernel(%arg0: i32, %arg1: memref<8x256xf32, #tpu.memory_space<vmem>>, %arg2: memref<1x1xf32, #tpu.memory_space<vmem>>, %arg3: memref<8x256xf32, #tpu.memory_space<vmem>>) attributes {dimension_semantics = [#tpu.dimension_semantics<arbitrary>], iteration_bounds = array<i64: 1>, scalar_prefetch = 0 : i64, scratch_operands = 1 : i64, tpu.core_type = #tpu.core_type<tc>, window_params = [{transform_indices = @transform_0, window_bounds = array<i64: 8, 256>}, {pipeline_mode = #tpu.pipeline_mode<synchronous>, transform_indices = @transform_1, window_bounds = array<i64: 1, 1>}]} {
    %c0_i32 = arith.constant 0 : i32
    %0 = arith.cmpi eq, %arg0, %c0_i32 : i32
    %1 = arith.extui %0 : i1 to i32
    %c0_i32_0 = arith.constant 0 : i32
    %2 = arith.cmpi ne, %1, %c0_i32_0 : i32
    scf.if %2 {
      %cst_10 = arith.constant 0.000000e+00 : f32
      %21 = vector.broadcast %cst_10 : f32 to vector<8x256xf32>
      %c0_11 = arith.constant 0 : index
      %c0_12 = arith.constant 0 : index
      %22 = vector.load %arg3[%c0_11, %c0_12] : memref<8x256xf32, #tpu.memory_space<vmem>>, vector<8x256xf32>
      tpu.vector_store %arg3[%c0_11, %c0_12], %21 {strides = array<i32>} : memref<8x256xf32, #tpu.memory_space<vmem>>, vector<8x256xf32>,
    } else {
    }
    %c0 = arith.constant 0 : index
    %c0_1 = arith.constant 0 : index
    %3 = vector.load %arg1[%c0, %c0_1] : memref<8x256xf32, #tpu.memory_space<vmem>>, vector<8x256xf32>
    %4 = tpu.iota {dimensions = array<i32: 0>} : vector<8x256xi32>
    %c8_i32 = arith.constant 8 : i32
    %5 = arith.muli %arg0, %c8_i32 : i32
    %6 = vector.broadcast %5 : i32 to vector<8x256xi32>
    %7 = arith.addi %4, %6 : vector<8x256xi32>
    %c8_i32_2 = arith.constant 8 : i32
    %8 = vector.broadcast %c8_i32_2 : i32 to vector<8x256xi32>
    %9 = arith.cmpi slt, %7, %8 : vector<8x256xi32>
    %10 = arith.mulf %3, %3 : vector<8x256xf32>
    %cst = arith.constant 0.000000e+00 : f32
    %11 = vector.broadcast %cst : f32 to vector<8x256xf32>
    %12 = arith.select %9, %10, %11 : vector<8x256xi1>, vector<8x256xf32>
    %c0_3 = arith.constant 0 : index
    %c0_4 = arith.constant 0 : index
    %13 = vector.load %arg3[%c0_3, %c0_4] : memref<8x256xf32, #tpu.memory_space<vmem>>, vector<8x256xf32>
    %14 = vector.shape_cast %12 : vector<8x256xf32> to vector<1x8x256xf32>
    %cst_5 = arith.constant dense<0.000000e+00> : vector<8x256xf32>
    %15 = vector.multi_reduction <add>, %14, %cst_5 [0] : vector<1x8x256xf32> to vector<8x256xf32>
    %16 = arith.addf %13, %15 : vector<8x256xf32>
    %c0_6 = arith.constant 0 : index
    %c0_7 = arith.constant 0 : index
    %17 = vector.load %arg3[%c0_6, %c0_7] : memref<8x256xf32, #tpu.memory_space<vmem>>, vector<8x256xf32>
    tpu.vector_store %arg3[%c0_6, %c0_7], %16 {strides = array<i32>} : memref<8x256xf32, #tpu.memory_space<vmem>>, vector<8x256xf32>,
    %c0_i32_8 = arith.constant 0 : i32
    %18 = arith.cmpi eq, %arg0, %c0_i32_8 : i32
    %19 = arith.extui %18 : i1 to i32
    %c0_i32_9 = arith.constant 0 : i32
    %20 = arith.cmpi ne, %19, %c0_i32_9 : i32
    scf.if %20 {
      %c0_10 = arith.constant 0 : index
      %c0_11 = arith.constant 0 : index
      %21 = vector.load %arg3[%c0_10, %c0_11] : memref<8x256xf32, #tpu.memory_space<vmem>>, vector<8x256xf32>
      %22 = vector.shape_cast %21 : vector<8x256xf32> to vector<1x8x256xf32>
      %cst_12 = arith.constant dense<0.000000e+00> : vector<1xf32>
      %23 = vector.multi_reduction <add>, %22, %cst_12 [1, 2] : vector<1x8x256xf32> to vector<1xf32>
      %24 = vector.shape_cast %23 : vector<1xf32> to vector<1x1x1xf32>
      %25 = vector.extract %24[0, 0, 0] : f32 from vector<1x1x1xf32>
      %26 = vector.broadcast %25 : f32 to vector<1x1xf32>
      %cst_13 = arith.constant 4.8828125E-4 : f32
      %27 = vector.broadcast %cst_13 : f32 to vector<1x1xf32>
      %28 = arith.mulf %26, %27 : vector<1x1xf32>
      %29 = math.sqrt %28 : vector<1x1xf32>
      %c0_14 = arith.constant 0 : index
      %c0_15 = arith.constant 0 : index
      %30 = vector.load %arg2[%c0_14, %c0_15] : memref<1x1xf32, #tpu.memory_space<vmem>>, vector<1x1xf32>
      tpu.vector_store %arg2[%c0_14, %c0_15], %29 {strides = array<i32>} : memref<1x1xf32, #tpu.memory_space<vmem>>, vector<1x1xf32>,
    } else {
    }
    return
  }
  func.func @transform_0(%arg0: i32) -> (i32, i32) {
    %c0_i32 = arith.constant 0 : i32
    %c0_i32_0 = arith.constant 0 : i32
    return %arg0, %c0_i32 : i32, i32
  }
  func.func @transform_1(%arg0: i32) -> (i32, i32) {
    %c0_i32 = arith.constant 0 : i32
    %c0_i32_0 = arith.constant 0 : i32
    %c0_i32_1 = arith.constant 0 : i32
    return %c0_i32, %c0_i32_0 : i32, i32
  }
}

module attributes {stable_mosaic.version = 11 : i64} {
  func.func @_convlstm_kernel(%arg0: i32, %arg1: memref<1x1xf32, #tpu.memory_space<smem>>, %arg2: memref<1x18x18x36xbf16, #tpu.memory_space<vmem>>, %arg3: memref<1x256x32xf32, #tpu.memory_space<vmem>>, %arg4: memref<9x36x128xbf16, #tpu.memory_space<vmem>>, %arg5: memref<1x128xf32, #tpu.memory_space<vmem>>, %arg6: memref<9x32x128xbf16, #tpu.memory_space<vmem>>, %arg7: memref<1x128xf32, #tpu.memory_space<vmem>>, %arg8: memref<1x256x4xf32, #tpu.memory_space<vmem>>, %arg9: memref<1x18x18x32xbf16, #tpu.memory_space<vmem>>) attributes {dimension_semantics = [#tpu.dimension_semantics<parallel>], iteration_bounds = array<i64: 2>, scalar_prefetch = 0 : i64, scratch_operands = 1 : i64, tpu.core_type = #tpu.core_type<tc>, window_params = [{transform_indices = @transform_0, window_bounds = array<i64: 1, 1>}, {transform_indices = @transform_1, window_bounds = array<i64: 1, 18, 18, 36>}, {transform_indices = @transform_2, window_bounds = array<i64: 1, 256, 32>}, {pipeline_mode = #tpu.pipeline_mode<synchronous>, transform_indices = @transform_3, window_bounds = array<i64: 9, 36, 128>}, {pipeline_mode = #tpu.pipeline_mode<synchronous>, transform_indices = @transform_4, window_bounds = array<i64: 1, 128>}, {pipeline_mode = #tpu.pipeline_mode<synchronous>, transform_indices = @transform_5, window_bounds = array<i64: 9, 32, 128>}, {pipeline_mode = #tpu.pipeline_mode<synchronous>, transform_indices = @transform_6, window_bounds = array<i64: 1, 128>}, {transform_indices = @transform_7, window_bounds = array<i64: 1, 256, 4>}]} {
    %c0 = arith.constant 0 : index
    %c0_0 = arith.constant 0 : index
    %0 = memref.load %arg1[%c0, %c0_0] : memref<1x1xf32, #tpu.memory_space<smem>>
    %1 = tpu.iota {dimensions = array<i32: 1>} : vector<9x36x128xi32>
    %c0_1 = arith.constant 0 : index
    %c0_2 = arith.constant 0 : index
    %c0_3 = arith.constant 0 : index
    %2 = vector.load %arg4[%c0_1, %c0_2, %c0_3] : memref<9x36x128xbf16, #tpu.memory_space<vmem>>, vector<9x36x128xbf16>
    %3 = arith.extf %2 : vector<9x36x128xbf16> to vector<9x36x128xf32>
    %c4_i32 = arith.constant 4 : i32
    %4 = vector.broadcast %c4_i32 : i32 to vector<9x36x128xi32>
    %5 = arith.cmpi slt, %1, %4 : vector<9x36x128xi32>
    %cst = arith.constant 1.000000e+00 : f32
    %6 = vector.broadcast %0 : f32 to vector<9x36x128xf32>
    %7 = vector.broadcast %cst : f32 to vector<9x36x128xf32>
    %8 = arith.select %5, %6, %7 : vector<9x36x128xi1>, vector<9x36x128xf32>
    %9 = arith.mulf %3, %8 : vector<9x36x128xf32>
    %10 = arith.truncf %9 : vector<9x36x128xf32> to vector<9x36x128xbf16>
    %c0_4 = arith.constant 0 : index
    %c0_5 = arith.constant 0 : index
    %c0_6 = arith.constant 0 : index
    %c0_7 = arith.constant 0 : index
    %11 = vector.load %arg2[%c0_4, %c0_5, %c0_6, %c0_7] : memref<1x18x18x36xbf16, #tpu.memory_space<vmem>>, vector<1x16x16x36xbf16>
    %12 = vector.shape_cast %11 : vector<1x16x16x36xbf16> to vector<256x36xbf16>
    %13 = vector.extract_strided_slice %10 {offsets = [0, 0, 0], sizes = [1, 36, 128], strides = [1, 1, 1]} : vector<9x36x128xbf16> to vector<1x36x128xbf16>
    %14 = vector.shape_cast %13 : vector<1x36x128xbf16> to vector<36x128xbf16>
    %cst_8 = arith.constant dense<0.000000e+00> : vector<256x128xf32>
    %15 = tpu.matmul %12, %14, %cst_8 {dimension_numbers = #tpu.dot_dimension_numbers<[1], [0], [0], [1], [0, 0, 1, 1], [], []>} : vector<256x36xbf16>, vector<36x128xbf16>, vector<256x128xf32> -> vector<256x128xf32>
    %c0_9 = arith.constant 0 : index
    %c0_10 = arith.constant 0 : index
    %c1 = arith.constant 1 : index
    %c0_11 = arith.constant 0 : index
    %16 = vector.load %arg2[%c0_9, %c0_10, %c1, %c0_11] : memref<1x18x18x36xbf16, #tpu.memory_space<vmem>>, vector<1x16x16x36xbf16>
    %17 = vector.shape_cast %16 : vector<1x16x16x36xbf16> to vector<256x36xbf16>
    %18 = vector.extract_strided_slice %10 {offsets = [1, 0, 0], sizes = [1, 36, 128], strides = [1, 1, 1]} : vector<9x36x128xbf16> to vector<1x36x128xbf16>
    %19 = vector.shape_cast %18 : vector<1x36x128xbf16> to vector<36x128xbf16>
    %cst_12 = arith.constant dense<0.000000e+00> : vector<256x128xf32>
    %20 = tpu.matmul %17, %19, %cst_12 {dimension_numbers = #tpu.dot_dimension_numbers<[1], [0], [0], [1], [0, 0, 1, 1], [], []>} : vector<256x36xbf16>, vector<36x128xbf16>, vector<256x128xf32> -> vector<256x128xf32>
    %21 = arith.addf %15, %20 : vector<256x128xf32>
    %c0_13 = arith.constant 0 : index
    %c0_14 = arith.constant 0 : index
    %c2 = arith.constant 2 : index
    %c0_15 = arith.constant 0 : index
    %22 = vector.load %arg2[%c0_13, %c0_14, %c2, %c0_15] : memref<1x18x18x36xbf16, #tpu.memory_space<vmem>>, vector<1x16x16x36xbf16>
    %23 = vector.shape_cast %22 : vector<1x16x16x36xbf16> to vector<256x36xbf16>
    %24 = vector.extract_strided_slice %10 {offsets = [2, 0, 0], sizes = [1, 36, 128], strides = [1, 1, 1]} : vector<9x36x128xbf16> to vector<1x36x128xbf16>
    %25 = vector.shape_cast %24 : vector<1x36x128xbf16> to vector<36x128xbf16>
    %cst_16 = arith.constant dense<0.000000e+00> : vector<256x128xf32>
    %26 = tpu.matmul %23, %25, %cst_16 {dimension_numbers = #tpu.dot_dimension_numbers<[1], [0], [0], [1], [0, 0, 1, 1], [], []>} : vector<256x36xbf16>, vector<36x128xbf16>, vector<256x128xf32> -> vector<256x128xf32>
    %27 = arith.addf %21, %26 : vector<256x128xf32>
    %c0_17 = arith.constant 0 : index
    %c1_18 = arith.constant 1 : index
    %c0_19 = arith.constant 0 : index
    %c0_20 = arith.constant 0 : index
    %28 = vector.load %arg2[%c0_17, %c1_18, %c0_19, %c0_20] : memref<1x18x18x36xbf16, #tpu.memory_space<vmem>>, vector<1x16x16x36xbf16>
    %29 = vector.shape_cast %28 : vector<1x16x16x36xbf16> to vector<256x36xbf16>
    %30 = vector.extract_strided_slice %10 {offsets = [3, 0, 0], sizes = [1, 36, 128], strides = [1, 1, 1]} : vector<9x36x128xbf16> to vector<1x36x128xbf16>
    %31 = vector.shape_cast %30 : vector<1x36x128xbf16> to vector<36x128xbf16>
    %cst_21 = arith.constant dense<0.000000e+00> : vector<256x128xf32>
    %32 = tpu.matmul %29, %31, %cst_21 {dimension_numbers = #tpu.dot_dimension_numbers<[1], [0], [0], [1], [0, 0, 1, 1], [], []>} : vector<256x36xbf16>, vector<36x128xbf16>, vector<256x128xf32> -> vector<256x128xf32>
    %33 = arith.addf %27, %32 : vector<256x128xf32>
    %c0_22 = arith.constant 0 : index
    %c1_23 = arith.constant 1 : index
    %c1_24 = arith.constant 1 : index
    %c0_25 = arith.constant 0 : index
    %34 = vector.load %arg2[%c0_22, %c1_23, %c1_24, %c0_25] : memref<1x18x18x36xbf16, #tpu.memory_space<vmem>>, vector<1x16x16x36xbf16>
    %35 = vector.shape_cast %34 : vector<1x16x16x36xbf16> to vector<256x36xbf16>
    %36 = vector.extract_strided_slice %10 {offsets = [4, 0, 0], sizes = [1, 36, 128], strides = [1, 1, 1]} : vector<9x36x128xbf16> to vector<1x36x128xbf16>
    %37 = vector.shape_cast %36 : vector<1x36x128xbf16> to vector<36x128xbf16>
    %cst_26 = arith.constant dense<0.000000e+00> : vector<256x128xf32>
    %38 = tpu.matmul %35, %37, %cst_26 {dimension_numbers = #tpu.dot_dimension_numbers<[1], [0], [0], [1], [0, 0, 1, 1], [], []>} : vector<256x36xbf16>, vector<36x128xbf16>, vector<256x128xf32> -> vector<256x128xf32>
    %39 = arith.addf %33, %38 : vector<256x128xf32>
    %c0_27 = arith.constant 0 : index
    %c1_28 = arith.constant 1 : index
    %c2_29 = arith.constant 2 : index
    %c0_30 = arith.constant 0 : index
    %40 = vector.load %arg2[%c0_27, %c1_28, %c2_29, %c0_30] : memref<1x18x18x36xbf16, #tpu.memory_space<vmem>>, vector<1x16x16x36xbf16>
    %41 = vector.shape_cast %40 : vector<1x16x16x36xbf16> to vector<256x36xbf16>
    %42 = vector.extract_strided_slice %10 {offsets = [5, 0, 0], sizes = [1, 36, 128], strides = [1, 1, 1]} : vector<9x36x128xbf16> to vector<1x36x128xbf16>
    %43 = vector.shape_cast %42 : vector<1x36x128xbf16> to vector<36x128xbf16>
    %cst_31 = arith.constant dense<0.000000e+00> : vector<256x128xf32>
    %44 = tpu.matmul %41, %43, %cst_31 {dimension_numbers = #tpu.dot_dimension_numbers<[1], [0], [0], [1], [0, 0, 1, 1], [], []>} : vector<256x36xbf16>, vector<36x128xbf16>, vector<256x128xf32> -> vector<256x128xf32>
    %45 = arith.addf %39, %44 : vector<256x128xf32>
    %c0_32 = arith.constant 0 : index
    %c2_33 = arith.constant 2 : index
    %c0_34 = arith.constant 0 : index
    %c0_35 = arith.constant 0 : index
    %46 = vector.load %arg2[%c0_32, %c2_33, %c0_34, %c0_35] : memref<1x18x18x36xbf16, #tpu.memory_space<vmem>>, vector<1x16x16x36xbf16>
    %47 = vector.shape_cast %46 : vector<1x16x16x36xbf16> to vector<256x36xbf16>
    %48 = vector.extract_strided_slice %10 {offsets = [6, 0, 0], sizes = [1, 36, 128], strides = [1, 1, 1]} : vector<9x36x128xbf16> to vector<1x36x128xbf16>
    %49 = vector.shape_cast %48 : vector<1x36x128xbf16> to vector<36x128xbf16>
    %cst_36 = arith.constant dense<0.000000e+00> : vector<256x128xf32>
    %50 = tpu.matmul %47, %49, %cst_36 {dimension_numbers = #tpu.dot_dimension_numbers<[1], [0], [0], [1], [0, 0, 1, 1], [], []>} : vector<256x36xbf16>, vector<36x128xbf16>, vector<256x128xf32> -> vector<256x128xf32>
    %51 = arith.addf %45, %50 : vector<256x128xf32>
    %c0_37 = arith.constant 0 : index
    %c2_38 = arith.constant 2 : index
    %c1_39 = arith.constant 1 : index
    %c0_40 = arith.constant 0 : index
    %52 = vector.load %arg2[%c0_37, %c2_38, %c1_39, %c0_40] : memref<1x18x18x36xbf16, #tpu.memory_space<vmem>>, vector<1x16x16x36xbf16>
    %53 = vector.shape_cast %52 : vector<1x16x16x36xbf16> to vector<256x36xbf16>
    %54 = vector.extract_strided_slice %10 {offsets = [7, 0, 0], sizes = [1, 36, 128], strides = [1, 1, 1]} : vector<9x36x128xbf16> to vector<1x36x128xbf16>
    %55 = vector.shape_cast %54 : vector<1x36x128xbf16> to vector<36x128xbf16>
    %cst_41 = arith.constant dense<0.000000e+00> : vector<256x128xf32>
    %56 = tpu.matmul %53, %55, %cst_41 {dimension_numbers = #tpu.dot_dimension_numbers<[1], [0], [0], [1], [0, 0, 1, 1], [], []>} : vector<256x36xbf16>, vector<36x128xbf16>, vector<256x128xf32> -> vector<256x128xf32>
    %57 = arith.addf %51, %56 : vector<256x128xf32>
    %c0_42 = arith.constant 0 : index
    %c2_43 = arith.constant 2 : index
    %c2_44 = arith.constant 2 : index
    %c0_45 = arith.constant 0 : index
    %58 = vector.load %arg2[%c0_42, %c2_43, %c2_44, %c0_45] : memref<1x18x18x36xbf16, #tpu.memory_space<vmem>>, vector<1x16x16x36xbf16>
    %59 = vector.shape_cast %58 : vector<1x16x16x36xbf16> to vector<256x36xbf16>
    %60 = vector.extract_strided_slice %10 {offsets = [8, 0, 0], sizes = [1, 36, 128], strides = [1, 1, 1]} : vector<9x36x128xbf16> to vector<1x36x128xbf16>
    %61 = vector.shape_cast %60 : vector<1x36x128xbf16> to vector<36x128xbf16>
    %cst_46 = arith.constant dense<0.000000e+00> : vector<256x128xf32>
    %62 = tpu.matmul %59, %61, %cst_46 {dimension_numbers = #tpu.dot_dimension_numbers<[1], [0], [0], [1], [0, 0, 1, 1], [], []>} : vector<256x36xbf16>, vector<36x128xbf16>, vector<256x128xf32> -> vector<256x128xf32>
    %63 = arith.addf %57, %62 : vector<256x128xf32>
    %c0_47 = arith.constant 0 : index
    %c0_48 = arith.constant 0 : index
    %64 = vector.load %arg5[%c0_47, %c0_48] : memref<1x128xf32, #tpu.memory_space<vmem>>, vector<1x128xf32>
    %65 = vector.broadcast %64 : vector<1x128xf32> to vector<256x128xf32>
    %66 = arith.addf %63, %65 : vector<256x128xf32>
    %67 = tpu.iota {dimensions = array<i32: 1>} : vector<256x128xi32>
    %c96_i32 = arith.constant 96 : i32
    %68 = vector.broadcast %c96_i32 : i32 to vector<256x128xi32>
    %69 = arith.cmpi slt, %67, %68 : vector<256x128xi32>
    %cst_49 = arith.constant 2.000000e+00 : f32
    %70 = vector.broadcast %cst_49 : f32 to vector<256x128xf32>
    %71 = arith.mulf %70, %66 : vector<256x128xf32>
    %72 = arith.select %69, %66, %71 : vector<256x128xi1>, vector<256x128xf32>
    %73 = arith.negf %72 : vector<256x128xf32>
    %74 = math.exp %73 : vector<256x128xf32>
    %cst_50 = arith.constant 1.000000e+00 : f32
    %75 = vector.broadcast %cst_50 : f32 to vector<256x128xf32>
    %76 = arith.addf %75, %74 : vector<256x128xf32>
    %77 = arith.divf %75, %76 : vector<256x128xf32>
    %cst_51 = arith.constant 2.000000e+00 : f32
    %78 = vector.broadcast %cst_51 : f32 to vector<256x128xf32>
    %79 = arith.mulf %78, %77 : vector<256x128xf32>
    %cst_52 = arith.constant 1.000000e+00 : f32
    %80 = vector.broadcast %cst_52 : f32 to vector<256x128xf32>
    %81 = arith.subf %79, %80 : vector<256x128xf32>
    %82 = arith.select %69, %77, %81 : vector<256x128xi1>, vector<256x128xf32>
    %83 = vector.extract_strided_slice %82 {offsets = [0, 0], sizes = [256, 32], strides = [1, 1]} : vector<256x128xf32> to vector<256x32xf32>
    %84 = vector.extract_strided_slice %82 {offsets = [0, 32], sizes = [256, 32], strides = [1, 1]} : vector<256x128xf32> to vector<256x32xf32>
    %85 = vector.extract_strided_slice %82 {offsets = [0, 64], sizes = [256, 32], strides = [1, 1]} : vector<256x128xf32> to vector<256x32xf32>
    %86 = vector.extract_strided_slice %82 {offsets = [0, 96], sizes = [256, 32], strides = [1, 1]} : vector<256x128xf32> to vector<256x32xf32>
    %c0_53 = arith.constant 0 : index
    %c0_54 = arith.constant 0 : index
    %c0_55 = arith.constant 0 : index
    %87 = vector.load %arg3[%c0_53, %c0_54, %c0_55] : memref<1x256x32xf32, #tpu.memory_space<vmem>>, vector<1x256x32xf32>
    %88 = vector.shape_cast %87 : vector<1x256x32xf32> to vector<256x32xf32>
    %89 = arith.mulf %84, %88 : vector<256x32xf32>
    %90 = arith.mulf %83, %86 : vector<256x32xf32>
    %91 = arith.addf %89, %90 : vector<256x32xf32>
    %92 = math.tanh %91 : vector<256x32xf32>
    %93 = arith.mulf %85, %92 : vector<256x32xf32>
    %cst_56 = arith.constant 0.000000e+00 : bf16
    %94 = vector.broadcast %cst_56 : bf16 to vector<1x1x18x32xbf16>
    %c0_57 = arith.constant 0 : index
    %c0_58 = arith.constant 0 : index
    %c0_59 = arith.constant 0 : index
    %c0_60 = arith.constant 0 : index
    %95 = vector.load %arg9[%c0_57, %c0_58, %c0_59, %c0_60] : memref<1x18x18x32xbf16, #tpu.memory_space<vmem>>, vector<1x1x18x32xbf16>
    tpu.vector_store %arg9[%c0_57, %c0_58, %c0_59, %c0_60], %94 {strides = array<i32>} : memref<1x18x18x32xbf16, #tpu.memory_space<vmem>>, vector<1x1x18x32xbf16>,
    %cst_61 = arith.constant 0.000000e+00 : bf16
    %96 = vector.broadcast %cst_61 : bf16 to vector<1x1x18x32xbf16>
    %c0_62 = arith.constant 0 : index
    %c17 = arith.constant 17 : index
    %c0_63 = arith.constant 0 : index
    %c0_64 = arith.constant 0 : index
    %97 = vector.load %arg9[%c0_62, %c17, %c0_63, %c0_64] : memref<1x18x18x32xbf16, #tpu.memory_space<vmem>>, vector<1x1x18x32xbf16>
    tpu.vector_store %arg9[%c0_62, %c17, %c0_63, %c0_64], %96 {strides = array<i32>} : memref<1x18x18x32xbf16, #tpu.memory_space<vmem>>, vector<1x1x18x32xbf16>,
    %cst_65 = arith.constant 0.000000e+00 : bf16
    %98 = vector.broadcast %cst_65 : bf16 to vector<1x18x1x32xbf16>
    %c0_66 = arith.constant 0 : index
    %c0_67 = arith.constant 0 : index
    %c0_68 = arith.constant 0 : index
    %c0_69 = arith.constant 0 : index
    %99 = vector.load %arg9[%c0_66, %c0_67, %c0_68, %c0_69] : memref<1x18x18x32xbf16, #tpu.memory_space<vmem>>, vector<1x18x1x32xbf16>
    tpu.vector_store %arg9[%c0_66, %c0_67, %c0_68, %c0_69], %98 {strides = array<i32>} : memref<1x18x18x32xbf16, #tpu.memory_space<vmem>>, vector<1x18x1x32xbf16>,
    %cst_70 = arith.constant 0.000000e+00 : bf16
    %100 = vector.broadcast %cst_70 : bf16 to vector<1x18x1x32xbf16>
    %c0_71 = arith.constant 0 : index
    %c0_72 = arith.constant 0 : index
    %c17_73 = arith.constant 17 : index
    %c0_74 = arith.constant 0 : index
    %101 = vector.load %arg9[%c0_71, %c0_72, %c17_73, %c0_74] : memref<1x18x18x32xbf16, #tpu.memory_space<vmem>>, vector<1x18x1x32xbf16>
    tpu.vector_store %arg9[%c0_71, %c0_72, %c17_73, %c0_74], %100 {strides = array<i32>} : memref<1x18x18x32xbf16, #tpu.memory_space<vmem>>, vector<1x18x1x32xbf16>,
    %102 = vector.shape_cast %93 : vector<256x32xf32> to vector<1x16x16x32xf32>
    %103 = arith.truncf %102 : vector<1x16x16x32xf32> to vector<1x16x16x32xbf16>
    %c0_75 = arith.constant 0 : index
    %c1_76 = arith.constant 1 : index
    %c1_77 = arith.constant 1 : index
    %c0_78 = arith.constant 0 : index
    %104 = vector.load %arg9[%c0_75, %c1_76, %c1_77, %c0_78] : memref<1x18x18x32xbf16, #tpu.memory_space<vmem>>, vector<1x16x16x32xbf16>
    tpu.vector_store %arg9[%c0_75, %c1_76, %c1_77, %c0_78], %103 {strides = array<i32>} : memref<1x18x18x32xbf16, #tpu.memory_space<vmem>>, vector<1x16x16x32xbf16>,
    %c0_79 = arith.constant 0 : index
    %c0_80 = arith.constant 0 : index
    %c0_81 = arith.constant 0 : index
    %c0_82 = arith.constant 0 : index
    %105 = vector.load %arg9[%c0_79, %c0_80, %c0_81, %c0_82] : memref<1x18x18x32xbf16, #tpu.memory_space<vmem>>, vector<1x16x16x32xbf16>
    %106 = vector.shape_cast %105 : vector<1x16x16x32xbf16> to vector<256x32xbf16>
    %c0_83 = arith.constant 0 : index
    %c0_84 = arith.constant 0 : index
    %c0_85 = arith.constant 0 : index
    %107 = vector.load %arg6[%c0_83, %c0_84, %c0_85] : memref<9x32x128xbf16, #tpu.memory_space<vmem>>, vector<1x32x128xbf16>
    %108 = vector.shape_cast %107 : vector<1x32x128xbf16> to vector<32x128xbf16>
    %cst_86 = arith.constant dense<0.000000e+00> : vector<256x128xf32>
    %109 = tpu.matmul %106, %108, %cst_86 {dimension_numbers = #tpu.dot_dimension_numbers<[1], [0], [0], [1], [0, 0, 1, 1], [], []>} : vector<256x32xbf16>, vector<32x128xbf16>, vector<256x128xf32> -> vector<256x128xf32>
    %c0_87 = arith.constant 0 : index
    %c0_88 = arith.constant 0 : index
    %c1_89 = arith.constant 1 : index
    %c0_90 = arith.constant 0 : index
    %110 = vector.load %arg9[%c0_87, %c0_88, %c1_89, %c0_90] : memref<1x18x18x32xbf16, #tpu.memory_space<vmem>>, vector<1x16x16x32xbf16>
    %111 = vector.shape_cast %110 : vector<1x16x16x32xbf16> to vector<256x32xbf16>
    %c1_91 = arith.constant 1 : index
    %c0_92 = arith.constant 0 : index
    %c0_93 = arith.constant 0 : index
    %112 = vector.load %arg6[%c1_91, %c0_92, %c0_93] : memref<9x32x128xbf16, #tpu.memory_space<vmem>>, vector<1x32x128xbf16>
    %113 = vector.shape_cast %112 : vector<1x32x128xbf16> to vector<32x128xbf16>
    %cst_94 = arith.constant dense<0.000000e+00> : vector<256x128xf32>
    %114 = tpu.matmul %111, %113, %cst_94 {dimension_numbers = #tpu.dot_dimension_numbers<[1], [0], [0], [1], [0, 0, 1, 1], [], []>} : vector<256x32xbf16>, vector<32x128xbf16>, vector<256x128xf32> -> vector<256x128xf32>
    %115 = arith.addf %109, %114 : vector<256x128xf32>
    %c0_95 = arith.constant 0 : index
    %c0_96 = arith.constant 0 : index
    %c2_97 = arith.constant 2 : index
    %c0_98 = arith.constant 0 : index
    %116 = vector.load %arg9[%c0_95, %c0_96, %c2_97, %c0_98] : memref<1x18x18x32xbf16, #tpu.memory_space<vmem>>, vector<1x16x16x32xbf16>
    %117 = vector.shape_cast %116 : vector<1x16x16x32xbf16> to vector<256x32xbf16>
    %c2_99 = arith.constant 2 : index
    %c0_100 = arith.constant 0 : index
    %c0_101 = arith.constant 0 : index
    %118 = vector.load %arg6[%c2_99, %c0_100, %c0_101] : memref<9x32x128xbf16, #tpu.memory_space<vmem>>, vector<1x32x128xbf16>
    %119 = vector.shape_cast %118 : vector<1x32x128xbf16> to vector<32x128xbf16>
    %cst_102 = arith.constant dense<0.000000e+00> : vector<256x128xf32>
    %120 = tpu.matmul %117, %119, %cst_102 {dimension_numbers = #tpu.dot_dimension_numbers<[1], [0], [0], [1], [0, 0, 1, 1], [], []>} : vector<256x32xbf16>, vector<32x128xbf16>, vector<256x128xf32> -> vector<256x128xf32>
    %121 = arith.addf %115, %120 : vector<256x128xf32>
    %c0_103 = arith.constant 0 : index
    %c1_104 = arith.constant 1 : index
    %c0_105 = arith.constant 0 : index
    %c0_106 = arith.constant 0 : index
    %122 = vector.load %arg9[%c0_103, %c1_104, %c0_105, %c0_106] : memref<1x18x18x32xbf16, #tpu.memory_space<vmem>>, vector<1x16x16x32xbf16>
    %123 = vector.shape_cast %122 : vector<1x16x16x32xbf16> to vector<256x32xbf16>
    %c3 = arith.constant 3 : index
    %c0_107 = arith.constant 0 : index
    %c0_108 = arith.constant 0 : index
    %124 = vector.load %arg6[%c3, %c0_107, %c0_108] : memref<9x32x128xbf16, #tpu.memory_space<vmem>>, vector<1x32x128xbf16>
    %125 = vector.shape_cast %124 : vector<1x32x128xbf16> to vector<32x128xbf16>
    %cst_109 = arith.constant dense<0.000000e+00> : vector<256x128xf32>
    %126 = tpu.matmul %123, %125, %cst_109 {dimension_numbers = #tpu.dot_dimension_numbers<[1], [0], [0], [1], [0, 0, 1, 1], [], []>} : vector<256x32xbf16>, vector<32x128xbf16>, vector<256x128xf32> -> vector<256x128xf32>
    %127 = arith.addf %121, %126 : vector<256x128xf32>
    %c0_110 = arith.constant 0 : index
    %c1_111 = arith.constant 1 : index
    %c1_112 = arith.constant 1 : index
    %c0_113 = arith.constant 0 : index
    %128 = vector.load %arg9[%c0_110, %c1_111, %c1_112, %c0_113] : memref<1x18x18x32xbf16, #tpu.memory_space<vmem>>, vector<1x16x16x32xbf16>
    %129 = vector.shape_cast %128 : vector<1x16x16x32xbf16> to vector<256x32xbf16>
    %c4 = arith.constant 4 : index
    %c0_114 = arith.constant 0 : index
    %c0_115 = arith.constant 0 : index
    %130 = vector.load %arg6[%c4, %c0_114, %c0_115] : memref<9x32x128xbf16, #tpu.memory_space<vmem>>, vector<1x32x128xbf16>
    %131 = vector.shape_cast %130 : vector<1x32x128xbf16> to vector<32x128xbf16>
    %cst_116 = arith.constant dense<0.000000e+00> : vector<256x128xf32>
    %132 = tpu.matmul %129, %131, %cst_116 {dimension_numbers = #tpu.dot_dimension_numbers<[1], [0], [0], [1], [0, 0, 1, 1], [], []>} : vector<256x32xbf16>, vector<32x128xbf16>, vector<256x128xf32> -> vector<256x128xf32>
    %133 = arith.addf %127, %132 : vector<256x128xf32>
    %c0_117 = arith.constant 0 : index
    %c1_118 = arith.constant 1 : index
    %c2_119 = arith.constant 2 : index
    %c0_120 = arith.constant 0 : index
    %134 = vector.load %arg9[%c0_117, %c1_118, %c2_119, %c0_120] : memref<1x18x18x32xbf16, #tpu.memory_space<vmem>>, vector<1x16x16x32xbf16>
    %135 = vector.shape_cast %134 : vector<1x16x16x32xbf16> to vector<256x32xbf16>
    %c5 = arith.constant 5 : index
    %c0_121 = arith.constant 0 : index
    %c0_122 = arith.constant 0 : index
    %136 = vector.load %arg6[%c5, %c0_121, %c0_122] : memref<9x32x128xbf16, #tpu.memory_space<vmem>>, vector<1x32x128xbf16>
    %137 = vector.shape_cast %136 : vector<1x32x128xbf16> to vector<32x128xbf16>
    %cst_123 = arith.constant dense<0.000000e+00> : vector<256x128xf32>
    %138 = tpu.matmul %135, %137, %cst_123 {dimension_numbers = #tpu.dot_dimension_numbers<[1], [0], [0], [1], [0, 0, 1, 1], [], []>} : vector<256x32xbf16>, vector<32x128xbf16>, vector<256x128xf32> -> vector<256x128xf32>
    %139 = arith.addf %133, %138 : vector<256x128xf32>
    %c0_124 = arith.constant 0 : index
    %c2_125 = arith.constant 2 : index
    %c0_126 = arith.constant 0 : index
    %c0_127 = arith.constant 0 : index
    %140 = vector.load %arg9[%c0_124, %c2_125, %c0_126, %c0_127] : memref<1x18x18x32xbf16, #tpu.memory_space<vmem>>, vector<1x16x16x32xbf16>
    %141 = vector.shape_cast %140 : vector<1x16x16x32xbf16> to vector<256x32xbf16>
    %c6 = arith.constant 6 : index
    %c0_128 = arith.constant 0 : index
    %c0_129 = arith.constant 0 : index
    %142 = vector.load %arg6[%c6, %c0_128, %c0_129] : memref<9x32x128xbf16, #tpu.memory_space<vmem>>, vector<1x32x128xbf16>
    %143 = vector.shape_cast %142 : vector<1x32x128xbf16> to vector<32x128xbf16>
    %cst_130 = arith.constant dense<0.000000e+00> : vector<256x128xf32>
    %144 = tpu.matmul %141, %143, %cst_130 {dimension_numbers = #tpu.dot_dimension_numbers<[1], [0], [0], [1], [0, 0, 1, 1], [], []>} : vector<256x32xbf16>, vector<32x128xbf16>, vector<256x128xf32> -> vector<256x128xf32>
    %145 = arith.addf %139, %144 : vector<256x128xf32>
    %c0_131 = arith.constant 0 : index
    %c2_132 = arith.constant 2 : index
    %c1_133 = arith.constant 1 : index
    %c0_134 = arith.constant 0 : index
    %146 = vector.load %arg9[%c0_131, %c2_132, %c1_133, %c0_134] : memref<1x18x18x32xbf16, #tpu.memory_space<vmem>>, vector<1x16x16x32xbf16>
    %147 = vector.shape_cast %146 : vector<1x16x16x32xbf16> to vector<256x32xbf16>
    %c7 = arith.constant 7 : index
    %c0_135 = arith.constant 0 : index
    %c0_136 = arith.constant 0 : index
    %148 = vector.load %arg6[%c7, %c0_135, %c0_136] : memref<9x32x128xbf16, #tpu.memory_space<vmem>>, vector<1x32x128xbf16>
    %149 = vector.shape_cast %148 : vector<1x32x128xbf16> to vector<32x128xbf16>
    %cst_137 = arith.constant dense<0.000000e+00> : vector<256x128xf32>
    %150 = tpu.matmul %147, %149, %cst_137 {dimension_numbers = #tpu.dot_dimension_numbers<[1], [0], [0], [1], [0, 0, 1, 1], [], []>} : vector<256x32xbf16>, vector<32x128xbf16>, vector<256x128xf32> -> vector<256x128xf32>
    %151 = arith.addf %145, %150 : vector<256x128xf32>
    %c0_138 = arith.constant 0 : index
    %c2_139 = arith.constant 2 : index
    %c2_140 = arith.constant 2 : index
    %c0_141 = arith.constant 0 : index
    %152 = vector.load %arg9[%c0_138, %c2_139, %c2_140, %c0_141] : memref<1x18x18x32xbf16, #tpu.memory_space<vmem>>, vector<1x16x16x32xbf16>
    %153 = vector.shape_cast %152 : vector<1x16x16x32xbf16> to vector<256x32xbf16>
    %c8 = arith.constant 8 : index
    %c0_142 = arith.constant 0 : index
    %c0_143 = arith.constant 0 : index
    %154 = vector.load %arg6[%c8, %c0_142, %c0_143] : memref<9x32x128xbf16, #tpu.memory_space<vmem>>, vector<1x32x128xbf16>
    %155 = vector.shape_cast %154 : vector<1x32x128xbf16> to vector<32x128xbf16>
    %cst_144 = arith.constant dense<0.000000e+00> : vector<256x128xf32>
    %156 = tpu.matmul %153, %155, %cst_144 {dimension_numbers = #tpu.dot_dimension_numbers<[1], [0], [0], [1], [0, 0, 1, 1], [], []>} : vector<256x32xbf16>, vector<32x128xbf16>, vector<256x128xf32> -> vector<256x128xf32>
    %157 = arith.addf %151, %156 : vector<256x128xf32>
    %c0_145 = arith.constant 0 : index
    %c0_146 = arith.constant 0 : index
    %158 = vector.load %arg7[%c0_145, %c0_146] : memref<1x128xf32, #tpu.memory_space<vmem>>, vector<1x128xf32>
    %159 = vector.broadcast %158 : vector<1x128xf32> to vector<256x128xf32>
    %160 = arith.addf %157, %159 : vector<256x128xf32>
    %161 = vector.extract_strided_slice %160 {offsets = [0, 0], sizes = [256, 4], strides = [1, 1]} : vector<256x128xf32> to vector<256x4xf32>
    %162 = vector.shape_cast %161 : vector<256x4xf32> to vector<1x256x4xf32>
    %c0_147 = arith.constant 0 : index
    %c0_148 = arith.constant 0 : index
    %c0_149 = arith.constant 0 : index
    %163 = vector.load %arg8[%c0_147, %c0_148, %c0_149] : memref<1x256x4xf32, #tpu.memory_space<vmem>>, vector<1x256x4xf32>
    tpu.vector_store %arg8[%c0_147, %c0_148, %c0_149], %162 {strides = array<i32>} : memref<1x256x4xf32, #tpu.memory_space<vmem>>, vector<1x256x4xf32>,
    return
  }
  func.func @transform_0(%arg0: i32) -> (i32, i32) {
    %c0_i32 = arith.constant 0 : i32
    %c0_i32_0 = arith.constant 0 : i32
    %c0_i32_1 = arith.constant 0 : i32
    return %c0_i32, %c0_i32_0 : i32, i32
  }
  func.func @transform_1(%arg0: i32) -> (i32, i32, i32, i32) {
    %c0_i32 = arith.constant 0 : i32
    %c0_i32_0 = arith.constant 0 : i32
    %c0_i32_1 = arith.constant 0 : i32
    %c0_i32_2 = arith.constant 0 : i32
    return %arg0, %c0_i32, %c0_i32_0, %c0_i32_1 : i32, i32, i32, i32
  }
  func.func @transform_2(%arg0: i32) -> (i32, i32, i32) {
    %c0_i32 = arith.constant 0 : i32
    %c0_i32_0 = arith.constant 0 : i32
    %c0_i32_1 = arith.constant 0 : i32
    return %arg0, %c0_i32, %c0_i32_0 : i32, i32, i32
  }
  func.func @transform_3(%arg0: i32) -> (i32, i32, i32) {
    %c0_i32 = arith.constant 0 : i32
    %c0_i32_0 = arith.constant 0 : i32
    %c0_i32_1 = arith.constant 0 : i32
    %c0_i32_2 = arith.constant 0 : i32
    return %c0_i32, %c0_i32_0, %c0_i32_1 : i32, i32, i32
  }
  func.func @transform_4(%arg0: i32) -> (i32, i32) {
    %c0_i32 = arith.constant 0 : i32
    %c0_i32_0 = arith.constant 0 : i32
    %c0_i32_1 = arith.constant 0 : i32
    return %c0_i32, %c0_i32_0 : i32, i32
  }
  func.func @transform_5(%arg0: i32) -> (i32, i32, i32) {
    %c0_i32 = arith.constant 0 : i32
    %c0_i32_0 = arith.constant 0 : i32
    %c0_i32_1 = arith.constant 0 : i32
    %c0_i32_2 = arith.constant 0 : i32
    return %c0_i32, %c0_i32_0, %c0_i32_1 : i32, i32, i32
  }
  func.func @transform_6(%arg0: i32) -> (i32, i32) {
    %c0_i32 = arith.constant 0 : i32
    %c0_i32_0 = arith.constant 0 : i32
    %c0_i32_1 = arith.constant 0 : i32
    return %c0_i32, %c0_i32_0 : i32, i32
  }
  func.func @transform_7(%arg0: i32) -> (i32, i32, i32) {
    %c0_i32 = arith.constant 0 : i32
    %c0_i32_0 = arith.constant 0 : i32
    %c0_i32_1 = arith.constant 0 : i32
    return %arg0, %c0_i32, %c0_i32_0 : i32, i32, i32
  }
}

</mosaic_0001>

<bundles_post_ra>
// kernel: convlstm_forward.2
= control target key start
LH: loop header
LB: loop body
LE: loop exit
PB: predicated region body
PF: predicated region fallthrough
CT: control target
= control target key end

     0   :  { %s122_s0 = inlined_call_operand.vmem [shape: f32[8,256], index: 0, kind: input, shape index: {}]   ;;  %s123_s1 = inlined_call_operand.hbm [shape: f32[1,1], index: 1, kind: output, shape index: {}]  }
   0x1   :  { %v15_v0 = vld [vmem:[%s122_s0] sm:$0xff]  ;;  %v16_v1 = vld [vmem:[%s122_s0 + $0x8] sm:$0xff] }
   0x2   :  { %6 = vsyncpa [#allocation4], 0  ;;  %v23_v2 = vmul.f32 %v15_v0, %v15_v0  ;;  %v24_v3 = vmul.f32 %v16_v1, %v16_v1  ;;  %s102_s11 = smov [#allocation3]   ;;  %vm59_vm1 = vcmask 0  }
   0x3   :  { %s67_s0 = sshll.u32 %s102_s11, 4  ;;  %s68_s0 = int_to_ptr.vmem [resolvable:$true] %s67_s0 }
   0x4   :  { %v40_v4 = vadd.f32 %v24_v3, %v23_v2  ;;  %s80_s12 = scalar_lea.vmem %s68_s0, 16  ;;  %s84_s13 = scalar_lea.vmem %s68_s0, 32 }
   0x5   :  { %p81_p0 = scmp.ne.s32.totalorder %s68_s0, %s80_s12  ;;  %p85_p1 = scmp.lt.s32.totalorder %s68_s0, %s68_s0 }
   0x6   :  { %41 = vadd.xlane.f32.xlu0 %v40_v4  ;;  %p86_p2 = scmp.lt.s32.totalorder %s84_s13, %s80_s12 }
   0x8   :  { %p87_p3 = por %p86_p2, %p85_p1 }
   0xa   :  { %p88_p4 = pnand %p87_p3, %p81_p0 }
  0x8f   :  { %v42_v5 = vpop.xlane.xlu0 %41 }
  0x90   :  { %v43_v6 = vrot.slane %v42_v5, 4 }
  0x92   :  { %v44_v7 = vadd.f32 %v43_v6, %v42_v5 }
  0x94   :  { %v45_v8 = vrot.slane %v44_v7, 2 }
  0x96   :  { %v46_v9 = vadd.f32 %v45_v8, %v44_v7 }
  0x98   :  { %v47_v10 = vrot.slane %v46_v9, 1 }
  0x9a   :  { %v48_v11 = vadd.f32 %v47_v10, %v46_v9 }
  0x9c   :  { %75 = vpush %v48_v11 }
  0xcd   :  { %s76_s10 = spop %75 }
  0xce   :  { %v50_v12 = vstv %s76_s10 }
  0xcf   :  { %v51_v13 = vmul.f32 0.00048828125, %v50_v12 }
  0xd1   :  { %78 = vrsqrt.f32 %v51_v13  ;;  %vm54_vm0 = vcmp.eq.f32.partialorder %v51_v13, inf  ;;  %v57_v16 = vand.u32 2147483648, %v51_v13  ;;  %vm56_vm2 = vcmp.eq.f32.partialorder %v51_v13, 0.0 }
  0xde   :  { %v79_v14 = vpop.eup %78 }
  0xdf   :  { %v53_v15 = vmul.f32 %v79_v14, %v51_v13 }
  0xe1   :  { %v55_v17 = vsel %vm54_vm0, %v51_v13, %v53_v15 }
  0xe2   :  { %v58_v18 = vsel %vm56_vm2, %v57_v16, %v55_v17 }
  0xe3   :  { %60 = vst.msk [vmem:[#allocation3] sm:$0x1] %vm59_vm1, %v58_v18 }
  0xe4   :  { %91 = shalt.err (!%p88_p4)
}
  0xe5   :  { %70 = dma.vmem_to_hbm [thread:$0]  %s68_s0, 16, %s123_s1, [#allocation4]  }
  0xe6   :  { %100 = dma.done.wait [#allocation4], 16  }
  0xe7   :  { %101 = vsyncadd [#allocation4], 4294967280 }
  0xe8   :  { %74 = vsyncpa [#allocation4], 1 }

// kernel: convlstm_forward.3
= control target key start
LH: loop header
LB: loop body
LE: loop exit
PB: predicated region body
PF: predicated region fallthrough
CT: control target
= control target key end

     0   :  { %s14172_s26 = smov 0   ;;  %s19853_s0 = inlined_call_operand.<no memory space> [shape: f32[1,1], index: 0, kind: input, shape index: {}]   ;;  %s19854_s1 = inlined_call_operand.vmem [shape: bf16[2,18,18,36], index: 1, kind: input, shape index: {}]   ;;  %s19855_s2 = inlined_call_operand.vmem [shape: f32[2,256,32], index: 2, kind: input, shape index: {}]   ;;  %s19856_s3 = inlined_call_operand.vmem [shape: bf16[9,36,128], index: 3, kind: input, shape index: {}]   ;;  %s19857_s4 = inlined_call_operand.vmem [shape: f32[1,128], index: 4, kind: input, shape index: {}]   ;;  %s19858_s5 = inlined_call_operand.vmem [shape: bf16[9,32,128], index: 5, kind: input, shape index: {}]   ;;  %s19859_s6 = inlined_call_operand.vmem [shape: f32[1,128], index: 6, kind: input, shape index: {}]   ;;  %s19860_s7 = inlined_call_operand.vmem [shape: f32[2,256,4], index: 7, kind: output, shape index: {}]  }
   0x1   :  { %12 = sst [smem:[#allocation3]] %s19853_s0 }
   0x2 LB: > { %s11670_s27 = sadd.s32 4294967295, %s14124_s26   ;;  %p11674_p0 = scmp.ge.s32.totalorder %s14124_s26, 1  ;;  %s14124_s26 = sphi %s14172_s26, %s18_s26  }
   0x3   : > { %p248_p1 = scmp.lt.s32.totalorder %s14124_s26, 3 }
   0x5   : > { %p249_p2 = pnand %p11674_p0, %p248_p1 }
   0x7   : > { %252 = sbr.rel (%p249_p2) target bundleno = 1623 (0x657), region = 48 }
   0xc   : > { %v13790_v0 = vld [vmem:[%s19856_s3 + $0x24] ss:$0 sps:$4 sm:$0x33]   ;;  %vm1013_vm0 = vcmask 1041408   ;;  %v19861_v1 = vlaneseq  ;;  %v13792_v3 = vld [vmem:[%s19856_s3 + $0x1c] sm:$0xff]   ;;  %v13793_v5 = vld [vmem:[%s19856_s3 + $0x8] sm:$0xff]  }
   0xd   : > { %v13791_v2 = vld [vmem:[%s19856_s3 + $0x10] ss:$0 sps:$4 sm:$0x33]   ;;  %13769 = vmatprep.subr.msk.bf16.mxu0 %vm1013_vm0, %v13790_v0  ;;  %v1015_v4 = vsel %vm1013_vm0, %v13790_v0, 0  ;;  %s301_s12 = sld [smem:[#allocation3]]  ;;  %p285_p3 = scmp.lt.s32.totalorder %s11670_s27, 1 }
   0xe   : > { %13104 = vmatpush3.bf16.msra.mxu0 %v1015_v4  ;;  %13770 = vmatprep.subr.msk.bf16.mxu1 %vm1013_vm0, %v13791_v2  ;;  %v1307_v6 = vsel %vm1013_vm0, %v13791_v2, 0  ;;  %v303_v7 = vshrl.u32 %v19861_v1, 7  ;;  %v313_v8 = vld [vmem:[%s19856_s3 + $0x14] sm:$0xff]   ;;  %v12747_v9 = vld [vmem:[%s19856_s3] sm:$0xff]   ;;  %vm529_vm2 = vsmask.f32 3328 }
   0xf   : > { %13142 = vmatpush3.bf16.msra.mxu1 %v1307_v6  ;;  %13105 = vmatprep.subr.bf16.mxu0 %v13792_v3  ;;  %s20296_s27 = smov (!%p285_p3, %s11670_s27), 1  ;;  %v13795_v10 = vld [vmem:[%s19856_s3 + $0x38] ss:$0 sps:$4 sm:$0x33]   ;;  %v358_v11 = vunpack.c.l.bf16 %v313_v8  ;;  %v12748_v12 = vunpack.c.l.bf16 %v12747_v9  ;;  %vm530_vm3 = vsmask.f32 7440  ;;  %v359_v14 = vunpack.c.h.bf16 %v313_v8 }
  0x10   : > { %13143 = vmatprep.subr.bf16.mxu1 %v13793_v5  ;;  %vm398_vm1 = vcmp.lt.s32.totalorder %v303_v7, 4  ;;  %s13778_s19 = smul.u32 216, %s20296_s27  ;;  %v14212_v13 = vld [vmem:[%s19856_s3 + $0x28] sm:$0xff]   ;;  %v12749_v15 = vunpack.c.h.bf16 %v12747_v9  ;;  %vm964_vm4 = vcmask 293888   ;;  %v14223_v18 = vsel %vm1013_vm0, %v13795_v10, 0  ;;  %v14230_v21 = vld [vmem:[%s19856_s3 + $0x3c] sm:$0xff]   ;;  %vm14264_vm5 = vmor %vm529_vm2, %vm530_vm3 }
  0x11   : > { %v13810_v16 = vld [vmem:[%s19856_s3 + $0x4c] ss:$0 sps:$4 sm:$0x33]   ;;  %v12752_v19 = vunpack.c.l.bf16 %v14212_v13  ;;  %v12753_v20 = vunpack.c.h.bf16 %v14212_v13  ;;  %v368_v26 = vunpack.c.l.bf16 %v14230_v21  ;;  %v369_v27 = vunpack.c.h.bf16 %v14230_v21  ;;  %v13813_v9 = vld [vmem:[%s19856_s3 + $0x44] sm:$0xff]   ;;  %s12712_s20 = sshll.u32 %s20296_s27, 8  ;;  %s14126_s24 = smov 32  }
  0x12   : > { %13106 = vmatpush3.bf16.msra.mxu0 %v13792_v3  ;;  %s14220_s28 = scalar_lea.vmem %s19854_s1, %s13778_s19  ;;  %v14240_v25 = vsel %vm1013_vm0, %v13810_v16, 0  ;;  %v19894_v52 = vmov 0  ;;  %vm1518_vm6 = vcmask 1042432   ;;  %vm1519_vm7 = vcmask 1046532   ;;  %s15655_s23 = scalar_lea.vmem %s19855_s2, %s12712_s20 }
  0x13   : > { %13144 = vmatpush3.bf16.msra.mxu1 %v13793_v5  ;;  %v403_v17 = vstv %s301_s12  ;;  %v481_v23 = vld [vmem:[%s14220_s28] sm:$0xf]  ;;  %v14237_v24 = vld [vmem:[%s14220_s28 + $0x4] sm:$0xf]  ;;  %v14247_v30 = vld [vmem:[%s14220_s28 + $0x8] sm:$0x1]  ;;  %s19667_s8 = scalar_lea.vmem %s19860_s7, %s12712_s20 }
  0x14   : > { %v14233_v22 = vsel %vm398_vm1, %v403_v17, 1.0  ;;  %v533_v31 = vshrl.u32 %v481_v23, 16  ;;  %v536_v32 = vshll.u32 %v481_v23, 16  ;;  %v483_v33 = vld [vmem:[%s14220_s28 + $0xc] sm:$0xf]  ;;  %v542_v34 = vshll.u32 %v14237_v24, 16  ;;  %vm14547_vm8 = vmor %vm1518_vm6, %vm1519_vm7 }
  0x15   : > { %v414_v28 = vmul.f32 %v14233_v22, %v358_v11  ;;  %v409_v29 = vmul.f32 %v12748_v12, %v14233_v22  ;;  %v546_v35 = vshrl.u32 %v14237_v24, 16  ;;  %v552_v36 = vshll.u32 %v14247_v30, 16  ;;  %v14255_v38 = vld [vmem:[%s14220_s28 + $0x10] sm:$0xf]  ;;  %v14258_v43 = vld [vmem:[%s14220_s28 + $0x14] sm:$0x1] }
  0x16   : > { %v535_v41 = vrot.slane %v533_v31, 4  ;;  %v538_v42 = vrot.slane %v536_v32, 5  ;;  %v544_v44 = vrot.slane %v542_v34, 5  ;;  %v11730_v47 = vcombine.low %v481_v23, %v14237_v24  ;;  %v485_v57 = vld [vmem:[%s14220_s28 + $0x18] sm:$0xf]  ;;  %s14127_s9 = smov 64  }
  0x17   : > { %v457_v39 = vpack.c.bf16 %v359_v14, %v414_v28  ;;  %v454_v40 = vpack.c.bf16 %v12749_v15, %v409_v29  ;;  %v548_v45 = vrot.slane %v546_v35, 4  ;;  %v554_v46 = vrot.slane %v552_v36, 5  ;;  %v14275_v62 = vld [vmem:[%s14220_s28 + $0x1c] sm:$0xf]  ;;  %v14283_v7 = vld [vmem:[%s14220_s28 + $0x20] sm:$0x1] }
  0x18   : > { %v539_v48 = vor.u32 %v538_v42, %v535_v41  ;;  %v557_v49 = vshrl.u32 %v483_v33, 16  ;;  %v560_v50 = vshll.u32 %v483_v33, 16  ;;  %v566_v51 = vshll.u32 %v14255_v38, 16  ;;  %13147 = vmatprep.mubr.msk.bf16.mxu1 %vm964_vm4, %v11730_v47  ;;  %v487_v15 = vld [vmem:[%s14220_s28 + $0x24] sm:$0xf] }
  0x19   : > { %13107 = vmatprep.subr.bf16.mxu0 %v457_v39  ;;  %13145 = vmatprep.subr.bf16.mxu1 %v454_v40  ;;  %v19895_v52 = vsel %vm14264_vm5, 4294967295, %v19894_v52  ;;  %v549_v53 = vor.u32 %v548_v45, %v544_v44  ;;  %v570_v54 = vshrl.u32 %v14255_v38, 16  ;;  %v576_v55 = vshll.u32 %v14258_v43, 16  ;;  %v14296_v34 = vld [vmem:[%s14220_s28 + $0x28] sm:$0xf] }
  0x1a   : > { %13108 = vmatpush3.bf16.msra.mxu0 %v457_v39  ;;  %13146 = vmatpush3.bf16.msra.mxu1 %v454_v40  ;;  %19896 = vst [vmem:[#allocation4_spill] sm:$0xff] %v19895_v52  ;;  %v1530_v56 = vrot.slane %v14255_v38, 5  ;;  %v540_v58 = vrot.slane %v539_v48, 4  ;;  %v559_v59 = vrot.slane %v557_v49, 4  ;;  %v562_v60 = vrot.slane %v560_v50, 5 }
  0x1b   : > { %13771 = vmatprep.subr.msk.bf16.mxu0 %vm1013_vm0, %v13795_v10  ;;  %v568_v61 = vrot.slane %v566_v51, 5  ;;  %v550_v63 = vrot.slane %v549_v53, 4  ;;  %v572_v0 = vrot.slane %v570_v54, 4  ;;  %v578_v2 = vrot.slane %v576_v55, 5  ;;  %13772 = vmatprep.subr.msk.bf16.mxu1 %vm1013_vm0, %v13810_v16  ;;  %v14304_v40 = vld [vmem:[%s14220_s28 + $0x2c] sm:$0x1] }
  0x1c   : > { %v1533_v3 = vrot.slane %v14258_v43, 5  ;;  %v545_v4 = vsel %vm14264_vm5, %v540_v58, %v544_v44  ;;  %v563_v5 = vor.u32 %v562_v60, %v559_v59  ;;  %v11731_v6 = vcombine.low %v483_v33, %v14255_v38  ;;  %v13801_v51 = vld [vmem:[%s19856_s3 + $0x30] sm:$0xff]  }
  0x1d   : > { %v581_v8 = vshrl.u32 %v485_v57, 16  ;;  %v555_v10 = vsel %vm14264_vm5, %v550_v63, %v554_v46  ;;  %v573_v11 = vor.u32 %v572_v0, %v568_v61  ;;  %v584_v12 = vshll.u32 %v485_v57, 16  ;;  %v14317_v58 = vld [vmem:[%s14220_s28 + $0x34] sm:$0xf] }
  0x1e   : > { %v590_v14 = vshll.u32 %v14275_v62, 16  ;;  %v11698_v16 = vcombine.low %v545_v4, %v555_v10  ;;  %v564_v17 = vrot.slane %v563_v5, 4  ;;  %13148 = vmatmul.mubr.msk.bf16.vlgmr.msra.gmra.mxu1 %vm964_vm4, %v11731_v6  ;;  %v594_v28 = vshrl.u32 %v14275_v62, 16  ;;  %v14325_v6 = vld [vmem:[%s14220_s28 + $0x38] sm:$0x1] }
  0x1f   : > { %v583_v23 = vrot.slane %v581_v8, 4  ;;  %v574_v29 = vrot.slane %v573_v11, 4  ;;  %v586_v31 = vrot.slane %v584_v12, 5  ;;  %v600_v33 = vshll.u32 %v14283_v7, 16  ;;  %13218 = vmatpush3.bf16.msra.mxu1 %v14240_v25  ;;  %v489_v25 = vld [vmem:[%s14220_s28 + $0x30] sm:$0xf] }
  0x20   : > { %v592_v32 = vrot.slane %v590_v14, 5  ;;  %13109 = vmatprep.mubr.msk.bf16.mxu0 %vm964_vm4, %v11698_v16  ;;  %v569_v35 = vsel %vm14264_vm5, %v564_v17, %v568_v61  ;;  %v596_v36 = vrot.slane %v594_v28, 4  ;;  %v11732_v39 = vcombine.low %v485_v57, %v14275_v62  ;;  %13219 = vmatprep.subr.bf16.mxu1 %v13813_v9  ;;  %v491_v12 = vld [vmem:[%s14220_s28 + $0x3c] sm:$0xf]  ;;  %v14334_v17 = vld [vmem:[%s14220_s28 + $0x40] sm:$0xf] }
  0x21   : > { %v605_v41 = vshrl.u32 %v487_v15, 16  ;;  %v579_v42 = vsel %vm14264_vm5, %v574_v29, %v578_v2  ;;  %v587_v44 = vor.u32 %v586_v31, %v583_v23  ;;  %v602_v45 = vrot.slane %v600_v33, 5 }
  0x22   : > { %v608_v46 = vshll.u32 %v487_v15, 16  ;;  %v11699_v47 = vcombine.low %v569_v35, %v579_v42  ;;  %v597_v48 = vor.u32 %v596_v36, %v592_v32  ;;  %13151 = vmatprep.mubr.msk.bf16.mxu1 %vm964_vm4, %v11732_v39  ;;  %v614_v50 = vshll.u32 %v14296_v34, 16  ;;  %v14343_v42 = vld [vmem:[%s14220_s28 + $0x44] sm:$0x1] }
  0x23   : > { %v607_v49 = vrot.slane %v605_v41, 4  ;;  %v588_v53 = vrot.slane %v587_v44, 4  ;;  %v618_v55 = vshrl.u32 %v14296_v34, 16  ;;  %v624_v57 = vshll.u32 %v14304_v40, 16  ;;  %13220 = vmatpush3.bf16.msra.mxu1 %v13813_v9 }
  0x24   : > { %v610_v54 = vrot.slane %v608_v46, 5  ;;  %13110 = vmatmul.mubr.msk.bf16.vlgmr.msra.gmra.mxu0 %vm964_vm4, %v11699_v47  ;;  %v598_v59 = vrot.slane %v597_v48, 4  ;;  %v616_v60 = vrot.slane %v614_v50, 5  ;;  %v11733_v61 = vcombine.low %v487_v15, %v14296_v34 }
  0x25   : > { %v629_v63 = vshrl.u32 %v489_v25, 16  ;;  %13180 = vmatpush3.bf16.msra.mxu0 %v14223_v18  ;;  %v593_v0 = vsel %vm14264_vm5, %v588_v53, %v592_v32  ;;  %v620_v4 = vrot.slane %v618_v55, 4  ;;  %v626_v5 = vrot.slane %v624_v57, 5  ;;  %v14351_v55 = vld [vmem:[%s14220_s28 + $0x4c] sm:$0xf] }
  0x26   : > { %v611_v2 = vor.u32 %v610_v54, %v607_v49  ;;  %v603_v8 = vsel %vm14264_vm5, %v598_v59, %v602_v45  ;;  %13152 = vmatmul.mubr.msk.bf16.gmra.mxu1 %vm964_vm4, %v11733_v61  ;;  %v632_v10 = vshll.u32 %v489_v25, 16  ;;  %v638_v11 = vshll.u32 %v14317_v58, 16  ;;  %13181 = vmatprep.subr.bf16.mxu0 %v13801_v51  ;;  %v493_v49 = vld [vmem:[%s14220_s28 + $0x48] sm:$0xf] }
  0x27   : > { %v631_v9 = vrot.slane %v629_v63, 4  ;;  %v11700_v18 = vcombine.low %v593_v0, %v603_v8  ;;  %v621_v15 = vor.u32 %v620_v4, %v616_v60  ;;  %v642_v16 = vshrl.u32 %v14317_v58, 16 }
  0x28   : > { %v612_v14 = vrot.slane %v611_v2, 4  ;;  %v634_v23 = vrot.slane %v632_v10, 5  ;;  %v640_v28 = vrot.slane %v638_v11, 5  ;;  %v648_v29 = vshll.u32 %v14325_v6, 16  ;;  %v14359_v2 = vld [vmem:[%s14220_s28 + $0x50] sm:$0x1] }
  0x29   : > { %v11734_v31 = vcombine.low %v489_v25, %v14317_v58  ;;  %13113 = vmatprep.mubr.msk.bf16.mxu0 %vm964_vm4, %v11700_v18  ;;  %v622_v33 = vrot.slane %v621_v15, 4  ;;  %v644_v35 = vrot.slane %v642_v16, 4  ;;  %v653_v36 = vshrl.u32 %v491_v12, 16  ;;  %13182 = vmatpush3.bf16.msra.mxu0 %v13801_v51 }
  0x2a   : > { %v617_v32 = vsel %vm14264_vm5, %v612_v14, %v616_v60  ;;  %v635_v39 = vor.u32 %v634_v23, %v631_v9  ;;  %v650_v41 = vrot.slane %v648_v29, 5  ;;  %v656_v44 = vshll.u32 %v491_v12, 16 }
  0x2b   : > { %13155 = vmatprep.mubr.msk.bf16.mxu1 %vm964_vm4, %v11734_v31  ;;  %v662_v45 = vshll.u32 %v14334_v17, 16  ;;  %v627_v46 = vsel %vm14264_vm5, %v622_v33, %v626_v5  ;;  %v645_v25 = vor.u32 %v644_v35, %v640_v28  ;;  %v655_v47 = vrot.slane %v653_v36, 4 }
  0x2c   : > { %v666_v48 = vshrl.u32 %v14334_v17, 16  ;;  %v11701_v50 = vcombine.low %v617_v32, %v627_v46  ;;  %v636_v51 = vrot.slane %v635_v39, 4  ;;  %v658_v53 = vrot.slane %v656_v44, 5  ;;  %v14369_v32 = vld [vmem:[%s14220_s28 + $0x58] sm:$0xf] }
  0x2d   : > { %v664_v54 = vrot.slane %v662_v45, 5  ;;  %v646_v57 = vrot.slane %v645_v25, 4  ;;  %v672_v60 = vshll.u32 %v14343_v42, 16  ;;  %v11735_v61 = vcombine.low %v491_v12, %v14334_v17  ;;  %v495_v12 = vld [vmem:[%s14220_s28 + $0x54] sm:$0xf] }
  0x2e   : > { %v668_v59 = vrot.slane %v666_v48, 4  ;;  %13114 = vmatmul.mubr.msk.bf16.gmra.mxu0 %vm964_vm4, %v11701_v50  ;;  %v641_v63 = vsel %vm14264_vm5, %v636_v51, %v640_v28  ;;  %v659_v0 = vor.u32 %v658_v53, %v655_v47  ;;  %v677_v4 = vshrl.u32 %v493_v49, 16  ;;  %v14376_v39 = vld [vmem:[%s14220_s28 + $0x5c] sm:$0x1]  ;;  %v497_v47 = vld [vmem:[%s14220_s28 + $0x60] sm:$0xf] }
  0x2f   : > { %v680_v5 = vshll.u32 %v493_v49, 16  ;;  %v651_v8 = vsel %vm14264_vm5, %v646_v57, %v650_v41  ;;  %v674_v10 = vrot.slane %v672_v60, 5  ;;  %13156 = vmatmul.mubr.msk.bf16.gmra.mxu1 %vm964_vm4, %v11735_v61  ;;  %v686_v11 = vshll.u32 %v14351_v55, 16  ;;  %v14386_v60 = vld [vmem:[%s14220_s28 + $0x64] sm:$0xf] }
  0x30   : > { %v669_v9 = vor.u32 %v668_v59, %v664_v54  ;;  %v11702_v18 = vcombine.low %v641_v63, %v651_v8  ;;  %v660_v14 = vrot.slane %v659_v0, 4  ;;  %v679_v15 = vrot.slane %v677_v4, 4  ;;  %v14393_v4 = vld [vmem:[%s14220_s28 + $0x68] sm:$0x1] }
  0x31   : > { %v682_v16 = vrot.slane %v680_v5, 5  ;;  %v688_v28 = vrot.slane %v686_v11, 5  ;;  %v690_v29 = vshrl.u32 %v14351_v55, 16  ;;  %v696_v31 = vshll.u32 %v14359_v2, 16 }
  0x32   : > { %v670_v23 = vrot.slane %v669_v9, 4  ;;  %13117 = vmatprep.mubr.msk.bf16.mxu0 %vm964_vm4, %v11702_v18  ;;  %v665_v33 = vsel %vm14264_vm5, %v660_v14, %v664_v54  ;;  %v11736_v36 = vcombine.low %v493_v49, %v14351_v55  ;;  %v701_v41 = vshrl.u32 %v495_v12, 16  ;;  %v499_v18 = vld [vmem:[%s14220_s28 + $0x6c] sm:$0xf] }
  0x33   : > { %v683_v35 = vor.u32 %v682_v16, %v679_v15  ;;  %v692_v45 = vrot.slane %v690_v29, 4  ;;  %v698_v46 = vrot.slane %v696_v31, 5  ;;  %v704_v25 = vshll.u32 %v495_v12, 16 }
  0x34   : > { %v675_v44 = vsel %vm14264_vm5, %v670_v23, %v674_v10  ;;  %13159 = vmatprep.mubr.msk.bf16.mxu1 %vm964_vm4, %v11736_v36  ;;  %v703_v51 = vrot.slane %v701_v41, 4  ;;  %v710_v53 = vshll.u32 %v14369_v32, 16  ;;  %v714_v57 = vshrl.u32 %v14369_v32, 16 }
  0x35   : > { %v11703_v48 = vcombine.low %v665_v33, %v675_v44  ;;  %v684_v50 = vrot.slane %v683_v35, 4  ;;  %v693_v49 = vor.u32 %v692_v45, %v688_v28  ;;  %v706_v54 = vrot.slane %v704_v25, 5 }
  0x36   : > { %v720_v59 = vshll.u32 %v14376_v39, 16  ;;  %v712_v63 = vrot.slane %v710_v53, 5  ;;  %v11737_v0 = vcombine.low %v495_v12, %v14369_v32  ;;  %v725_v5 = vshrl.u32 %v497_v47, 16  ;;  %v14403_v12 = vld [vmem:[%s14220_s28 + $0x74] sm:$0x1] }
  0x37   : > { %13118 = vmatmul.mubr.msk.bf16.gmra.mxu0 %vm964_vm4, %v11703_v48  ;;  %v689_v61 = vsel %vm14264_vm5, %v684_v50, %v688_v28  ;;  %v694_v8 = vrot.slane %v693_v49, 4  ;;  %v707_v9 = vor.u32 %v706_v54, %v703_v51  ;;  %v716_v10 = vrot.slane %v714_v57, 4  ;;  %v14400_v28 = vld [vmem:[%s14220_s28 + $0x70] sm:$0xf]  ;;  %v501_v53 = vld [vmem:[%s14220_s28 + $0x78] sm:$0xf] }
  0x38   : > { %v722_v11 = vrot.slane %v720_v59, 5  ;;  %13160 = vmatmul.mubr.msk.bf16.gmra.mxu1 %vm964_vm4, %v11737_v0  ;;  %v727_v14 = vrot.slane %v725_v5, 4  ;;  %v728_v15 = vshll.u32 %v497_v47, 16  ;;  %v734_v16 = vshll.u32 %v14386_v60, 16 }
  0x39   : > { %v738_v23 = vshrl.u32 %v14386_v60, 16  ;;  %v699_v29 = vsel %vm14264_vm5, %v694_v8, %v698_v46  ;;  %v708_v31 = vrot.slane %v707_v9, 4  ;;  %v717_v33 = vor.u32 %v716_v10, %v712_v63 }
  0x3a   : > { %v744_v35 = vshll.u32 %v14393_v4, 16  ;;  %v11704_v36 = vcombine.low %v689_v61, %v699_v29  ;;  %v730_v41 = vrot.slane %v728_v15, 5  ;;  %v736_v44 = vrot.slane %v734_v16, 5 }
  0x3b   : > { %v740_v45 = vrot.slane %v738_v23, 4  ;;  %v713_v25 = vsel %vm14264_vm5, %v708_v31, %v712_v63  ;;  %v718_v48 = vrot.slane %v717_v33, 4  ;;  %v11738_v51 = vcombine.low %v497_v47, %v14386_v60  ;;  %v14420_v47 = vld [vmem:[%s14220_s28 + $0x7c] sm:$0xf]  ;;  %v14423_v23 = vld [vmem:[%s14220_s28 + $0x80] sm:$0x1] }
  0x3c   : > { %v746_v50 = vrot.slane %v744_v35, 5  ;;  %13121 = vmatprep.mubr.msk.bf16.mxu0 %vm964_vm4, %v11704_v36  ;;  %v731_v46 = vor.u32 %v730_v41, %v727_v14  ;;  %v749_v54 = vshrl.u32 %v499_v18, 16  ;;  %v752_v57 = vshll.u32 %v499_v18, 16  ;;  %v503_v36 = vld [vmem:[%s14220_s28 + $0x84] sm:$0xf] }
  0x3d   : > { %v741_v49 = vor.u32 %v740_v45, %v736_v44  ;;  %v723_v59 = vsel %vm14264_vm5, %v718_v48, %v722_v11  ;;  %13163 = vmatprep.mubr.msk.bf16.mxu1 %vm964_vm4, %v11738_v51  ;;  %v758_v61 = vshll.u32 %v14400_v28, 16  ;;  %v762_v63 = vshrl.u32 %v14400_v28, 16  ;;  %v14433_v51 = vld [vmem:[%s14220_s28 + $0x88] sm:$0xf] }
  0x3e   : > { %v768_v0 = vshll.u32 %v14403_v12, 16  ;;  %v11705_v5 = vcombine.low %v713_v25, %v723_v59  ;;  %v732_v8 = vrot.slane %v731_v46, 4  ;;  %v751_v10 = vrot.slane %v749_v54, 4 }
  0x3f   : > { %v742_v9 = vrot.slane %v741_v49, 4  ;;  %v754_v14 = vrot.slane %v752_v57, 5  ;;  %v760_v15 = vrot.slane %v758_v61, 5  ;;  %v764_v16 = vrot.slane %v762_v63, 4 }
  0x40   : > { %v770_v11 = vrot.slane %v768_v0, 5  ;;  %13122 = vmatmul.mubr.msk.bf16.gmra.mxu0 %vm964_vm4, %v11705_v5  ;;  %v737_v29 = vsel %vm14264_vm5, %v732_v8, %v736_v44  ;;  %v11739_v33 = vcombine.low %v499_v18, %v14400_v28  ;;  %v773_v35 = vshrl.u32 %v501_v53, 16 }
  0x41   : > { %v747_v31 = vsel %vm14264_vm5, %v742_v9, %v746_v50  ;;  %v755_v45 = vor.u32 %v754_v14, %v751_v10  ;;  %v765_v25 = vor.u32 %v764_v16, %v760_v15  ;;  %v776_v48 = vshll.u32 %v501_v53, 16  ;;  %v14440_v50 = vld [vmem:[%s14220_s28 + $0x8c] sm:$0x1] }
  0x42   : > { %v11706_v41 = vcombine.low %v737_v29, %v747_v31  ;;  %13164 = vmatmul.mubr.msk.bf16.gmra.mxu1 %vm964_vm4, %v11739_v33  ;;  %v775_v46 = vrot.slane %v773_v35, 4  ;;  %v782_v49 = vshll.u32 %v14420_v47, 16  ;;  %v786_v44 = vshrl.u32 %v14420_v47, 16  ;;  %v505_v29 = vld [vmem:[%s14220_s28 + $0x90] sm:$0xf] }
  0x43   : > { %v792_v54 = vshll.u32 %v14423_v23, 16  ;;  %v756_v18 = vrot.slane %v755_v45, 4  ;;  %v766_v57 = vrot.slane %v765_v25, 4  ;;  %v778_v59 = vrot.slane %v776_v48, 5 }
  0x44   : > { %13125 = vmatprep.mubr.msk.bf16.mxu0 %vm964_vm4, %v11706_v41  ;;  %v11740_v61 = vcombine.low %v501_v53, %v14420_v47  ;;  %v784_v63 = vrot.slane %v782_v49, 5  ;;  %v788_v0 = vrot.slane %v786_v44, 4  ;;  %v797_v8 = vshrl.u32 %v503_v36, 16  ;;  %v14452_v41 = vld [vmem:[%s14220_s28 + $0x94] sm:$0xf] }
  0x45   : > { %v794_v5 = vrot.slane %v792_v54, 5  ;;  %v761_v9 = vsel %vm14264_vm5, %v756_v18, %v760_v15  ;;  %v771_v10 = vsel %vm14264_vm5, %v766_v57, %v770_v11  ;;  %v779_v14 = vor.u32 %v778_v59, %v775_v46  ;;  %v14462_v54 = vld [vmem:[%s14220_s28 + $0x98] sm:$0x1]  ;;  %v14467_v18 = vld [vmem:[%s19856_s3 + $0x60] ss:$0 sps:$4 sm:$0x33]  }
  0x46   : > { %13167 = vmatprep.mubr.msk.bf16.mxu1 %vm964_vm4, %v11740_v61  ;;  %v800_v16 = vshll.u32 %v503_v36, 16  ;;  %v11707_v31 = vcombine.low %v761_v9, %v771_v10  ;;  %v789_v33 = vor.u32 %v788_v0, %v784_v63  ;;  %v799_v35 = vrot.slane %v797_v8, 4  ;;  %v507_v8 = vld [vmem:[%s14220_s28 + $0x9c] sm:$0xf] }
  0x47   : > { %v806_v53 = vshll.u32 %v14433_v51, 16  ;;  %v780_v45 = vrot.slane %v779_v14, 4  ;;  %v810_v15 = vshrl.u32 %v14433_v51, 16  ;;  %v816_v11 = vshll.u32 %v14440_v50, 16 }
  0x48   : > { %v802_v25 = vrot.slane %v800_v16, 5  ;;  %13126 = vmatmul.mubr.msk.bf16.gmra.mxu0 %vm964_vm4, %v11707_v31  ;;  %v790_v48 = vrot.slane %v789_v33, 4  ;;  %v11741_v49 = vcombine.low %v503_v36, %v14433_v51  ;;  %v419_v44 = vmul.f32 %v12752_v19, %v14233_v22  ;;  %v14479_v33 = vld [vmem:[%s14220_s28 + $0xa0] sm:$0xf] }
  0x49   : > { %v808_v46 = vrot.slane %v806_v53, 5  ;;  %v785_v57 = vsel %vm14264_vm5, %v780_v45, %v784_v63  ;;  %v812_v61 = vrot.slane %v810_v15, 4  ;;  %v818_v0 = vrot.slane %v816_v11, 5 }
  0x4a   : > { %v803_v59 = vor.u32 %v802_v25, %v799_v35  ;;  %v795_v36 = vsel %vm14264_vm5, %v790_v48, %v794_v5  ;;  %13168 = vmatmul.mubr.msk.bf16.gmra.mxu1 %vm964_vm4, %v11741_v49  ;;  %v460_v19 = vpack.c.bf16 %v12753_v20, %v419_v44  ;;  %v821_v9 = vshrl.u32 %v505_v29, 16  ;;  %v14484_v25 = vld [vmem:[%s14220_s28 + $0xa4] sm:$0x1]  ;;  %v509_v48 = vld [vmem:[%s14220_s28 + $0xa8] sm:$0xf] }
  0x4b   : > { %v824_v10 = vshll.u32 %v505_v29, 16  ;;  %v11708_v14 = vcombine.low %v785_v57, %v795_v36  ;;  %v813_v31 = vor.u32 %v812_v61, %v808_v46  ;;  %v830_v63 = vshll.u32 %v14452_v41, 16 }
  0x4c   : > { %v804_v16 = vrot.slane %v803_v59, 4  ;;  %13183 = vmatprep.subr.bf16.mxu0 %v460_v19  ;;  %v823_v35 = vrot.slane %v821_v9, 4  ;;  %v834_v5 = vshrl.u32 %v14452_v41, 16  ;;  %v840_v45 = vshll.u32 %v14462_v54, 16 }
  0x4d   : > { %v826_v53 = vrot.slane %v824_v10, 5  ;;  %13129 = vmatprep.mubr.msk.bf16.mxu0 %vm964_vm4, %v11708_v14  ;;  %v814_v20 = vrot.slane %v813_v31, 4  ;;  %13184 = vmatpush3.bf16.msra.mxu0 %v460_v19  ;;  %v832_v15 = vrot.slane %v830_v63, 5  ;;  %v11742_v11 = vcombine.low %v505_v29, %v14452_v41 }
  0x4e   : > { %v809_v13 = vsel %vm14264_vm5, %v804_v16, %v808_v46  ;;  %v836_v44 = vrot.slane %v834_v5, 4  ;;  %v842_v57 = vrot.slane %v840_v45, 5  ;;  %v845_v59 = vshrl.u32 %v507_v8, 16  ;;  %13773 = vmatprep.subr.msk.bf16.mxu0 %vm1013_vm0, %v14467_v18  ;;  %v14499_v16 = vld [vmem:[%s14220_s28 + $0xac] sm:$0xf] }
  0x4f   : > { %v827_v49 = vor.u32 %v826_v53, %v823_v35  ;;  %v819_v61 = vsel %vm14264_vm5, %v814_v20, %v818_v0  ;;  %13171 = vmatprep.mubr.msk.bf16.mxu1 %vm964_vm4, %v11742_v11  ;;  %v848_v46 = vshll.u32 %v507_v8, 16  ;;  %v854_v36 = vshll.u32 %v14479_v33, 16  ;;  %v14503_v5 = vld [vmem:[%s14220_s28 + $0xb0] sm:$0x1] }
  0x50   : > { %v858_v29 = vshrl.u32 %v14479_v33, 16  ;;  %v11709_v19 = vcombine.low %v809_v13, %v819_v61  ;;  %v837_v10 = vor.u32 %v836_v44, %v832_v15  ;;  %v847_v14 = vrot.slane %v845_v59, 4 }
  0x51   : > { %v828_v9 = vrot.slane %v827_v49, 4  ;;  %v850_v31 = vrot.slane %v848_v46, 5  ;;  %v856_v63 = vrot.slane %v854_v36, 5  ;;  %v864_v53 = vshll.u32 %v14484_v25, 16 }
  0x52   : > { %v860_v35 = vrot.slane %v858_v29, 4  ;;  %13130 = vmatmul.mubr.msk.bf16.gmra.mxu0 %vm964_vm4, %v11709_v19  ;;  %v838_v45 = vrot.slane %v837_v10, 4  ;;  %v11743_v13 = vcombine.low %v507_v8, %v14479_v33  ;;  %v869_v20 = vshrl.u32 %v509_v48, 16  ;;  %v511_v29 = vld [vmem:[%s14220_s28 + $0xb4] sm:$0xf] }
  0x53   : > { %v833_v0 = vsel %vm14264_vm5, %v828_v9, %v832_v15  ;;  %v851_v11 = vor.u32 %v850_v31, %v847_v14  ;;  %v866_v44 = vrot.slane %v864_v53, 5  ;;  %v872_v59 = vshll.u32 %v509_v48, 16  ;;  %v14516_v14 = vld [vmem:[%s14220_s28 + $0xb8] sm:$0xf] }
  0x54   : > { %v861_v49 = vor.u32 %v860_v35, %v856_v63  ;;  %v843_v61 = vsel %vm14264_vm5, %v838_v45, %v842_v57  ;;  %13172 = vmatmul.mubr.msk.bf16.gmra.mxu1 %vm964_vm4, %v11743_v13  ;;  %v871_v46 = vrot.slane %v869_v20, 4  ;;  %v878_v36 = vshll.u32 %v14499_v16, 16  ;;  %v14521_v45 = vld [vmem:[%s14220_s28 + $0xbc] sm:$0x1] }
  0x55   : > { %v882_v15 = vshrl.u32 %v14499_v16, 16  ;;  %v11710_v8 = vcombine.low %v833_v0, %v843_v61  ;;  %v852_v19 = vrot.slane %v851_v11, 4  ;;  %v874_v10 = vrot.slane %v872_v59, 5  ;;  %v13815_v59 = vld [vmem:[%s14220_s28 + $0xc] sm:$0xff]  }
  0x56   : > { %v862_v9 = vrot.slane %v861_v49, 4  ;;  %v880_v31 = vrot.slane %v878_v36, 5  ;;  %v888_v57 = vshll.u32 %v14503_v5, 16  ;;  %v11744_v53 = vcombine.low %v509_v48, %v14499_v16  ;;  %v1470_v49 = vld [vmem:[%s14220_s28] sm:$0xe] }
  0x57   : > { %v884_v35 = vrot.slane %v882_v15, 4  ;;  %13133 = vmatprep.mubr.msk.bf16.mxu0 %vm964_vm4, %v11710_v8  ;;  %v857_v13 = vsel %vm14264_vm5, %v852_v19, %v856_v63  ;;  %v875_v20 = vor.u32 %v874_v10, %v871_v46  ;;  %v893_v11 = vshrl.u32 %v511_v29, 16 }
  0x58   : > { %v867_v0 = vsel %vm14264_vm5, %v862_v9, %v866_v44  ;;  %v890_v15 = vrot.slane %v888_v57, 5  ;;  %13175 = vmatprep.mubr.msk.bf16.mxu1 %vm964_vm4, %v11744_v53  ;;  %v896_v48 = vshll.u32 %v511_v29, 16  ;;  %v902_v8 = vshll.u32 %v14516_v14, 16 }
  0x59   : > { %v11711_v61 = vcombine.low %v857_v13, %v867_v0  ;;  %v885_v36 = vor.u32 %v884_v35, %v880_v31  ;;  %v876_v1 = vrot.slane %v875_v20, 4  ;;  %v895_v37 = vrot.slane %v893_v11, 4  ;;  %v1471_v13 = vld [vmem:[%s14220_s28 + $0xc] sm:$0xe] }
  0x5a   : > { %v906_v63 = vshrl.u32 %v14516_v14, 16  ;;  %v898_v46 = vrot.slane %v896_v48, 5  ;;  %v912_v19 = vshll.u32 %v14521_v45, 16  ;;  %v11745_v9 = vcombine.low %v511_v29, %v14516_v14 }
  0x5b   : > { %13134 = vmatmul.mubr.msk.bf16.gmra.mxu0 %vm964_vm4, %v11711_v61  ;;  %v886_v44 = vrot.slane %v885_v36, 4  ;;  %v881_v10 = vsel %vm14264_vm5, %v876_v1, %v880_v31  ;;  %v904_v35 = vrot.slane %v902_v8, 5  ;;  %v424_v53 = vmul.f32 %v14233_v22, %v368_v26  ;;  %v1472_v31 = vld [vmem:[%s14220_s28 + $0x18] sm:$0xe] }
  0x5c   : > { %v908_v57 = vrot.slane %v906_v63, 4  ;;  %v899_v20 = vor.u32 %v898_v46, %v895_v37  ;;  %v914_v11 = vrot.slane %v912_v19, 5  ;;  %13176 = vmatmul.mubr.msk.bf16.gmra.mxu1 %vm964_vm4, %v11745_v9  ;;  %v19897_v29 = vmov 0  ;;  %v14559_v37 = vld [vmem:[%s19856_s3 + $0x74] ss:$0 sps:$4 sm:$0x33]  }
  0x5d   : > { %v891_v0 = vsel %vm14264_vm5, %v886_v44, %v890_v15  ;;  %v19898_v29 = vsel %vm14547_vm8, 4294967295, %v19897_v29  ;;  %v11762_v1 = vrot.slane %v1470_v49, 9  ;;  %v463_v26 = vpack.c.bf16 %v369_v27, %v424_v53  ;;  %13223 = vmatprep.mubr.msk.bf16.mxu1 %vm964_vm4, %v13815_v59  ;;  %v13816_v19 = vld [vmem:[%s14220_s28 + $0x18] sm:$0xff]   ;;  %v13817_v53 = vld [vmem:[%s14220_s28 + $0x24] sm:$0xff]  }
  0x5e   : > { %19899 = vst [vmem:[#allocation5_spill] sm:$0xff] %v19898_v29  ;;  %v11712_v61 = vcombine.low %v881_v10, %v891_v0  ;;  %v909_v36 = vor.u32 %v908_v57, %v904_v35  ;;  %v1523_v48 = vrot.slane %v14237_v24, 5  ;;  %v900_v15 = vrot.slane %v899_v20, 4  ;;  %v1473_v10 = vld [vmem:[%s14220_s28 + $0x24] sm:$0xe] }
  0x5f   : > { %v11763_v8 = vrot.slane %v1471_v13, 9  ;;  %v1532_v49 = vrot.slane %v1530_v56, 4  ;;  %v14565_v21 = vsel %vm1013_vm0, %v14467_v18, 0  ;;  %13221 = vmatprep.subr.bf16.mxu1 %v463_v26  ;;  %v11764_v63 = vrot.slane %v1472_v31, 9  ;;  %v1474_v57 = vld [vmem:[%s14220_s28 + $0x30] sm:$0xe] }
  0x60   : > { %13137 = vmatprep.mubr.msk.bf16.mxu0 %vm964_vm4, %v11712_v61  ;;  %v910_v24 = vrot.slane %v909_v36, 4  ;;  %v1524_v27 = vsel %vm14547_vm8, %v11762_v1, %v1523_v48  ;;  %v1525_v59 = vrot.slane %v1523_v48, 4  ;;  %v905_v44 = vsel %vm14264_vm5, %v900_v15, %v904_v35  ;;  %13222 = vmatpush3.bf16.msra.mxu1 %v463_v26  ;;  %v1475_v13 = vld [vmem:[%s14220_s28 + $0x3c] sm:$0xe]  ;;  %v1476_v36 = vld [vmem:[%s14220_s28 + $0x48] sm:$0xe] }
  0x61   : > { %v14576_v18 = vsel %vm14547_vm8, %v11763_v8, %v1530_v56  ;;  %v14582_v46 = vsel %vm14547_vm8, %v1532_v49, %v1533_v3  ;;  %v1537_v9 = vrot.slane %v14275_v62, 5  ;;  %v19900_v38 = vrot.slane %v14247_v30, 5  ;;  %13774 = vmatprep.subr.msk.bf16.mxu1 %vm1013_vm0, %v14559_v37 }
  0x62   : > { %v915_v35 = vsel %vm14264_vm5, %v910_v24, %v914_v11  ;;  %v11779_v43 = vcombine.low %v14576_v18, %v14582_v46  ;;  %v1540_v3 = vrot.slane %v14283_v7, 5  ;;  %v11765_v30 = vrot.slane %v1473_v10, 9  ;;  %v1477_v24 = vld [vmem:[%s14220_s28 + $0x54] sm:$0xe]  ;;  %v1478_v46 = vld [vmem:[%s14220_s28 + $0x60] sm:$0xe] }
  0x63   : > { %v1527_v56 = vsel %vm14547_vm8, %v1525_v59, %v19900_v38  ;;  %v11713_v62 = vcombine.low %v905_v44, %v915_v35  ;;  %v1538_v20 = vsel %vm14547_vm8, %v11764_v63, %v1537_v9  ;;  %v1539_v11 = vrot.slane %v1537_v9, 4  ;;  %v13818_v9 = vld [vmem:[%s14220_s28 + $0x30] sm:$0xff]   ;;  %v1479_v35 = vld [vmem:[%s14220_s28 + $0x6c] sm:$0xe] }
  0x64   : > { %v11778_v0 = vcombine.low %v1524_v27, %v1527_v56  ;;  %v1544_v1 = vrot.slane %v14296_v34, 5  ;;  %v1547_v31 = vrot.slane %v14304_v40, 5  ;;  %v11766_v61 = vrot.slane %v1474_v57, 9  ;;  %13224 = vmatmul.mubr.msk.bf16.vlgmr.msra.gmra.mxu1 %vm964_vm4, %v13816_v19  ;;  %v13819_v56 = vld [vmem:[%s14220_s28 + $0x3c] sm:$0xff]  }
  0x65   : > { %13138 = vmatmul.mubr.msk.bf16.gmra.mxu0 %vm964_vm4, %v11713_v62  ;;  %v1541_v7 = vsel %vm14547_vm8, %v1539_v11, %v1540_v3  ;;  %v1551_v26 = vrot.slane %v14317_v58, 5  ;;  %v1554_v48 = vrot.slane %v14325_v6, 5  ;;  %v11767_v15 = vrot.slane %v1475_v13, 9  ;;  %13227 = vmatprep.mubr.msk.bf16.mxu1 %vm964_vm4, %v13817_v53  ;;  %v1480_v11 = vld [vmem:[%s14220_s28 + $0x78] sm:$0xe] }
  0x66   : > { %13185 = vmatprep.mubr.msk.bf16.mxu0 %vm964_vm4, %v11778_v0  ;;  %v11780_v34 = vcombine.low %v1538_v20, %v1541_v7  ;;  %v14615_v40 = vsel %vm14547_vm8, %v11765_v30, %v1544_v1  ;;  %v1546_v8 = vrot.slane %v1544_v1, 4  ;;  %v1558_v49 = vrot.slane %v14334_v17, 5 }
  0x67   : > { %v14622_v58 = vsel %vm14547_vm8, %v11766_v61, %v1551_v26  ;;  %v1553_v6 = vrot.slane %v1551_v26, 4  ;;  %v1561_v27 = vrot.slane %v14343_v42, 5  ;;  %v11768_v59 = vrot.slane %v1476_v36, 9  ;;  %v1481_v26 = vld [vmem:[%s14220_s28 + $0x84] sm:$0xe] }
  0x68   : > { %v14627_v63 = vsel %vm14547_vm8, %v1546_v8, %v1547_v31  ;;  %v14631_v44 = vsel %vm14547_vm8, %v11767_v15, %v1558_v49  ;;  %v1560_v17 = vrot.slane %v1558_v49, 4  ;;  %v1565_v18 = vrot.slane %v14351_v55, 5 }
  0x69   : > { %v11781_v19 = vcombine.low %v14615_v40, %v14627_v63  ;;  %v14640_v42 = vsel %vm14547_vm8, %v1553_v6, %v1554_v48  ;;  %v1568_v10 = vrot.slane %v14359_v2, 5  ;;  %v11769_v57 = vrot.slane %v1477_v24, 9  ;;  %v13821_v2 = vld [vmem:[%s19856_s3 + $0x58] sm:$0xff]  }
  0x6a   : > { %v11782_v38 = vcombine.low %v14622_v58, %v14640_v42  ;;  %v14648_v55 = vsel %vm14547_vm8, %v1560_v17, %v1561_v27  ;;  %v14653_v3 = vsel %vm14547_vm8, %v11768_v59, %v1565_v18  ;;  %v1567_v53 = vrot.slane %v1565_v18, 4  ;;  %v1482_v27 = vld [vmem:[%s14220_s28 + $0x90] sm:$0xe]  ;;  %v13820_v59 = vld [vmem:[%s14220_s28 + $0x48] sm:$0xff]  }
  0x6b   : > { %v11783_v13 = vcombine.low %v14631_v44, %v14648_v55  ;;  %v1572_v62 = vrot.slane %v14369_v32, 5  ;;  %v1575_v0 = vrot.slane %v14376_v39, 5  ;;  %v11770_v20 = vrot.slane %v1478_v46, 9 }
  0x6c   : > { %v14665_v30 = vsel %vm14547_vm8, %v1567_v53, %v1568_v10  ;;  %v1579_v1 = vrot.slane %v14386_v60, 5  ;;  %v1582_v31 = vrot.slane %v14393_v4, 5  ;;  %v11771_v61 = vrot.slane %v1479_v35, 9  ;;  %13228 = vmatmul.mubr.msk.bf16.gmra.mxu1 %vm964_vm4, %v13818_v9  ;;  %v13822_v9 = vld [vmem:[%s14220_s28 + $0x54] sm:$0xff]  }
  0x6d   : > { %13186 = vmatmul.mubr.msk.bf16.vlgmr.msra.gmra.mxu0 %vm964_vm4, %v11779_v43  ;;  %v11784_v32 = vcombine.low %v14653_v3, %v14665_v30  ;;  %v14675_v39 = vsel %vm14547_vm8, %v11769_v57, %v1572_v62  ;;  %v1574_v36 = vrot.slane %v1572_v62, 4  ;;  %v1586_v7 = vrot.slane %v14400_v28, 5  ;;  %13231 = vmatprep.mubr.msk.bf16.mxu1 %vm964_vm4, %v13819_v56  ;;  %v1483_v56 = vld [vmem:[%s14220_s28 + $0x9c] sm:$0xe] }
  0x6e   : > { %13256 = vmatpush3.bf16.msra.mxu0 %v14565_v21  ;;  %13189 = vmatprep.mubr.msk.bf16.mxu0 %vm964_vm4, %v11780_v34  ;;  %v14683_v60 = vsel %vm14547_vm8, %v11770_v20, %v1579_v1  ;;  %v1581_v4 = vrot.slane %v1579_v1, 4  ;;  %v1589_v43 = vrot.slane %v14403_v12, 5  ;;  %v11772_v48 = vrot.slane %v1480_v11, 9  ;;  %v12767_v12 = vld [vmem:[%s19856_s3 + $0x50] sm:$0xff]   ;;  %v1484_v1 = vld [vmem:[%s14220_s28 + $0xa8] sm:$0xe] }
  0x6f   : > { %13257 = vmatprep.subr.bf16.mxu0 %v13821_v2  ;;  %v14689_v28 = vsel %vm14547_vm8, %v1574_v36, %v1575_v0  ;;  %v14693_v21 = vsel %vm14547_vm8, %v11771_v61, %v1586_v7  ;;  %v1588_v15 = vrot.slane %v1586_v7, 4  ;;  %v1593_v34 = vrot.slane %v14420_v47, 5  ;;  %v1485_v7 = vld [vmem:[%s14220_s28 + $0xb4] sm:$0xe] }
  0x70   : > { %v11785_v8 = vcombine.low %v14675_v39, %v14689_v28  ;;  %v14703_v49 = vsel %vm14547_vm8, %v1581_v4, %v1582_v31  ;;  %v1596_v24 = vrot.slane %v14423_v23, 5  ;;  %v11773_v6 = vrot.slane %v1481_v26, 9  ;;  %v14762_v26 = vld [vmem:[%s19856_s3 + $0x88] ss:$0 sps:$4 sm:$0x33]  }
  0x71   : > { %v11786_v47 = vcombine.low %v14683_v60, %v14703_v49  ;;  %v14712_v17 = vsel %vm14547_vm8, %v1588_v15, %v1589_v43  ;;  %v14716_v18 = vsel %vm14547_vm8, %v11772_v48, %v1593_v34  ;;  %v1595_v46 = vrot.slane %v1593_v34, 4  ;;  %v11874_v34 = vld [vmem:[%s14220_s28 + $0xc] sm:$0xf] }
  0x72   : > { %13258 = vmatpush3.bf16.msra.mxu0 %v13821_v2  ;;  %v11787_v23 = vcombine.low %v14693_v21, %v14712_v17  ;;  %v1600_v10 = vrot.slane %v14433_v51, 5  ;;  %v1603_v57 = vrot.slane %v14440_v50, 5  ;;  %v12756_v35 = vunpack.c.l.bf16 %v12767_v12 }
  0x73   : > { %v14726_v53 = vsel %vm14547_vm8, %v1595_v46, %v1596_v24  ;;  %v12757_v62 = vunpack.c.h.bf16 %v12767_v12  ;;  %v11774_v0 = vrot.slane %v1482_v27, 9  ;;  %v1607_v20 = vrot.slane %v14452_v41, 5  ;;  %v13823_v12 = vld [vmem:[%s14220_s28 + $0x60] sm:$0xff]   ;;  %v13824_v46 = vld [vmem:[%s14220_s28 + $0x6c] sm:$0xff]  }
  0x74   : > { %v11788_v2 = vcombine.low %v14716_v18, %v14726_v53  ;;  %v14733_v11 = vsel %vm14547_vm8, %v11773_v6, %v1600_v10  ;;  %v1602_v51 = vrot.slane %v1600_v10, 4  ;;  %v429_v50 = vmul.f32 %v12756_v35, %v14233_v22  ;;  %13232 = vmatmul.mubr.msk.bf16.gmra.mxu1 %vm964_vm4, %v13820_v59  ;;  %v14800_v35 = vld [vmem:[%s14220_s28 + $0x10] sm:$0xf] }
  0x75   : > { %13190 = vmatmul.mubr.msk.bf16.gmra.mxu0 %vm964_vm4, %v11781_v19  ;;  %v14744_v41 = vsel %vm14547_vm8, %v11774_v0, %v1607_v20  ;;  %v1609_v31 = vrot.slane %v1607_v20, 4  ;;  %v1610_v61 = vrot.slane %v14462_v54, 5  ;;  %v11775_v36 = vrot.slane %v1483_v56, 9  ;;  %13235 = vmatprep.mubr.msk.bf16.mxu1 %vm964_vm4, %v13822_v9  ;;  %v14811_v0 = vld [vmem:[%s14220_s28 + $0x14] sm:$0x1] }
  0x76   : > { %13193 = vmatprep.mubr.msk.bf16.mxu0 %vm964_vm4, %v11782_v38  ;;  %v14755_v40 = vsel %vm14547_vm8, %v1602_v51, %v1603_v57  ;;  %v466_v63 = vpack.c.bf16 %v12757_v62, %v429_v50  ;;  %v1614_v19 = vrot.slane %v14479_v33, 5  ;;  %v1617_v54 = vrot.slane %v14484_v25, 5  ;;  %v13833_v33 = vld [vmem:[%s19856_s3 + $0x6c] sm:$0xff]   ;;  %v333_v25 = vld [vmem:[%s19856_s3 + $0x64] sm:$0xff]  }
  0x77   : > { %v11789_v58 = vcombine.low %v14733_v11, %v14755_v40  ;;  %v14768_v42 = vsel %vm14547_vm8, %v1609_v31, %v1610_v61  ;;  %v11776_v38 = vrot.slane %v1484_v1, 9  ;;  %v1621_v4 = vrot.slane %v14499_v16, 5 }
  0x78   : > { %13259 = vmatprep.subr.bf16.mxu0 %v466_v63  ;;  %v11790_v43 = vcombine.low %v14744_v41, %v14768_v42  ;;  %v14781_v48 = vsel %vm14547_vm8, %v11775_v36, %v1614_v19  ;;  %v1616_v15 = vrot.slane %v1614_v19, 4  ;;  %v1624_v16 = vrot.slane %v14503_v5, 5  ;;  %v14840_v19 = vld [vmem:[%s14220_s28 + $0x20] sm:$0x1]  ;;  %v11958_v42 = vld [vmem:[%s14220_s28 + $0x3c] sm:$0xe] }
  0x79   : > { %13260 = vmatpush3.bf16.msra.mxu0 %v466_v63  ;;  %v14788_v24 = vsel %vm14547_vm8, %v11776_v38, %v1621_v4  ;;  %v1623_v6 = vrot.slane %v1621_v4, 4  ;;  %v3279_v27 = vsel %vm1013_vm0, %v14559_v37, 0  ;;  %v11777_v59 = vrot.slane %v1485_v7, 9  ;;  %v11878_v63 = vld [vmem:[%s14220_s28 + $0x1c] sm:$0xf] }
  0x7a   : > { %v14795_v9 = vsel %vm14547_vm8, %v1616_v15, %v1617_v54  ;;  %13294 = vmatpush3.bf16.msra.mxu1 %v3279_v27  ;;  %v1628_v5 = vrot.slane %v14516_v14, 5  ;;  %v1631_v10 = vrot.slane %v14521_v45, 5  ;;  %v378_v57 = vunpack.c.l.bf16 %v333_v25  ;;  %13775 = vmatprep.subr.msk.bf16.mxu0 %vm1013_vm0, %v14762_v26  ;;  %v11877_v45 = vld [vmem:[%s14220_s28 + $0x18] sm:$0xf]  ;;  %v11954_v38 = vld [vmem:[%s14220_s28 + $0xc] sm:$0xe] }
  0x7b   : > { %v11791_v37 = vcombine.low %v14781_v48, %v14795_v9  ;;  %v14808_v56 = vsel %vm14547_vm8, %v1623_v6, %v1624_v16  ;;  %13295 = vmatprep.subr.bf16.mxu1 %v13833_v33  ;;  %v379_v62 = vunpack.c.h.bf16 %v333_v25  ;;  %v2331_v14 = vshrl.u32 %v11874_v34, 16  ;;  %v11955_v25 = vld [vmem:[%s14220_s28 + $0x18] sm:$0xe] }
  0x7c   : > { %v11792_v20 = vcombine.low %v14788_v24, %v14808_v56  ;;  %v14818_v51 = vsel %vm14547_vm8, %v11777_v59, %v1628_v5  ;;  %v1630_v50 = vrot.slane %v1628_v5, 4  ;;  %v434_v1 = vmul.f32 %v14233_v22, %v378_v57  ;;  %13236 = vmatmul.mubr.msk.bf16.gmra.mxu1 %vm964_vm4, %v13823_v12  ;;  %v13825_v6 = vld [vmem:[%s14220_s28 + $0x78] sm:$0xff]  }
  0x7d   : > { %13194 = vmatmul.mubr.msk.bf16.gmra.mxu0 %vm964_vm4, %v11783_v13  ;;  %v2333_v31 = vrot.slane %v2331_v14, 4  ;;  %v2334_v61 = vshll.u32 %v11874_v34, 16  ;;  %v2340_v36 = vshll.u32 %v14800_v35, 16  ;;  %v2344_v7 = vshrl.u32 %v14800_v35, 16  ;;  %13239 = vmatprep.mubr.msk.bf16.mxu1 %vm964_vm4, %v13824_v46 }
  0x7e   : > { %13197 = vmatprep.mubr.msk.bf16.mxu0 %vm964_vm4, %v11784_v32  ;;  %v14836_v44 = vsel %vm14547_vm8, %v1630_v50, %v1631_v10  ;;  %v469_v55 = vpack.c.bf16 %v379_v62, %v434_v1  ;;  %v2350_v13 = vshll.u32 %v14811_v0, 16  ;;  %v2355_v54 = vshrl.u32 %v11877_v45, 16  ;;  %13296 = vmatpush3.bf16.msra.mxu1 %v13833_v33  ;;  %v14851_v33 = vld [vmem:[%s19856_s3 + $0x9c] ss:$0 sps:$4 sm:$0x33]   ;;  %v13826_v10 = vld [vmem:[%s14220_s28 + $0x84] sm:$0xff]  }
  0x7f   : > { %v11793_v4 = vcombine.low %v14818_v51, %v14836_v44  ;;  %v2336_v3 = vrot.slane %v2334_v61, 5  ;;  %v2342_v30 = vrot.slane %v2340_v36, 5  ;;  %v2346_v32 = vrot.slane %v2344_v7, 4 }
  0x80   : > { %13297 = vmatprep.subr.bf16.mxu1 %v469_v55  ;;  %v2352_v15 = vrot.slane %v2350_v13, 5  ;;  %v2357_v16 = vrot.slane %v2355_v54, 4  ;;  %v2358_v34 = vshll.u32 %v11877_v45, 16  ;;  %v2364_v12 = vshll.u32 %v11878_v63, 16 }
  0x81   : > { %v2337_v27 = vor.u32 %v2336_v3, %v2333_v31  ;;  %v2347_v59 = vor.u32 %v2346_v32, %v2342_v30  ;;  %v2368_v46 = vshrl.u32 %v11878_v63, 16  ;;  %v2374_v5 = vshll.u32 %v14840_v19, 16  ;;  %v14873_v3 = vld [vmem:[%s14220_s28 + $0x28] sm:$0xf]  ;;  %v11883_v32 = vld [vmem:[%s14220_s28 + $0x30] sm:$0xf] }
  0x82   : > { %v2360_v57 = vrot.slane %v2358_v34, 5  ;;  %v2366_v62 = vrot.slane %v2364_v12, 5  ;;  %v14856_v14 = vsel %vm1013_vm0, %v14762_v26, 0  ;;  %v11970_v45 = vrot.slane %v11954_v38, 9  ;;  %13298 = vmatpush3.bf16.msra.mxu1 %v469_v55  ;;  %v11880_v38 = vld [vmem:[%s14220_s28 + $0x24] sm:$0xf] }
  0x83   : > { %v2338_v50 = vrot.slane %v2337_v27, 4  ;;  %v2348_v1 = vrot.slane %v2347_v59, 4  ;;  %v2370_v31 = vrot.slane %v2368_v46, 4  ;;  %v2376_v61 = vrot.slane %v2374_v5, 5  ;;  %13776 = vmatprep.subr.msk.bf16.mxu1 %vm1013_vm0, %v14851_v33  ;;  %v14906_v59 = vld [vmem:[%s14220_s28 + $0x38] sm:$0x1] }
  0x84   : > { %v2361_v36 = vor.u32 %v2360_v57, %v2357_v16  ;;  %v3072_v7 = vrot.slane %v14800_v35, 5  ;;  %v3075_v13 = vrot.slane %v14811_v0, 5  ;;  %v11971_v54 = vrot.slane %v11955_v25, 9  ;;  %13240 = vmatmul.mubr.msk.bf16.gmra.mxu1 %vm964_vm4, %v13825_v6  ;;  %v13827_v25 = vld [vmem:[%s14220_s28 + $0x90] sm:$0xff]   ;;  %v13828_v46 = vld [vmem:[%s14220_s28 + $0x9c] sm:$0xff]  }
  0x85   : > { %13198 = vmatmul.mubr.msk.bf16.gmra.mxu0 %vm964_vm4, %v11785_v8  ;;  %v2343_v26 = vsel %vm14264_vm5, %v2338_v50, %v2342_v30  ;;  %v2353_v35 = vsel %vm14264_vm5, %v2348_v1, %v2352_v15  ;;  %v2371_v0 = vor.u32 %v2370_v31, %v2366_v62  ;;  %v3079_v55 = vrot.slane %v11878_v63, 5  ;;  %13243 = vmatprep.mubr.msk.bf16.mxu1 %vm964_vm4, %v13826_v10  ;;  %v14887_v30 = vld [vmem:[%s14220_s28 + $0x2c] sm:$0x1]  ;;  %v14897_v16 = vld [vmem:[%s14220_s28 + $0x34] sm:$0xf] }
  0x86   : > { %13201 = vmatprep.mubr.msk.bf16.mxu0 %vm964_vm4, %v11786_v47  ;;  %v14880_v39 = vcombine.low %v2343_v26, %v2353_v35  ;;  %v2362_v28 = vrot.slane %v2361_v36, 4  ;;  %v14884_v8 = vsel %vm14547_vm8, %v11970_v45, %v3072_v7  ;;  %v3074_v63 = vrot.slane %v3072_v7, 4 }
  0x87   : > { %v2372_v15 = vrot.slane %v2371_v0, 4  ;;  %v14893_v60 = vsel %vm14547_vm8, %v11971_v54, %v3079_v55  ;;  %v3081_v49 = vrot.slane %v3079_v55, 4  ;;  %v3082_v47 = vrot.slane %v14840_v19, 5  ;;  %v11956_v0 = vld [vmem:[%s14220_s28 + $0x24] sm:$0xe] }
  0x88   : > { %v2367_v34 = vsel %vm14264_vm5, %v2362_v28, %v2366_v62  ;;  %v14903_v12 = vsel %vm14547_vm8, %v3074_v63, %v3075_v13  ;;  %v2379_v6 = vshrl.u32 %v11880_v38, 16  ;;  %v2382_v27 = vshll.u32 %v11880_v38, 16 }
  0x89   : > { %v2377_v5 = vsel %vm14264_vm5, %v2372_v15, %v2376_v61  ;;  %v11986_v19 = vcombine.low %v14884_v8, %v14903_v12  ;;  %v14915_v10 = vsel %vm14547_vm8, %v3081_v49, %v3082_v47  ;;  %v2388_v57 = vshll.u32 %v14873_v3, 16  ;;  %v11895_v12 = vld [vmem:[%s14220_s28 + $0x60] sm:$0xf] }
  0x8a   : > { %v14918_v62 = vcombine.low %v2367_v34, %v2377_v5  ;;  %v11987_v45 = vcombine.low %v14893_v60, %v14915_v10  ;;  %v2381_v50 = vrot.slane %v2379_v6, 4  ;;  %v2384_v1 = vrot.slane %v2382_v27, 5  ;;  %v13829_v6 = vld [vmem:[%s14220_s28 + $0xa8] sm:$0xff]   ;;  %v13831_v5 = vld [vmem:[%s14220_s28 + $0xb4] sm:$0xff]   ;;  %v11961_v10 = vld [vmem:[%s14220_s28 + $0x60] sm:$0xe] }
  0x8b   : > { %v2390_v31 = vrot.slane %v2388_v57, 5  ;;  %v2392_v61 = vshrl.u32 %v14873_v3, 16  ;;  %v2398_v36 = vshll.u32 %v14887_v30, 16  ;;  %v2403_v7 = vshrl.u32 %v11883_v32, 16 }
  0x8c   : > { %v2385_v13 = vor.u32 %v2384_v1, %v2381_v50  ;;  %v2406_v54 = vshll.u32 %v11883_v32, 16  ;;  %v2412_v26 = vshll.u32 %v14897_v16, 16  ;;  %v2416_v35 = vshrl.u32 %v14897_v16, 16  ;;  %13244 = vmatmul.mubr.msk.bf16.gmra.mxu1 %vm964_vm4, %v13827_v25  ;;  %v11957_v25 = vld [vmem:[%s14220_s28 + $0x30] sm:$0xe] }
  0x8d   : > { %13202 = vmatmul.mubr.msk.bf16.gmra.mxu0 %vm964_vm4, %v11787_v23  ;;  %v2394_v55 = vrot.slane %v2392_v61, 4  ;;  %v2400_v38 = vrot.slane %v2398_v36, 5  ;;  %v2405_v28 = vrot.slane %v2403_v7, 4  ;;  %v2422_v63 = vshll.u32 %v14906_v59, 16  ;;  %13247 = vmatprep.mubr.msk.bf16.mxu1 %vm964_vm4, %v13828_v46  ;;  %v11886_v46 = vld [vmem:[%s14220_s28 + $0x3c] sm:$0xf] }
  0x8e   : > { %13205 = vmatprep.mubr.msk.bf16.mxu0 %vm964_vm4, %v11788_v2  ;;  %v2386_v21 = vrot.slane %v2385_v13, 4  ;;  %v2408_v17 = vrot.slane %v2406_v54, 5  ;;  %v2414_v23 = vrot.slane %v2412_v26, 5  ;;  %v2418_v32 = vrot.slane %v2416_v35, 4  ;;  %v14952_v36 = vld [vmem:[%s14220_s28 + $0x44] sm:$0x1] }
  0x8f   : > { %v2395_v15 = vor.u32 %v2394_v55, %v2390_v31  ;;  %v2424_v49 = vrot.slane %v2422_v63, 5  ;;  %v11972_v47 = vrot.slane %v11956_v0, 9  ;;  %v3086_v34 = vrot.slane %v14873_v3, 5  ;;  %v11887_v3 = vld [vmem:[%s14220_s28 + $0x40] sm:$0xf] }
  0x90   : > { %v2391_v18 = vsel %vm14264_vm5, %v2386_v21, %v2390_v31  ;;  %v2409_v53 = vor.u32 %v2408_v17, %v2405_v28  ;;  %v2419_v2 = vor.u32 %v2418_v32, %v2414_v23  ;;  %v3089_v27 = vrot.slane %v14887_v30, 5 }
  0x91   : > { %v2396_v57 = vrot.slane %v2395_v15, 4  ;;  %v14948_v50 = vsel %vm14547_vm8, %v11972_v47, %v3086_v34  ;;  %v3088_v1 = vrot.slane %v3086_v34, 4  ;;  %v11973_v61 = vrot.slane %v11957_v25, 9  ;;  %v11891_v15 = vld [vmem:[%s14220_s28 + $0x50] sm:$0x1] }
  0x92   : > { %v2410_v7 = vrot.slane %v2409_v53, 4  ;;  %v2420_v31 = vrot.slane %v2419_v2, 4  ;;  %v3093_v13 = vrot.slane %v14897_v16, 5  ;;  %v3096_v30 = vrot.slane %v14906_v59, 5  ;;  %v11889_v59 = vld [vmem:[%s14220_s28 + $0x48] sm:$0xf] }
  0x93   : > { %v2401_v54 = vsel %vm14264_vm5, %v2396_v57, %v2400_v38  ;;  %v14960_v26 = vsel %vm14547_vm8, %v3088_v1, %v3089_v27  ;;  %v2427_v35 = vshrl.u32 %v11886_v46, 16  ;;  %v2430_v0 = vshll.u32 %v11886_v46, 16  ;;  %v14972_v38 = vld [vmem:[%s14220_s28 + $0x4c] sm:$0xf]  ;;  %v11959_v27 = vld [vmem:[%s14220_s28 + $0x48] sm:$0xe] }
  0x94   : > { %v14962_v55 = vcombine.low %v2391_v18, %v2401_v54  ;;  %v2415_v28 = vsel %vm14264_vm5, %v2410_v7, %v2414_v23  ;;  %v2425_v63 = vsel %vm14264_vm5, %v2420_v31, %v2424_v49  ;;  %v11988_v16 = vcombine.low %v14948_v50, %v14960_v26  ;;  %13248 = vmatmul.mubr.msk.bf16.gmra.mxu1 %vm964_vm4, %v13829_v6  ;;  %v13832_v49 = vld [vmem:[%s14220_s28 + $0xc0] sm:$0xff]  }
  0x95   : > { %13206 = vmatmul.mubr.msk.bf16.gmra.mxu0 %vm964_vm4, %v11789_v58  ;;  %v14979_v21 = vcombine.low %v2415_v28, %v2425_v63  ;;  %v14983_v17 = vsel %vm14547_vm8, %v11973_v61, %v3093_v13  ;;  %v3095_v23 = vrot.slane %v3093_v13, 4  ;;  %v2429_v32 = vrot.slane %v2427_v35, 4  ;;  %13251 = vmatprep.mubr.msk.bf16.mxu1 %vm964_vm4, %v13831_v5 }
  0x96   : > { %13209 = vmatprep.mubr.msk.bf16.mxu0 %vm964_vm4, %v11790_v43  ;;  %v2432_v11 = vrot.slane %v2430_v0, 5  ;;  %v2436_v40 = vshll.u32 %v11887_v3, 16  ;;  %v2440_v58 = vshrl.u32 %v11887_v3, 16  ;;  %v2446_v25 = vshll.u32 %v14952_v36, 16 }
  0x97   : > { %v14995_v47 = vsel %vm14547_vm8, %v3095_v23, %v3096_v30  ;;  %v2451_v34 = vshrl.u32 %v11889_v59, 16  ;;  %v2454_v6 = vshll.u32 %v11889_v59, 16  ;;  %v2460_v41 = vshll.u32 %v14972_v38, 16 }
  0x98   : > { %v11989_v43 = vcombine.low %v14983_v17, %v14995_v47  ;;  %v2433_v18 = vor.u32 %v2432_v11, %v2429_v32  ;;  %v2438_v53 = vrot.slane %v2436_v40, 5  ;;  %v2442_v2 = vrot.slane %v2440_v58, 4  ;;  %v11892_v32 = vld [vmem:[%s14220_s28 + $0x54] sm:$0xf] }
  0x99   : > { %v2448_v46 = vrot.slane %v2446_v25, 5  ;;  %v2453_v5 = vrot.slane %v2451_v34, 4  ;;  %v2456_v57 = vrot.slane %v2454_v6, 5  ;;  %v2462_v1 = vrot.slane %v2460_v41, 5  ;;  %v11893_v25 = vld [vmem:[%s14220_s28 + $0x58] sm:$0xf] }
  0x9a   : > { %v2434_v61 = vrot.slane %v2433_v18, 4  ;;  %v2443_v7 = vor.u32 %v2442_v2, %v2438_v53  ;;  %v2464_v31 = vshrl.u32 %v14972_v38, 16  ;;  %v2470_v13 = vshll.u32 %v11891_v15, 16  ;;  %v11896_v6 = vld [vmem:[%s14220_s28 + $0x64] sm:$0xf] }
  0x9b   : > { %v2457_v30 = vor.u32 %v2456_v57, %v2453_v5  ;;  %v11974_v54 = vrot.slane %v11958_v42, 9  ;;  %v3100_v35 = vrot.slane %v11887_v3, 5  ;;  %v3103_v0 = vrot.slane %v14952_v36, 5  ;;  %v15048_v41 = vld [vmem:[%s14220_s28 + $0x68] sm:$0x1] }
  0x9c   : > { %v2439_v28 = vsel %vm14264_vm5, %v2434_v61, %v2438_v53  ;;  %v2444_v63 = vrot.slane %v2443_v7, 4  ;;  %v2466_v59 = vrot.slane %v2464_v31, 4  ;;  %v2472_v23 = vrot.slane %v2470_v13, 5  ;;  %13252 = vmatmul.mubr.msk.bf16.gmra.mxu1 %vm964_vm4, %v13832_v49  ;;  %v15029_v49 = vld [vmem:[%s14220_s28 + $0x5c] sm:$0x1] }
  0x9d   : > { %13210 = vmatmul.mubr.msk.bf16.gmra.mxu0 %vm964_vm4, %v11791_v37  ;;  %v2458_v11 = vrot.slane %v2457_v30, 4  ;;  %v15014_v3 = vsel %vm14547_vm8, %v11974_v54, %v3100_v35  ;;  %v3102_v36 = vrot.slane %v3100_v35, 4  ;;  %v11975_v40 = vrot.slane %v11959_v27, 9  ;;  %13299 = vmatprep.mubr.msk.bf16.mxu1 %vm964_vm4, %v11986_v19  ;;  %v11960_v13 = vld [vmem:[%s14220_s28 + $0x54] sm:$0xe] }
  0x9e   : > { %13213 = vmatprep.mubr.msk.bf16.mxu0 %vm964_vm4, %v11792_v20  ;;  %v2449_v48 = vsel %vm14264_vm5, %v2444_v63, %v2448_v46  ;;  %v2467_v9 = vor.u32 %v2466_v59, %v2462_v1  ;;  %v3107_v37 = vrot.slane %v14972_v38, 5  ;;  %v3110_v58 = vrot.slane %v11891_v15, 5 }
  0x9f   : > { %v15031_v24 = vcombine.low %v2439_v28, %v2449_v48  ;;  %v2463_v56 = vsel %vm14264_vm5, %v2458_v11, %v2462_v1  ;;  %v15037_v20 = vsel %vm14547_vm8, %v3102_v36, %v3103_v0  ;;  %v2475_v8 = vshrl.u32 %v11892_v32, 16 }
  0xa0   : > { %v2468_v19 = vrot.slane %v2467_v9, 4  ;;  %v11990_v34 = vcombine.low %v15014_v3, %v15037_v20  ;;  %v15044_v38 = vsel %vm14547_vm8, %v11975_v40, %v3107_v37  ;;  %v3109_v15 = vrot.slane %v3107_v37, 4  ;;  %v11898_v40 = vld [vmem:[%s14220_s28 + $0x6c] sm:$0xf]  ;;  %v11963_v20 = vld [vmem:[%s14220_s28 + $0x78] sm:$0xe] }
  0xa1   : > { %v2477_v42 = vrot.slane %v2475_v8, 4  ;;  %v2478_v18 = vshll.u32 %v11892_v32, 16  ;;  %v2484_v53 = vshll.u32 %v11893_v25, 16  ;;  %v2488_v2 = vshrl.u32 %v11893_v25, 16 }
  0xa2   : > { %v2473_v27 = vsel %vm14264_vm5, %v2468_v19, %v2472_v23  ;;  %v15054_v46 = vsel %vm14547_vm8, %v3109_v15, %v3110_v58  ;;  %v2494_v5 = vshll.u32 %v15029_v49, 16  ;;  %v2499_v57 = vshrl.u32 %v11895_v12, 16  ;;  %v11899_v15 = vld [vmem:[%s14220_s28 + $0x70] sm:$0xf] }
  0xa3   : > { %v15057_v1 = vcombine.low %v2463_v56, %v2473_v27  ;;  %v11991_v61 = vcombine.low %v15044_v38, %v15054_v46  ;;  %v2480_v7 = vrot.slane %v2478_v18, 5  ;;  %v2486_v31 = vrot.slane %v2484_v53, 5  ;;  %v15098_v53 = vld [vmem:[%s14220_s28 + $0x74] sm:$0x1]  ;;  %v11901_v27 = vld [vmem:[%s14220_s28 + $0x78] sm:$0xf] }
  0xa4   : > { %v2490_v30 = vrot.slane %v2488_v2, 4  ;;  %v2496_v54 = vrot.slane %v2494_v5, 5  ;;  %v2501_v35 = vrot.slane %v2499_v57, 4  ;;  %v2502_v0 = vshll.u32 %v11895_v12, 16  ;;  %13300 = vmatmul.mubr.msk.bf16.vlgmr.msra.gmra.mxu1 %vm964_vm4, %v11987_v45 }
  0xa5   : > { %13214 = vmatmul.mubr.msk.bf16.gmra.mxu0 %vm964_vm4, %v11793_v4  ;;  %v2481_v28 = vor.u32 %v2480_v7, %v2477_v42  ;;  %v2508_v63 = vshll.u32 %v11896_v6, 16  ;;  %v2512_v59 = vshrl.u32 %v11896_v6, 16  ;;  %v2518_v23 = vshll.u32 %v15048_v41, 16  ;;  %13303 = vmatprep.mubr.msk.bf16.mxu1 %vm964_vm4, %v11988_v16  ;;  %v15109_v7 = vld [vmem:[%s14220_s28 + $0x7c] sm:$0xf] }
  0xa6   : > { %13261 = vmatprep.mubr.msk.bf16.mxu0 %vm964_vm4, %v14880_v39  ;;  %v2491_v51 = vor.u32 %v2490_v30, %v2486_v31  ;;  %v2504_v44 = vrot.slane %v2502_v0, 5  ;;  %v11976_v4 = vrot.slane %v11960_v13, 9  ;;  %v3114_v60 = vrot.slane %v11893_v25, 5  ;;  %v13835_v25 = vld [vmem:[%s19856_s3 + $0x80] sm:$0xff]   ;;  %v11962_v0 = vld [vmem:[%s14220_s28 + $0x6c] sm:$0xe] }
  0xa7   : > { %v2482_v45 = vrot.slane %v2481_v28, 4  ;;  %v2510_v32 = vrot.slane %v2508_v63, 5  ;;  %v2514_v11 = vrot.slane %v2512_v59, 4  ;;  %v2520_v36 = vrot.slane %v2518_v23, 5 }
  0xa8   : > { %v2492_v48 = vrot.slane %v2491_v51, 4  ;;  %v2505_v9 = vor.u32 %v2504_v44, %v2501_v35  ;;  %v15081_v39 = vsel %vm14547_vm8, %v11976_v4, %v3114_v60  ;;  %v3116_v50 = vrot.slane %v3114_v60, 4 }
  0xa9   : > { %v2487_v26 = vsel %vm14264_vm5, %v2482_v45, %v2486_v31  ;;  %v2515_v16 = vor.u32 %v2514_v11, %v2510_v32  ;;  %v3117_v37 = vrot.slane %v15029_v49, 5  ;;  %v11977_v58 = vrot.slane %v11961_v10, 9  ;;  %v15112_v31 = vld [vmem:[%s14220_s28 + $0x80] sm:$0x1] }
  0xaa   : > { %v2497_v56 = vsel %vm14264_vm5, %v2492_v48, %v2496_v54  ;;  %v2506_v8 = vrot.slane %v2505_v9, 4  ;;  %v3121_v12 = vrot.slane %v11896_v6, 5  ;;  %v3124_v19 = vrot.slane %v15048_v41, 5 }
  0xab   : > { %v15093_v42 = vcombine.low %v2487_v26, %v2497_v56  ;;  %v2516_v18 = vrot.slane %v2515_v16, 4  ;;  %v3118_v49 = vsel %vm14547_vm8, %v3116_v50, %v3117_v37  ;;  %v2523_v2 = vshrl.u32 %v11898_v40, 16  ;;  %v11904_v37 = vld [vmem:[%s14220_s28 + $0x84] sm:$0xf] }
  0xac   : > { %v2511_v5 = vsel %vm14264_vm5, %v2506_v8, %v2510_v32  ;;  %v11992_v57 = vcombine.low %v15081_v39, %v3118_v49  ;;  %v15106_v6 = vsel %vm14547_vm8, %v11977_v58, %v3121_v12  ;;  %v3123_v41 = vrot.slane %v3121_v12, 4  ;;  %13304 = vmatmul.mubr.msk.bf16.gmra.mxu1 %vm964_vm4, %v11989_v43  ;;  %v11905_v12 = vld [vmem:[%s14220_s28 + $0x88] sm:$0xf] }
  0xad   : > { %13262 = vmatmul.mubr.msk.bf16.vlgmr.msra.gmra.mxu0 %vm964_vm4, %v14918_v62  ;;  %v2521_v13 = vsel %vm14264_vm5, %v2516_v18, %v2520_v36  ;;  %v2525_v30 = vrot.slane %v2523_v2, 4  ;;  %v2526_v54 = vshll.u32 %v11898_v40, 16  ;;  %v2532_v35 = vshll.u32 %v11899_v15, 16  ;;  %13307 = vmatprep.mubr.msk.bf16.mxu1 %vm964_vm4, %v11990_v34 }
  0xae   : > { %13332 = vmatpush3.bf16.msra.mxu0 %v14856_v14  ;;  %13265 = vmatprep.mubr.msk.bf16.mxu0 %vm964_vm4, %v14962_v55  ;;  %v15126_v28 = vcombine.low %v2511_v5, %v2521_v13  ;;  %v15130_v62 = vsel %vm14547_vm8, %v3123_v41, %v3124_v19  ;;  %v2536_v17 = vshrl.u32 %v11899_v15, 16  ;;  %v2542_v47 = vshll.u32 %v15098_v53, 16  ;;  %v15157_v19 = vld [vmem:[%s14220_s28 + $0x8c] sm:$0x1] }
  0xaf   : > { %13333 = vmatprep.subr.bf16.mxu0 %v13835_v25  ;;  %v11993_v14 = vcombine.low %v15106_v6, %v15130_v62  ;;  %v2528_v55 = vrot.slane %v2526_v54, 5  ;;  %v2534_v43 = vrot.slane %v2532_v35, 5  ;;  %v2547_v63 = vshrl.u32 %v11901_v27, 16 }
  0xb0   : > { %v2538_v59 = vrot.slane %v2536_v17, 4  ;;  %v2544_v23 = vrot.slane %v2542_v47, 5  ;;  %v2550_v51 = vshll.u32 %v11901_v27, 16  ;;  %v2556_v44 = vshll.u32 %v15109_v7, 16  ;;  %v15186_v47 = vld [vmem:[%s14220_s28 + $0x98] sm:$0x1] }
  0xb1   : > { %v2529_v4 = vor.u32 %v2528_v55, %v2525_v30  ;;  %v2549_v60 = vrot.slane %v2547_v63, 4  ;;  %v2560_v10 = vshrl.u32 %v15109_v7, 16  ;;  %v2566_v3 = vshll.u32 %v15112_v31, 16  ;;  %v11908_v30 = vld [vmem:[%s14220_s28 + $0x94] sm:$0xf] }
  0xb2   : > { %13334 = vmatpush3.bf16.msra.mxu0 %v13835_v25  ;;  %v2539_v34 = vor.u32 %v2538_v59, %v2534_v43  ;;  %v2552_v45 = vrot.slane %v2550_v51, 5  ;;  %v2558_v32 = vrot.slane %v2556_v44, 5  ;;  %v11978_v11 = vrot.slane %v11962_v0, 9 }
  0xb3   : > { %v2530_v36 = vrot.slane %v2529_v4, 4  ;;  %v2562_v40 = vrot.slane %v2560_v10, 4  ;;  %v2568_v48 = vrot.slane %v2566_v3, 5  ;;  %v3128_v9 = vrot.slane %v11899_v15, 5  ;;  %v11965_v10 = vld [vmem:[%s14220_s28 + $0x90] sm:$0xe] }
  0xb4   : > { %v2540_v39 = vrot.slane %v2539_v34, 4  ;;  %v2553_v50 = vor.u32 %v2552_v45, %v2549_v60  ;;  %v3131_v26 = vrot.slane %v15098_v53, 5  ;;  %v11979_v16 = vrot.slane %v11963_v20, 9  ;;  %13308 = vmatmul.mubr.msk.bf16.gmra.mxu1 %vm964_vm4, %v11991_v61 }
  0xb5   : > { %13266 = vmatmul.mubr.msk.bf16.gmra.mxu0 %vm964_vm4, %v14979_v21  ;;  %v2535_v58 = vsel %vm14264_vm5, %v2530_v36, %v2534_v43  ;;  %v2563_v25 = vor.u32 %v2562_v40, %v2558_v32  ;;  %v3129_v56 = vsel %vm14547_vm8, %v11978_v11, %v3128_v9  ;;  %v3130_v8 = vrot.slane %v3128_v9, 4  ;;  %13311 = vmatprep.mubr.msk.bf16.mxu1 %vm964_vm4, %v11992_v57  ;;  %v11907_v57 = vld [vmem:[%s14220_s28 + $0x90] sm:$0xf] }
  0xb6   : > { %13269 = vmatprep.mubr.msk.bf16.mxu0 %vm964_vm4, %v15031_v24  ;;  %v2545_v21 = vsel %vm14264_vm5, %v2540_v39, %v2544_v23  ;;  %v2554_v38 = vrot.slane %v2553_v50, 4  ;;  %v3135_v46 = vrot.slane %v15109_v7, 5  ;;  %v3138_v61 = vrot.slane %v15112_v31, 5  ;;  %v11964_v23 = vld [vmem:[%s14220_s28 + $0x84] sm:$0xe] }
  0xb7   : > { %v15166_v15 = vcombine.low %v2535_v58, %v2545_v21  ;;  %v2564_v18 = vrot.slane %v2563_v25, 4  ;;  %v3132_v49 = vsel %vm14547_vm8, %v3130_v8, %v3131_v26  ;;  %v2571_v53 = vshrl.u32 %v11904_v37, 16 }
  0xb8   : > { %v2559_v24 = vsel %vm14264_vm5, %v2554_v38, %v2558_v32  ;;  %v11994_v2 = vcombine.low %v3129_v56, %v3132_v49  ;;  %v15174_v27 = vsel %vm14547_vm8, %v11979_v16, %v3135_v46  ;;  %v3137_v5 = vrot.slane %v3135_v46, 4 }
  0xb9   : > { %v2569_v41 = vsel %vm14264_vm5, %v2564_v18, %v2568_v48  ;;  %v2573_v7 = vrot.slane %v2571_v53, 4  ;;  %v2574_v31 = vshll.u32 %v11904_v37, 16  ;;  %v2580_v13 = vshll.u32 %v11905_v12, 16  ;;  %v11911_v18 = vld [vmem:[%s14220_s28 + $0xa0] sm:$0xf] }
  0xba   : > { %v15180_v54 = vcombine.low %v2559_v24, %v2569_v41  ;;  %v3139_v35 = vsel %vm14547_vm8, %v3137_v5, %v3138_v61  ;;  %v2584_v0 = vshrl.u32 %v11905_v12, 16  ;;  %v2590_v17 = vshll.u32 %v15157_v19, 16  ;;  %v15227_v41 = vld [vmem:[%s14220_s28 + $0xa4] sm:$0x1] }
  0xbb   : > { %v11995_v55 = vcombine.low %v15174_v27, %v3139_v35  ;;  %v2576_v43 = vrot.slane %v2574_v31, 5  ;;  %v2582_v63 = vrot.slane %v2580_v13, 5  ;;  %v2595_v59 = vshrl.u32 %v11907_v57, 16  ;;  %v11913_v31 = vld [vmem:[%s14220_s28 + $0xa8] sm:$0xf] }
  0xbc   : > { %v2586_v51 = vrot.slane %v2584_v0, 4  ;;  %v2592_v44 = vrot.slane %v2590_v17, 5  ;;  %v2598_v4 = vshll.u32 %v11907_v57, 16  ;;  %v2604_v60 = vshll.u32 %v11908_v30, 16  ;;  %13312 = vmatmul.mubr.msk.bf16.gmra.mxu1 %vm964_vm4, %v11993_v14  ;;  %v11914_v0 = vld [vmem:[%s14220_s28 + $0xac] sm:$0xf] }
  0xbd   : > { %13270 = vmatmul.mubr.msk.bf16.gmra.mxu0 %vm964_vm4, %v15057_v1  ;;  %v2577_v3 = vor.u32 %v2576_v43, %v2573_v7  ;;  %v2597_v20 = vrot.slane %v2595_v59, 4  ;;  %v2608_v34 = vshrl.u32 %v11908_v30, 16  ;;  %v2614_v45 = vshll.u32 %v15186_v47, 16  ;;  %13315 = vmatprep.mubr.msk.bf16.mxu1 %vm964_vm4, %v11994_v2  ;;  %v15239_v17 = vld [vmem:[%s14220_s28 + $0xb0] sm:$0x1] }
  0xbe   : > { %13273 = vmatprep.mubr.msk.bf16.mxu0 %vm964_vm4, %v15093_v42  ;;  %v2587_v32 = vor.u32 %v2586_v51, %v2582_v63  ;;  %v2600_v11 = vrot.slane %v2598_v4, 5  ;;  %v2606_v36 = vrot.slane %v2604_v60, 5  ;;  %v11980_v40 = vrot.slane %v11964_v23, 9  ;;  %v12768_v42 = vld [vmem:[%s19856_s3 + $0x78] sm:$0xff]  }
  0xbf   : > { %v2578_v1 = vrot.slane %v2577_v3, 4  ;;  %v2610_v48 = vrot.slane %v2608_v34, 4  ;;  %v2616_v6 = vrot.slane %v2614_v45, 5  ;;  %v3142_v62 = vrot.slane %v11905_v12, 5  ;;  %v11966_v4 = vld [vmem:[%s14220_s28 + $0x9c] sm:$0xe] }
  0xc0   : > { %v2588_v14 = vrot.slane %v2587_v32, 4  ;;  %v2601_v9 = vor.u32 %v2600_v11, %v2597_v20  ;;  %v3145_v39 = vrot.slane %v15157_v19, 5  ;;  %v11981_v50 = vrot.slane %v11965_v10, 9  ;;  %v11910_v19 = vld [vmem:[%s14220_s28 + $0x9c] sm:$0xf] }
  0xc1   : > { %v2583_v26 = vsel %vm14264_vm5, %v2578_v1, %v2582_v63  ;;  %v2611_v16 = vor.u32 %v2610_v48, %v2606_v36  ;;  %v3143_v37 = vsel %vm14547_vm8, %v11980_v40, %v3142_v62  ;;  %v3144_v58 = vrot.slane %v3142_v62, 4  ;;  %v11967_v34 = vld [vmem:[%s14220_s28 + $0xa8] sm:$0xe] }
  0xc2   : > { %v2593_v25 = vsel %vm14264_vm5, %v2588_v14, %v2592_v44  ;;  %v2602_v56 = vrot.slane %v2601_v9, 4  ;;  %v3149_v8 = vrot.slane %v11908_v30, 5  ;;  %v3152_v12 = vrot.slane %v15186_v47, 5 }
  0xc3   : > { %v11932_v21 = vcombine.low %v2583_v26, %v2593_v25  ;;  %v2612_v38 = vrot.slane %v2611_v16, 4  ;;  %v3146_v46 = vsel %vm14547_vm8, %v3144_v58, %v3145_v39  ;;  %v12760_v61 = vunpack.c.l.bf16 %v12768_v42 }
  0xc4   : > { %v2607_v49 = vsel %vm14264_vm5, %v2602_v56, %v2606_v36  ;;  %v11996_v53 = vcombine.low %v3143_v37, %v3146_v46  ;;  %v3150_v24 = vsel %vm14547_vm8, %v11981_v50, %v3149_v8  ;;  %v3151_v2 = vrot.slane %v3149_v8, 4  ;;  %13316 = vmatmul.mubr.msk.bf16.gmra.mxu1 %vm964_vm4, %v11995_v55  ;;  %v11916_v37 = vld [vmem:[%s14220_s28 + $0xb4] sm:$0xf] }
  0xc5   : > { %13274 = vmatmul.mubr.msk.bf16.gmra.mxu0 %vm964_vm4, %v15126_v28  ;;  %v2617_v27 = vsel %vm14264_vm5, %v2612_v38, %v2616_v6  ;;  %v12761_v5 = vunpack.c.h.bf16 %v12768_v42  ;;  %v439_v57 = vmul.f32 %v12760_v61, %v14233_v22  ;;  %v2619_v7 = vshrl.u32 %v11910_v19, 16 }
  0xc6   : > { %13277 = vmatprep.mubr.msk.bf16.mxu0 %vm964_vm4, %v15166_v15  ;;  %v15232_v13 = vcombine.low %v2607_v49, %v2617_v27  ;;  %13319 = vmatprep.mubr.msk.bf16.mxu1 %vm964_vm4, %v11996_v53  ;;  %v3153_v28 = vsel %vm14547_vm8, %v3151_v2, %v3152_v12  ;;  %v2622_v30 = vshll.u32 %v11910_v19, 16  ;;  %v2628_v35 = vshll.u32 %v11911_v18, 16  ;;  %v15244_v15 = vld [vmem:[%s19856_s3 + $0xb0] ss:$0 sps:$4 sm:$0x33]  }
  0xc7   : > { %v11997_v47 = vcombine.low %v3150_v24, %v3153_v28  ;;  %v472_v55 = vpack.c.bf16 %v12761_v5, %v439_v57  ;;  %v2621_v43 = vrot.slane %v2619_v7, 4  ;;  %v2632_v63 = vshrl.u32 %v11911_v18, 16  ;;  %v15266_v12 = vld [vmem:[%s14220_s28 + $0xbc] sm:$0x1]  ;;  %v15284_v7 = vld [vmem:[%s14220_s28 + $0xc4] sm:$0xf] }
  0xc8   : > { %v2624_v59 = vrot.slane %v2622_v30, 5  ;;  %v2630_v23 = vrot.slane %v2628_v35, 5  ;;  %v2638_v51 = vshll.u32 %v15227_v41, 16  ;;  %v2643_v44 = vshrl.u32 %v11913_v31, 16 }
  0xc9   : > { %13335 = vmatprep.subr.bf16.mxu0 %v472_v55  ;;  %v2634_v60 = vrot.slane %v2632_v63, 4  ;;  %v2646_v10 = vshll.u32 %v11913_v31, 16  ;;  %v2652_v3 = vshll.u32 %v11914_v0, 16  ;;  %v2656_v20 = vshrl.u32 %v11914_v0, 16 }
  0xca   : > { %13336 = vmatpush3.bf16.msra.mxu0 %v472_v55  ;;  %v2625_v45 = vor.u32 %v2624_v59, %v2621_v43  ;;  %v2640_v32 = vrot.slane %v2638_v51, 5  ;;  %v2645_v11 = vrot.slane %v2643_v44, 4  ;;  %v2662_v36 = vshll.u32 %v15239_v17, 16 }
  0xcb   : > { %v2635_v40 = vor.u32 %v2634_v60, %v2630_v23  ;;  %v2648_v1 = vrot.slane %v2646_v10, 5  ;;  %v2654_v48 = vrot.slane %v2652_v3, 5  ;;  %v2658_v6 = vrot.slane %v2656_v20, 4  ;;  %13777 = vmatprep.subr.msk.bf16.mxu0 %vm1013_vm0, %v15244_v15 }
  0xcc   : > { %v2626_v62 = vrot.slane %v2625_v45, 4  ;;  %v2664_v14 = vrot.slane %v2662_v36, 5  ;;  %v11982_v9 = vrot.slane %v11966_v4, 9  ;;  %v3156_v39 = vrot.slane %v11911_v18, 5  ;;  %13320 = vmatmul.mubr.msk.bf16.gmra.mxu1 %vm964_vm4, %v11997_v47  ;;  %v13837_v18 = vld [vmem:[%s19856_s3 + $0x94] sm:$0xff]  }
  0xcd   : > { %13278 = vmatmul.mubr.msk.bf16.gmra.mxu0 %vm964_vm4, %v15180_v54  ;;  %v2636_v50 = vrot.slane %v2635_v40, 4  ;;  %v2649_v42 = vor.u32 %v2648_v1, %v2645_v11  ;;  %v2659_v26 = vor.u32 %v2658_v6, %v2654_v48  ;;  %v3159_v16 = vrot.slane %v15227_v41, 5  ;;  %v15263_v54 = vld [vmem:[%s14220_s28 + $0xb8] sm:$0xf] }
  0xce   : > { %13281 = vmatprep.mubr.msk.bf16.mxu0 %vm964_vm4, %v11932_v21  ;;  %v2631_v58 = vsel %vm14264_vm5, %v2626_v62, %v2630_v23  ;;  %v3157_v25 = vsel %vm14547_vm8, %v11982_v9, %v3156_v39  ;;  %v3158_v56 = vrot.slane %v3156_v39, 4  ;;  %v11983_v8 = vrot.slane %v11967_v34, 9  ;;  %v11919_v21 = vld [vmem:[%s14220_s28 + $0xc0] sm:$0xf] }
  0xcf   : > { %v2641_v19 = vsel %vm14264_vm5, %v2636_v50, %v2640_v32  ;;  %v2650_v38 = vrot.slane %v2649_v42, 4  ;;  %v2660_v46 = vrot.slane %v2659_v26, 4  ;;  %v3163_v61 = vrot.slane %v11914_v0, 5  ;;  %v15287_v0 = vld [vmem:[%s14220_s28 + $0xc8] sm:$0x1]  ;;  %v343_v42 = vld [vmem:[%s19856_s3 + $0x8c] sm:$0xff]  }
  0xd0   : > { %v11934_v49 = vcombine.low %v2631_v58, %v2641_v19  ;;  %v3160_v53 = vsel %vm14547_vm8, %v3158_v56, %v3159_v16  ;;  %v3166_v24 = vrot.slane %v15239_v17, 5  ;;  %v2667_v2 = vshrl.u32 %v11916_v37, 16  ;;  %v11968_v17 = vld [vmem:[%s14220_s28 + $0xb4] sm:$0xe]  ;;  %v11969_v32 = vld [vmem:[%s14220_s28 + $0xc0] sm:$0xe] }
  0xd1   : > { %v2655_v27 = vsel %vm14264_vm5, %v2650_v38, %v2654_v48  ;;  %v2665_v5 = vsel %vm14264_vm5, %v2660_v46, %v2664_v14  ;;  %v11998_v57 = vcombine.low %v3157_v25, %v3160_v53  ;;  %v3164_v41 = vsel %vm14547_vm8, %v11983_v8, %v3163_v61  ;;  %v12082_v26 = vld [vmem:[%s14220_s28 + $0x18] sm:$0xf]  ;;  %v12083_v56 = vld [vmem:[%s14220_s28 + $0x1c] sm:$0xf] }
  0xd2   : > { %v11935_v31 = vcombine.low %v2655_v27, %v2665_v5  ;;  %v3165_v28 = vrot.slane %v3163_v61, 4  ;;  %v2669_v30 = vrot.slane %v2667_v2, 4  ;;  %v2670_v35 = vshll.u32 %v11916_v37, 16  ;;  %v12085_v27 = vld [vmem:[%s14220_s28 + $0x24] sm:$0xf] }
  0xd3   : > { %13323 = vmatprep.mubr.msk.bf16.mxu1 %vm964_vm4, %v11998_v57  ;;  %v2676_v47 = vshll.u32 %v15263_v54, 16  ;;  %v2680_v55 = vshrl.u32 %v15263_v54, 16  ;;  %v2686_v43 = vshll.u32 %v15266_v12, 16  ;;  %v4360_v63 = vsel %vm1013_vm0, %v14851_v33, 0 }
  0xd4   : > { %v3167_v59 = vsel %vm14547_vm8, %v3165_v28, %v3166_v24  ;;  %v2672_v23 = vrot.slane %v2670_v35, 5  ;;  %13370 = vmatpush3.bf16.msra.mxu1 %v4360_v63  ;;  %v2691_v51 = vshrl.u32 %v11919_v21, 16  ;;  %v2694_v44 = vshll.u32 %v11919_v21, 16 }
  0xd5   : > { %13282 = vmatmul.mubr.msk.bf16.gmra.mxu0 %vm964_vm4, %v15232_v13  ;;  %v11999_v4 = vcombine.low %v3164_v41, %v3167_v59  ;;  %v2678_v60 = vrot.slane %v2676_v47, 5  ;;  %v2682_v10 = vrot.slane %v2680_v55, 4  ;;  %v2688_v3 = vrot.slane %v2686_v43, 5  ;;  %13371 = vmatprep.subr.bf16.mxu1 %v13837_v18 }
  0xd6   : > { %13285 = vmatprep.mubr.msk.bf16.mxu0 %vm964_vm4, %v11934_v49  ;;  %v2673_v20 = vor.u32 %v2672_v23, %v2669_v30  ;;  %v2693_v33 = vrot.slane %v2691_v51, 4  ;;  %v2696_v34 = vrot.slane %v2694_v44, 5  ;;  %v2700_v45 = vshll.u32 %v15284_v7, 16 }
  0xd7   : > { %13324 = vmatmul.mubr.msk.bf16.gmra.mxu1 %vm964_vm4, %v11999_v4  ;;  %v2683_v11 = vor.u32 %v2682_v10, %v2678_v60  ;;  %v2704_v36 = vshrl.u32 %v15284_v7, 16  ;;  %v2710_v13 = vshll.u32 %v15287_v0, 16  ;;  %v11984_v40 = vrot.slane %v11968_v17, 9  ;;  %v15340_v17 = vld [vmem:[%s14220_s28 + $0x2c] sm:$0x1]  ;;  %v13838_v10 = vld [vmem:[%s14220_s28 + $0x18] sm:$0xff]  }
  0xd8   : > { %v2674_v1 = vrot.slane %v2673_v20, 4  ;;  %v2697_v48 = vor.u32 %v2696_v34, %v2693_v33  ;;  %v2702_v6 = vrot.slane %v2700_v45, 5  ;;  %v3170_v62 = vrot.slane %v15263_v54, 5  ;;  %13372 = vmatpush3.bf16.msra.mxu1 %v13837_v18  ;;  %v12084_v18 = vld [vmem:[%s14220_s28 + $0x20] sm:$0x1] }
  0xd9   : > { %v2684_v14 = vrot.slane %v2683_v11, 4  ;;  %v2706_v9 = vrot.slane %v2704_v36, 4  ;;  %v2712_v39 = vrot.slane %v2710_v13, 5  ;;  %v3173_v50 = vrot.slane %v15266_v12, 5  ;;  %v12088_v36 = vld [vmem:[%s14220_s28 + $0x30] sm:$0xf] }
  0xda   : > { %v2679_v16 = vsel %vm14264_vm5, %v2674_v1, %v2678_v60  ;;  %v2698_v37 = vrot.slane %v2697_v48, 4  ;;  %v3171_v58 = vsel %vm14547_vm8, %v11984_v40, %v3170_v62  ;;  %v3172_v25 = vrot.slane %v3170_v62, 4 }
  0xdb   : > { %v2689_v8 = vsel %vm14264_vm5, %v2684_v14, %v2688_v3  ;;  %v2707_v54 = vor.u32 %v2706_v9, %v2702_v6  ;;  %v11985_v12 = vrot.slane %v11969_v32, 9  ;;  %v3177_v19 = vrot.slane %v15284_v7, 5  ;;  %v15332_v7 = vld [vmem:[%s14220_s28 + $0x28] sm:$0xf] }
  0xdc   : > { %v11936_v38 = vcombine.low %v2679_v16, %v2689_v8  ;;  %v2703_v46 = vsel %vm14264_vm5, %v2698_v37, %v2702_v6  ;;  %v3174_v61 = vsel %vm14547_vm8, %v3172_v25, %v3173_v50  ;;  %v3180_v21 = vrot.slane %v15287_v0, 5 }
  0xdd   : > { %13286 = vmatmul.mubr.msk.bf16.gmra.mxu0 %vm964_vm4, %v11935_v31  ;;  %v2708_v49 = vrot.slane %v2707_v54, 4  ;;  %v12000_v53 = vcombine.low %v3171_v58, %v3174_v61  ;;  %v3178_v24 = vsel %vm14547_vm8, %v11985_v12, %v3177_v19  ;;  %v3179_v2 = vrot.slane %v3177_v19, 4  ;;  %v15363_v61 = vld [vmem:[%s14220_s28 + $0x38] sm:$0x1] }
  0xde   : > { %13289 = vmatprep.mubr.msk.bf16.mxu0 %vm964_vm4, %v11936_v38  ;;  %v388_v5 = vunpack.c.l.bf16 %v343_v42  ;;  %v389_v57 = vunpack.c.h.bf16 %v343_v42  ;;  %v3880_v41 = vshrl.u32 %v12082_v26, 16  ;;  %v13149_v30 = vpop.f32.mrf.mxu1  ;;  %v3883_v35 = vshll.u32 %v12082_v26, 16  ;;  %v15351_v42 = vld [vmem:[%s14220_s28 + $0x34] sm:$0xf] }
  0xdf   : > { %v2713_v28 = vsel %vm14264_vm5, %v2708_v49, %v2712_v39  ;;  %13327 = vmatprep.mubr.msk.bf16.mxu1 %vm964_vm4, %v12000_v53  ;;  %v3181_v31 = vsel %vm14547_vm8, %v3179_v2, %v3180_v21  ;;  %v3889_v0 = vshll.u32 %v12083_v56, 16  ;;  %v3893_v51 = vshrl.u32 %v12083_v56, 16 }
  0xe0   : > { %v11937_v47 = vcombine.low %v2703_v46, %v2713_v28  ;;  %v12001_v55 = vcombine.low %v3178_v24, %v3181_v31  ;;  %v444_v43 = vmul.f32 %v14233_v22, %v388_v5  ;;  %v3882_v63 = vrot.slane %v3880_v41, 4  ;;  %v1343_v4 = vpop.f32.mrf.mxu1 }
  0xe1   : > { %v3885_v59 = vrot.slane %v3883_v35, 5  ;;  %v3891_v23 = vrot.slane %v3889_v0, 5  ;;  %v3899_v44 = vshll.u32 %v12084_v18, 16  ;;  %v3904_v3 = vshrl.u32 %v12085_v27, 16  ;;  %v13840_v18 = vld [vmem:[%s14220_s28 + $0x24] sm:$0xff]  }
  0xe2   : > { %13328 = vmatmul.mubr.msk.bf16.gmra.mxu1 %vm964_vm4, %v12001_v55  ;;  %v475_v60 = vpack.c.bf16 %v389_v57, %v444_v43  ;;  %v3907_v20 = vshll.u32 %v12085_v27, 16  ;;  %v3913_v33 = vshll.u32 %v15332_v7, 16  ;;  %v3895_v45 = vrot.slane %v3893_v51, 4  ;;  %v13150_v11 = vpop.f32.mrf.mxu1  ;;  %v12091_v57 = vld [vmem:[%s14220_s28 + $0x3c] sm:$0xf] }
  0xe3   : > { %v3886_v34 = vor.u32 %v3885_v59, %v3882_v63  ;;  %v3917_v32 = vshrl.u32 %v15332_v7, 16  ;;  %v3906_v13 = vrot.slane %v3904_v3, 4  ;;  %v3923_v48 = vshll.u32 %v15340_v17, 16  ;;  %v15377_v0 = vld [vmem:[%s14220_s28 + $0x40] sm:$0xf] }
  0xe4   : > { %13373 = vmatprep.subr.bf16.mxu1 %v475_v60  ;;  %v3909_v40 = vrot.slane %v3907_v20, 5  ;;  %v3915_v1 = vrot.slane %v3913_v33, 5  ;;  %v13111_v6 = vpop.f32.mrf.mxu0  ;;  %v3896_v14 = vor.u32 %v3895_v45, %v3891_v23  ;;  %v3901_v9 = vrot.slane %v3899_v44, 5  ;;  %v1346_v50 = vpop.f32.mrf.mxu1  ;;  %v13845_v44 = vld [vmem:[%s19856_s3 + $0xa8] sm:$0xff]  }
  0xe5   : > { %13290 = vmatmul.mubr.msk.bf16.gmra.mxu0 %vm964_vm4, %v11937_v47  ;;  %13374 = vmatpush3.bf16.msra.mxu1 %v475_v60  ;;  %v3887_v62 = vrot.slane %v3886_v34, 4  ;;  %v3919_v39 = vrot.slane %v3917_v32, 4  ;;  %v15354_v26 = vadd.f32 %v13149_v30, %v13111_v6  ;;  %v4828_v16 = vsel %vm1013_vm0, %v15244_v15, 0  ;;  %v13841_v30 = vld [vmem:[%s14220_s28 + $0x30] sm:$0xff]  }
  0xe6   : > { %13337 = vmatprep.mubr.msk.bf16.mxu0 %vm964_vm4, %v13838_v10  ;;  %v3910_v37 = vor.u32 %v3909_v40, %v3906_v13  ;;  %v3925_v58 = vrot.slane %v3923_v48, 5  ;;  %v3897_v56 = vrot.slane %v3896_v14, 4  ;;  %v1051_v8 = vpop.f32.mrf.mxu0  ;;  %v13153_v12 = vpop.f32.mrf.mxu1  ;;  %v3928_v19 = vshrl.u32 %v12088_v36, 16 }
  0xe7   : > { %v3892_v25 = vsel %vm14264_vm5, %v3887_v62, %v3891_v23  ;;  %v3920_v54 = vor.u32 %v3919_v39, %v3915_v1  ;;  %v15360_v38 = vadd.f32 %v1343_v4, %v1051_v8  ;;  %v3931_v21 = vshll.u32 %v12088_v36, 16  ;;  %v15383_v23 = vld [vmem:[%s14220_s28 + $0x44] sm:$0x1] }
  0xe8   : > { %v3911_v46 = vrot.slane %v3910_v37, 4  ;;  %v3937_v15 = vshll.u32 %v15351_v42, 16  ;;  %v3902_v49 = vsel %vm14264_vm5, %v3897_v56, %v3901_v9  ;;  %v13112_v24 = vpop.f32.mrf.mxu0  ;;  %v3930_v2 = vrot.slane %v3928_v19, 4  ;;  %v1359_v5 = vpop.f32.mrf.mxu1  ;;  %v15399_v9 = vld [vmem:[%s14220_s28 + $0x4c] sm:$0xf] }
  0xe9   : > { %v3921_v53 = vrot.slane %v3920_v54, 4  ;;  %v3941_v27 = vshrl.u32 %v15351_v42, 16  ;;  %v12130_v41 = vcombine.low %v3892_v25, %v3902_v49  ;;  %v15373_v31 = vadd.f32 %v13150_v11, %v13112_v24  ;;  %v13842_v25 = vld [vmem:[%s14220_s28 + $0x3c] sm:$0xff]   ;;  %v15409_v19 = vld [vmem:[%s14220_s28 + $0x50] sm:$0x1]  ;;  %v13843_v49 = vld [vmem:[%s14220_s28 + $0x48] sm:$0xff]  }
  0xea   : > { %v3916_v28 = vsel %vm14264_vm5, %v3911_v46, %v3915_v1  ;;  %v3933_v35 = vrot.slane %v3931_v21, 5  ;;  %v1054_v55 = vpop.f32.mrf.mxu0  ;;  %v3939_v43 = vrot.slane %v3937_v15, 5  ;;  %v3947_v59 = vshll.u32 %v15363_v61, 16  ;;  %v13154_v51 = vpop.f32.mrf.mxu1  ;;  %v12094_v1 = vld [vmem:[%s14220_s28 + $0x48] sm:$0xf] }
  0xeb   : > { %v3926_v47 = vsel %vm14264_vm5, %v3921_v53, %v3925_v58  ;;  %v3943_v63 = vrot.slane %v3941_v27, 4  ;;  %13375 = vmatprep.mubr.msk.bf16.mxu1 %vm964_vm4, %v12130_v41  ;;  %v15389_v60 = vadd.f32 %v1346_v50, %v1054_v55  ;;  %v3952_v3 = vshrl.u32 %v12091_v57, 16 }
  0xec   : > { %v12131_v4 = vcombine.low %v3916_v28, %v3926_v47  ;;  %v3934_v10 = vor.u32 %v3933_v35, %v3930_v2  ;;  %v3949_v33 = vrot.slane %v3947_v59, 5  ;;  %v3955_v34 = vshll.u32 %v12091_v57, 16  ;;  %v1362_v32 = vpop.f32.mrf.mxu1  ;;  %v12097_v2 = vld [vmem:[%s14220_s28 + $0x54] sm:$0xf] }
  0xed   : > { %13338 = vmatmul.mubr.msk.bf16.vlgmr.msra.gmra.mxu0 %vm964_vm4, %v13840_v18  ;;  %v3944_v20 = vor.u32 %v3943_v63, %v3939_v43  ;;  %v3961_v45 = vshll.u32 %v15377_v0, 16  ;;  %v3954_v36 = vrot.slane %v3952_v3, 4  ;;  %v3965_v13 = vshrl.u32 %v15377_v0, 16 }
  0xee   : > { %13408 = vmatpush3.bf16.msra.mxu0 %v4828_v16  ;;  %13376 = vmatmul.mubr.msk.bf16.vlgmr.msra.gmra.mxu1 %vm964_vm4, %v12131_v4  ;;  %v3935_v11 = vrot.slane %v3934_v10, 4  ;;  %v3971_v40 = vshll.u32 %v15383_v23, 16  ;;  %v13115_v48 = vpop.f32.mrf.mxu0  ;;  %v3957_v62 = vrot.slane %v3955_v34, 5  ;;  %v3976_v46 = vshrl.u32 %v12094_v1, 16  ;;  %v15425_v10 = vld [vmem:[%s14220_s28 + $0x58] sm:$0xf] }
  0xef   : > { %13341 = vmatprep.mubr.msk.bf16.mxu0 %vm964_vm4, %v13841_v30  ;;  %v3945_v6 = vrot.slane %v3944_v20, 4  ;;  %v3963_v14 = vrot.slane %v3961_v45, 5  ;;  %13409 = vmatprep.subr.bf16.mxu0 %v13845_v44  ;;  %v15401_v39 = vadd.f32 %v13153_v12, %v13115_v48  ;;  %v3967_v16 = vrot.slane %v3965_v13, 4  ;;  %v13157_v58 = vpop.f32.mrf.mxu1  ;;  %v15433_v34 = vld [vmem:[%s14220_s28 + $0x5c] sm:$0x1] }
  0xf0   : > { %v3940_v50 = vsel %vm14264_vm5, %v3935_v11, %v3939_v43  ;;  %v3973_v37 = vrot.slane %v3971_v40, 5  ;;  %v1067_v8 = vpop.f32.mrf.mxu0  ;;  %v3958_v54 = vor.u32 %v3957_v62, %v3954_v36  ;;  %v3979_v21 = vshll.u32 %v12094_v1, 16 }
  0xf1   : > { %v3950_v56 = vsel %vm14264_vm5, %v3945_v6, %v3949_v33  ;;  %v15411_v12 = vadd.f32 %v1359_v5, %v1067_v8  ;;  %v3968_v18 = vor.u32 %v3967_v16, %v3963_v14  ;;  %v3985_v53 = vshll.u32 %v15399_v9, 16  ;;  %v1375_v24 = vpop.f32.mrf.mxu1  ;;  %v13844_v16 = vld [vmem:[%s14220_s28 + $0x54] sm:$0xff]  }
  0xf2   : > { %v12132_v15 = vcombine.low %v3940_v50, %v3950_v56  ;;  %13410 = vmatpush3.bf16.msra.mxu0 %v13845_v44  ;;  %v3959_v27 = vrot.slane %v3958_v54, 4  ;;  %v13116_v57 = vpop.f32.mrf.mxu0  ;;  %v3978_v41 = vrot.slane %v3976_v46, 4  ;;  %v3981_v28 = vrot.slane %v3979_v21, 5  ;;  %v12100_v50 = vld [vmem:[%s14220_s28 + $0x60] sm:$0xf] }
  0xf3   : > { %v3989_v30 = vshrl.u32 %v15399_v9, 16  ;;  %v3969_v35 = vrot.slane %v3968_v18, 4  ;;  %v15418_v5 = vadd.f32 %v13154_v51, %v13116_v57  ;;  %v3987_v47 = vrot.slane %v3985_v53, 5  ;;  %v13158_v43 = vpop.f32.mrf.mxu1  ;;  %v13846_v18 = vld [vmem:[%s14220_s28 + $0x60] sm:$0xff]   ;;  %v15454_v57 = vld [vmem:[%s14220_s28 + $0x68] sm:$0x1] }
  0xf4   : > { %13379 = vmatprep.mubr.msk.bf16.mxu1 %vm964_vm4, %v12132_v15  ;;  %v3995_v55 = vshll.u32 %v15409_v19, 16  ;;  %v3964_v63 = vsel %vm14264_vm5, %v3959_v27, %v3963_v14  ;;  %v1070_v59 = vpop.f32.mrf.mxu0  ;;  %v3982_v44 = vor.u32 %v3981_v28, %v3978_v41  ;;  %v4000_v3 = vshrl.u32 %v12097_v2, 16 }
  0xf5   : > { %13342 = vmatmul.mubr.msk.bf16.gmra.mxu0 %vm964_vm4, %v13842_v25  ;;  %v3991_v4 = vrot.slane %v3989_v30, 4  ;;  %v3974_v20 = vsel %vm14264_vm5, %v3969_v35, %v3973_v37  ;;  %v15429_v51 = vadd.f32 %v1362_v32, %v1070_v59  ;;  %v4003_v45 = vshll.u32 %v12097_v2, 16  ;;  %v1378_v11 = vpop.f32.mrf.mxu1 }
  0xf6   : > { %13345 = vmatprep.mubr.msk.bf16.mxu0 %vm964_vm4, %v13843_v49  ;;  %v3997_v33 = vrot.slane %v3995_v55, 5  ;;  %v12133_v36 = vcombine.low %v3964_v63, %v3974_v20  ;;  %v3983_v40 = vrot.slane %v3982_v44, 4  ;;  %v4002_v48 = vrot.slane %v4000_v3, 4  ;;  %v15449_v49 = vld [vmem:[%s14220_s28 + $0x64] sm:$0xf] }
  0xf7   : > { %v13119_v13 = vpop.f32.mrf.mxu0  ;;  %v3992_v1 = vor.u32 %v3991_v4, %v3987_v47  ;;  %v4005_v62 = vrot.slane %v4003_v45, 5  ;;  %v4009_v32 = vshll.u32 %v15425_v10, 16  ;;  %v4013_v14 = vshrl.u32 %v15425_v10, 16  ;;  %v12103_v63 = vld [vmem:[%s14220_s28 + $0x6c] sm:$0xf] }
  0xf8   : > { %v15435_v6 = vadd.f32 %v13157_v58, %v13119_v13  ;;  %13380 = vmatmul.mubr.msk.bf16.gmra.mxu1 %vm964_vm4, %v12133_v36  ;;  %v3988_v37 = vsel %vm14264_vm5, %v3983_v40, %v3987_v47  ;;  %v4019_v58 = vshll.u32 %v15433_v34, 16  ;;  %v13161_v8 = vpop.f32.mrf.mxu1  ;;  %v4024_v41 = vshrl.u32 %v12100_v50, 16 }
  0xf9   : > { %v3993_v25 = vrot.slane %v3992_v1, 4  ;;  %v1083_v56 = vpop.f32.mrf.mxu0  ;;  %v4006_v46 = vor.u32 %v4005_v62, %v4002_v48  ;;  %v4011_v21 = vrot.slane %v4009_v32, 5  ;;  %v4015_v15 = vrot.slane %v4013_v14, 4 }
  0xfa   : > { %v15445_v54 = vadd.f32 %v1375_v24, %v1083_v56  ;;  %v4021_v2 = vrot.slane %v4019_v58, 5  ;;  %v4027_v28 = vshll.u32 %v12100_v50, 16  ;;  %v1391_v30 = vpop.f32.mrf.mxu1  ;;  %v4026_v44 = vrot.slane %v4024_v41, 4 }
  0xfb   : > { %v3998_v53 = vsel %vm14264_vm5, %v3993_v25, %v3997_v33  ;;  %v13120_v27 = vpop.f32.mrf.mxu0  ;;  %v4007_v35 = vrot.slane %v4006_v46, 4  ;;  %v4016_v47 = vor.u32 %v4015_v15, %v4011_v21  ;;  %v4033_v3 = vshll.u32 %v15449_v49, 16  ;;  %v15463_v33 = vld [vmem:[%s14220_s28 + $0x70] sm:$0xf] }
  0xfc   : > { %v12134_v24 = vcombine.low %v3988_v37, %v3998_v53  ;;  %v15456_v55 = vadd.f32 %v13158_v43, %v13120_v27  ;;  %v4029_v4 = vrot.slane %v4027_v28, 5  ;;  %v4037_v20 = vshrl.u32 %v15449_v49, 16  ;;  %v13162_v45 = vpop.f32.mrf.mxu1  ;;  %v15475_v37 = vld [vmem:[%s14220_s28 + $0x74] sm:$0x1]  ;;  %v13847_v46 = vld [vmem:[%s14220_s28 + $0x6c] sm:$0xff]  }
  0xfd   : > { %13346 = vmatmul.mubr.msk.bf16.gmra.mxu0 %vm964_vm4, %v13844_v16  ;;  %v1086_v59 = vpop.f32.mrf.mxu0  ;;  %v4012_v43 = vsel %vm14264_vm5, %v4007_v35, %v4011_v21  ;;  %v4017_v36 = vrot.slane %v4016_v47, 4  ;;  %v4043_v40 = vshll.u32 %v15454_v57, 16  ;;  %v4035_v48 = vrot.slane %v4033_v3, 5  ;;  %v12106_v53 = vld [vmem:[%s14220_s28 + $0x78] sm:$0xf] }
  0xfe   : > { %13383 = vmatprep.mubr.msk.bf16.mxu1 %vm964_vm4, %v12134_v24  ;;  %v15468_v13 = vadd.f32 %v1378_v11, %v1086_v59  ;;  %13349 = vmatprep.mubr.msk.bf16.mxu0 %vm964_vm4, %v13846_v18  ;;  %v4030_v1 = vor.u32 %v4029_v4, %v4026_v44  ;;  %v4039_v62 = vrot.slane %v4037_v20, 4  ;;  %v4048_v32 = vshrl.u32 %v12103_v63, 16  ;;  %v1394_v14 = vpop.f32.mrf.mxu1  ;;  %v13848_v24 = vld [vmem:[%s14220_s28 + $0x78] sm:$0xff]  }
  0xff   : > { %v4022_v50 = vsel %vm14264_vm5, %v4017_v36, %v4021_v2  ;;  %v4045_v16 = vrot.slane %v4043_v40, 5  ;;  %v4051_v11 = vshll.u32 %v12103_v63, 16  ;;  %v4057_v25 = vshll.u32 %v15463_v33, 16  ;;  %v15485_v35 = vld [vmem:[%s14220_s28 + $0x7c] sm:$0xf] }
 0x100   : > { %v12135_v56 = vcombine.low %v4012_v43, %v4022_v50  ;;  %v13123_v58 = vpop.f32.mrf.mxu0  ;;  %v4031_v21 = vrot.slane %v4030_v1, 4  ;;  %v4040_v15 = vor.u32 %v4039_v62, %v4035_v48  ;;  %v4050_v18 = vrot.slane %v4048_v32, 4 }
 0x101   : > { %v15480_v27 = vadd.f32 %v13161_v8, %v13123_v58  ;;  %v4053_v41 = vrot.slane %v4051_v11, 5  ;;  %v4059_v28 = vrot.slane %v4057_v25, 5  ;;  %v4061_v2 = vshrl.u32 %v15463_v33, 16  ;;  %v12109_v58 = vld [vmem:[%s14220_s28 + $0x84] sm:$0xf] }
 0x102   : > { %13384 = vmatmul.mubr.msk.bf16.gmra.mxu1 %vm964_vm4, %v12135_v56  ;;  %v4036_v47 = vsel %vm14264_vm5, %v4031_v21, %v4035_v48  ;;  %v4041_v63 = vrot.slane %v4040_v15, 4  ;;  %v1099_v59 = vpop.f32.mrf.mxu0  ;;  %v4067_v44 = vshll.u32 %v15475_v37, 16  ;;  %v13165_v4 = vpop.f32.mrf.mxu1  ;;  %v4072_v43 = vshrl.u32 %v12106_v53, 16  ;;  %v15497_v48 = vld [vmem:[%s14220_s28 + $0x80] sm:$0x1] }
 0x103   : > { %v15491_v8 = vadd.f32 %v1391_v30, %v1099_v59  ;;  %v4054_v3 = vor.u32 %v4053_v41, %v4050_v18  ;;  %v4063_v20 = vrot.slane %v4061_v2, 4  ;;  %v4075_v62 = vshll.u32 %v12106_v53, 16  ;;  %v15506_v53 = vld [vmem:[%s14220_s28 + $0x88] sm:$0xf] }
 0x104   : > { %v4046_v36 = vsel %vm14264_vm5, %v4041_v63, %v4045_v16  ;;  %v4069_v40 = vrot.slane %v4067_v44, 5  ;;  %v13124_v1 = vpop.f32.mrf.mxu0  ;;  %v4081_v32 = vshll.u32 %v15485_v35, 16  ;;  %v1407_v50 = vpop.f32.mrf.mxu1  ;;  %v4074_v16 = vrot.slane %v4072_v43, 4  ;;  %v13849_v59 = vld [vmem:[%s14220_s28 + $0x84] sm:$0xff]  }
 0x105   : > { %19901 = vst [vmem:[#allocation6_spill] sm:$0xff] %v15491_v8  ;;  %13350 = vmatmul.mubr.msk.bf16.gmra.mxu0 %vm964_vm4, %v13847_v46  ;;  %v12136_v30 = vcombine.low %v4036_v47, %v4046_v36  ;;  %v4055_v11 = vrot.slane %v4054_v3, 4  ;;  %v4064_v25 = vor.u32 %v4063_v20, %v4059_v28  ;;  %v15500_v56 = vadd.f32 %v13162_v45, %v13124_v1  ;;  %v13850_v1 = vld [vmem:[%s14220_s28 + $0x90] sm:$0xff]  }
 0x106   : > { %13353 = vmatprep.mubr.msk.bf16.mxu0 %vm964_vm4, %v13848_v24  ;;  %v1102_v46 = vpop.f32.mrf.mxu0  ;;  %v4077_v21 = vrot.slane %v4075_v62, 5  ;;  %v4083_v15 = vrot.slane %v4081_v32, 5  ;;  %v4085_v18 = vshrl.u32 %v15485_v35, 16  ;;  %v13166_v41 = vpop.f32.mrf.mxu1  ;;  %v4091_v47 = vshll.u32 %v15497_v48, 16 }
 0x107   : > { %19902 = vst [vmem:[#allocation7_spill] sm:$0xff] %v15500_v56  ;;  %13387 = vmatprep.mubr.msk.bf16.mxu1 %vm964_vm4, %v12136_v30  ;;  %v4060_v45 = vsel %vm14264_vm5, %v4055_v11, %v4059_v28  ;;  %v4065_v2 = vrot.slane %v4064_v25, 4  ;;  %v15511_v24 = vadd.f32 %v1394_v14, %v1102_v46  ;;  %v4096_v20 = vshrl.u32 %v12109_v58, 16  ;;  %v15523_v14 = vld [vmem:[%s14220_s28 + $0x8c] sm:$0x1] }
 0x108   : > { %v13127_v63 = vpop.f32.mrf.mxu0  ;;  %v4078_v44 = vor.u32 %v4077_v21, %v4074_v16  ;;  %v4087_v3 = vrot.slane %v4085_v18, 4  ;;  %v4099_v43 = vshll.u32 %v12109_v58, 16  ;;  %v15515_v36 = vpop.f32.mrf.mxu1  ;;  %v4093_v32 = vrot.slane %v4091_v47, 5  ;;  %v12112_v11 = vld [vmem:[%s14220_s28 + $0x90] sm:$0xf] }
 0x109   : > { %19903 = vst [vmem:[#allocation8_spill] sm:$0xff] %v15511_v24  ;;  %19904 = vst [vmem:[#allocation9_spill] sm:$0xff] %v15515_v36  ;;  %v4070_v62 = vsel %vm14264_vm5, %v4065_v2, %v4069_v40  ;;  %v15520_v28 = vadd.f32 %v13165_v4, %v13127_v63  ;;  %v4105_v30 = vshll.u32 %v15506_v53, 16  ;;  %v4098_v58 = vrot.slane %v4096_v20, 4  ;;  %v15531_v2 = vld [vmem:[%s14220_s28 + $0x94] sm:$0xf] }
 0x10a   : > { %v12137_v25 = vcombine.low %v4060_v45, %v4070_v62  ;;  %v4079_v46 = vrot.slane %v4078_v44, 4  ;;  %v4088_v16 = vor.u32 %v4087_v3, %v4083_v15  ;;  %v1115_v21 = vpop.f32.mrf.mxu0  ;;  %v13169_v18 = vpop.f32.mrf.mxu1  ;;  %v4101_v24 = vrot.slane %v4099_v43, 5  ;;  %19907 = vst [vmem:[#allocation12_spill] sm:$0xff] %v15531_v2 }
 0x10b   : > { %19905 = vst [vmem:[#allocation10_spill] sm:$0xff] %v15520_v28  ;;  %v15527_v36 = vadd.f32 %v1407_v50, %v1115_v21  ;;  %v4107_v40 = vrot.slane %v4105_v30, 5  ;;  %v4109_v4 = vshrl.u32 %v15506_v53, 16  ;;  %v4115_v63 = vshll.u32 %v15523_v14, 16  ;;  %v15542_v30 = vld [vmem:[%s14220_s28 + $0x98] sm:$0x1] }
 0x10c   : > { %13388 = vmatmul.mubr.msk.bf16.gmra.mxu1 %vm964_vm4, %v12137_v25  ;;  %v4084_v45 = vsel %vm14264_vm5, %v4079_v46, %v4083_v15  ;;  %v4089_v47 = vrot.slane %v4088_v16, 4  ;;  %v13128_v50 = vpop.f32.mrf.mxu0  ;;  %v4120_v44 = vshrl.u32 %v12112_v11, 16  ;;  %v1423_v3 = vpop.f32.mrf.mxu1  ;;  %v4102_v20 = vor.u32 %v4101_v24, %v4098_v58  ;;  %19909 = vst [vmem:[#allocation14_spill] sm:$0xff] %v15542_v30  ;;  %v12115_v21 = vld [vmem:[%s14220_s28 + $0x9c] sm:$0xf] }
 0x10d   : > { %19906 = vst [vmem:[#allocation11_spill] sm:$0xff] %v15527_v36  ;;  %13354 = vmatmul.mubr.msk.bf16.gmra.mxu0 %vm964_vm4, %v13849_v59  ;;  %v4111_v43 = vrot.slane %v4109_v4, 4  ;;  %v15538_v62 = vadd.f32 %v13166_v41, %v13128_v50  ;;  %v4123_v59 = vshll.u32 %v12112_v11, 16  ;;  %v4129_v16 = vshll.u32 %v15531_v2, 16 }
 0x10e   : > { %13357 = vmatprep.mubr.msk.bf16.mxu0 %vm964_vm4, %v13850_v1  ;;  %v4094_v15 = vsel %vm14264_vm5, %v4089_v47, %v4093_v32  ;;  %v15546_v25 = vpop.f32.mrf.mxu0  ;;  %v4122_v46 = vrot.slane %v4120_v44, 4  ;;  %v13170_v24 = vpop.f32.mrf.mxu1  ;;  %v4103_v4 = vrot.slane %v4102_v20, 4  ;;  %v4117_v50 = vrot.slane %v4115_v63, 5  ;;  %v13851_v1 = vld [vmem:[%s14220_s28 + $0x9c] sm:$0xff]  }
 0x10f   : > { %19908 = vst [vmem:[#allocation13_spill] sm:$0xff] %v15538_v62  ;;  %19910 = vst [vmem:[#allocation15_spill] sm:$0xff] %v15546_v25  ;;  %v12138_v58 = vcombine.low %v4084_v45, %v4094_v15  ;;  %v4112_v41 = vor.u32 %v4111_v43, %v4107_v40  ;;  %v15551_v62 = vld [vmem:[%s14220_s28 + $0xa0] sm:$0xf]  ;;  %v4125_v11 = vrot.slane %v4123_v59, 5  ;;  %v4131_v36 = vrot.slane %v4129_v16, 5 }
 0x110   : > { %v4133_v32 = vshrl.u32 %v15531_v2, 16  ;;  %v4139_v47 = vshll.u32 %v15542_v30, 16  ;;  %v15556_v44 = vpop.f32.mrf.mxu1  ;;  %v4108_v45 = vsel %vm14264_vm5, %v4103_v4, %v4107_v40  ;;  %v4144_v43 = vshrl.u32 %v12115_v21, 16  ;;  %v13852_v15 = vld [vmem:[%s14220_s28 + $0xa8] sm:$0xff]   ;;  %v15563_v16 = vld [vmem:[%s14220_s28 + $0xa4] sm:$0x1] }
 0x111   : > { %19911 = vst [vmem:[#allocation16_spill] sm:$0xff] %v15556_v44  ;;  %13391 = vmatprep.mubr.msk.bf16.mxu1 %vm964_vm4, %v12138_v58  ;;  %v4113_v20 = vrot.slane %v4112_v41, 4  ;;  %v4147_v63 = vshll.u32 %v12115_v21, 16  ;;  %v4126_v28 = vor.u32 %v4125_v11, %v4122_v46  ;;  %19912 = vst [vmem:[#allocation17_spill] sm:$0xff] %v15563_v16  ;;  %v4153_v8 = vshll.u32 %v15551_v62, 16  ;;  %v12769_v21 = vld [vmem:[%s19856_s3 + $0xa0] sm:$0xff]  }
 0x112   : > { %v13131_v25 = vpop.f32.mrf.mxu0  ;;  %v4135_v56 = vrot.slane %v4133_v32, 4  ;;  %v4141_v59 = vrot.slane %v4139_v47, 5  ;;  %v4146_v58 = vrot.slane %v4144_v43, 4  ;;  %vm6124_vm10 = vcmask 253952  }
 0x113   : > { %v4118_v44 = vsel %vm14264_vm5, %v4113_v20, %v4117_v50  ;;  %v15568_v30 = vadd.f32 %v13169_v18, %v13131_v25  ;;  %v4149_v40 = vrot.slane %v4147_v63, 5  ;;  %v4127_v46 = vrot.slane %v4126_v28, 4  ;;  %v12118_v20 = vld [vmem:[%s14220_s28 + $0xa8] sm:$0xf] }
 0x114   : > { %v12139_v4 = vcombine.low %v4108_v45, %v4118_v44  ;;  %v4136_v41 = vor.u32 %v4135_v56, %v4131_v36  ;;  %v1131_v11 = vpop.f32.mrf.mxu0  ;;  %v15574_v32 = vrot.slane %v4153_v8, 5  ;;  %v13173_v47 = vpop.f32.mrf.mxu1  ;;  %v4157_v25 = vshrl.u32 %v15551_v62, 16 }
 0x115   : > { %19913 = vst [vmem:[#allocation18_spill] sm:$0xff] %v15568_v30  ;;  %13358 = vmatmul.mubr.msk.bf16.gmra.mxu0 %vm964_vm4, %v13851_v1  ;;  %v15576_v2 = vadd.f32 %v1423_v3, %v1131_v11  ;;  %v4150_v18 = vor.u32 %v4149_v40, %v4146_v58  ;;  %v4163_v50 = vshll.u32 %v15563_v16, 16  ;;  %v4132_v8 = vsel %vm14264_vm5, %v4127_v46, %v4131_v36  ;;  %v15589_v58 = vld [vmem:[%s14220_s28 + $0xac] sm:$0xf]  ;;  %v15598_v46 = vld [vmem:[%s14220_s28 + $0xb0] sm:$0x1] }
 0x116   : > { %13361 = vmatprep.mubr.msk.bf16.mxu0 %vm964_vm4, %v13852_v15  ;;  %13392 = vmatmul.mubr.msk.bf16.gmra.mxu1 %vm964_vm4, %v12139_v4  ;;  %v4137_v56 = vrot.slane %v4136_v41, 4  ;;  %v12764_v28 = vunpack.c.l.bf16 %v12769_v21  ;;  %v12765_v3 = vunpack.c.h.bf16 %v12769_v21  ;;  %v13132_v1 = vpop.f32.mrf.mxu0  ;;  %v1439_v44 = vpop.f32.mrf.mxu1  ;;  %v4159_v63 = vrot.slane %v4157_v25, 4  ;;  %19916 = vst [vmem:[#allocation21_spill] sm:$0xff] %v15589_v58  ;;  %v13853_v21 = vld [vmem:[%s14220_s28 + $0xb4] sm:$0xff]   ;;  %19918 = vst [vmem:[#allocation23_spill] sm:$0xff] %v15598_v46 }
 0x117   : > { %19914 = vst [vmem:[#allocation19_spill] sm:$0xff] %v15576_v2  ;;  %v4151_v43 = vrot.slane %v4150_v18, 4  ;;  %v15586_v15 = vadd.f32 %v13170_v24, %v13132_v1  ;;  %v4168_v41 = vshrl.u32 %v12118_v20, 16  ;;  %v4171_v11 = vshll.u32 %v12118_v20, 16 }
 0x118   : > { %v4142_v40 = vsel %vm14264_vm5, %v4137_v56, %v4141_v59  ;;  %v449_v36 = vmul.f32 %v12764_v28, %v14233_v22  ;;  %v15594_v4 = vpop.f32.mrf.mxu0  ;;  %v13174_v18 = vpop.f32.mrf.mxu1  ;;  %v4160_v25 = vor.u32 %v4159_v63, %v15574_v32  ;;  %v4165_v1 = vrot.slane %v4163_v50, 5  ;;  %v12121_v59 = vld [vmem:[%s14220_s28 + $0xb4] sm:$0xf]  ;;  %v13854_v56 = vld [vmem:[%s14220_s28 + $0xc0] sm:$0xff]   ;;  %v15615_v50 = vld [vmem:[%s14220_s28 + $0xb8] sm:$0xf] }
 0x119   : > { %19915 = vst [vmem:[#allocation20_spill] sm:$0xff] %v15586_v15  ;;  %19917 = vst [vmem:[#allocation22_spill] sm:$0xff] %v15594_v4  ;;  %v12140_v45 = vcombine.low %v4132_v8, %v4142_v40  ;;  %v4156_v24 = vsel %vm14264_vm5, %v4151_v43, %v15574_v32  ;;  %v4170_v4 = vrot.slane %v4168_v41, 4  ;;  %v4173_v15 = vrot.slane %v4171_v11, 5  ;;  %v15619_v41 = vld [vmem:[%s14220_s28 + $0xbc] sm:$0x1] }
 0x11a   : > { %v478_v22 = vpack.c.bf16 %v12765_v3, %v449_v36  ;;  %v4177_v2 = vshll.u32 %v15589_v58, 16  ;;  %v15607_v20 = vpop.f32.mrf.mxu1  ;;  %v4161_v8 = vrot.slane %v4160_v25, 4  ;;  %v4181_v43 = vshrl.u32 %v15589_v58, 16  ;;  %19921 = vst [vmem:[#allocation26_spill] sm:$0xff] %v15615_v50  ;;  %19922 = vst [vmem:[#allocation27_spill] sm:$0xff] %v15619_v41 }
 0x11b   : > { %v13135_v28 = vpop.f32.mrf.mxu0  ;;  %19919 = vst [vmem:[#allocation24_spill] sm:$0xff] %v15607_v20  ;;  %13395 = vmatprep.mubr.msk.bf16.mxu1 %vm964_vm4, %v12140_v45  ;;  %v4187_v32 = vshll.u32 %v15598_v46, 16  ;;  %v4174_v3 = vor.u32 %v4173_v15, %v4170_v4  ;;  %v4192_v11 = vshrl.u32 %v12121_v59, 16  ;;  %v4195_v45 = vshll.u32 %v12121_v59, 16 }
 0x11c   : > { %v15610_v40 = vadd.f32 %v13173_v47, %v13135_v28  ;;  %13411 = vmatprep.subr.bf16.mxu0 %v478_v22  ;;  %v4179_v63 = vrot.slane %v4177_v2, 5  ;;  %v13177_v25 = vpop.f32.mrf.mxu1  ;;  %v4166_v47 = vsel %vm14264_vm5, %v4161_v8, %v4165_v1  ;;  %v4183_v28 = vrot.slane %v4181_v43, 4  ;;  %v13855_v8 = vld [vmem:[%s14220_s28 + $0xcc] sm:$0xff]  }
 0x11d   : > { %13362 = vmatmul.mubr.msk.bf16.gmra.mxu0 %vm964_vm4, %v13853_v21  ;;  %v1147_v36 = vpop.f32.mrf.mxu0  ;;  %v4189_v20 = vrot.slane %v4187_v32, 5  ;;  %v12124_v21 = vld [vmem:[%s14220_s28 + $0xc0] sm:$0xf]  ;;  %v12141_v15 = vcombine.low %v4156_v24, %v4166_v47  ;;  %v4175_v2 = vrot.slane %v4174_v3, 4  ;;  %v4194_v4 = vrot.slane %v4192_v11, 4 }
 0x11e   : > { %19920 = vst [vmem:[#allocation25_spill] sm:$0xff] %v15610_v40  ;;  %13412 = vmatpush3.bf16.msra.mxu0 %v478_v22  ;;  %v15623_v40 = vadd.f32 %v1439_v44, %v1147_v36  ;;  %13365 = vmatprep.mubr.msk.bf16.mxu0 %vm964_vm4, %v13854_v56  ;;  %v4197_v30 = vrot.slane %v4195_v45, 5  ;;  %v1455_v46 = vpop.f32.mrf.mxu1  ;;  %v4184_v16 = vor.u32 %v4183_v28, %v4179_v63  ;;  %v4201_v1 = vshll.u32 %v15615_v50, 16  ;;  %v15638_v3 = vld [vmem:[%s14220_s28 + $0xc4] sm:$0xf] }
 0x11f   : > { %v13136_v59 = vpop.f32.mrf.mxu0  ;;  %v4205_v22 = vshrl.u32 %v15615_v50, 16  ;;  %v4211_v44 = vshll.u32 %v15619_v41, 16  ;;  %13396 = vmatmul.mubr.msk.bf16.gmra.mxu1 %vm964_vm4, %v12141_v15  ;;  %19926 = vst [vmem:[#allocation31_spill] sm:$0xff] %v15638_v3  ;;  %v15641_v36 = vld [vmem:[%s14220_s28 + $0xc8] sm:$0x1]  ;;  %v4216_v11 = vshrl.u32 %v12124_v21, 16  ;;  %v4180_v47 = vsel %vm14264_vm5, %v4175_v2, %v4179_v63 }
 0x120   : > { %19923 = vst [vmem:[#allocation28_spill] sm:$0xff] %v15623_v40  ;;  %v4198_v24 = vor.u32 %v4197_v30, %v4194_v4  ;;  %v15633_v43 = vadd.f32 %v13174_v18, %v13136_v59  ;;  %19927 = vst [vmem:[#allocation32_spill] sm:$0xff] %v15641_v36  ;;  %v15643_v45 = vpop.f32.mrf.mxu1  ;;  %v4185_v28 = vrot.slane %v4184_v16, 4  ;;  %v4203_v56 = vrot.slane %v4201_v1, 5  ;;  %v15679_v41 = vld [vmem:[%s14220_s28 + $0xd4] sm:$0x1] }
 0x121   : > { %v15635_v32 = vpop.f32.mrf.mxu0  ;;  %v4207_v15 = vrot.slane %v4205_v22, 4  ;;  %v4213_v18 = vrot.slane %v4211_v44, 5  ;;  %v4218_v4 = vrot.slane %v4216_v11, 4  ;;  %v4219_v59 = vshll.u32 %v12124_v21, 16  ;;  %v12127_v22 = vld [vmem:[%s14220_s28 + $0xcc] sm:$0xf] }
 0x122   : > { %19924 = vst [vmem:[#allocation29_spill] sm:$0xff] %v15633_v43  ;;  %19925 = vst [vmem:[#allocation30_spill] sm:$0xff] %v15635_v32  ;;  %v4199_v30 = vrot.slane %v4198_v24, 4  ;;  %v15648_v32 = vpop.f32.mrf.mxu1  ;;  %v4190_v16 = vsel %vm14264_vm5, %v4185_v28, %v4189_v20  ;;  %v4225_v2 = vshll.u32 %v15638_v3, 16  ;;  %v4229_v1 = vshrl.u32 %v15638_v3, 16  ;;  %v5417_v21 = vld [vmem:[%s15655_s23] sm:$0xff] }
 0x123   : > { %19928 = vst [vmem:[#allocation33_spill] sm:$0xff] %v15648_v32  ;;  %v4208_v63 = vor.u32 %v4207_v15, %v4203_v56  ;;  %v12142_v44 = vcombine.low %v4180_v47, %v4190_v16  ;;  %v4221_v32 = vrot.slane %v4219_v59, 5  ;;  %v4235_v20 = vshll.u32 %v15641_v36, 16  ;;  %v15668_v28 = vld [vmem:[%s14220_s28 + $0xd0] sm:$0xf]  ;;  %5481 = vrot.lane.b32.xlu0 %v5417_v21, %s14126_s24 }
 0x124   : > { %v4204_v24 = vsel %vm14264_vm5, %v4199_v30, %v4203_v56  ;;  %v15670_v15 = vpop.f32.mrf.mxu1  ;;  %v4227_v47 = vrot.slane %v4225_v2, 5  ;;  %v4231_v16 = vrot.slane %v4229_v1, 4  ;;  %v5418_v56 = vld [vmem:[%s15655_s23 + $0x8] sm:$0xff]  ;;  %v5419_v30 = vld [vmem:[%s15655_s23 + $0x10] sm:$0xff]  ;;  %v4240_v3 = vshrl.u32 %v12127_v22, 16 }
 0x125   : > { %v13139_v11 = vpop.f32.mrf.mxu0  ;;  %13366 = vmatmul.mubr.msk.bf16.gmra.mxu0 %vm964_vm4, %v13855_v8  ;;  %v4209_v43 = vrot.slane %v4208_v63, 4  ;;  %13399 = vmatprep.mubr.msk.bf16.mxu1 %vm964_vm4, %v12142_v44  ;;  %v4222_v8 = vor.u32 %v4221_v32, %v4218_v4  ;;  %v4237_v59 = vrot.slane %v4235_v20, 5  ;;  %v4243_v50 = vshll.u32 %v12127_v22, 16  ;;  %v12162_v4 = vld [vmem:[%s14220_s28 + $0x18] sm:$0xe] }
 0x126   : > { %v15673_v40 = vadd.f32 %v13177_v25, %v13139_v11  ;;  %v15681_v58 = vpop.f32.mrf.mxu1  ;;  %5483 = vrot.lane.b32.xlu1 %v5418_v56, %s14126_s24  ;;  %v4232_v63 = vor.u32 %v4231_v16, %v4227_v47  ;;  %v4249_v32 = vshll.u32 %v15668_v28, 16  ;;  %v4242_v44 = vrot.slane %v4240_v3, 4  ;;  %v5421_v16 = vld [vmem:[%s15655_s23 + $0x20] sm:$0xff] }
 0x127   : > { %v1163_v36 = vpop.f32.mrf.mxu0  ;;  %v4214_v25 = vsel %vm14264_vm5, %v4209_v43, %v4213_v18  ;;  %v4223_v21 = vrot.slane %v4222_v8, 4  ;;  %v4245_v11 = vrot.slane %v4243_v50, 5  ;;  %5485 = vrot.lane.b32.xlu0 %v5419_v30, %s14126_s24  ;;  %v4253_v18 = vshrl.u32 %v15668_v28, 16 }
 0x128   : > { %19929 = vst [vmem:[#allocation34_spill] sm:$0xff] %v15673_v40  ;;  %v15686_v2 = vadd.f32 %v1455_v46, %v1163_v36  ;;  %v12143_v1 = vcombine.low %v4204_v24, %v4214_v25  ;;  %v15690_v20 = vpop.f32.mrf.mxu1  ;;  %v4233_v56 = vrot.slane %v4232_v63, 4  ;;  %v4251_v43 = vrot.slane %v4249_v32, 5  ;;  %v5420_v36 = vld [vmem:[%s15655_s23 + $0x18] sm:$0xff]  ;;  %v12163_v25 = vld [vmem:[%s14220_s28 + $0x24] sm:$0xe] }
 0x129   : > { %v13140_v22 = vpop.f32.mrf.mxu0  ;;  %v4259_v46 = vshll.u32 %v15679_v41, 16  ;;  %v4228_v50 = vsel %vm14264_vm5, %v4223_v21, %v4227_v47  ;;  %v4246_v3 = vor.u32 %v4245_v11, %v4242_v44  ;;  %v12178_v8 = vrot.slane %v12162_v4, 9  ;;  %v12164_v21 = vld [vmem:[%s14220_s28 + $0x30] sm:$0xe]  ;;  %v14114_v11 = vld [vmem:[%s14220_s28 + $0x1c] sm:$0xf] }
 0x12a   : > { %19930 = vst [vmem:[#allocation35_spill] sm:$0xff] %v15686_v2  ;;  %13400 = vmatmul.mubr.msk.bf16.gmra.mxu1 %vm964_vm4, %v12143_v1  ;;  %v15701_v24 = vadd.f32 %v15643_v45, %v13140_v22  ;;  %v15706_v63 = vpop.f32.mrf.mxu1  ;;  %5487 = vrot.lane.b32.xlu1 %v5420_v36, %s14126_s24  ;;  %v4238_v1 = vsel %vm14264_vm5, %v4233_v56, %v4237_v59  ;;  %v4255_v2 = vrot.slane %v4253_v18, 4  ;;  %v4621_v22 = vrot.slane %v14114_v11, 5  ;;  %v14115_v4 = vld [vmem:[%s14220_s28 + $0x20] sm:$0x1]  ;;  %v5423_v40 = vld [vmem:[%s15655_s23 + $0x30] sm:$0xff] }
 0x12b   : > { %v15703_v30 = vpop.f32.mrf.mxu0  ;;  %19933 = vst [vmem:[#allocation38_spill] sm:$0xff] %v15706_v63  ;;  %v4261_v47 = vrot.slane %v4259_v46, 5  ;;  %v12144_v45 = vcombine.low %v4228_v50, %v4238_v1  ;;  %v4247_v44 = vrot.slane %v4246_v3, 4  ;;  %5489 = vrot.lane.b32.xlu0 %v5421_v16, %s14126_s24  ;;  %v12179_v59 = vrot.slane %v12163_v25, 9  ;;  %v5422_v46 = vld [vmem:[%s15655_s23 + $0x28] sm:$0xff] }
 0x12c   : > { %19931 = vst [vmem:[#allocation36_spill] sm:$0xff] %v15701_v24  ;;  %19932 = vst [vmem:[#allocation37_spill] sm:$0xff] %v15703_v30  ;;  %v4624_v30 = vrot.slane %v14115_v4, 5  ;;  %v15715_v63 = vpop.f32.mrf.mxu1  ;;  %v4256_v36 = vor.u32 %v4255_v2, %v4251_v43  ;;  %v19934_v56 = vrot.slane %v15332_v7, 5  ;;  %v4622_v3 = vsel %vm14547_vm8, %v12178_v8, %v4621_v22 }
 0x12d   : > { %v13187_v24 = vpop.f32.mrf.mxu0  ;;  %13403 = vmatprep.mubr.msk.bf16.mxu1 %vm964_vm4, %v12144_v45  ;;  %v4252_v50 = vsel %vm14264_vm5, %v4247_v44, %v4251_v43  ;;  %v4623_v1 = vrot.slane %v4621_v22, 4  ;;  %v12180_v2 = vrot.slane %v12164_v21, 9  ;;  %v19936_v43 = vrot.slane %v15340_v17, 5 }
 0x12e   : > { %v1895_v32 = vadd.f32 %v13187_v24, %v15354_v26  ;;  %v4630_v18 = vrot.slane %v19934_v56, 4  ;;  %v15728_v11 = vpop.f32.mrf.mxu1  ;;  %5491 = vrot.lane.b32.xlu1 %v5422_v46, %s14126_s24  ;;  %v4257_v26 = vrot.slane %v4256_v36, 4  ;;  %v19935_v24 = vmov %v19934_v56  ;;  %v12165_v36 = vld [vmem:[%s14220_s28 + $0x3c] sm:$0xe] }
 0x12f   : > { %v1766_v16 = vpop.f32.mrf.mxu0  ;;  %v4629_v25 = vsel %vm14547_vm8, %v12179_v59, %v19935_v24  ;;  %v4625_v21 = vsel %vm14547_vm8, %v4623_v1, %v4624_v30  ;;  %v4635_v4 = vrot.slane %v15351_v42, 5  ;;  %5493 = vrot.lane.b32.xlu0 %v5423_v40, %s14126_s24  ;;  %v4638_v40 = vrot.slane %v15363_v61, 5 }
 0x130   : > { %v4632_v8 = vsel %vm14547_vm8, %v4630_v18, %v19936_v43  ;;  %v1893_v45 = vadd.f32 %v1766_v16, %v15360_v38  ;;  %v15743_v22 = vadd.f32 %v15670_v15, %v1895_v32  ;;  %v15747_v59 = vpop.f32.mrf.mxu1  ;;  %v4262_v17 = vsel %vm14264_vm5, %v4257_v26, %v4261_v47  ;;  %v12166_v15 = vld [vmem:[%s14220_s28 + $0x48] sm:$0xe]  ;;  %v5424_v32 = vld [vmem:[%s15655_s23 + $0x38] sm:$0xff]  ;;  %v12168_v43 = vld [vmem:[%s14220_s28 + $0x60] sm:$0xe] }
 0x131   : > { %v12195_v44 = vcombine.low %v4629_v25, %v4632_v8  ;;  %v13188_v7 = vpop.f32.mrf.mxu0  ;;  %v12194_v38 = vcombine.low %v4622_v3, %v4625_v21  ;;  %v12145_v18 = vcombine.low %v4252_v50, %v4262_v17  ;;  %v4636_v46 = vsel %vm14547_vm8, %v12180_v2, %v4635_v4  ;;  %v12167_v2 = vld [vmem:[%s14220_s28 + $0x54] sm:$0xe] }
 0x132   : > { %v1896_v56 = vadd.f32 %v13188_v7, %v15373_v31  ;;  %v15754_v30 = vadd.f32 %v15681_v58, %v1893_v45  ;;  %v4637_v1 = vrot.slane %v4635_v4, 4  ;;  %v15761_v16 = vpop.f32.mrf.mxu1  ;;  %5495 = vrot.lane.b32.xlu1 %v5424_v32, %s14126_s24  ;;  %v5425_v31 = vld [vmem:[%s15655_s23 + $0x40] sm:$0xff]  ;;  %v12181_v50 = vrot.slane %v12165_v36, 9 }
 0x133   : > { %v1769_v42 = vpop.f32.mrf.mxu0  ;;  %13413 = vmatprep.mubr.msk.bf16.mxu0 %vm964_vm4, %v12194_v38  ;;  %v4642_v3 = vrot.slane %v15377_v0, 5  ;;  %13404 = vmatmul.mubr.msk.bf16.gmra.mxu1 %vm964_vm4, %v12145_v18  ;;  %v12182_v24 = vrot.slane %v12166_v15, 9  ;;  %v4652_v25 = vrot.slane %v15409_v19, 5  ;;  %v4659_v0 = vrot.slane %v15433_v34, 5  ;;  %v5427_v34 = vld [vmem:[%s15655_s23 + $0x50] sm:$0xff] }
 0x134   : > { %v15767_v58 = vadd.f32 %v1769_v42, %v15389_v60  ;;  %v15770_v47 = vadd.f32 %v15690_v20, %v1896_v56  ;;  %13414 = vmatmul.mubr.msk.bf16.vlgmr.msra.gmra.mxu0 %vm964_vm4, %v12195_v44  ;;  %v4639_v61 = vsel %vm14547_vm8, %v4637_v1, %v4638_v40  ;;  %v4649_v60 = vrot.slane %v15399_v9, 5  ;;  %v15780_v20 = vpop.f32.mrf.mxu1  ;;  %5497 = vrot.lane.b32.xlu0 %v5425_v31, %s14126_s24  ;;  %v5426_v44 = vld [vmem:[%s15655_s23 + $0x48] sm:$0xff] }
 0x135   : > { %v13191_v26 = vpop.f32.mrf.mxu0  ;;  %v12196_v8 = vcombine.low %v4636_v46, %v4639_v61  ;;  %v4643_v21 = vsel %vm14547_vm8, %v12181_v50, %v4642_v3  ;;  %v4644_v7 = vrot.slane %v4642_v3, 4  ;;  %v12183_v36 = vrot.slane %v12167_v2, 9 }
 0x136   : > { %v1899_v45 = vadd.f32 %v13191_v26, %v15401_v39  ;;  %v4650_v9 = vsel %vm14547_vm8, %v12182_v24, %v4649_v60  ;;  %v4651_v19 = vrot.slane %v4649_v60, 4  ;;  %v15791_v17 = vpop.f32.mrf.mxu1  ;;  %5499 = vrot.lane.b32.xlu1 %v5426_v44, %s14126_s24  ;;  %v4656_v56 = vrot.slane %v15425_v10, 5 }
 0x137   : > { %v1782_v4 = vpop.f32.mrf.mxu0  ;;  %13417 = vmatprep.mubr.msk.bf16.mxu0 %vm964_vm4, %v12196_v8  ;;  %v12184_v15 = vrot.slane %v12168_v43, 9  ;;  %v19937_v32 = vrot.slane %v15383_v23, 5  ;;  %v4663_v40 = vrot.slane %v15449_v49, 5  ;;  %v4670_v60 = vrot.slane %v15463_v33, 5  ;;  %v5429_v43 = vld [vmem:[%s15655_s23 + $0x60] sm:$0xff] }
 0x138   : > { %v1897_v39 = vadd.f32 %v1782_v4, %v15411_v12  ;;  %v15798_v38 = vadd.f32 %v15715_v63, %v1899_v45  ;;  %v4653_v46 = vsel %vm14547_vm8, %v4651_v19, %v4652_v25  ;;  %v15807_v1 = vpop.f32.mrf.mxu1  ;;  %v4666_v12 = vrot.slane %v15454_v57, 5  ;;  %v12169_v63 = vld [vmem:[%s14220_s28 + $0x6c] sm:$0xe]  ;;  %5501 = vrot.lane.b32.xlu0 %v5427_v34, %s14126_s24  ;;  %v5428_v25 = vld [vmem:[%s15655_s23 + $0x58] sm:$0xff] }
 0x139   : > { %v4646_v18 = vsel %vm14547_vm8, %v4644_v7, %v19937_v32  ;;  %v13192_v42 = vpop.f32.mrf.mxu0  ;;  %v12198_v50 = vcombine.low %v4650_v9, %v4653_v46  ;;  %v4657_v2 = vsel %vm14547_vm8, %v12183_v36, %v4656_v56  ;;  %v4658_v61 = vrot.slane %v4656_v56, 4  ;;  %v12170_v36 = vld [vmem:[%s14220_s28 + $0x78] sm:$0xe]  ;;  %v5431_v32 = vld [vmem:[%s15655_s23 + $0x70] sm:$0xff] }
 0x13a   : > { %v12197_v31 = vcombine.low %v4643_v21, %v4646_v18  ;;  %v1900_v10 = vadd.f32 %v13192_v42, %v15418_v5  ;;  %v15814_v23 = vadd.f32 %v15728_v11, %v1897_v39  ;;  %v4664_v49 = vsel %vm14547_vm8, %v12184_v15, %v4663_v40  ;;  %v15821_v26 = vpop.f32.mrf.mxu1  ;;  %5503 = vrot.lane.b32.xlu1 %v5428_v25, %s14126_s24  ;;  %v5430_v15 = vld [vmem:[%s15655_s23 + $0x68] sm:$0xff] }
 0x13b   : > { %v1785_v3 = vpop.f32.mrf.mxu0  ;;  %v4665_v57 = vrot.slane %v4663_v40, 4  ;;  %v12185_v24 = vrot.slane %v12169_v63, 9  ;;  %v4673_v8 = vrot.slane %v15475_v37, 5  ;;  %v4660_v21 = vsel %vm14547_vm8, %v4658_v61, %v4659_v0 }
 0x13c   : > { %v15824_v5 = vadd.f32 %v1785_v3, %v15429_v51  ;;  %v15827_v11 = vadd.f32 %v15747_v59, %v1900_v10  ;;  %13418 = vmatmul.mubr.msk.bf16.gmra.mxu0 %vm964_vm4, %v12197_v31  ;;  %v13237_v44 = vpop.f32.mrf.mxu1  ;;  %v12171_v59 = vld [vmem:[%s14220_s28 + $0x84] sm:$0xe]  ;;  %v12199_v37 = vcombine.low %v4657_v2, %v4660_v21  ;;  %v4672_v0 = vrot.slane %v4670_v60, 4  ;;  %5505 = vrot.lane.b32.xlu0 %v5429_v43, %s14126_s24 }
 0x13d   : > { %v13195_v45 = vpop.f32.mrf.mxu0  ;;  %v4667_v51 = vsel %vm14547_vm8, %v4665_v57, %v4666_v12  ;;  %13421 = vmatprep.mubr.msk.bf16.mxu0 %vm964_vm4, %v12198_v50  ;;  %v15844_v9 = vsel %vm14547_vm8, %v12185_v24, %v4670_v60  ;;  %v4677_v34 = vrot.slane %v15485_v35, 5  ;;  %v4684_v40 = vrot.slane %v15506_v53, 5  ;;  %v5432_v57 = vld [vmem:[%s15655_s23 + $0x78] sm:$0xff]  ;;  %v5433_v24 = vld [vmem:[%s15655_s23 + $0x80] sm:$0xff] }
 0x13e   : > { %v1903_v33 = vadd.f32 %v13195_v45, %v15435_v6  ;;  %v12200_v7 = vcombine.low %v4664_v49, %v4667_v51  ;;  %v2171_v19 = vpop.f32.mrf.mxu1  ;;  %v12187_v6 = vrot.slane %v12171_v59, 9  ;;  %v4674_v42 = vsel %vm14547_vm8, %v4672_v0, %v4673_v8  ;;  %5507 = vrot.lane.b32.xlu1 %v5430_v15, %s14126_s24  ;;  %v19938_v8 = vld [vmem:[#allocation12_spill] sm:$0xff]  ;;  %v12172_v59 = vld [vmem:[%s14220_s28 + $0x90] sm:$0xe] }
 0x13f   : > { %v1798_v4 = vpop.f32.mrf.mxu0  ;;  %v4687_v12 = vrot.slane %v15523_v14, 5  ;;  %v12186_v63 = vrot.slane %v12170_v36, 9  ;;  %v4679_v10 = vrot.slane %v4677_v34, 4  ;;  %v4680_v50 = vrot.slane %v15497_v48, 5  ;;  %v5434_v36 = vld [vmem:[%s15655_s23 + $0x88] sm:$0xff] }
 0x140   : > { %v1901_v39 = vadd.f32 %v1798_v4, %v15445_v54  ;;  %v15851_v56 = vadd.f32 %v15780_v20, %v1903_v33  ;;  %v13238_v46 = vpop.f32.mrf.mxu1  ;;  %v12201_v20 = vcombine.low %v15844_v9, %v4674_v42  ;;  %v15870_v53 = vsel %vm14547_vm8, %v12187_v6, %v4684_v40  ;;  %5509 = vrot.lane.b32.xlu0 %v5431_v32, %s14126_s24  ;;  %v19941_v32 = vld [vmem:[#allocation14_spill] sm:$0xff] }
 0x141   : > { %v13196_v18 = vpop.f32.mrf.mxu0  ;;  %v4686_v14 = vrot.slane %v4684_v40, 4  ;;  %v4678_v60 = vsel %vm14547_vm8, %v12186_v63, %v4677_v34  ;;  %v4681_v25 = vsel %vm14547_vm8, %v4679_v10, %v4680_v50  ;;  %v4691_v45 = vrot.slane %v19938_v8, 5  ;;  %v5435_v34 = vld [vmem:[%s15655_s23 + $0x90] sm:$0xff]  ;;  %v19943_v63 = vld [vmem:[#allocation10_spill] sm:$0xff]  ;;  %v12173_v10 = vld [vmem:[%s14220_s28 + $0x9c] sm:$0xe] }
 0x142   : > { %v1904_v35 = vadd.f32 %v13196_v18, %v15456_v55  ;;  %v15862_v54 = vadd.f32 %v15791_v17, %v1901_v39  ;;  %v15866_v3 = vpop.f32.mrf.mxu1  ;;  %5511 = vrot.lane.b32.xlu1 %v5432_v57, %s14126_s24  ;;  %v12202_v0 = vcombine.low %v4678_v60, %v4681_v25  ;;  %v12188_v6 = vrot.slane %v12172_v59, 9  ;;  %v19944_v57 = vld [vmem:[#allocation21_spill] sm:$0xff]  ;;  %v12174_v25 = vld [vmem:[%s14220_s28 + $0xa8] sm:$0xe]  ;;  %v5436_v8 = vld [vmem:[%s15655_s23 + $0x98] sm:$0xff] }
 0x143   : > { %v1801_v31 = vpop.f32.mrf.mxu0  ;;  %v15882_v48 = vsel %vm14547_vm8, %v4686_v14, %v4687_v12  ;;  %v4693_v15 = vrot.slane %v4691_v45, 4  ;;  %v4694_v18 = vrot.slane %v19941_v32, 5  ;;  %v4698_v50 = vrot.slane %v15551_v62, 5  ;;  %v19946_v59 = vld [vmem:[#allocation17_spill] sm:$0xff] }
 0x144   : > { %v15874_v55 = vadd.f32 %v1801_v31, %v15468_v13  ;;  %v15877_v17 = vadd.f32 %v15807_v1, %v1904_v35  ;;  %13422 = vmatmul.mubr.msk.bf16.gmra.mxu0 %vm964_vm4, %v12199_v37  ;;  %v13241_v61 = vpop.f32.mrf.mxu1  ;;  %v12203_v13 = vcombine.low %v15870_v53, %v15882_v48  ;;  %5513 = vrot.lane.b32.xlu0 %v5433_v24, %s14126_s24  ;;  %v19945_v24 = vld [vmem:[#allocation11_spill] sm:$0xff]  ;;  %v12189_v62 = vrot.slane %v12173_v10, 9 }
 0x145   : > { %v13199_v2 = vpop.f32.mrf.mxu0  ;;  %13425 = vmatprep.mubr.msk.bf16.mxu0 %vm964_vm4, %v12200_v7  ;;  %v19940_v7 = vld [vmem:[#allocation7_spill] sm:$0xff]  ;;  %vm6131_vm11 = vsmask.f32 256  ;;  %vm6187_vm13 = vsmask.f32 7938  ;;  %vm6121_vm15 = vcmask 257024  }
 0x146   : > { %v1907_v49 = vadd.f32 %v13199_v2, %v15480_v27  ;;  %v2187_v43 = vpop.f32.mrf.mxu1  ;;  %v19939_v27 = vld [vmem:[#allocation6_spill] sm:$0xff]  ;;  %5515 = vrot.lane.b32.xlu1 %v5434_v36, %s14126_s24  ;;  %v4692_v2 = vsel %vm14547_vm8, %v12188_v6, %v4691_v45  ;;  %v4700_v36 = vrot.slane %v4698_v50, 4  ;;  %v12175_v53 = vld [vmem:[%s14220_s28 + $0xb4] sm:$0xe]  ;;  %vm16995_vm12 = vmand %vm6124_vm10, %vm6131_vm11  ;;  %vm6339_vm0 = vsmask.f32 4368 }
 0x147   : > { %v1814_v1 = vpop.f32.mrf.mxu0  ;;  %vm17011_vm14 = vmand %vm6124_vm10, %vm6187_vm13  ;;  %vm7373_vm2 = vcmask 261120  }
 0x148   : > { %v1905_v21 = vadd.f32 %v1814_v1, %v19939_v27  ;;  %v15898_v51 = vadd.f32 %v13237_v44, %v1907_v49  ;;  %v13242_v37 = vpop.f32.mrf.mxu1  ;;  %5517 = vrot.lane.b32.xlu0 %v5435_v34, %s14126_s24  ;;  %v19942_v44 = vld [vmem:[#allocation8_spill] sm:$0xff]  ;;  %v5437_v27 = vld [vmem:[%s15655_s23 + $0xa0] sm:$0xff]  ;;  %vm17041_vm1 = vmor %vm6131_vm11, %vm6339_vm0 }
 0x149   : > { %v13200_v33 = vpop.f32.mrf.mxu0  ;;  %vm17259_vm3 = vmand %vm6121_vm15, %vm6187_vm13 }
 0x14a   : > { %v1908_v4 = vadd.f32 %v13200_v33, %v19940_v7  ;;  %v15902_v9 = vadd.f32 %v2171_v19, %v1905_v21  ;;  %v15907_v42 = vpop.f32.mrf.mxu1  ;;  %v4701_v33 = vrot.slane %v19946_v59, 5  ;;  %5519 = vrot.lane.b32.xlu1 %v5436_v8, %s14126_s24  ;;  %v19947_v7 = vld [vmem:[#allocation13_spill] sm:$0xff] }
 0x14b   : > { %v1817_v39 = vpop.f32.mrf.mxu0 }
 0x14c   : > { %v15912_v40 = vadd.f32 %v1817_v39, %v19942_v44  ;;  %v15914_v19 = vadd.f32 %v13238_v46, %v1908_v4  ;;  %13426 = vmatmul.mubr.msk.bf16.gmra.mxu0 %vm964_vm4, %v12201_v20  ;;  %v13245_v35 = vpop.f32.mrf.mxu1  ;;  %v4695_v46 = vsel %vm14547_vm8, %v4693_v15, %v4694_v18  ;;  %v4705_v20 = vrot.slane %v19944_v57, 5  ;;  %5521 = vrot.lane.b32.xlu0 %v5437_v27, %s14126_s24  ;;  %v19948_v15 = vld [vmem:[#allocation23_spill] sm:$0xff] }
 0x14d   : > { %v13203_v12 = vpop.f32.mrf.mxu0  ;;  %13429 = vmatprep.mubr.msk.bf16.mxu0 %vm964_vm4, %v12202_v0  ;;  %v12190_v39 = vrot.slane %v12174_v25, 9  ;;  %v4708_v32 = vrot.slane %v19948_v15, 5  ;;  %v4702_v57 = vsel %vm14547_vm8, %v4700_v36, %v4701_v33  ;;  %v19951_v25 = vld [vmem:[#allocation31_spill] sm:$0xff]  ;;  %v19953_v36 = vld [vmem:[#allocation20_spill] sm:$0xff] }
 0x14e   : > { %v1911_v31 = vadd.f32 %v13203_v12, %v19943_v63  ;;  %v2203_v49 = vpop.f32.mrf.mxu1  ;;  %v4707_v6 = vrot.slane %v4705_v20, 4  ;;  %v5438_v12 = vld [vmem:[%s15655_s23 + $0xa8] sm:$0xff]  ;;  %v5439_v63 = vld [vmem:[%s15655_s23 + $0xb0] sm:$0xff]  ;;  %v4719_v8 = vrot.slane %v19951_v25, 5 }
 0x14f   : > { %v1830_v14 = vpop.f32.mrf.mxu0  ;;  %5523 = vrot.lane.b32.xlu1 %v5438_v12, %s14126_s24  ;;  %v19952_v27 = vld [vmem:[#allocation19_spill] sm:$0xff]  ;;  %v5440_v12 = vld [vmem:[%s15655_s23 + $0xb8] sm:$0xff] }
 0x150   : > { %v1909_v1 = vadd.f32 %v1830_v14, %v19945_v24  ;;  %v15927_v60 = vadd.f32 %v13241_v61, %v1911_v31  ;;  %v13246_v45 = vpop.f32.mrf.mxu1  ;;  %v12204_v61 = vcombine.low %v4692_v2, %v4695_v46  ;;  %v19949_v31 = vld [vmem:[#allocation26_spill] sm:$0xff]  ;;  %5525 = vrot.lane.b32.xlu0 %v5439_v63, %s14126_s24  ;;  %v4709_v24 = vsel %vm14547_vm8, %v4707_v6, %v4708_v32  ;;  %v19954_v6 = vld [vmem:[#allocation27_spill] sm:$0xff]  ;;  %v5441_v63 = vld [vmem:[%s15655_s23 + $0xc0] sm:$0xff] }
 0x151   : > { %v13204_v21 = vpop.f32.mrf.mxu0  ;;  %v4712_v10 = vrot.slane %v19949_v31, 5  ;;  %v19950_v2 = vld [vmem:[#allocation18_spill] sm:$0xff]  ;;  %v4715_v32 = vrot.slane %v19954_v6, 5  ;;  %v4721_v31 = vrot.slane %v4719_v8, 4 }
 0x152   : > { %v1912_v4 = vadd.f32 %v13204_v21, %v19947_v7  ;;  %v15936_v0 = vadd.f32 %v2187_v43, %v1909_v1  ;;  %v15941_v18 = vpop.f32.mrf.mxu1  ;;  %v12191_v7 = vrot.slane %v12175_v53, 9 }
 0x153   : > { %v15938_v34 = vpop.f32.mrf.mxu0  ;;  %5527 = vrot.lane.b32.xlu1 %v5440_v12, %s14126_s24  ;;  %v19958_v12 = vld [vmem:[#allocation29_spill] sm:$0xff] }
 0x154   : > { %v15943_v44 = vadd.f32 %v13242_v37, %v1912_v4  ;;  %13430 = vmatmul.mubr.msk.bf16.gmra.mxu0 %vm964_vm4, %v12203_v13  ;;  %v13249_v14 = vpop.f32.mrf.mxu1  ;;  %v4699_v37 = vsel %vm14547_vm8, %v12189_v62, %v4698_v50  ;;  %v4706_v13 = vsel %vm14547_vm8, %v12190_v39, %v4705_v20  ;;  %v12176_v62 = vld [vmem:[%s14220_s28 + $0xc0] sm:$0xe]  ;;  %v4714_v4 = vrot.slane %v4712_v10, 4  ;;  %5529 = vrot.lane.b32.xlu0 %v5441_v63, %s14126_s24 }
 0x155   : > { %v13207_v43 = vpop.f32.mrf.mxu0  ;;  %13433 = vmatprep.mubr.msk.bf16.mxu0 %vm964_vm4, %v12204_v61  ;;  %v12205_v59 = vcombine.low %v4699_v37, %v4702_v57  ;;  %v12206_v15 = vcombine.low %v4706_v13, %v4709_v24  ;;  %v4713_v24 = vsel %vm14547_vm8, %v12191_v7, %v4712_v10  ;;  %v19957_v10 = vld [vmem:[#allocation28_spill] sm:$0xff] }
 0x156   : > { %v1915_v46 = vadd.f32 %v13207_v43, %v19950_v2  ;;  %v2219_v1 = vpop.f32.mrf.mxu1  ;;  %v19955_v2 = vld [vmem:[#allocation32_spill] sm:$0xff]  ;;  %v4716_v25 = vsel %vm14547_vm8, %v4714_v4, %v4715_v32  ;;  %v4729_v32 = vrot.slane %v15679_v41, 5 }
 0x157   : > { %v1846_v48 = vpop.f32.mrf.mxu0 }
 0x158   : > { %v1913_v50 = vadd.f32 %v1846_v48, %v19952_v27  ;;  %v15967_v21 = vadd.f32 %v13245_v35, %v1915_v46  ;;  %v13250_v61 = vpop.f32.mrf.mxu1  ;;  %v12192_v35 = vrot.slane %v12176_v62, 9  ;;  %v4722_v46 = vrot.slane %v19955_v2, 5  ;;  %v19956_v48 = vld [vmem:[#allocation25_spill] sm:$0xff]  ;;  %v12177_v27 = vld [vmem:[%s14220_s28 + $0xcc] sm:$0xe] }
 0x159   : > { %v13208_v33 = vpop.f32.mrf.mxu0  ;;  %v5442_v62 = vld [vmem:[%s15655_s23 + $0xc8] sm:$0xff]  ;;  %v12193_v6 = vrot.slane %v12177_v27, 9 }
 0x15a   : > { %v1916_v20 = vadd.f32 %v13208_v33, %v19953_v36  ;;  %v15971_v39 = vadd.f32 %v2203_v49, %v1913_v50  ;;  %v15979_v37 = vpop.f32.mrf.mxu1  ;;  %v4726_v50 = vrot.slane %v15668_v28, 5  ;;  %v4723_v36 = vsel %vm14547_vm8, %v4721_v31, %v4722_v46  ;;  %5531 = vrot.lane.b32.xlu1 %v5442_v62, %s14126_s24 }
 0x15b   : > { %v15976_v43 = vpop.f32.mrf.mxu0  ;;  %v12207_v28 = vcombine.low %v4713_v24, %v4716_v25 }
 0x15c   : > { %v15983_v49 = vadd.f32 %v13246_v45, %v1916_v20  ;;  %13434 = vmatmul.mubr.msk.bf16.gmra.mxu0 %vm964_vm4, %v12205_v59  ;;  %v13253_v53 = vpop.f32.mrf.mxu1  ;;  %v5443_v45 = vld [vmem:[%s15655_s23 + $0xd0] sm:$0xff]  ;;  %v4720_v59 = vsel %vm14547_vm8, %v12192_v35, %v4719_v8  ;;  %v4728_v2 = vrot.slane %v4726_v50, 4  ;;  %v4727_v27 = vsel %vm14547_vm8, %v12193_v6, %v4726_v50  ;;  %v19961_v50 = vld [vmem:[#allocation36_spill] sm:$0xff] }
 0x15d   : > { %v13211_v57 = vpop.f32.mrf.mxu0  ;;  %13437 = vmatprep.mubr.msk.bf16.mxu0 %vm964_vm4, %v12206_v15  ;;  %5533 = vrot.lane.b32.xlu0 %v5443_v45, %s14126_s24  ;;  %v12208_v31 = vcombine.low %v4720_v59, %v4723_v36 }
 0x15e   : > { %v1919_v13 = vadd.f32 %v13211_v57, %v19956_v48  ;;  %v2235_v20 = vpop.f32.mrf.mxu1 }
 0x15f   : > { %v1862_v33 = vpop.f32.mrf.mxu0 }
 0x160   : > { %v1917_v7 = vadd.f32 %v1862_v33, %v19957_v10  ;;  %v16003_v4 = vadd.f32 %v13249_v14, %v1919_v13  ;;  %v13254_v8 = vpop.f32.mrf.mxu1  ;;  %v5444_v14 = vld [vmem:[%s15655_s23 + $0xd8] sm:$0xff]  ;;  %v5445_v13 = vld [vmem:[%s15655_s23 + $0xe0] sm:$0xff]  ;;  %v19960_v33 = vld [vmem:[#allocation35_spill] sm:$0xff] }
 0x161   : > { %v13212_v15 = vpop.f32.mrf.mxu0  ;;  %5535 = vrot.lane.b32.xlu1 %v5444_v14, %s14126_s24  ;;  %5537 = vrot.lane.b32.xlu0 %v5445_v13, %s14126_s24  ;;  %v5446_v10 = vld [vmem:[%s15655_s23 + $0xe8] sm:$0xff] }
 0x162   : > { %v1920_v63 = vadd.f32 %v13212_v15, %v19958_v12  ;;  %v16007_v35 = vadd.f32 %v2219_v1, %v1917_v7  ;;  %v16011_v57 = vpop.f32.mrf.mxu1  ;;  %v19959_v1 = vld [vmem:[#allocation34_spill] sm:$0xff]  ;;  %v5447_v7 = vld [vmem:[%s15655_s23 + $0xf0] sm:$0xff] }
 0x163   : > { %v16009_v46 = vpop.f32.mrf.mxu0 }
 0x164   : > { %v16013_v48 = vadd.f32 %v13250_v61, %v1920_v63  ;;  %13438 = vmatmul.mubr.msk.bf16.gmra.mxu0 %vm964_vm4, %v12207_v28  ;;  %v13301_v24 = vpop.f32.mrf.mxu1  ;;  %v4730_v61 = vsel %vm14547_vm8, %v4728_v2, %v4729_v32 }
 0x165   : > { %v13215_v41 = vpop.f32.mrf.mxu0  ;;  %13441 = vmatprep.mubr.msk.bf16.mxu0 %vm964_vm4, %v12208_v31  ;;  %v12209_v28 = vcombine.low %v4727_v27, %v4730_v61  ;;  %5539 = vrot.lane.b32.xlu1 %v5446_v10, %s14126_s24 }
 0x166   : > { %v1923_v25 = vadd.f32 %v13215_v41, %v19959_v1  ;;  %v16026_v45 = vpop.f32.mrf.mxu1  ;;  %5541 = vrot.lane.b32.xlu0 %v5447_v7, %s14126_s24  ;;  %v5448_v41 = vld [vmem:[%s15655_s23 + $0xf8] sm:$0xff] }
 0x167   : > { %v1878_v62 = vpop.f32.mrf.mxu0 }
 0x168   : > { %v1921_v59 = vadd.f32 %v1878_v62, %v19960_v33  ;;  %v16029_v36 = vadd.f32 %v13253_v53, %v1923_v25  ;;  %v13302_v12 = vpop.f32.mrf.mxu1 }
 0x169   : > { %v13216_v15 = vpop.f32.mrf.mxu0  ;;  %5543 = vrot.lane.b32.xlu1 %v5448_v41, %s14126_s24 }
 0x16a   : > { %v1924_v6 = vadd.f32 %v13216_v15, %v19961_v50  ;;  %v16035_v32 = vadd.f32 %v2235_v20, %v1921_v59  ;;  %v16040_v31 = vpop.f32.mrf.mxu1 }
 0x16b   : > { %v16038_v63 = vpop.f32.mrf.mxu0 }
 0x16c   : > { %v16042_v53 = vadd.f32 %v13254_v8, %v1924_v6  ;;  %13442 = vmatmul.mubr.msk.bf16.gmra.mxu0 %vm964_vm4, %v12209_v28  ;;  %v13305_v14 = vpop.f32.mrf.mxu1  ;;  %vm11570_vm4 = vcmask 31744  }
 0x16d   : > { %v13263_v2 = vpop.f32.mrf.mxu0 }
 0x16e   : > { %v2976_v13 = vadd.f32 %v13263_v2, %v15743_v22  ;;  %v3331_v25 = vpop.f32.mrf.mxu1 }
 0x16f   : > { %v2847_v1 = vpop.f32.mrf.mxu0 }
 0x170   : > { %v16049_v20 = vadd.f32 %v2847_v1, %v15754_v30  ;;  %v16051_v27 = vadd.f32 %v13301_v24, %v2976_v13  ;;  %v13306_v62 = vpop.f32.mrf.mxu1 }
 0x171   : > { %v13264_v61 = vpop.f32.mrf.mxu0 }
 0x172   : > { %v2977_v8 = vadd.f32 %v13264_v61, %v15770_v47  ;;  %v16056_v59 = vpop.f32.mrf.mxu1 }
 0x173   : > { %v16054_v33 = vpop.f32.mrf.mxu0  ;;  %19962 = vst [vmem:[#allocation12_spill] sm:$0xff] %v16056_v59 }
 0x174   : > { %v16058_v10 = vadd.f32 %v13302_v12, %v2977_v8  ;;  %v13309_v7 = vpop.f32.mrf.mxu1 }
 0x175   : > { %v13267_v22 = vpop.f32.mrf.mxu0 }
 0x176   : > { %v2980_v28 = vadd.f32 %v13267_v22, %v15798_v38  ;;  %v3347_v50 = vpop.f32.mrf.mxu1 }
 0x177   : > { %v2863_v15 = vpop.f32.mrf.mxu0 }
 0x178   : > { %v2978_v30 = vadd.f32 %v2863_v15, %v15814_v23  ;;  %v16062_v24 = vadd.f32 %v13305_v14, %v2980_v28  ;;  %v13310_v2 = vpop.f32.mrf.mxu1 }
 0x179   : > { %v13268_v6 = vpop.f32.mrf.mxu0 }
 0x17a   : > { %v2981_v47 = vadd.f32 %v13268_v6, %v15827_v11  ;;  %v16065_v13 = vadd.f32 %v3331_v25, %v2978_v30  ;;  %v16069_v12 = vpop.f32.mrf.mxu1 }
 0x17b   : > { %v16067_v41 = vpop.f32.mrf.mxu0  ;;  %19963 = vst [vmem:[#allocation6_spill] sm:$0xff] %v16069_v12 }
 0x17c   : > { %v16071_v1 = vadd.f32 %v13306_v62, %v2981_v47  ;;  %v13313_v38 = vpop.f32.mrf.mxu1 }
 0x17d   : > { %v13271_v61 = vpop.f32.mrf.mxu0 }
 0x17e   : > { %v2984_v8 = vadd.f32 %v13271_v61, %v15851_v56  ;;  %v3363_v23 = vpop.f32.mrf.mxu1 }
 0x17f   : > { %v2879_v22 = vpop.f32.mrf.mxu0 }
 0x180   : > { %v2982_v14 = vadd.f32 %v2879_v22, %v15862_v54  ;;  %v16075_v28 = vadd.f32 %v13309_v7, %v2984_v8  ;;  %v13314_v11 = vpop.f32.mrf.mxu1 }
 0x181   : > { %v13272_v15 = vpop.f32.mrf.mxu0 }
 0x182   : > { %v2985_v25 = vadd.f32 %v13272_v15, %v15877_v17  ;;  %v16078_v30 = vadd.f32 %v3347_v50, %v2982_v14  ;;  %v16082_v62 = vpop.f32.mrf.mxu1 }
 0x183   : > { %v16080_v6 = vpop.f32.mrf.mxu0  ;;  %19964 = vst [vmem:[#allocation7_spill] sm:$0xff] %v16082_v62 }
 0x184   : > { %v16084_v47 = vadd.f32 %v13310_v2, %v2985_v25  ;;  %v13317_v56 = vpop.f32.mrf.mxu1 }
 0x185   : > { %v13275_v29 = vpop.f32.mrf.mxu0 }
 0x186   : > { %v2988_v61 = vadd.f32 %v13275_v29, %v15898_v51  ;;  %v3379_v54 = vpop.f32.mrf.mxu1 }
 0x187   : > { %v2895_v52 = vpop.f32.mrf.mxu0 }
 0x188   : > { %v2986_v7 = vadd.f32 %v2895_v52, %v15902_v9  ;;  %v16088_v8 = vadd.f32 %v13313_v38, %v2988_v61  ;;  %v13318_v17 = vpop.f32.mrf.mxu1 }
 0x189   : > { %v13276_v22 = vpop.f32.mrf.mxu0 }
 0x18a   : > { %v2989_v50 = vadd.f32 %v13276_v22, %v15914_v19  ;;  %v16091_v14 = vadd.f32 %v3363_v23, %v2986_v7  ;;  %v16095_v2 = vpop.f32.mrf.mxu1 }
 0x18b   : > { %v16093_v15 = vpop.f32.mrf.mxu0  ;;  %19965 = vst [vmem:[#allocation14_spill] sm:$0xff] %v16095_v2 }
 0x18c   : > { %v16097_v25 = vadd.f32 %v13314_v11, %v2989_v50  ;;  %v13321_v29 = vpop.f32.mrf.mxu1 }
 0x18d   : > { %v13279_v62 = vpop.f32.mrf.mxu0 }
 0x18e   : > { %v2992_v51 = vadd.f32 %v13279_v62, %v15927_v60  ;;  %v3395_v52 = vpop.f32.mrf.mxu1 }
 0x18f   : > { %v2911_v12 = vpop.f32.mrf.mxu0 }
 0x190   : > { %v2990_v9 = vadd.f32 %v2911_v12, %v15936_v0  ;;  %v16101_v38 = vadd.f32 %v13317_v56, %v2992_v51  ;;  %v13322_v19 = vpop.f32.mrf.mxu1 }
 0x191   : > { %v13280_v61 = vpop.f32.mrf.mxu0 }
 0x192   : > { %v2993_v23 = vadd.f32 %v13280_v61, %v15943_v44  ;;  %v16104_v7 = vadd.f32 %v3379_v54, %v2990_v9  ;;  %v16108_v11 = vpop.f32.mrf.mxu1 }
 0x193   : > { %v16106_v22 = vpop.f32.mrf.mxu0  ;;  %19966 = vst [vmem:[#allocation8_spill] sm:$0xff] %v16108_v11 }
 0x194   : > { %v16110_v50 = vadd.f32 %v13318_v17, %v2993_v23 }
 0x195   : > { %v13283_v2 = vpop.f32.mrf.mxu0 }
 0x196   : > { %v2996_v60 = vadd.f32 %v13283_v2, %v15967_v21 }
 0x197   : > { %v2927_v62 = vpop.f32.mrf.mxu0  ;;  %v13325_v59 = vpop.f32.mrf.mxu1 }
 0x198   : > { %v2994_v0 = vadd.f32 %v2927_v62, %v15971_v39  ;;  %v16114_v12 = vadd.f32 %v13321_v29, %v2996_v60 }
 0x199   : > { %v13284_v56 = vpop.f32.mrf.mxu0  ;;  %v3411_v51 = vpop.f32.mrf.mxu1 }
 0x19a   : > { %v2997_v44 = vadd.f32 %v13284_v56, %v15983_v49  ;;  %v16117_v54 = vadd.f32 %v3395_v52, %v2994_v0 }
 0x19b   : > { %v16119_v9 = vpop.f32.mrf.mxu0  ;;  %v13326_v61 = vpop.f32.mrf.mxu1 }
 0x19c   : > { %v16121_v17 = vadd.f32 %v13322_v19, %v2997_v44 }
 0x19d   : > { %v13287_v23 = vpop.f32.mrf.mxu0  ;;  %v16124_v2 = vpop.f32.mrf.mxu1 }
 0x19e   : > { %v3000_v21 = vadd.f32 %v13287_v23, %v16003_v4  ;;  %19967 = vst [vmem:[#allocation10_spill] sm:$0xff] %v16124_v2 }
 0x19f   : > { %v2943_v11 = vpop.f32.mrf.mxu0 }
 0x1a0   : > { %v2998_v39 = vadd.f32 %v2943_v11, %v16007_v35  ;;  %v16127_v29 = vadd.f32 %v13325_v59, %v3000_v21 }
 0x1a1   : > { %v13288_v60 = vpop.f32.mrf.mxu0 }
 0x1a2   : > { %v3001_v49 = vadd.f32 %v13288_v60, %v16013_v48  ;;  %v16130_v52 = vadd.f32 %v3411_v51, %v2998_v39  ;;  %v13329_v62 = vpop.f32.mrf.mxu1 }
 0x1a3   : > { %v16132_v0 = vpop.f32.mrf.mxu0 }
 0x1a4   : > { %v16134_v19 = vadd.f32 %v13326_v61, %v3001_v49  ;;  %v3427_v44 = vpop.f32.mrf.mxu1 }
 0x1a5   : > { %v13291_v56 = vpop.f32.mrf.mxu0 }
 0x1a6   : > { %v3004_v4 = vadd.f32 %v13291_v56, %v16029_v36  ;;  %v13330_v11 = vpop.f32.mrf.mxu1 }
 0x1a7   : > { %v2959_v23 = vpop.f32.mrf.mxu0 }
 0x1a8   : > { %v3002_v2 = vadd.f32 %v2959_v23, %v16035_v32  ;;  %v16138_v35 = vadd.f32 %v13329_v62, %v3004_v4 }
 0x1a9   : > { %v13292_v59 = vpop.f32.mrf.mxu0 }
 0x1aa   : > { %v3005_v48 = vadd.f32 %v13292_v59, %v16042_v53  ;;  %v16141_v51 = vadd.f32 %v3427_v44, %v3002_v2  ;;  %v16157_v53 = vpop.f32.mrf.mxu1 }
 0x1ab   : > { %v16143_v21 = vpop.f32.mrf.mxu0  ;;  %19968 = vst [vmem:[#allocation21_spill] sm:$0xff] %v16157_v53 }
 0x1ac   : > { %v16145_v39 = vadd.f32 %v13330_v11, %v3005_v48 }
 0x1ad   : > { %v13339_v61 = vpop.f32.mrf.mxu0 }
 0x1ae   : > { %v16148_v60 = vadd.f32 %v13339_v61, %v16051_v27  ;;  %v16165_v23 = vpop.f32.mrf.mxu1 }
 0x1af   : > { %v16150_v36 = vpop.f32.mrf.mxu0 }
 0x1b0   : > { %v16172_v48 = vpop.f32.mrf.mxu1 }
 0x1b1   : > { %v13340_v49 = vpop.f32.mrf.mxu0 }
 0x1b2   : > { %v16153_v32 = vadd.f32 %v13340_v49, %v16058_v10 }
 0x1b3   : > { %v16155_v62 = vpop.f32.mrf.mxu0 }
 0x1b5   : > { %v13343_v56 = vpop.f32.mrf.mxu0 }
 0x1b6   : > { %v16160_v2 = vadd.f32 %v13343_v56, %v16062_v24  ;;  %v16180_v56 = vpop.f32.mrf.mxu1 }
 0x1b7   : > { %v3688_v44 = vpop.f32.mrf.mxu0 }
 0x1b8   : > { %v16163_v4 = vadd.f32 %v3688_v44, %v16065_v13  ;;  %v16187_v53 = vpop.f32.mrf.mxu1 }
 0x1b9   : > { %v13344_v27 = vpop.f32.mrf.mxu0 }
 0x1ba   : > { %v16168_v59 = vadd.f32 %v13344_v27, %v16071_v1 }
 0x1bb   : > { %v16170_v10 = vpop.f32.mrf.mxu0 }
 0x1bc   : > { %19969 = vst [vmem:[#allocation11_spill] sm:$0xff] %v16168_v59 }
 0x1bd   : > { %v13347_v11 = vpop.f32.mrf.mxu0 }
 0x1be   : > { %v16175_v61 = vadd.f32 %v13347_v11, %v16075_v28 }
 0x1bf   : > { %v3704_v24 = vpop.f32.mrf.mxu0 }
 0x1c0   : > { %v16178_v49 = vadd.f32 %v3704_v24, %v16078_v30  ;;  %v16195_v24 = vpop.f32.mrf.mxu1 }
 0x1c1   : > { %v13348_v13 = vpop.f32.mrf.mxu0 }
 0x1c2   : > { %19970 = vst [vmem:[#allocation17_spill] sm:$0xff] %v16178_v49  ;;  %v16183_v44 = vadd.f32 %v13348_v13, %v16084_v47 }
 0x1c3   : > { %v16185_v1 = vpop.f32.mrf.mxu0 }
 0x1c4   : > { %19971 = vst [vmem:[#allocation13_spill] sm:$0xff] %v16183_v44  ;;  %19972 = vst [vmem:[#allocation23_spill] sm:$0xff] %v16185_v1  ;;  %v16202_v44 = vpop.f32.mrf.mxu1 }
 0x1c5   : > { %v13351_v27 = vpop.f32.mrf.mxu0 }
 0x1c6   : > { %v16190_v59 = vadd.f32 %v13351_v27, %v16088_v8 }
 0x1c7   : > { %v3720_v28 = vpop.f32.mrf.mxu0 }
 0x1c8   : > { %19973 = vst [vmem:[#allocation26_spill] sm:$0xff] %v16190_v59  ;;  %v16193_v11 = vadd.f32 %v3720_v28, %v16091_v14  ;;  %v16210_v28 = vpop.f32.mrf.mxu1 }
 0x1c9   : > { %v13352_v30 = vpop.f32.mrf.mxu0 }
 0x1ca   : > { %19974 = vst [vmem:[#allocation18_spill] sm:$0xff] %v16193_v11  ;;  %v16198_v49 = vadd.f32 %v13352_v30, %v16097_v25 }
 0x1cb   : > { %v16200_v47 = vpop.f32.mrf.mxu0 }
 0x1cc   : > { %19975 = vst [vmem:[#allocation31_spill] sm:$0xff] %v16198_v49  ;;  %v16217_v49 = vpop.f32.mrf.mxu1 }
 0x1cd   : > { %v13355_v13 = vpop.f32.mrf.mxu0 }
 0x1ce   : > { %v16205_v1 = vadd.f32 %v13355_v13, %v16101_v38 }
 0x1cf   : > { %v3736_v8 = vpop.f32.mrf.mxu0 }
 0x1d0   : > { %19976 = vst [vmem:[#allocation19_spill] sm:$0xff] %v16205_v1  ;;  %v16208_v27 = vadd.f32 %v3736_v8, %v16104_v7  ;;  %v16225_v8 = vpop.f32.mrf.mxu1 }
 0x1d1   : > { %v13356_v14 = vpop.f32.mrf.mxu0 }
 0x1d2   : > { %19977 = vst [vmem:[#allocation20_spill] sm:$0xff] %v16208_v27  ;;  %v16213_v11 = vadd.f32 %v13356_v14, %v16110_v50 }
 0x1d3   : > { %v16215_v25 = vpop.f32.mrf.mxu0 }
 0x1d4   : > { %19978 = vst [vmem:[#allocation27_spill] sm:$0xff] %v16213_v11  ;;  %19979 = vst [vmem:[#allocation32_spill] sm:$0xff] %v16215_v25  ;;  %v16232_v11 = vpop.f32.mrf.mxu1 }
 0x1d5   : > { %v13359_v30 = vpop.f32.mrf.mxu0 }
 0x1d6   : > { %v16220_v59 = vadd.f32 %v13359_v30, %v16114_v12 }
 0x1d7   : > { %v3752_v38 = vpop.f32.mrf.mxu0 }
 0x1d8   : > { %19980 = vst [vmem:[#allocation25_spill] sm:$0xff] %v16220_v59  ;;  %v16223_v13 = vadd.f32 %v3752_v38, %v16117_v54  ;;  %v16240_v38 = vpop.f32.mrf.mxu1 }
 0x1d9   : > { %v13360_v7 = vpop.f32.mrf.mxu0 }
 0x1da   : > { %19981 = vst [vmem:[#allocation28_spill] sm:$0xff] %v16223_v13  ;;  %v16228_v27 = vadd.f32 %v13360_v7, %v16121_v17 }
 0x1db   : > { %v16230_v50 = vpop.f32.mrf.mxu0 }
 0x1dc   : > { %19982 = vst [vmem:[#allocation29_spill] sm:$0xff] %v16228_v27  ;;  %19983 = vst [vmem:[#allocation34_spill] sm:$0xff] %v16230_v50  ;;  %v16247_v27 = vpop.f32.mrf.mxu1 }
 0x1dd   : > { %v13363_v14 = vpop.f32.mrf.mxu0 }
 0x1de   : > { %v16235_v25 = vadd.f32 %v13363_v14, %v16127_v29 }
 0x1df   : > { %v3768_v12 = vpop.f32.mrf.mxu0 }
 0x1e0   : > { %19984 = vst [vmem:[#allocation35_spill] sm:$0xff] %v16235_v25  ;;  %v16238_v30 = vadd.f32 %v3768_v12, %v16130_v52  ;;  %v16255_v12 = vpop.f32.mrf.mxu1  ;;  %v19993_v25 = vld [vmem:[#allocation22_spill] sm:$0xff] }
 0x1e1   : > { %v13364_v54 = vpop.f32.mrf.mxu0 }
 0x1e2   : > { %19985 = vst [vmem:[#allocation36_spill] sm:$0xff] %v16238_v30  ;;  %v16243_v13 = vadd.f32 %v13364_v54, %v16134_v19  ;;  %v19991_v19 = vld [vmem:[#allocation15_spill] sm:$0xff]  ;;  %v19992_v54 = vld [vmem:[#allocation9_spill] sm:$0xff]  ;;  %v16264_v1 = vpop.f32.mrf.mxu1 }
 0x1e3   : > { %v16245_v17 = vpop.f32.mrf.mxu0 }
 0x1e4   : > { %19986 = vst [vmem:[#allocation39_spill] sm:$0xff] %v16243_v13  ;;  %19987 = vst [vmem:[#allocation40_spill] sm:$0xff] %v16245_v17  ;;  %v1411_v13 = vadd.f32 %v19992_v54, %v19991_v19  ;;  %v19994_v17 = vld [vmem:[#allocation16_spill] sm:$0xff]  ;;  %v19996_v19 = vlaneseq }
 0x1e5   : > { %v13367_v7 = vpop.f32.mrf.mxu0  ;;  %v1427_v50 = vadd.f32 %v19994_v17, %v19993_v25  ;;  %v19997_v25 = vld [vmem:[#allocation30_spill] sm:$0xff]  ;;  %v19998_v17 = vld [vmem:[#allocation24_spill] sm:$0xff] }
 0x1e6   : > { %v16250_v59 = vadd.f32 %v13367_v7, %v16138_v35  ;;  %v19995_v35 = vld [vmem:[#allocation38_spill] sm:$0xff]  ;;  %v16276_v54 = vand.u32 127, %v19996_v19 }
 0x1e7   : > { %v3784_v29 = vpop.f32.mrf.mxu0  ;;  %v2251_v7 = vadd.f32 %v19995_v35, %v15767_v58  ;;  %v16281_v58 = vpop.f32.mrf.mxu1 }
 0x1e8   : > { %19988 = vst [vmem:[#allocation41_spill] sm:$0xff] %v16250_v59  ;;  %v16253_v14 = vadd.f32 %v3784_v29, %v16141_v51  ;;  %v1910_v51 = vadd.f32 %v15938_v34, %v1411_v13  ;;  %v1914_v29 = vadd.f32 %v15976_v43, %v1427_v50  ;;  %v19999_v34 = vld [vmem:[#allocation37_spill] sm:$0xff]  ;;  %vm5064_vm9 = vcmp.lt.s32.totalorder %v16276_v54, 96 }
 0x1e9   : > { %v13368_v52 = vpop.f32.mrf.mxu0  ;;  %v20000_v13 = vld [vmem:[#allocation33_spill] sm:$0xff] }
 0x1ea   : > { %19989 = vst [vmem:[#allocation42_spill] sm:$0xff] %v16253_v14  ;;  %v16258_v30 = vadd.f32 %v13368_v52, %v16145_v39  ;;  %v3442_v14 = vadd.f32 %v16026_v45, %v16049_v20  ;;  %v2975_v39 = vadd.f32 %v16054_v33, %v2251_v7  ;;  %v1459_v43 = vadd.f32 %v20000_v13, %v19999_v34  ;;  %v20005_v13 = vld [vmem:[#allocation8_spill] sm:$0xff] }
 0x1eb   : > { %v16273_v52 = vpop.f32.mrf.mxu0  ;;  %v2255_v45 = vadd.f32 %v15761_v16, %v15824_v5  ;;  %v2259_v20 = vadd.f32 %v15821_v26, %v15874_v55  ;;  %v2263_v33 = vadd.f32 %v15866_v3, %v15912_v40  ;;  %v2267_v50 = vadd.f32 %v15907_v42, %v1910_v51  ;;  %v16303_v3 = vld [vmem:[%s19857_s4] ss:$0 sm:$0xff]  ;;  %v16307_v40 = vpop.f32.mrf.mxu1 }
 0x1ec   : > { %19990 = vst [vmem:[#allocation43_spill] sm:$0xff] %v16258_v30  ;;  %v1443_v30 = vadd.f32 %v19998_v17, %v19997_v25  ;;  %v3799_v59 = vadd.f32 %v16150_v36, %v3442_v14  ;;  %v2271_v35 = vadd.f32 %v15941_v18, %v1914_v29  ;;  %v4525_v14 = vadd.f32 %v16165_v23, %v16148_v60  ;;  %v20003_v29 = vld [vmem:[#allocation7_spill] sm:$0xff] }
 0x1ed   : > { %v1922_v7 = vadd.f32 %v16038_v63, %v1459_v43  ;;  %v3443_v19 = vadd.f32 %v16040_v31, %v2975_v39  ;;  %v2979_v16 = vadd.f32 %v16067_v41, %v2255_v45  ;;  %v2983_v26 = vadd.f32 %v16080_v6, %v2259_v20  ;;  %v16321_v39 = vpop.f32.mrf.mxu1 }
 0x1ee   : > { %v1918_v36 = vadd.f32 %v16009_v46, %v1443_v30  ;;  %v2987_v55 = vadd.f32 %v16093_v15, %v2263_v33  ;;  %v4523_v42 = vadd.f32 %v16172_v48, %v3799_v59  ;;  %v2991_v46 = vadd.f32 %v16106_v22, %v2267_v50  ;;  %v20001_v48 = vld [vmem:[#allocation12_spill] sm:$0xff]  ;;  %v20002_v22 = vld [vmem:[#allocation6_spill] sm:$0xff] }
 0x1ef   : > { %v2995_v63 = vadd.f32 %v16119_v9, %v2271_v35  ;;  %v3800_v31 = vadd.f32 %v16155_v62, %v3443_v19  ;;  %v4526_v6 = vadd.f32 %v16180_v56, %v16153_v32  ;;  %v2279_v59 = vadd.f32 %v16011_v57, %v1922_v7  ;;  %v20004_v56 = vld [vmem:[#allocation14_spill] sm:$0xff] }
 0x1f0   : > { %v2275_v23 = vadd.f32 %v15979_v37, %v1918_v36  ;;  %v3447_v30 = vadd.f32 %v20001_v48, %v2979_v16  ;;  %v3451_v51 = vadd.f32 %v20002_v22, %v2983_v26  ;;  %v3455_v62 = vadd.f32 %v20003_v29, %v2987_v55  ;;  %v16341_v16 = vpop.f32.mrf.mxu1 }
 0x1f1   : > { %v16325_v34 = vadd.f32 %v20004_v56, %v2991_v46  ;;  %v16328_v37 = vadd.f32 %v20005_v13, %v2995_v63  ;;  %v4524_v43 = vadd.f32 %v16187_v53, %v3800_v31  ;;  %v4529_v20 = vadd.f32 %v16195_v24, %v16160_v2  ;;  %v20008_v31 = vld [vmem:[#allocation21_spill] sm:$0xff] }
 0x1f2   : > { %v2999_v57 = vadd.f32 %v16132_v0, %v2275_v23  ;;  %v3003_v36 = vadd.f32 %v16143_v21, %v2279_v59  ;;  %v3804_v53 = vadd.f32 %v16170_v10, %v3447_v30  ;;  %v16358_v23 = vpop.f32.mrf.mxu1  ;;  %v4533_v22 = vadd.f32 %v16225_v8, %v16175_v61 }
 0x1f4   : > { %v13415_v5 = vpop.f32.mrf.mxu0 }
 0x1f5   : > { %v4993_v18 = vadd.f32 %v13415_v5, %v4525_v14  ;;  %v4527_v14 = vadd.f32 %v16202_v44, %v16163_v4  ;;  %v20006_v5 = vld [vmem:[#allocation10_spill] sm:$0xff] }
 0x1f6   : > { %v4864_v41 = vpop.f32.mrf.mxu0  ;;  %v16346_v55 = vadd.f32 %v20006_v5, %v2999_v57  ;;  %v20010_v57 = vld [vmem:[#allocation17_spill] sm:$0xff] }
 0x1f7   : > { %v5032_v60 = vadd.f32 %v16303_v3, %v4993_v18  ;;  %v4991_v15 = vadd.f32 %v4864_v41, %v4523_v42  ;;  %v20007_v42 = vld [vmem:[#allocation11_spill] sm:$0xff]  ;;  %v16355_v41 = vadd.f32 %v20008_v31, %v3003_v36 }
 0x1f8   : > { %v13416_v9 = vpop.f32.mrf.mxu0  ;;  %v4530_v21 = vadd.f32 %v16210_v28, %v20007_v42  ;;  %v4528_v28 = vadd.f32 %v16217_v49, %v3804_v53 }
 0x1f9   : > { %v5067_v25 = vmul.f32 2.0, %v5032_v60  ;;  %v5030_v17 = vadd.f32 %v16303_v3, %v4991_v15  ;;  %v4994_v32 = vadd.f32 %v13416_v9, %v4526_v6  ;;  %v20009_v9 = vld [vmem:[#allocation23_spill] sm:$0xff] }
 0x1fa   : > { %v4867_v45 = vpop.f32.mrf.mxu0  ;;  %v3808_v29 = vadd.f32 %v20009_v9, %v3451_v51 }
 0x1fb   : > { %v5099_v33 = vsel %vm5064_vm9, %v5032_v60, %v5067_v25  ;;  %v5065_v50 = vmul.f32 2.0, %v5030_v17  ;;  %v5033_v35 = vadd.f32 %v16303_v3, %v4994_v32  ;;  %v4992_v19 = vadd.f32 %v4867_v45, %v4524_v43  ;;  %v20011_v45 = vld [vmem:[#allocation13_spill] sm:$0xff] }
 0x1fc   : > { %v12229_v7 = vmul.f32 -1.442695, %v5099_v33  ;;  %v13419_v0 = vpop.f32.mrf.mxu0  ;;  %v4531_v43 = vadd.f32 %v16232_v11, %v20010_v57  ;;  %v4534_v61 = vadd.f32 %v16240_v38, %v20011_v45  ;;  %v16373_v33 = vpop.f32.mrf.mxu1  ;;  %v4532_v38 = vadd.f32 %v16247_v27, %v3808_v29 }
 0x1fd   : > { %v5097_v2 = vsel %vm5064_vm9, %v5030_v17, %v5065_v50  ;;  %v5068_v24 = vmul.f32 2.0, %v5033_v35  ;;  %v4997_v26 = vadd.f32 %v13419_v0, %v4529_v20  ;;  %v5031_v4 = vadd.f32 %v16303_v3, %v4992_v19 }
 0x1fe   : > { %v12227_v18 = vmul.f32 -1.442695, %v5097_v2  ;;  %v4880_v44 = vpop.f32.mrf.mxu0  ;;  %13922 = vpow2.f32 %v12229_v7 }
 0x1ff   : > { %v5100_v10 = vsel %vm5064_vm9, %v5033_v35, %v5068_v24  ;;  %v5036_v46 = vadd.f32 %v16303_v3, %v4997_v26  ;;  %v4995_v63 = vadd.f32 %v4880_v44, %v4527_v14  ;;  %v5066_v60 = vmul.f32 2.0, %v5031_v4  ;;  %v20012_v24 = vld [vmem:[#allocation26_spill] sm:$0xff] }
 0x200   : > { %13924 = vpow2.f32 %v12227_v18  ;;  %v12230_v6 = vmul.f32 -1.442695, %v5100_v10  ;;  %v13420_v15 = vpop.f32.mrf.mxu0  ;;  %v3812_v14 = vadd.f32 %v16200_v47, %v3455_v62  ;;  %v4537_v26 = vadd.f32 %v16255_v12, %v20012_v24  ;;  %v20013_v62 = vld [vmem:[#allocation18_spill] sm:$0xff]  ;;  %v16387_v18 = vpop.f32.mrf.mxu1  ;;  %v20014_v10 = vld [vmem:[#allocation31_spill] sm:$0xff] }
 0x201   : > { %v5071_v59 = vmul.f32 2.0, %v5036_v46  ;;  %v5034_v48 = vadd.f32 %v16303_v3, %v4995_v63  ;;  %v4998_v30 = vadd.f32 %v13420_v15, %v4530_v21  ;;  %v5098_v25 = vsel %vm5064_vm9, %v5031_v4, %v5066_v60 }
 0x202   : > { %13926 = vpow2.f32 %v12230_v6  ;;  %v4883_v17 = vpop.f32.mrf.mxu0  ;;  %v12228_v32 = vmul.f32 -1.442695, %v5098_v25  ;;  %v4535_v21 = vadd.f32 %v16264_v1, %v20013_v62  ;;  %v4536_v63 = vadd.f32 %v16307_v40, %v3812_v14  ;;  %v20017_v25 = vld [vmem:[#allocation20_spill] sm:$0xff] }
 0x203   : > { %v5103_v49 = vsel %vm5064_vm9, %v5036_v46, %v5071_v59  ;;  %v5069_v56 = vmul.f32 2.0, %v5034_v48  ;;  %v5037_v13 = vadd.f32 %v16303_v3, %v4998_v30  ;;  %v4996_v51 = vadd.f32 %v4883_v17, %v4528_v28  ;;  %v20015_v59 = vld [vmem:[#allocation19_spill] sm:$0xff] }
 0x204   : > { %v12233_v8 = vmul.f32 -1.442695, %v5103_v49  ;;  %v13423_v20 = vpop.f32.mrf.mxu0  ;;  %13928 = vpow2.f32 %v12228_v32  ;;  %v4538_v46 = vadd.f32 %v16281_v58, %v20014_v10  ;;  %v20016_v58 = vld [vmem:[#allocation32_spill] sm:$0xff]  ;;  %v4539_v17 = vadd.f32 %v16341_v16, %v20017_v25  ;;  %v16406_v32 = vpop.f32.mrf.mxu1 }
 0x205   : > { %v5101_v50 = vsel %vm5064_vm9, %v5034_v48, %v5069_v56  ;;  %v5072_v35 = vmul.f32 2.0, %v5037_v13  ;;  %v5001_v36 = vadd.f32 %v13423_v20, %v4533_v22  ;;  %v5035_v11 = vadd.f32 %v16303_v3, %v4996_v51 }
 0x206   : > { %13930 = vpow2.f32 %v12233_v8  ;;  %v12231_v7 = vmul.f32 -1.442695, %v5101_v50  ;;  %v4896_v19 = vpop.f32.mrf.mxu0  ;;  %v4541_v48 = vadd.f32 %v16321_v39, %v20015_v59  ;;  %v16402_v30 = vadd.f32 %v20016_v58, %v16325_v34 }
 0x207   : > { %v5104_v0 = vsel %vm5064_vm9, %v5037_v13, %v5072_v35  ;;  %v5040_v53 = vadd.f32 %v16303_v3, %v5001_v36  ;;  %v4999_v2 = vadd.f32 %v4896_v19, %v4531_v43  ;;  %v5070_v42 = vmul.f32 2.0, %v5035_v11  ;;  %v16414_v36 = vpop.f32.mrf.mxu1 }
 0x208   : > { %13932 = vpow2.f32 %v12231_v7  ;;  %v12234_v5 = vmul.f32 -1.442695, %v5104_v0  ;;  %v13424_v47 = vpop.f32.mrf.mxu0 }
 0x209   : > { %v5075_v4 = vmul.f32 2.0, %v5040_v53  ;;  %v5038_v27 = vadd.f32 %v16303_v3, %v4999_v2  ;;  %v5002_v44 = vadd.f32 %v13424_v47, %v4534_v61  ;;  %v5102_v12 = vsel %vm5064_vm9, %v5035_v11, %v5070_v42  ;;  %v16428_v10 = vpop.f32.mrf.mxu1 }
 0x20a   : > { %13934 = vpow2.f32 %v12234_v5  ;;  %v4899_v31 = vpop.f32.mrf.mxu0  ;;  %v12232_v6 = vmul.f32 -1.442695, %v5102_v12 }
 0x20b   : > { %v5107_v1 = vsel %vm5064_vm9, %v5040_v53, %v5075_v4  ;;  %v5073_v60 = vmul.f32 2.0, %v5038_v27  ;;  %v5041_v15 = vadd.f32 %v16303_v3, %v5002_v44  ;;  %v13923_v28 = vpop.eup %13922  ;;  %v5000_v22 = vadd.f32 %v4899_v31, %v4532_v38  ;;  %v20018_v38 = vld [vmem:[#allocation27_spill] sm:$0xff]  ;;  %v20019_v53 = vld [vmem:[#allocation34_spill] sm:$0xff] }
 0x20c   : > { %v12237_v40 = vmul.f32 -1.442695, %v5107_v1  ;;  %v13427_v9 = vpop.f32.mrf.mxu0  ;;  %13936 = vpow2.f32 %v12232_v6  ;;  %v5227_v51 = vadd.f32 1.0, %v13923_v28  ;;  %v4542_v0 = vadd.f32 %v16358_v23, %v20018_v38 }
 0x20d   : > { %v13925_v29 = vpop.eup %13924  ;;  %v5105_v49 = vsel %vm5064_vm9, %v5038_v27, %v5073_v60  ;;  %v5076_v56 = vmul.f32 2.0, %v5041_v15  ;;  %v5005_v13 = vadd.f32 %v13427_v9, %v4537_v26  ;;  %v5039_v34 = vadd.f32 %v16303_v3, %v5000_v22 }
 0x20e   : > { %v5225_v57 = vadd.f32 1.0, %v13925_v29  ;;  %v12235_v39 = vmul.f32 -1.442695, %v5105_v49  ;;  %v4912_v43 = vpop.f32.mrf.mxu0  ;;  %13938 = vpow2.f32 %v12237_v40  ;;  %v16421_v2 = vadd.f32 %v20019_v53, %v16328_v37  ;;  %v16436_v29 = vpop.f32.mrf.mxu1 }
 0x20f   : > { %v13927_v45 = vpop.eup %13926  ;;  %v5108_v61 = vsel %vm5064_vm9, %v5041_v15, %v5076_v56  ;;  %v5044_v16 = vadd.f32 %v16303_v3, %v5005_v13  ;;  %v5003_v8 = vadd.f32 %v4912_v43, %v4535_v21  ;;  %v5074_v50 = vmul.f32 2.0, %v5039_v34 }
 0x210   : > { %13940 = vrcp.f32 %v5225_v57  ;;  %v12238_v20 = vmul.f32 -1.442695, %v5108_v61  ;;  %v13428_v35 = vpop.f32.mrf.mxu0  ;;  %v5228_v24 = vadd.f32 1.0, %v13927_v45  ;;  %v4540_v13 = vadd.f32 %v16373_v33, %v16402_v30  ;;  %v20020_v45 = vld [vmem:[#allocation25_spill] sm:$0xff] }
 0x211   : > { %13942 = vpow2.f32 %v12235_v39  ;;  %v5079_v14 = vmul.f32 2.0, %v5044_v16  ;;  %v5042_v7 = vadd.f32 %v16303_v3, %v5003_v8  ;;  %v5006_v11 = vadd.f32 %v13428_v35, %v4538_v46  ;;  %v13929_v19 = vpop.eup %13928 }
 0x212   : > { %v5106_v26 = vsel %vm5064_vm9, %v5039_v34, %v5074_v50  ;;  %v4915_v5 = vpop.f32.mrf.mxu0  ;;  %v5226_v47 = vadd.f32 1.0, %v13929_v19  ;;  %13944 = vpow2.f32 %v12238_v20  ;;  %v4545_v61 = vadd.f32 %v16387_v18, %v20020_v45 }
 0x213   : > { %v13931_v42 = vpop.eup %13930  ;;  %v12236_v62 = vmul.f32 -1.442695, %v5106_v26  ;;  %v5111_v21 = vsel %vm5064_vm9, %v5044_v16, %v5079_v14  ;;  %13946 = vrcp.f32 %v5227_v51  ;;  %v5077_v27 = vmul.f32 2.0, %v5042_v7  ;;  %v20021_v51 = vld [vmem:[#allocation28_spill] sm:$0xff]  ;;  %v16449_v14 = vpop.f32.mrf.mxu1  ;;  %v20022_v26 = vld [vmem:[#allocation29_spill] sm:$0xff] }
 0x214   : > { %v5231_v4 = vadd.f32 1.0, %v13931_v42  ;;  %v5045_v23 = vadd.f32 %v16303_v3, %v5006_v11  ;;  %v13431_v44 = vpop.f32.mrf.mxu0  ;;  %13948 = vrcp.f32 %v5226_v47  ;;  %v12241_v46 = vmul.f32 -1.442695, %v5111_v21 }
 0x215   : > { %v13933_v37 = vpop.eup %13932  ;;  %v5004_v12 = vadd.f32 %v4915_v5, %v4536_v63  ;;  %v5009_v31 = vadd.f32 %v13431_v44, %v4541_v48  ;;  %13950 = vrcp.f32 %v5228_v24  ;;  %v5109_v1 = vsel %vm5064_vm9, %v5042_v7, %v5077_v27 }
 0x216   : > { %v5229_v6 = vadd.f32 1.0, %v13933_v37  ;;  %v5080_v60 = vmul.f32 2.0, %v5045_v23  ;;  %v4928_v15 = vpop.f32.mrf.mxu0  ;;  %13952 = vpow2.f32 %v12236_v62  ;;  %v12239_v59 = vmul.f32 -1.442695, %v5109_v1 }
 0x217   : > { %v13935_v28 = vpop.eup %13934  ;;  %v5043_v58 = vadd.f32 %v16303_v3, %v5004_v12  ;;  %v5048_v40 = vadd.f32 %v16303_v3, %v5009_v31  ;;  %13954 = vrcp.f32 %v5231_v4  ;;  %v5007_v48 = vadd.f32 %v4928_v15, %v4539_v17  ;;  %v16460_v12 = vpop.f32.mrf.mxu1 }
 0x218   : > { %v5232_v22 = vadd.f32 1.0, %v13935_v28  ;;  %v5112_v63 = vsel %vm5064_vm9, %v5045_v23, %v5080_v60  ;;  %v13432_v9 = vpop.f32.mrf.mxu0  ;;  %13956 = vpow2.f32 %v12241_v46  ;;  %v4543_v33 = vadd.f32 %v16406_v32, %v20021_v51 }
 0x219   : > { %v12242_v25 = vmul.f32 -1.442695, %v5112_v63  ;;  %v5078_v49 = vmul.f32 2.0, %v5043_v58  ;;  %v5083_v56 = vmul.f32 2.0, %v5048_v40  ;;  %13958 = vrcp.f32 %v5229_v6  ;;  %v13937_v43 = vpop.eup %13936 }
 0x21a   : > { %v5046_v57 = vadd.f32 %v16303_v3, %v5007_v48  ;;  %v5010_v39 = vadd.f32 %v13432_v9, %v4542_v0  ;;  %v4931_v34 = vpop.f32.mrf.mxu0  ;;  %13960 = vpow2.f32 %v12239_v59  ;;  %v5230_v38 = vadd.f32 1.0, %v13937_v43 }
 0x21b   : > { %v5110_v17 = vsel %vm5064_vm9, %v5043_v58, %v5078_v49  ;;  %v5115_v16 = vsel %vm5064_vm9, %v5048_v40, %v5083_v56  ;;  %v13939_v8 = vpop.eup %13938  ;;  %13962 = vpow2.f32 %v12242_v25  ;;  %v5008_v11 = vadd.f32 %v4931_v34, %v4540_v13  ;;  %v4495_v49 = vpop.f32.mrf.mxu1 }
 0x21c   : > { %v12240_v30 = vmul.f32 -1.442695, %v5110_v17  ;;  %v5081_v20 = vmul.f32 2.0, %v5046_v57  ;;  %v13435_v50 = vpop.f32.mrf.mxu0  ;;  %13964 = vrcp.f32 %v5232_v22  ;;  %v12245_v18 = vmul.f32 -1.442695, %v5115_v16 }
 0x21d   : > { %v13941_v35 = vpop.eup %13940  ;;  %v5049_v7 = vadd.f32 %v16303_v3, %v5010_v39  ;;  %v5013_v24 = vadd.f32 %v13435_v50, %v4545_v61  ;;  %v4546_v5 = vadd.f32 %v16414_v36, %v20022_v26  ;;  %v5235_v21 = vadd.f32 1.0, %v13939_v8  ;;  %v20023_v8 = vld [vmem:[#allocation40_spill] sm:$0xff] }
 0x21e   : > { %v13943_v19 = vpop.eup %13942  ;;  %v5113_v0 = vsel %vm5064_vm9, %v5046_v57, %v5081_v20  ;;  %v5321_v53 = vmul.f32 2.0, %v13941_v35  ;;  %v4944_v32 = vpop.f32.mrf.mxu0  ;;  %13966 = vpow2.f32 %v12240_v30  ;;  %v5047_v4 = vadd.f32 %v16303_v3, %v5008_v11 }
 0x21f   : > { %v12243_v42 = vmul.f32 -1.442695, %v5113_v0  ;;  %v5084_v47 = vmul.f32 2.0, %v5049_v7  ;;  %v13945_v62 = vpop.eup %13944  ;;  %v5052_v23 = vadd.f32 %v16303_v3, %v5013_v24  ;;  %v4544_v46 = vadd.f32 %v16428_v10, %v16421_v2 }
 0x220   : > { %v12259_v27 = vadd.f32 -1.0, %v5321_v53  ;;  %v13436_v44 = vpop.f32.mrf.mxu0  ;;  %v13947_v37 = vpop.eup %13946  ;;  %v5233_v31 = vadd.f32 1.0, %v13943_v19  ;;  %13968 = vpow2.f32 %v12245_v18  ;;  %v5011_v36 = vadd.f32 %v4944_v32, %v4543_v33  ;;  %v20024_v19 = vld [vmem:[#allocation35_spill] sm:$0xff] }
 0x221   : > { %v13949_v6 = vpop.eup %13948  ;;  %13970 = vrcp.f32 %v5230_v38  ;;  %v5116_v1 = vsel %vm5064_vm9, %v5049_v7, %v5084_v47  ;;  %v5082_v60 = vmul.f32 2.0, %v5047_v4  ;;  %v5236_v58 = vadd.f32 1.0, %v13945_v62  ;;  %v13405_v38 = vpop.f32.mrf.mxu1  ;;  %v20025_v62 = vld [vmem:[#allocation36_spill] sm:$0xff] }
 0x222   : > { %v16466_v15 = vsel %vm5064_vm9, %v13941_v35, %v12259_v27  ;;  %v4947_v28 = vpop.f32.mrf.mxu0  ;;  %v16468_v59 = vpop.eup %13950  ;;  %13972 = vpow2.f32 %v12243_v42  ;;  %v5087_v2 = vmul.f32 2.0, %v5052_v23  ;;  %v5050_v10 = vadd.f32 %v16303_v3, %v5011_v36 }
 0x223   : > { %5641 = vrot.lane.b32.xlu0 %v16466_v15, %s14126_s24  ;;  %v13953_v40 = vpop.eup %13952  ;;  %13974 = vrcp.f32 %v5235_v21  ;;  %v5114_v22 = vsel %vm5064_vm9, %v5047_v4, %v5082_v60  ;;  %v5322_v63 = vmul.f32 2.0, %v13949_v6  ;;  %v5323_v48 = vmul.f32 2.0, %v13947_v37 }
 0x224   : > { %v13439_v9 = vpop.f32.mrf.mxu0  ;;  %v16475_v25 = vpop.eup %13954  ;;  %13976 = vrcp.f32 %v5233_v31  ;;  %v5234_v56 = vadd.f32 1.0, %v13953_v40  ;;  %v12246_v13 = vmul.f32 -1.442695, %v5116_v1  ;;  %v5085_v57 = vmul.f32 2.0, %v5050_v10 }
 0x225   : > { %v13957_v39 = vpop.eup %13956  ;;  %v5119_v34 = vsel %vm5064_vm9, %v5052_v23, %v5087_v2  ;;  %v12260_v43 = vadd.f32 -1.0, %v5322_v63  ;;  %v12261_v45 = vadd.f32 -1.0, %v5323_v48  ;;  %v5014_v61 = vadd.f32 %v13436_v44, %v4546_v5  ;;  %v4508_v23 = vpop.f32.mrf.mxu1  ;;  %v20027_v63 = vld [vmem:[#allocation41_spill] sm:$0xff]  ;;  %v20028_v48 = vld [vmem:[#allocation42_spill] sm:$0xff] }
 0x226   : > { %v4960_v17 = vpop.f32.mrf.mxu0  ;;  %v16479_v16 = vpop.eup %13958  ;;  %v3824_v51 = vadd.f32 %v20023_v8, %v16346_v55  ;;  %13978 = vrcp.f32 %v5236_v58  ;;  %v12244_v33 = vmul.f32 -1.442695, %v5114_v22  ;;  %v5012_v30 = vadd.f32 %v4947_v28, %v4544_v46 }
 0x227   : > { %v13961_v20 = vpop.eup %13960  ;;  %v5239_v50 = vadd.f32 1.0, %v13957_v39  ;;  %v5117_v35 = vsel %vm5064_vm9, %v5050_v10, %v5085_v57  ;;  %v16487_v18 = vsel %vm5064_vm9, %v13949_v6, %v12260_v43  ;;  %v16491_v7 = vsel %vm5064_vm9, %v13947_v37, %v12261_v45  ;;  %v20026_v6 = vld [vmem:[#allocation39_spill] sm:$0xff]  ;;  %v13406_v8 = vpop.f32.mrf.mxu1 }
 0x228   : > { %v13963_v11 = vpop.eup %13962  ;;  %v4549_v55 = vadd.f32 %v16436_v29, %v20024_v19  ;;  %v16497_v0 = vadd.f32 %v16273_v52, %v16355_v41  ;;  %13980 = vpow2.f32 %v12246_v13  ;;  %v12249_v53 = vmul.f32 -1.442695, %v5119_v34  ;;  %5645 = vrot.lane.b32.xlu1 %v16491_v7, %s14126_s24  ;;  %5643 = vrot.lane.b32.xlu0 %v16487_v18, %s14126_s24  ;;  %v13440_v24 = vpop.f32.mrf.mxu0 }
 0x229   : > { %v16503_v32 = vpop.eup %13964  ;;  %13982 = vrcp.f32 %v5234_v56  ;;  %v5237_v26 = vadd.f32 1.0, %v13961_v20  ;;  %v5053_v29 = vadd.f32 %v16303_v3, %v5014_v61  ;;  %v5051_v5 = vadd.f32 %v16303_v3, %v5012_v30 }
 0x22a   : > { %13984 = vpow2.f32 %v12244_v33  ;;  %v12247_v52 = vmul.f32 -1.442695, %v5117_v35  ;;  %v5324_v41 = vmul.f32 2.0, %v16468_v59  ;;  %v5017_v42 = vadd.f32 %v13439_v9, %v4549_v55  ;;  %v4963_v31 = vpop.f32.mrf.mxu0 }
 0x22b   : > { %v13967_v47 = vpop.eup %13966  ;;  %v4547_v21 = vadd.f32 %v16449_v14, %v20025_v62  ;;  %13986 = vrcp.f32 %v5239_v50  ;;  %v5240_v4 = vadd.f32 1.0, %v13963_v11  ;;  %v5088_v27 = vmul.f32 2.0, %v5053_v29 }
 0x22c   : > { %13988 = vpow2.f32 %v12249_v53  ;;  %v5086_v44 = vmul.f32 2.0, %v5051_v5  ;;  %v12262_v37 = vadd.f32 -1.0, %v5324_v41  ;;  %v5056_v46 = vadd.f32 %v16303_v3, %v5017_v42 }
 0x22d   : > { %v13969_v36 = vpop.eup %13968  ;;  %v4550_v1 = vadd.f32 %v16460_v12, %v20026_v6  ;;  %13990 = vrcp.f32 %v5237_v26  ;;  %v5120_v60 = vsel %vm5064_vm9, %v5053_v29, %v5088_v27  ;;  %v5325_v14 = vmul.f32 2.0, %v16479_v16  ;;  %v20029_v26 = vld [vmem:[#allocation43_spill] sm:$0xff] }
 0x22e   : > { %v16516_v28 = vpop.eup %13970  ;;  %v5238_v58 = vadd.f32 1.0, %v13967_v47  ;;  %13992 = vpow2.f32 %v12247_v52  ;;  %v12250_v2 = vmul.f32 -1.442695, %v5120_v60  ;;  %v16521_v10 = vsel %vm5064_vm9, %v16468_v59, %v12262_v37  ;;  %v13443_v59 = vpop.f32.mrf.mxu0 }
 0x22f   : > { %v13973_v40 = vpop.eup %13972  ;;  %v4548_v22 = vadd.f32 %v4495_v49, %v3824_v51  ;;  %v4553_v12 = vadd.f32 %v13405_v38, %v20027_v63  ;;  %v4551_v9 = vadd.f32 %v4508_v23, %v20028_v48  ;;  %13994 = vrcp.f32 %v5240_v4  ;;  %5647 = vrot.lane.b32.xlu1 %v16521_v10, %s14126_s24 }
 0x230   : > { %v16527_v56 = vpop.eup %13974  ;;  %v5243_v13 = vadd.f32 1.0, %v13969_v36  ;;  %v5118_v57 = vsel %vm5064_vm9, %v5051_v5, %v5086_v44  ;;  %v5091_v39 = vmul.f32 2.0, %v5056_v46  ;;  %v5015_v34 = vadd.f32 %v4960_v17, %v4547_v21  ;;  %v4976_v53 = vpop.f32.mrf.mxu0 }
 0x231   : > { %v16531_v43 = vpop.eup %13976  ;;  %13996 = vpow2.f32 %v12250_v2  ;;  %v12263_v49 = vadd.f32 -1.0, %v5325_v14  ;;  %v5327_v45 = vmul.f32 2.0, %v16475_v25  ;;  %v5018_v61 = vadd.f32 %v13440_v24, %v4550_v1  ;;  %v4511_v44 = vpop.f32.mrf.mxu1 }
 0x232   : > { %13998 = vrcp.f32 %v5238_v58  ;;  %v5241_v51 = vadd.f32 1.0, %v13973_v40  ;;  %v5123_v33 = vsel %vm5064_vm9, %v5056_v46, %v5091_v39  ;;  %v5054_v30 = vadd.f32 %v16303_v3, %v5015_v34  ;;  %v13444_v6 = vpop.f32.mrf.mxu0  ;;  %v16582_v39 = vpop.permute.xlu1 %5483 }
 0x233   : > { %v16537_v20 = vpop.eup %13978  ;;  %v12248_v50 = vmul.f32 -1.442695, %v5118_v57  ;;  %v12253_v17 = vmul.f32 -1.442695, %v5123_v33  ;;  %v12265_v35 = vadd.f32 -1.0, %v5327_v45  ;;  %v5057_v11 = vadd.f32 %v16303_v3, %v5018_v61 }
 0x234   : > { %14000 = vrcp.f32 %v5243_v13  ;;  %v5089_v19 = vmul.f32 2.0, %v5054_v30  ;;  %v5016_v55 = vadd.f32 %v4963_v31, %v4548_v22  ;;  %v5328_v38 = vmul.f32 2.0, %v16503_v32 }
 0x235   : > { %v13981_v24 = vpop.eup %13980  ;;  %v4554_v29 = vadd.f32 %v13406_v8, %v20029_v26  ;;  %14002 = vpow2.f32 %v12253_v17  ;;  %v5326_v5 = vmul.f32 2.0, %v16516_v28  ;;  %v16546_v52 = vsel %vm5064_vm9, %v16475_v25, %v12265_v35 }
 0x236   : > { %v16548_v41 = vpop.eup %13982  ;;  %14004 = vrcp.f32 %v5241_v51  ;;  %v5121_v42 = vsel %vm5064_vm9, %v5054_v30, %v5089_v19  ;;  %v5092_v47 = vmul.f32 2.0, %v5057_v11  ;;  %v5055_v62 = vadd.f32 %v16303_v3, %v5016_v55  ;;  %5653 = vrot.lane.b32.xlu0 %v16546_v52, %s14126_s24  ;;  %v16591_v51 = vpop.permute.xlu0 %5481 }
 0x237   : > { %v13985_v21 = vpop.eup %13984  ;;  %14006 = vpow2.f32 %v12248_v50  ;;  %v16558_v4 = vsel %vm5064_vm9, %v16479_v16, %v12263_v49  ;;  %v12251_v25 = vmul.f32 -1.442695, %v5121_v42  ;;  %v12266_v27 = vadd.f32 -1.0, %v5328_v38  ;;  %v4979_v49 = vpop.f32.mrf.mxu0 }
 0x238   : > { %v16560_v23 = vpop.eup %13986  ;;  %v5244_v37 = vadd.f32 1.0, %v13981_v24  ;;  %v5124_v46 = vsel %vm5064_vm9, %v5057_v11, %v5092_v47  ;;  %v5090_v31 = vmul.f32 2.0, %v5055_v62  ;;  %v5021_v36 = vadd.f32 %v13443_v59, %v4553_v12 }
 0x239   : > { %v13989_v1 = vpop.eup %13988  ;;  %v12264_v60 = vadd.f32 -1.0, %v5326_v5  ;;  %v12254_v14 = vmul.f32 -1.442695, %v5124_v46  ;;  %v16567_v16 = vsel %vm5064_vm9, %v16503_v32, %v12266_v27  ;;  %v5019_v58 = vadd.f32 %v4976_v53, %v4551_v9 }
 0x23a   : > { %v16569_v2 = vpop.eup %13990  ;;  %v5242_v40 = vadd.f32 1.0, %v13985_v21  ;;  %14008 = vpow2.f32 %v12251_v25  ;;  %v5122_v22 = vsel %vm5064_vm9, %v5055_v62, %v5090_v31  ;;  %v5329_v63 = vmul.f32 2.0, %v16531_v43  ;;  %5655 = vrot.lane.b32.xlu1 %v16567_v16, %s14126_s24  ;;  %5649 = vrot.lane.b32.xlu0 %v16558_v4, %s14126_s24  ;;  %v16610_v62 = vpop.permute.xlu1 %5487 }
 0x23b   : > { %v13993_v12 = vpop.eup %13992  ;;  %v4552_v32 = vadd.f32 %v4511_v44, %v16497_v0  ;;  %14010 = vpow2.f32 %v12254_v14  ;;  %v12252_v48 = vmul.f32 -1.442695, %v5122_v22  ;;  %v5060_v9 = vadd.f32 %v16303_v3, %v5021_v36  ;;  %v16625_v46 = vpop.permute.xlu0 %5485 }
 0x23c   : > { %v16580_v13 = vpop.eup %13994  ;;  %14012 = vrcp.f32 %v5244_v37  ;;  %v5247_v57 = vadd.f32 1.0, %v13989_v1  ;;  %v5058_v34 = vadd.f32 %v16303_v3, %v5019_v58  ;;  %v5331_v59 = vmul.f32 2.0, %v16527_v56 }
 0x23d   : > { %v16589_v45 = vsel %vm5064_vm9, %v16516_v28, %v12264_v60  ;;  %14014 = vpow2.f32 %v12252_v48  ;;  %v5095_v0 = vmul.f32 2.0, %v5060_v9  ;;  %v5022_v61 = vadd.f32 %v13444_v6, %v4554_v29 }
 0x23e   : > { %v13997_v8 = vpop.eup %13996  ;;  %14016 = vrcp.f32 %v5242_v40  ;;  %v5245_v33 = vadd.f32 1.0, %v13993_v12  ;;  %v12267_v30 = vadd.f32 -1.0, %v5329_v63  ;;  %v5093_v50 = vmul.f32 2.0, %v5058_v34  ;;  %5651 = vrot.lane.b32.xlu1 %v16589_v45, %s14126_s24 }
 0x23f   : > { %v16595_v17 = vpop.eup %13998  ;;  %v5127_v35 = vsel %vm5064_vm9, %v5060_v9, %v5095_v0  ;;  %v12269_v28 = vadd.f32 -1.0, %v5331_v59  ;;  %v5061_v11 = vadd.f32 %v16303_v3, %v5022_v61  ;;  %v5020_v19 = vadd.f32 %v4979_v49, %v4552_v32  ;;  %v16639_v9 = vpop.permute.xlu1 %5491 }
 0x240   : > { %14018 = vrcp.f32 %v5247_v57  ;;  %v12257_v55 = vmul.f32 -1.442695, %v5127_v35  ;;  %v5125_v38 = vsel %vm5064_vm9, %v5058_v34, %v5093_v50  ;;  %v5330_v53 = vmul.f32 2.0, %v16548_v41  ;;  %v16643_v0 = vpop.permute.xlu0 %5489 }
 0x241   : > { %v16603_v24 = vpop.eup %14000  ;;  %v5248_v26 = vadd.f32 1.0, %v13997_v8  ;;  %v12255_v29 = vmul.f32 -1.442695, %v5125_v38  ;;  %v16608_v5 = vsel %vm5064_vm9, %v16527_v56, %v12269_v28  ;;  %v5096_v42 = vmul.f32 2.0, %v5061_v11 }
 0x242   : > { %v14003_v47 = vpop.eup %14002  ;;  %14020 = vrcp.f32 %v5245_v33  ;;  %v5059_v21 = vadd.f32 %v16303_v3, %v5020_v19  ;;  %5661 = vrot.lane.b32.xlu0 %v16608_v5, %s14126_s24  ;;  %v16620_v27 = vsel %vm5064_vm9, %v16531_v43, %v12267_v30  ;;  %v5332_v44 = vmul.f32 2.0, %v16537_v20 }
 0x243   : > { %v16615_v25 = vpop.eup %14004  ;;  %14022 = vpow2.f32 %v12257_v55  ;;  %v5128_v56 = vsel %vm5064_vm9, %v5061_v11, %v5096_v42  ;;  %v12268_v3 = vadd.f32 -1.0, %v5330_v53  ;;  %v5251_v6 = vadd.f32 1.0, %v14003_v47  ;;  %v16668_v19 = vpop.permute.xlu1 %5495 }
 0x244   : > { %v14007_v37 = vpop.eup %14006  ;;  %14024 = vpow2.f32 %v12255_v29  ;;  %v12258_v31 = vmul.f32 -1.442695, %v5128_v56  ;;  %v5094_v36 = vmul.f32 2.0, %v5059_v21  ;;  %v12270_v1 = vadd.f32 -1.0, %v5332_v44 }
 0x245   : > { %14026 = vrcp.f32 %v5248_v26  ;;  %v5335_v60 = vmul.f32 2.0, %v16560_v23  ;;  %v5333_v14 = vmul.f32 2.0, %v16569_v2  ;;  %v5336_v58 = vmul.f32 2.0, %v16580_v13 }
 0x246   : > { %14028 = vpow2.f32 %v12258_v31  ;;  %v5126_v43 = vsel %vm5064_vm9, %v5059_v21, %v5094_v36  ;;  %5657 = vrot.lane.b32.xlu0 %v16620_v27, %s14126_s24  ;;  %v5246_v22 = vadd.f32 1.0, %v14007_v37  ;;  %v16637_v12 = vsel %vm5064_vm9, %v16537_v20, %v12270_v1 }
 0x247   : > { %v14009_v40 = vpop.eup %14008  ;;  %v12256_v63 = vmul.f32 -1.442695, %v5126_v43  ;;  %v12273_v32 = vadd.f32 -1.0, %v5335_v60  ;;  %5663 = vrot.lane.b32.xlu1 %v16637_v12, %s14126_s24  ;;  %v12274_v59 = vadd.f32 -1.0, %v5336_v58  ;;  %v12271_v8 = vadd.f32 -1.0, %v5333_v14  ;;  %v16695_v60 = vpop.permute.xlu1 %5499 }
 0x248   : > { %v14011_v48 = vpop.eup %14010  ;;  %v5249_v61 = vadd.f32 1.0, %v14009_v40  ;;  %v16655_v30 = vsel %vm5064_vm9, %v16548_v41, %v12268_v3  ;;  %v5334_v50 = vmul.f32 2.0, %v16595_v17  ;;  %v5339_v35 = vmul.f32 2.0, %v16603_v24 }
 0x249   : > { %v14013_v57 = vpop.eup %14012  ;;  %v5252_v34 = vadd.f32 1.0, %v14011_v48  ;;  %14030 = vpow2.f32 %v12256_v63  ;;  %v16648_v20 = vsel %vm5064_vm9, %v16560_v23, %v12273_v32  ;;  %v16666_v11 = vsel %vm5064_vm9, %v16580_v13, %v12274_v59  ;;  %v16678_v13 = vpop.permute.xlu0 %5493 }
 0x24a   : > { %v14015_v49 = vpop.eup %14014  ;;  %14032 = vrcp.f32 %v5251_v6  ;;  %5669 = vrot.lane.b32.xlu0 %v16648_v20, %s14126_s24  ;;  %v5340_v41 = vmul.f32 2.0, %v14013_v57  ;;  %v16673_v55 = vsel %vm5064_vm9, %v16569_v2, %v12271_v8  ;;  %v5337_v38 = vmul.f32 2.0, %v16615_v25 }
 0x24b   : > { %v16650_v33 = vpop.eup %14016  ;;  %14034 = vrcp.f32 %v5246_v22  ;;  %5659 = vrot.lane.b32.xlu1 %v16655_v30, %s14126_s24  ;;  %v5250_v28 = vadd.f32 1.0, %v14015_v49  ;;  %v12277_v53 = vadd.f32 -1.0, %v5339_v35  ;;  %v12272_v29 = vadd.f32 -1.0, %v5334_v50 }
 0x24c   : > { %14036 = vrcp.f32 %v5252_v34  ;;  %v12278_v56 = vadd.f32 -1.0, %v5340_v41  ;;  %v12275_v37 = vadd.f32 -1.0, %v5337_v38  ;;  %v5338_v1 = vmul.f32 2.0, %v16650_v33 }
 0x24d   : > { %v14019_v23 = vpop.eup %14018  ;;  %14038 = vrcp.f32 %v5249_v61  ;;  %v16685_v3 = vsel %vm5064_vm9, %v16603_v24, %v12277_v53  ;;  %v16690_v6 = vsel %vm5064_vm9, %v16595_v17, %v12272_v29  ;;  %v16703_v17 = vpop.permute.xlu0 %5497 }
 0x24e   : > { %5665 = vrot.lane.b32.xlu0 %v16673_v55, %s14126_s24  ;;  %14040 = vrcp.f32 %v5250_v28  ;;  %v5343_v31 = vmul.f32 2.0, %v14019_v23  ;;  %v16701_v24 = vsel %vm5064_vm9, %v14013_v57, %v12278_v56  ;;  %v16708_v40 = vsel %vm5064_vm9, %v16615_v25, %v12275_v37  ;;  %v16714_v61 = vpop.permute.xlu1 %5503 }
 0x24f   : > { %v14021_v26 = vpop.eup %14020  ;;  %5671 = vrot.lane.b32.xlu1 %v16666_v11, %s14126_s24  ;;  %v12276_v34 = vadd.f32 -1.0, %v5338_v1 }
 0x250   : > { %v14023_v42 = vpop.eup %14022  ;;  %v5341_v22 = vmul.f32 2.0, %v14021_v26  ;;  %v12281_v63 = vadd.f32 -1.0, %v5343_v31 }
 0x251   : > { %v14025_v47 = vpop.eup %14024  ;;  %v5255_v21 = vadd.f32 1.0, %v14023_v42  ;;  %v16723_v28 = vsel %vm5064_vm9, %v16650_v33, %v12276_v34  ;;  %v16727_v38 = vpop.permute.xlu0 %5501 }
 0x252   : > { %v14027_v2 = vpop.eup %14026  ;;  %v5253_v44 = vadd.f32 1.0, %v14025_v47  ;;  %5677 = vrot.lane.b32.xlu0 %v16685_v3, %s14126_s24  ;;  %v12279_v8 = vadd.f32 -1.0, %v5341_v22  ;;  %v16718_v25 = vsel %vm5064_vm9, %v14019_v23, %v12281_v63 }
 0x253   : > { %v14029_v36 = vpop.eup %14028  ;;  %14042 = vrcp.f32 %v5255_v21  ;;  %5667 = vrot.lane.b32.xlu1 %v16690_v6, %s14126_s24  ;;  %v5344_v14 = vmul.f32 2.0, %v14027_v2 }
 0x254   : > { %v5256_v43 = vadd.f32 1.0, %v14029_v36  ;;  %14044 = vrcp.f32 %v5253_v44  ;;  %v16737_v42 = vsel %vm5064_vm9, %v14021_v26, %v12279_v8  ;;  %v16741_v44 = vpop.permute.xlu1 %5507 }
 0x255   : > { %v12282_v59 = vadd.f32 -1.0, %v5344_v14  ;;  %v16745_v31 = vpop.permute.xlu0 %5505 }
 0x256   : > { %v14031_v58 = vpop.eup %14030  ;;  %14046 = vrcp.f32 %v5256_v43  ;;  %5673 = vrot.lane.b32.xlu0 %v16708_v40, %s14126_s24 }
 0x257   : > { %v14033_v32 = vpop.eup %14032  ;;  %v5254_v48 = vadd.f32 1.0, %v14031_v58  ;;  %5679 = vrot.lane.b32.xlu1 %v16701_v24, %s14126_s24  ;;  %v16733_v23 = vsel %vm5064_vm9, %v14027_v2, %v12282_v59 }
 0x258   : > { %v14035_v57 = vpop.eup %14034  ;;  %v5347_v50 = vmul.f32 2.0, %v14033_v32 }
 0x259   : > { %v14037_v49 = vpop.eup %14036  ;;  %14048 = vrcp.f32 %v5254_v48  ;;  %v5342_v41 = vmul.f32 2.0, %v14035_v57 }
 0x25a   : > { %v14039_v35 = vpop.eup %14038  ;;  %5685 = vrot.lane.b32.xlu0 %v16718_v25, %s14126_s24  ;;  %v5348_v53 = vmul.f32 2.0, %v14037_v49  ;;  %v12285_v47 = vadd.f32 -1.0, %v5347_v50  ;;  %v16771_v50 = vpop.permute.xlu0 %5509 }
 0x25b   : > { %5675 = vrot.lane.b32.xlu1 %v16723_v28, %s14126_s24  ;;  %v14041_v29 = vpop.eup %14040  ;;  %v5345_v33 = vmul.f32 2.0, %v14039_v35  ;;  %v12280_v21 = vadd.f32 -1.0, %v5342_v41 }
 0x25c   : > { %v12286_v2 = vadd.f32 -1.0, %v5348_v53  ;;  %v16749_v26 = vsel %vm5064_vm9, %v14033_v32, %v12285_v47  ;;  %v5346_v58 = vmul.f32 2.0, %v14041_v29  ;;  %v16763_v32 = vpop.permute.xlu1 %5511 }
 0x25d   : > { %v12283_v36 = vadd.f32 -1.0, %v5345_v33  ;;  %v16753_v14 = vsel %vm5064_vm9, %v14035_v57, %v12280_v21 }
 0x25e   : > { %5681 = vrot.lane.b32.xlu0 %v16737_v42, %s14126_s24  ;;  %20030 = vst [vmem:[#allocation15_spill] sm:$0xff] %v16753_v14  ;;  %v16761_v22 = vsel %vm5064_vm9, %v14037_v49, %v12286_v2  ;;  %v12284_v59 = vadd.f32 -1.0, %v5346_v58  ;;  %v16793_v2 = vpop.permute.xlu0 %5513 }
 0x25f   : > { %5687 = vrot.lane.b32.xlu1 %v16733_v23, %s14126_s24  ;;  %v16767_v48 = vsel %vm5064_vm9, %v14039_v35, %v12283_v36 }
 0x260   : > { %v14043_v56 = vpop.eup %14042  ;;  %v16781_v35 = vsel %vm5064_vm9, %v14041_v29, %v12284_v59  ;;  %v16785_v47 = vpop.permute.xlu1 %5515 }
 0x261   : > { %v14045_v37 = vpop.eup %14044  ;;  %v5351_v1 = vmul.f32 2.0, %v14043_v56 }
 0x262   : > { %5693 = vrot.lane.b32.xlu0 %v16749_v26, %s14126_s24  ;;  %v5349_v34 = vmul.f32 2.0, %v14045_v37 }
 0x263   : > { %v14047_v43 = vpop.eup %14046  ;;  %5683 = vrot.lane.b32.xlu1 %v16753_v14, %s14126_s24  ;;  %v12289_v57 = vadd.f32 -1.0, %v5351_v1 }
 0x264   : > { %v5352_v63 = vmul.f32 2.0, %v14047_v43  ;;  %v12287_v41 = vadd.f32 -1.0, %v5349_v34  ;;  %v16803_v36 = vpop.permute.xlu1 %5519 }
 0x265   : > { %v16777_v53 = vsel %vm5064_vm9, %v14043_v56, %v12289_v57 }
 0x266   : > { %5689 = vrot.lane.b32.xlu0 %v16767_v48, %s14126_s24  ;;  %v14049_v8 = vpop.eup %14048  ;;  %v12290_v49 = vadd.f32 -1.0, %v5352_v63  ;;  %v16797_v56 = vsel %vm5064_vm9, %v14045_v37, %v12287_v41 }
 0x267   : > { %5695 = vrot.lane.b32.xlu1 %v16761_v22, %s14126_s24  ;;  %v5350_v33 = vmul.f32 2.0, %v14049_v8 }
 0x268   : > { %v16791_v21 = vsel %vm5064_vm9, %v14047_v43, %v12290_v49  ;;  %v16809_v43 = vpop.permute.xlu0 %5517  ;;  %v16813_v37 = vpop.permute.xlu1 %5523 }
 0x269   : > { %v12288_v29 = vadd.f32 -1.0, %v5350_v33  ;;  %20031 = vst [vmem:[#allocation9_spill] sm:$0xff] %v16813_v37 }
 0x26a   : > { %5701 = vrot.lane.b32.xlu0 %v16777_v53, %s14126_s24 }
 0x26b   : > { %5691 = vrot.lane.b32.xlu1 %v16781_v35, %s14126_s24  ;;  %v16807_v1 = vsel %vm5064_vm9, %v14049_v8, %v12288_v29 }
 0x26c   : > { %v16815_v58 = vpop.permute.xlu0 %5521  ;;  %v16817_v63 = vpop.permute.xlu1 %5527 }
 0x26d   : > { %20032 = vst [vmem:[#allocation22_spill] sm:$0xff] %v16815_v58  ;;  %20033 = vst [vmem:[#allocation16_spill] sm:$0xff] %v16817_v63 }
 0x26e   : > { %5697 = vrot.lane.b32.xlu0 %v16797_v56, %s14126_s24 }
 0x26f   : > { %5703 = vrot.lane.b32.xlu1 %v16791_v21, %s14126_s24 }
 0x270   : > { %v16819_v34 = vpop.permute.xlu0 %5525  ;;  %v16821_v57 = vpop.permute.xlu1 %5531 }
 0x271   : > { %20034 = vst [vmem:[#allocation38_spill] sm:$0xff] %v16821_v57 }
 0x273   : > { %5699 = vrot.lane.b32.xlu1 %v16807_v1, %s14126_s24 }
 0x274   : > { %v16823_v59 = vpop.permute.xlu0 %5529  ;;  %v16825_v54 = vpop.permute.xlu1 %5535 }
 0x275   : > { %20035 = vst [vmem:[#allocation30_spill] sm:$0xff] %v16823_v59  ;;  %20036 = vst [vmem:[#allocation24_spill] sm:$0xff] %v16825_v54 }
 0x278   : > { %v16827_v8 = vpop.permute.xlu0 %5533  ;;  %v16829_v49 = vpop.permute.xlu1 %5539 }
 0x279   : > { %20037 = vst [vmem:[#allocation37_spill] sm:$0xff] %v16829_v49 }
 0x27c   : > { %v16831_v41 = vpop.permute.xlu0 %5537  ;;  %v16833_v33 = vpop.permute.xlu1 %5543 }
 0x27d   : > { %20038 = vst [vmem:[#allocation33_spill] sm:$0xff] %v16831_v41  ;;  %20039 = vst [vmem:[#allocation12_spill] sm:$0xff] %v16833_v33 }
 0x280   : > { %v16835_v29 = vpop.permute.xlu0 %5541 }
 0x281   : > { %20040 = vst [vmem:[#allocation6_spill] sm:$0xff] %v16835_v29 }
 0x295   : > { %v5642_v58 = vpop.permute.xlu0 %5641 }
 0x296   : > { %v5737_v57 = vmul.f32 %v5642_v58, %v16466_v15 }
 0x29a   : > { %v5646_v37 = vpop.permute.xlu1 %5645  ;;  %v5644_v49 = vpop.permute.xlu0 %5643 }
 0x29b   : > { %v5739_v63 = vmul.f32 %v5646_v37, %v16491_v7  ;;  %v5738_v33 = vmul.f32 %v5644_v49, %v16487_v18 }
 0x29d   : > { %5805 = vrot.lane.b32.xlu0 %v5739_v63, %s14126_s24 }
 0x2a1   : > { %v5648_v59 = vpop.permute.xlu1 %5647  ;;  %5801 = vrot.lane.b32.xlu0 %v5737_v57, %s14126_s24 }
 0x2a2   : > { %v5740_v54 = vmul.f32 %v5648_v59, %v16521_v10 }
 0x2a4   : > { %5807 = vrot.lane.b32.xlu1 %v5740_v54, %s14126_s24 }
 0x2a8   : > { %v5654_v41 = vpop.permute.xlu0 %5653  ;;  %5803 = vrot.lane.b32.xlu1 %v5738_v33, %s14126_s24 }
 0x2a9   : > { %v5743_v37 = vmul.f32 %v5654_v41, %v16546_v52 }
 0x2ab   : > { %5813 = vrot.lane.b32.xlu0 %v5743_v37, %s14126_s24 }
 0x2ac   : > { %v5656_v63 = vpop.permute.xlu1 %5655  ;;  %v5650_v29 = vpop.permute.xlu0 %5649 }
 0x2ad   : > { %v5744_v58 = vmul.f32 %v5656_v63, %v16567_v16  ;;  %v5741_v57 = vmul.f32 %v5650_v29, %v16558_v4 }
 0x2af   : > { %5815 = vrot.lane.b32.xlu1 %v5744_v58, %s14126_s24  ;;  %5809 = vrot.lane.b32.xlu0 %v5741_v57, %s14126_s24 }
 0x2b0   : > { %v5652_v59 = vpop.permute.xlu1 %5651 }
 0x2b1   : > { %v5742_v54 = vmul.f32 %v5652_v59, %v16589_v45 }
 0x2b3   : > { %5811 = vrot.lane.b32.xlu1 %v5742_v54, %s14126_s24 }
 0x2b4   : > { %v5662_v49 = vpop.permute.xlu0 %5661 }
 0x2b5   : > { %v5747_v41 = vmul.f32 %v5662_v49, %v16608_v5 }
 0x2b7   : > { %5821 = vrot.lane.b32.xlu0 %v5747_v41, %s14126_s24 }
 0x2b8   : > { %v5658_v33 = vpop.permute.xlu0 %5657 }
 0x2b9   : > { %v5745_v37 = vmul.f32 %v5658_v33, %v16620_v27  ;;  %v5664_v63 = vpop.permute.xlu1 %5663 }
 0x2ba   : > { %v5748_v29 = vmul.f32 %v5664_v63, %v16637_v12 }
 0x2bb   : > { %5817 = vrot.lane.b32.xlu0 %v5745_v37, %s14126_s24 }
 0x2bc   : > { %5823 = vrot.lane.b32.xlu1 %v5748_v29, %s14126_s24  ;;  %v5670_v58 = vpop.permute.xlu0 %5669 }
 0x2bd   : > { %v5660_v57 = vpop.permute.xlu1 %5659  ;;  %v5751_v59 = vmul.f32 %v5670_v58, %v16648_v20 }
 0x2be   : > { %v5746_v54 = vmul.f32 %v5660_v57, %v16655_v30 }
 0x2bf   : > { %5829 = vrot.lane.b32.xlu0 %v5751_v59, %s14126_s24 }
 0x2c0   : > { %5819 = vrot.lane.b32.xlu1 %v5746_v54, %s14126_s24  ;;  %v5666_v49 = vpop.permute.xlu0 %5665 }
 0x2c1   : > { %v5672_v41 = vpop.permute.xlu1 %5671  ;;  %v5749_v33 = vmul.f32 %v5666_v49, %v16673_v55 }
 0x2c2   : > { %v5752_v63 = vmul.f32 %v5672_v41, %v16666_v11 }
 0x2c3   : > { %5825 = vrot.lane.b32.xlu0 %v5749_v33, %s14126_s24 }
 0x2c4   : > { %5831 = vrot.lane.b32.xlu1 %v5752_v63, %s14126_s24  ;;  %v5678_v37 = vpop.permute.xlu0 %5677 }
 0x2c5   : > { %v5668_v29 = vpop.permute.xlu1 %5667  ;;  %v5755_v58 = vmul.f32 %v5678_v37, %v16685_v3 }
 0x2c6   : > { %v5750_v57 = vmul.f32 %v5668_v29, %v16690_v6 }
 0x2c7   : > { %5837 = vrot.lane.b32.xlu0 %v5755_v58, %s14126_s24 }
 0x2c8   : > { %5827 = vrot.lane.b32.xlu1 %v5750_v57, %s14126_s24  ;;  %v5674_v59 = vpop.permute.xlu0 %5673 }
 0x2c9   : > { %v5680_v54 = vpop.permute.xlu1 %5679  ;;  %v5753_v49 = vmul.f32 %v5674_v59, %v16708_v40 }
 0x2ca   : > { %v5756_v41 = vmul.f32 %v5680_v54, %v16701_v24 }
 0x2cb   : > { %5833 = vrot.lane.b32.xlu0 %v5753_v49, %s14126_s24 }
 0x2cc   : > { %5839 = vrot.lane.b32.xlu1 %v5756_v41, %s14126_s24  ;;  %v5686_v33 = vpop.permute.xlu0 %5685 }
 0x2cd   : > { %v5676_v63 = vpop.permute.xlu1 %5675  ;;  %v5759_v37 = vmul.f32 %v5686_v33, %v16718_v25 }
 0x2ce   : > { %v5754_v29 = vmul.f32 %v5676_v63, %v16723_v28 }
 0x2cf   : > { %5845 = vrot.lane.b32.xlu0 %v5759_v37, %s14126_s24 }
 0x2d0   : > { %5835 = vrot.lane.b32.xlu1 %v5754_v29, %s14126_s24  ;;  %v5682_v58 = vpop.permute.xlu0 %5681 }
 0x2d1   : > { %v5688_v57 = vpop.permute.xlu1 %5687  ;;  %v5757_v59 = vmul.f32 %v5682_v58, %v16737_v42 }
 0x2d2   : > { %v5760_v54 = vmul.f32 %v5688_v57, %v16733_v23 }
 0x2d3   : > { %5841 = vrot.lane.b32.xlu0 %v5757_v59, %s14126_s24 }
 0x2d4   : > { %5847 = vrot.lane.b32.xlu1 %v5760_v54, %s14126_s24  ;;  %v5694_v49 = vpop.permute.xlu0 %5693 }
 0x2d5   : > { %v5684_v41 = vpop.permute.xlu1 %5683  ;;  %v5763_v33 = vmul.f32 %v5694_v49, %v16749_v26 }
 0x2d6   : > { %v5758_v63 = vmul.f32 %v5684_v41, %v16753_v14 }
 0x2d7   : > { %5853 = vrot.lane.b32.xlu0 %v5763_v33, %s14126_s24 }
 0x2d8   : > { %5843 = vrot.lane.b32.xlu1 %v5758_v63, %s14126_s24  ;;  %v5690_v37 = vpop.permute.xlu0 %5689 }
 0x2d9   : > { %v5696_v29 = vpop.permute.xlu1 %5695  ;;  %v5761_v58 = vmul.f32 %v5690_v37, %v16767_v48 }
 0x2da   : > { %v5764_v57 = vmul.f32 %v5696_v29, %v16761_v22 }
 0x2db   : > { %5849 = vrot.lane.b32.xlu0 %v5761_v58, %s14126_s24 }
 0x2dc   : > { %5855 = vrot.lane.b32.xlu1 %v5764_v57, %s14126_s24  ;;  %v5702_v59 = vpop.permute.xlu0 %5701  ;;  %v5579_v57 = vmul.f32 %v16625_v46, %v16491_v7 }
 0x2dd   : > { %v5692_v54 = vpop.permute.xlu1 %5691  ;;  %v5767_v14 = vmul.f32 %v5702_v59, %v16777_v53  ;;  %v5577_v59 = vmul.f32 %v16591_v51, %v16466_v15 }
 0x2de   : > { %v5762_v49 = vmul.f32 %v5692_v54, %v16781_v35 }
 0x2e0   : > { %5851 = vrot.lane.b32.xlu1 %v5762_v49, %s14126_s24  ;;  %v5698_v41 = vpop.permute.xlu0 %5697 }
 0x2e1   : > { %v5704_v33 = vpop.permute.xlu1 %5703  ;;  %v5765_v63 = vmul.f32 %v5698_v41, %v16797_v56 }
 0x2e2   : > { %v5768_v37 = vmul.f32 %v5704_v33, %v16791_v21  ;;  %v5580_v33 = vmul.f32 %v16610_v62, %v16521_v10  ;;  %v5584_v62 = vmul.f32 %v16668_v19, %v16567_v16  ;;  %v5587_v19 = vmul.f32 %v16727_v38, %v16608_v5 }
 0x2e3   : > { %5857 = vrot.lane.b32.xlu0 %v5765_v63, %s14126_s24 }
 0x2e4   : > { %5861 = vrot.lane.b32.xlu1 %v5767_v14, %s14126_s24 }
 0x2e5   : > { %v5700_v29 = vpop.permute.xlu1 %5699 }
 0x2e6   : > { %v5766_v58 = vmul.f32 %v5700_v29, %v16807_v1 }
 0x2e7   : > { %5863 = vrot.lane.b32.xlu0 %v5768_v37, %s14126_s24  ;;  %v5578_v37 = vmul.f32 %v16582_v39, %v16487_v18 }
 0x2e8   : > { %5859 = vrot.lane.b32.xlu1 %v5766_v58, %s14126_s24 }
 0x30f   : > { %v5806_v54 = vpop.permute.xlu0 %5805 }
 0x310   : > { %v5899_v49 = vadd.f32 %v5806_v54, %v5579_v57  ;;  %v5583_v57 = vmul.f32 %v16678_v13, %v16546_v52  ;;  %v5582_v13 = vmul.f32 %v16639_v9, %v16589_v45  ;;  %v5585_v9 = vmul.f32 %v16703_v17, %v16620_v27 }
 0x311   : > { %v5586_v17 = vmul.f32 %v16695_v60, %v16655_v30 }
 0x312   : > { %14050 = vtanh.f32 %v5899_v49 }
 0x313   : > { %v5802_v41 = vpop.permute.xlu0 %5801 }
 0x314   : > { %v5897_v14 = vadd.f32 %v5802_v41, %v5577_v59  ;;  %v5581_v59 = vmul.f32 %v16643_v0, %v16558_v4 }
 0x316   : > { %14052 = vtanh.f32 %v5897_v14  ;;  %v5808_v63 = vpop.permute.xlu1 %5807 }
 0x317   : > { %v5900_v29 = vadd.f32 %v5808_v63, %v5580_v33 }
 0x319   : > { %14054 = vtanh.f32 %v5900_v29 }
 0x31a   : > { %v5804_v58 = vpop.permute.xlu1 %5803 }
 0x31b   : > { %v5898_v46 = vadd.f32 %v5804_v58, %v5578_v37 }
 0x31d   : > { %14056 = vtanh.f32 %v5898_v46  ;;  %v5814_v51 = vpop.permute.xlu0 %5813 }
 0x31e   : > { %v5903_v54 = vadd.f32 %v5814_v51, %v5583_v57 }
 0x31f   : > { %v14051_v49 = vpop.eup %14050 }
 0x320   : > { %14058 = vtanh.f32 %v5903_v54  ;;  %5997 = vrot.lane.b32.xlu0 %v14051_v49, %s14126_s24  ;;  %v5588_v49 = vmul.f32 %v16714_v61, %v16637_v12 }
 0x321   : > { %v5816_v39 = vpop.permute.xlu1 %5815  ;;  %v5810_v41 = vpop.permute.xlu0 %5809 }
 0x322   : > { %v5904_v14 = vadd.f32 %v5816_v39, %v5584_v62  ;;  %v5901_v33 = vadd.f32 %v5810_v41, %v5581_v59  ;;  %v5591_v41 = vmul.f32 %v16771_v50, %v16648_v20  ;;  %v5592_v50 = vmul.f32 %v16763_v32, %v16666_v11 }
 0x323   : > { %v14053_v63 = vpop.eup %14052 }
 0x324   : > { %14060 = vtanh.f32 %v5904_v14  ;;  %5993 = vrot.lane.b32.xlu0 %v14053_v63, %s14126_s24 }
 0x325   : > { %14062 = vtanh.f32 %v5901_v33  ;;  %v5812_v29 = vpop.permute.xlu1 %5811 }
 0x326   : > { %v14055_v0 = vpop.eup %14054  ;;  %v5902_v37 = vadd.f32 %v5812_v29, %v5582_v13 }
 0x327   : > { %5999 = vrot.lane.b32.xlu1 %v14055_v0, %s14126_s24  ;;  %v5589_v0 = vmul.f32 %v16745_v31, %v16673_v55 }
 0x328   : > { %14064 = vtanh.f32 %v5902_v37 }
 0x329   : > { %v5822_v58 = vpop.permute.xlu0 %5821 }
 0x32a   : > { %v14057_v46 = vpop.eup %14056  ;;  %v5907_v57 = vadd.f32 %v5822_v58, %v5587_v19 }
 0x32b   : > { %5995 = vrot.lane.b32.xlu1 %v14057_v46, %s14126_s24 }
 0x32c   : > { %14066 = vtanh.f32 %v5907_v57  ;;  %v5595_v57 = vmul.f32 %v16809_v43, %v16685_v3 }
 0x32d   : > { %v14059_v51 = vpop.eup %14058  ;;  %v5818_v54 = vpop.permute.xlu0 %5817 }
 0x32e   : > { %v5905_v59 = vadd.f32 %v5818_v54, %v5585_v9  ;;  %6005 = vrot.lane.b32.xlu0 %v14059_v51, %s14126_s24  ;;  %v5824_v62 = vpop.permute.xlu1 %5823  ;;  %v5590_v9 = vmul.f32 %v16741_v44, %v16690_v6 }
 0x32f   : > { %v5908_v38 = vadd.f32 %v5824_v62, %v5588_v49  ;;  %v5596_v62 = vmul.f32 %v16803_v36, %v16701_v24 }
 0x330   : > { %14068 = vtanh.f32 %v5905_v59  ;;  %v5593_v59 = vmul.f32 %v16793_v2, %v16708_v40  ;;  %v5594_v2 = vmul.f32 %v16785_v47, %v16723_v28 }
 0x331   : > { %v14061_v39 = vpop.eup %14060  ;;  %14070 = vtanh.f32 %v5908_v38  ;;  %v5830_v33 = vpop.permute.xlu0 %5829 }
 0x332   : > { %v14063_v14 = vpop.eup %14062  ;;  %6007 = vrot.lane.b32.xlu1 %v14061_v39, %s14126_s24  ;;  %v5820_v63 = vpop.permute.xlu1 %5819  ;;  %v5911_v61 = vadd.f32 %v5830_v33, %v5591_v41 }
 0x333   : > { %6001 = vrot.lane.b32.xlu0 %v14063_v14, %s14126_s24  ;;  %v5906_v13 = vadd.f32 %v5820_v63, %v5586_v17  ;;  %v5599_v14 = vmul.f32 %v16819_v34, %v16718_v25 }
 0x334   : > { %14072 = vtanh.f32 %v5911_v61 }
 0x335   : > { %v14065_v29 = vpop.eup %14064  ;;  %14074 = vtanh.f32 %v5906_v13  ;;  %v5826_v37 = vpop.permute.xlu0 %5825 }
 0x336   : > { %6003 = vrot.lane.b32.xlu1 %v14065_v29, %s14126_s24  ;;  %v5832_v60 = vpop.permute.xlu1 %5831  ;;  %v5909_v19 = vadd.f32 %v5826_v37, %v5589_v0  ;;  %v20041_v29 = vld [vmem:[#allocation22_spill] sm:$0xff] }
 0x337   : > { %v5912_v58 = vadd.f32 %v5832_v60, %v5592_v50  ;;  %v5597_v0 = vmul.f32 %v20041_v29, %v16737_v42  ;;  %v20042_v50 = vld [vmem:[#allocation16_spill] sm:$0xff] }
 0x338   : > { %14076 = vtanh.f32 %v5909_v19  ;;  %v5600_v37 = vmul.f32 %v20042_v50, %v16733_v23  ;;  %v20048_v50 = vld [vmem:[#allocation33_spill] sm:$0xff] }
 0x339   : > { %v14067_v46 = vpop.eup %14066  ;;  %14078 = vtanh.f32 %v5912_v58  ;;  %v5838_v31 = vpop.permute.xlu0 %5837 }
 0x33a   : > { %6013 = vrot.lane.b32.xlu0 %v14067_v46, %s14126_s24  ;;  %v5828_v32 = vpop.permute.xlu1 %5827  ;;  %v5915_v51 = vadd.f32 %v5838_v31, %v5595_v57  ;;  %v5603_v57 = vmul.f32 %v16827_v8, %v16749_v26  ;;  %v20043_v31 = vld [vmem:[#allocation15_spill] sm:$0xff] }
 0x33b   : > { %v5910_v54 = vadd.f32 %v5828_v32, %v5590_v9  ;;  %v20044_v32 = vld [vmem:[#allocation9_spill] sm:$0xff] }
 0x33c   : > { %14080 = vtanh.f32 %v5915_v51  ;;  %v5598_v51 = vmul.f32 %v20044_v32, %v20043_v31 }
 0x33d   : > { %v14069_v49 = vpop.eup %14068  ;;  %14082 = vtanh.f32 %v5910_v54  ;;  %v5834_v43 = vpop.permute.xlu0 %5833 }
 0x33e   : > { %6009 = vrot.lane.b32.xlu0 %v14069_v49, %s14126_s24  ;;  %v14071_v44 = vpop.eup %14070  ;;  %v5840_v38 = vpop.permute.xlu1 %5839  ;;  %v5913_v39 = vadd.f32 %v5834_v43, %v5593_v59 }
 0x33f   : > { %v5916_v41 = vadd.f32 %v5840_v38, %v5596_v62  ;;  %6015 = vrot.lane.b32.xlu1 %v14071_v44, %s14126_s24  ;;  %v20045_v44 = vld [vmem:[#allocation30_spill] sm:$0xff] }
 0x340   : > { %14084 = vtanh.f32 %v5913_v39  ;;  %v5601_v38 = vmul.f32 %v20045_v44, %v16767_v48  ;;  %v20046_v39 = vld [vmem:[#allocation24_spill] sm:$0xff] }
 0x341   : > { %v14073_v17 = vpop.eup %14072  ;;  %14086 = vtanh.f32 %v5916_v41  ;;  %v5846_v36 = vpop.permute.xlu0 %5845  ;;  %v5604_v41 = vmul.f32 %v20046_v39, %v16761_v22  ;;  %v13856_v39 = vld [vmem:[%s19858_s5 + $0x18] sm:$0xff]  }
 0x342   : > { %v14075_v33 = vpop.eup %14074  ;;  %v5836_v63 = vpop.permute.xlu1 %5835  ;;  %v5919_v61 = vadd.f32 %v5846_v36, %v5599_v14  ;;  %6021 = vrot.lane.b32.xlu0 %v14073_v17, %s14126_s24  ;;  %13445 = vmatprep.subr.bf16.mxu1 %v13856_v39 }
 0x343   : > { %v5914_v13 = vadd.f32 %v5836_v63, %v5594_v2  ;;  %6011 = vrot.lane.b32.xlu1 %v14075_v33, %s14126_s24  ;;  %13446 = vmatpush3.bf16.msra.mxu1 %v13856_v39 }
 0x344   : > { %14088 = vtanh.f32 %v5919_v61  ;;  %v20047_v61 = vld [vmem:[#allocation38_spill] sm:$0xff] }
 0x345   : > { %v14077_v34 = vpop.eup %14076  ;;  %14090 = vtanh.f32 %v5914_v13  ;;  %v5842_v47 = vpop.permute.xlu0 %5841  ;;  %v5602_v13 = vmul.f32 %v20047_v61, %v16781_v35  ;;  %v20052_v61 = vmov 0 }
 0x346   : > { %v14079_v60 = vpop.eup %14078  ;;  %v5848_v19 = vpop.permute.xlu1 %5847  ;;  %v5917_v58 = vadd.f32 %v5842_v47, %v5597_v0  ;;  %6017 = vrot.lane.b32.xlu0 %v14077_v34, %s14126_s24  ;;  %v20053_v61 = vsel %vm17011_vm14, 4294967295, %v20052_v61 }
 0x347   : > { %v5920_v46 = vadd.f32 %v5848_v19, %v5600_v37  ;;  %6023 = vrot.lane.b32.xlu1 %v14079_v60, %s14126_s24  ;;  %v5605_v37 = vmul.f32 %v20048_v50, %v16797_v56  ;;  %20054 = vst [vmem:[#allocation7_spill] sm:$0xff] %v20053_v61 }
 0x348   : > { %14092 = vtanh.f32 %v5917_v58 }
 0x349   : > { %v14081_v9 = vpop.eup %14080  ;;  %14094 = vtanh.f32 %v5920_v46  ;;  %v5854_v54 = vpop.permute.xlu0 %5853 }
 0x34a   : > { %v14083_v49 = vpop.eup %14082  ;;  %v5844_v59 = vpop.permute.xlu1 %5843  ;;  %v5923_v62 = vadd.f32 %v5854_v54, %v5603_v57  ;;  %6029 = vrot.lane.b32.xlu0 %v14081_v9, %s14126_s24  ;;  %v20049_v9 = vld [vmem:[#allocation37_spill] sm:$0xff] }
 0x34b   : > { %v5918_v43 = vadd.f32 %v5844_v59, %v5598_v51  ;;  %6019 = vrot.lane.b32.xlu1 %v14083_v49, %s14126_s24  ;;  %v5606_v32 = vmul.f32 %v20049_v9, %v16807_v1 }
 0x34c   : > { %14096 = vtanh.f32 %v5923_v62 }
 0x34d   : > { %v14085_v8 = vpop.eup %14084  ;;  %14098 = vtanh.f32 %v5918_v43  ;;  %v5850_v14 = vpop.permute.xlu0 %5849 }
 0x34e   : > { %v14087_v17 = vpop.eup %14086  ;;  %v5856_v2 = vpop.permute.xlu1 %5855  ;;  %v5921_v36 = vadd.f32 %v5850_v14, %v5601_v38  ;;  %6025 = vrot.lane.b32.xlu0 %v14085_v8, %s14126_s24 }
 0x34f   : > { %v5924_v33 = vadd.f32 %v5856_v2, %v5604_v41  ;;  %6031 = vrot.lane.b32.xlu1 %v14087_v17, %s14126_s24  ;;  %v6139_v41 = vld [vmem:[#allocation2 + $0x18] sm:$0x1]  ;;  %v6136_v2 = vld [vmem:[#allocation2 + $0xc] sm:$0x1] }
 0x350   : > { %14100 = vtanh.f32 %v5921_v36  ;;  %v6140_v14 = vsel %vm16995_vm12, 0, %v6139_v41 }
 0x351   : > { %v14089_v63 = vpop.eup %14088  ;;  %14102 = vtanh.f32 %v5924_v33  ;;  %6141 = vst [vmem:[#allocation2 + $0x18] sm:$0x1] %v6140_v14  ;;  %v6137_v33 = vsel %vm16995_vm12, 0, %v6136_v2 }
 0x352   : > { %v14091_v29 = vpop.eup %14090  ;;  %v5852_v0 = vpop.permute.xlu1 %5851  ;;  %6037 = vrot.lane.b32.xlu0 %v14089_v63, %s14126_s24  ;;  %6138 = vst [vmem:[#allocation2 + $0xc] sm:$0x1] %v6137_v33  ;;  %v14128_v33 = vmov 0  }
 0x353   : > { %v5922_v34 = vadd.f32 %v5852_v0, %v5602_v13  ;;  %6027 = vrot.lane.b32.xlu1 %v14091_v29, %s14126_s24  ;;  %v6195_v29 = vld [vmem:[#allocation2 + $0x20] sm:$0x1]  ;;  %6122 = vst.msk [vmem:[#allocation2] sm:$0xf] %vm6121_vm15, %v14128_v33  ;;  %6123 = vst.msk [vmem:[#allocation2 + $0x4] sm:$0xf] %vm6121_vm15, %v14128_v33 }
 0x354   : > { %6125 = vst.msk [vmem:[#allocation2 + $0x8] sm:$0x1] %vm6124_vm10, %v14128_v33  ;;  %6129 = vst.msk [vmem:[#allocation2 + $0xd4] sm:$0x1] %vm6124_vm10, %v14128_v33 }
 0x355   : > { %v14093_v47 = vpop.eup %14092  ;;  %14104 = vtanh.f32 %v5922_v34  ;;  %v5858_v60 = vpop.permute.xlu0 %5857  ;;  %v6196_v34 = vsel %vm17011_vm14, 0, %v6195_v29  ;;  %6127 = vst.msk [vmem:[#allocation2 + $0xcc] sm:$0xf] %vm6121_vm15, %v14128_v33  ;;  %6128 = vst.msk [vmem:[#allocation2 + $0xd0] sm:$0xf] %vm6121_vm15, %v14128_v33 }
 0x356   : > { %v14095_v19 = vpop.eup %14094  ;;  %v16980_v58 = vpop.permute.xlu1 %5861  ;;  %v5925_v46 = vadd.f32 %v5858_v60, %v5605_v37  ;;  %6033 = vrot.lane.b32.xlu0 %v14093_v47, %s14126_s24  ;;  %6197 = vst [vmem:[#allocation2 + $0x20] sm:$0x1] %v6196_v34 }
 0x357   : > { %6039 = vrot.lane.b32.xlu1 %v14095_v19, %s14126_s24 }
 0x358   : > { %14106 = vtanh.f32 %v5925_v46 }
 0x359   : > { %v14097_v57 = vpop.eup %14096  ;;  %v17004_v17 = vpop.permute.xlu0 %5863 }
 0x35a   : > { %v14099_v51 = vpop.eup %14098  ;;  %v5860_v54 = vpop.permute.xlu1 %5859  ;;  %6045 = vrot.lane.b32.xlu0 %v14097_v57, %s14126_s24 }
 0x35b   : > { %v5926_v49 = vadd.f32 %v5860_v54, %v5606_v32  ;;  %6035 = vrot.lane.b32.xlu1 %v14099_v51, %s14126_s24  ;;  %v13857_v51 = vld [vmem:[%s19858_s5 + $0x8] sm:$0xff]   ;;  %v6192_v54 = vld [vmem:[#allocation2 + $0x14] sm:$0x1] }
 0x35c   : > { %13481 = vmatprep.subr.bf16.mxu0 %v13857_v51 }
 0x35d   : > { %v14101_v59 = vpop.eup %14100  ;;  %14108 = vtanh.f32 %v5926_v49  ;;  %13482 = vmatpush3.bf16.msra.mxu0 %v13857_v51 }
 0x35e   : > { %v14103_v62 = vpop.eup %14102  ;;  %6041 = vrot.lane.b32.xlu0 %v14101_v59, %s14126_s24 }
 0x35f   : > { %6047 = vrot.lane.b32.xlu1 %v14103_v62, %s14126_s24 }
 0x362   : > { %v14105_v43 = vpop.eup %14104 }
 0x363   : > { %6043 = vrot.lane.b32.xlu1 %v14105_v43, %s14126_s24 }
 0x365   : > { %v14107_v44 = vpop.eup %14106 }
 0x366   : > { %6049 = vrot.lane.b32.xlu0 %v14107_v44, %s14126_s24 }
 0x36a   : > { %v14109_v38 = vpop.eup %14108 }
 0x36b   : > { %6051 = vrot.lane.b32.xlu1 %v14109_v38, %s14126_s24 }
 0x392   : > { %v5998_v36 = vpop.permute.xlu0 %5997 }
 0x393   : > { %v6091_v63 = vmul.f32 %v5998_v36, %v16491_v7 }
 0x395   : > { %v12716_v13 = vpack.c.bf16 %v6091_v63, %v6091_v63 }
 0x396   : > { %v5994_v0 = vpop.permute.xlu0 %5993 }
 0x397   : > { %v6359_v50 = vshrl.u32 %v12716_v13, 16  ;;  %v6089_v37 = vmul.f32 %v5994_v0, %v16466_v15  ;;  %v6362_v60 = vshll.u32 %v12716_v13, 16  ;;  %v6193_v15 = vsel %vm17011_vm14, 0, %v6192_v54  ;;  %v13858_v13 = vld [vmem:[%s19858_s5] sm:$0xff]  }
 0x398   : > { %6194 = vst [vmem:[#allocation2 + $0x14] sm:$0x1] %v6193_v15  ;;  %13483 = vmatprep.subr.bf16.mxu0 %v13858_v13  ;;  %v6198_v15 = vld [vmem:[#allocation2 + $0x2c] sm:$0x1] }
 0x399   : > { %v6361_v47 = vrot.slane %v6359_v50, 7  ;;  %v12714_v7 = vpack.c.bf16 %v6089_v37, %v6089_v37  ;;  %v6000_v19 = vpop.permute.xlu1 %5999  ;;  %13484 = vmatpush3.bf16.msra.mxu0 %v13858_v13 }
 0x39a   : > { %v6092_v46 = vmul.f32 %v6000_v19, %v16521_v10  ;;  %v6145_v10 = vld [vmem:[#allocation2 + $0x30] sm:$0x1] }
 0x39b   : > { %v6364_v57 = vor.u32 %v6362_v60, %v6361_v47  ;;  %v6342_v9 = vshrl.u32 %v12714_v7, 16  ;;  %v6345_v59 = vshll.u32 %v12714_v7, 16  ;;  %v6146_v38 = vsel %vm16995_vm12, 0, %v6145_v10  ;;  %v6142_v60 = vld [vmem:[#allocation2 + $0x24] sm:$0x1] }
 0x39c   : > { %v12717_v32 = vpack.c.bf16 %v6092_v46, %v6092_v46  ;;  %6147 = vst [vmem:[#allocation2 + $0x30] sm:$0x1] %v6146_v38  ;;  %v6365_v29 = vrot.slane %v6361_v47, 4  ;;  %v17057_v38 = vld [vmem:[#allocation2 + $0x4] sm:$0xf] }
 0x39d   : > { %v17022_v49 = vrot.slane %v6342_v9, 7  ;;  %v5996_v62 = vpop.permute.xlu1 %5995  ;;  %6619 = vrot.lane.b32.xlu1 %v6364_v57, %s14127_s9  ;;  %v6143_v57 = vsel %vm16995_vm12, 0, %v6142_v60  ;;  %v6938_v13 = vshrl.u32 %v17057_v38, 16 }
 0x39e   : > { %v6367_v43 = vshrl.u32 %v12717_v32, 16  ;;  %v6090_v44 = vmul.f32 %v5996_v62, %v16487_v18  ;;  %v6370_v14 = vshll.u32 %v12717_v32, 16  ;;  %6144 = vst [vmem:[#allocation2 + $0x24] sm:$0x1] %v6143_v57 }
 0x39f   : > { %v6347_v39 = vor.u32 %v6345_v59, %v17022_v49  ;;  %v6348_v51 = vrot.slane %v17022_v49, 4 }
 0x3a0   : > { %v6369_v41 = vrot.slane %v6367_v43, 7  ;;  %v12715_v2 = vpack.c.bf16 %v6090_v44, %v6090_v44  ;;  %v6006_v36 = vpop.permute.xlu0 %6005  ;;  %v6133_v44 = vld [vmem:[#allocation2] sm:$0x1] }
 0x3a1   : > { %v6095_v18 = vmul.f32 %v6006_v36, %v16546_v52  ;;  %6613 = vrot.lane.b32.xlu0 %v6347_v39, %s14127_s9  ;;  %v6199_v39 = vsel %vm17011_vm14, 0, %v6198_v15  ;;  %v6134_v49 = vsel %vm16995_vm12, 0, %v6133_v44 }
 0x3a2   : > { %v6372_v0 = vor.u32 %v6370_v14, %v6369_v41  ;;  %v6374_v34 = vrot.slane %v6369_v41, 4  ;;  %v6350_v50 = vshrl.u32 %v12715_v2, 16  ;;  %v6353_v7 = vshll.u32 %v12715_v2, 16  ;;  %6200 = vst [vmem:[#allocation2 + $0x2c] sm:$0x1] %v6199_v39 }
 0x3a3   : > { %v12720_v37 = vpack.c.bf16 %v6095_v18, %v6095_v18  ;;  %v6201_v2 = vld [vmem:[#allocation2 + $0x38] sm:$0x1]  ;;  %6135 = vst [vmem:[#allocation2] sm:$0x1] %v6134_v49 }
 0x3a4   : > { %v6352_v52 = vrot.slane %v6350_v50, 7  ;;  %v6008_v19 = vpop.permute.xlu1 %6007  ;;  %6623 = vrot.lane.b32.xlu1 %v6374_v34, %s14127_s9  ;;  %v6373_v46 = vsel %vm17041_vm1, %v6365_v29, %v6372_v0  ;;  %v6202_v29 = vsel %vm17011_vm14, 0, %v6201_v2  ;;  %v6189_v0 = vld [vmem:[#allocation2 + $0x8] sm:$0x1] }
 0x3a5   : > { %v6393_v9 = vshrl.u32 %v12720_v37, 16  ;;  %v6096_v47 = vmul.f32 %v6008_v19, %v16567_v16  ;;  %v6002_v32 = vpop.permute.xlu0 %6001  ;;  %6621 = vrot.lane.b32.xlu0 %v6373_v46, %s14127_s9  ;;  %6203 = vst [vmem:[#allocation2 + $0x38] sm:$0x1] %v6202_v29 }
 0x3a6   : > { %v6355_v54 = vor.u32 %v6353_v7, %v6352_v52  ;;  %v6357_v59 = vrot.slane %v6352_v52, 4  ;;  %v6093_v62 = vmul.f32 %v6002_v32, %v16558_v4  ;;  %v6396_v4 = vshll.u32 %v12720_v37, 16  ;;  %v13862_v37 = vld [vmem:[%s19858_s5 + $0x10] sm:$0xff]   ;;  %v6151_v52 = vld [vmem:[#allocation2 + $0x48] sm:$0x1] }
 0x3a7   : > { %v6395_v10 = vrot.slane %v6393_v9, 7  ;;  %v12721_v43 = vpack.c.bf16 %v6096_v47, %v6096_v47  ;;  %v6190_v7 = vsel %vm17011_vm14, 0, %v6189_v0  ;;  %v6152_v9 = vsel %vm16995_vm12, 0, %v6151_v52  ;;  %13447 = vmatprep.subr.bf16.mxu1 %v13862_v37 }
 0x3a8   : > { %v12718_v16 = vpack.c.bf16 %v6093_v62, %v6093_v62  ;;  %v6004_v41 = vpop.permute.xlu1 %6003  ;;  %v6356_v14 = vsel %vm17041_vm1, %v6348_v51, %v6355_v54  ;;  %6191 = vst [vmem:[#allocation2 + $0x8] sm:$0x1] %v6190_v7  ;;  %6153 = vst [vmem:[#allocation2 + $0x48] sm:$0x1] %v6152_v9  ;;  %v6934_v54 = vshll.u32 %v17057_v38, 16  ;;  %13448 = vmatpush3.bf16.msra.mxu1 %v13862_v37 }
 0x3a9   : > { %v6401_v36 = vshrl.u32 %v12721_v43, 16  ;;  %6615 = vrot.lane.b32.xlu1 %v6356_v14, %s14127_s9  ;;  %6617 = vrot.lane.b32.xlu0 %v6357_v59, %s14127_s9  ;;  %v6094_v18 = vmul.f32 %v6004_v41, %v16589_v45  ;;  %v6398_v34 = vor.u32 %v6396_v4, %v6395_v10  ;;  %v6404_v60 = vshll.u32 %v12721_v43, 16 }
 0x3aa   : > { %v6376_v33 = vshrl.u32 %v12718_v16, 16  ;;  %v6399_v19 = vrot.slane %v6395_v10, 4  ;;  %v6379_v32 = vshll.u32 %v12718_v16, 16  ;;  %v17084_v41 = vrot.slane %v6934_v54, 5 }
 0x3ab   : > { %v6403_v50 = vrot.slane %v6401_v36, 7  ;;  %v12719_v46 = vpack.c.bf16 %v6094_v18, %v6094_v18  ;;  %v6940_v14 = vrot.slane %v6938_v13, 4 }
 0x3ac   : > { %v6378_v45 = vrot.slane %v6376_v33, 7  ;;  %v6014_v57 = vpop.permute.xlu0 %6013 }
 0x3ad   : > { %v6406_v47 = vor.u32 %v6404_v60, %v6403_v50  ;;  %v6099_v51 = vmul.f32 %v6014_v57, %v16608_v5  ;;  %6631 = vrot.lane.b32.xlu1 %v6398_v34, %s14127_s9  ;;  %v6384_v59 = vshrl.u32 %v12719_v46, 16  ;;  %v6408_v62 = vrot.slane %v6403_v50, 4  ;;  %v6872_v5 = vld [vmem:[#allocation2] sm:$0xf] }
 0x3ae   : > { %v6381_v15 = vor.u32 %v6379_v32, %v6378_v45  ;;  %v6387_v39 = vshll.u32 %v12719_v46, 16  ;;  %v6382_v49 = vrot.slane %v6378_v45, 4  ;;  %v6925_v36 = vshrl.u32 %v6872_v5, 16 }
 0x3af   : > { %v12724_v10 = vpack.c.bf16 %v6099_v51, %v6099_v51  ;;  %v6407_v43 = vsel %vm17041_vm1, %v6399_v19, %v6406_v47  ;;  %v6386_v44 = vrot.slane %v6384_v59, 7  ;;  %v6928_v0 = vshll.u32 %v6872_v5, 16  ;;  %v17090_v7 = vld [vmem:[#allocation2 + $0x8] sm:$0x1] }
 0x3b0   : > { %v6010_v16 = vpop.permute.xlu0 %6009  ;;  %6633 = vrot.lane.b32.xlu0 %v6407_v43, %s14127_s9  ;;  %v12361_v34 = vcombine.low %v6872_v5, %v17057_v38  ;;  %v6927_v52 = vrot.slane %v6925_v36, 4  ;;  %v6941_v19 = vor.u32 %v6940_v14, %v17084_v41  ;;  %v6944_v45 = vshll.u32 %v17090_v7, 16 }
 0x3b1   : > { %v6427_v2 = vshrl.u32 %v12724_v10, 16  ;;  %v6097_v4 = vmul.f32 %v6010_v16, %v16620_v27  ;;  %6625 = vrot.lane.b32.xlu1 %v6381_v15, %s14127_s9  ;;  %v6389_v33 = vor.u32 %v6387_v39, %v6386_v44  ;;  %v6391_v18 = vrot.slane %v6386_v44, 4  ;;  %v6016_v29 = vpop.permute.xlu1 %6015 }
 0x3b2   : > { %v6100_v60 = vmul.f32 %v6016_v29, %v16637_v12  ;;  %v6430_v13 = vshll.u32 %v12724_v10, 16  ;;  %v6930_v27 = vrot.slane %v6928_v0, 5  ;;  %13485 = vmatprep.mubr.msk.bf16.mxu0 %vm7373_vm2, %v12361_v34  ;;  %v6148_v12 = vld [vmem:[#allocation2 + $0x3c] sm:$0x1]  ;;  %v6942_v44 = vrot.slane %v6941_v19, 4 }
 0x3b3   : > { %v6429_v50 = vrot.slane %v6427_v2, 7  ;;  %v12722_v37 = vpack.c.bf16 %v6097_v4, %v6097_v4  ;;  %v6390_v54 = vsel %vm17041_vm1, %v6382_v49, %v6389_v33  ;;  %v6149_v5 = vsel %vm16995_vm12, 0, %v6148_v12  ;;  %v6204_v0 = vld [vmem:[#allocation2 + $0x44] sm:$0x1] }
 0x3b4   : > { %6629 = vrot.lane.b32.xlu0 %v6391_v18, %s14127_s9  ;;  %v12725_v46 = vpack.c.bf16 %v6100_v60, %v6100_v60  ;;  %v6022_v9 = vpop.permute.xlu0 %6021  ;;  %v6931_v59 = vor.u32 %v6930_v27, %v6927_v52  ;;  %6150 = vst [vmem:[#allocation2 + $0x3c] sm:$0x1] %v6149_v5 }
 0x3b5   : > { %v6410_v57 = vshrl.u32 %v12722_v37, 16  ;;  %6635 = vrot.lane.b32.xlu1 %v6408_v62, %s14127_s9  ;;  %v6432_v47 = vor.u32 %v6430_v13, %v6429_v50  ;;  %v6012_v32 = vpop.permute.xlu1 %6011  ;;  %v6103_v51 = vmul.f32 %v6022_v9, %v16648_v20  ;;  %v6946_v62 = vrot.slane %v6944_v45, 5 }
 0x3b6   : > { %v6435_v15 = vshrl.u32 %v12725_v46, 16  ;;  %v6098_v43 = vmul.f32 %v6012_v32, %v16655_v30  ;;  %v6932_v16 = vrot.slane %v6931_v59, 4  ;;  %v6438_v20 = vshll.u32 %v12725_v46, 16 }
 0x3b7   : > { %v17100_v10 = vrot.slane %v6410_v57, 7  ;;  %v12728_v39 = vpack.c.bf16 %v6103_v51, %v6103_v51  ;;  %v6413_v2 = vshll.u32 %v12722_v37, 16  ;;  %v6433_v34 = vrot.slane %v6429_v50, 4 }
 0x3b8   : > { %6627 = vrot.lane.b32.xlu0 %v6390_v54, %s14127_s9  ;;  %v6437_v14 = vrot.slane %v6435_v15, 7  ;;  %v12723_v4 = vpack.c.bf16 %v6098_v43, %v6098_v43  ;;  %v6018_v49 = vpop.permute.xlu0 %6017  ;;  %v6937_v29 = vsel %vm14264_vm5, %v6932_v16, %v17084_v41  ;;  %v6947_v19 = vsel %vm14264_vm5, %v6942_v44, %v6946_v62 }
 0x3b9   : > { %6643 = vrot.lane.b32.xlu1 %v6432_v47, %s14127_s9  ;;  %v6461_v36 = vshrl.u32 %v12728_v39, 16  ;;  %v6024_v33 = vpop.permute.xlu1 %6023  ;;  %v6101_v30 = vmul.f32 %v6018_v49, %v16673_v55  ;;  %v6415_v52 = vor.u32 %v6413_v2, %v17100_v10  ;;  %v12327_v41 = vcombine.low %v6937_v29, %v6947_v19  ;;  %v6157_v47 = vld [vmem:[#allocation2 + $0x60] sm:$0x1] }
 0x3ba   : > { %v6440_v60 = vor.u32 %v6438_v20, %v6437_v14  ;;  %v6418_v13 = vshrl.u32 %v12723_v4, 16  ;;  %v6104_v37 = vmul.f32 %v6024_v33, %v16666_v11  ;;  %v6205_v50 = vsel %vm17011_vm14, 0, %v6204_v0  ;;  %v6207_v11 = vld [vmem:[#allocation2 + $0x50] sm:$0x1] }
 0x3bb   : > { %v12726_v27 = vpack.c.bf16 %v6101_v30, %v6101_v30  ;;  %v6463_v57 = vrot.slane %v6461_v36, 7  ;;  %6206 = vst [vmem:[#allocation2 + $0x44] sm:$0x1] %v6205_v50  ;;  %v6442_v32 = vrot.slane %v6437_v14, 4  ;;  %v6421_v51 = vshll.u32 %v12723_v4, 16  ;;  %13449 = vmatprep.mubr.msk.bf16.mxu1 %vm7373_vm2, %v12327_v41 }
 0x3bc   : > { %v6420_v45 = vrot.slane %v6418_v13, 7  ;;  %v6030_v46 = vpop.permute.xlu0 %6029  ;;  %v6441_v55 = vsel %vm17041_vm1, %v6433_v34, %v6440_v60  ;;  %v12729_v9 = vpack.c.bf16 %v6104_v37, %v6104_v37  ;;  %v6464_v43 = vshll.u32 %v12728_v39, 16  ;;  %v6210_v34 = vld [vmem:[#allocation2 + $0x5c] sm:$0x1]  ;;  %v6213_v50 = vld [vmem:[#allocation2 + $0x68] sm:$0x1] }
 0x3bd   : > { %6637 = vrot.lane.b32.xlu1 %v6415_v52, %s14127_s9  ;;  %v6020_v12 = vpop.permute.xlu1 %6019  ;;  %6645 = vrot.lane.b32.xlu0 %v6441_v55, %s14127_s9  ;;  %v6444_v54 = vshrl.u32 %v12726_v27, 16  ;;  %v6107_v16 = vmul.f32 %v6030_v46, %v16685_v3  ;;  %v6208_v2 = vsel %vm17011_vm14, 0, %v6207_v11  ;;  %v6158_v14 = vsel %vm16995_vm12, 0, %v6157_v47  ;;  %v6154_v3 = vld [vmem:[#allocation2 + $0x54] sm:$0x1] }
 0x3be   : > { %v6102_v59 = vmul.f32 %v6020_v12, %v16690_v6  ;;  %v6425_v15 = vrot.slane %v6420_v45, 4  ;;  %v6469_v44 = vshrl.u32 %v12729_v9, 16  ;;  %v6423_v62 = vor.u32 %v6421_v51, %v6420_v45  ;;  %6209 = vst [vmem:[#allocation2 + $0x50] sm:$0x1] %v6208_v2  ;;  %6159 = vst [vmem:[#allocation2 + $0x60] sm:$0x1] %v6158_v14 }
 0x3bf   : > { %v6416_v6 = vrot.slane %v17100_v10, 4  ;;  %v6466_v4 = vor.u32 %v6464_v43, %v6463_v57  ;;  %v6472_v36 = vshll.u32 %v12729_v9, 16  ;;  %v17131_v33 = vrot.slane %v6444_v54, 7  ;;  %v6163_v9 = vld [vmem:[#allocation2 + $0x78] sm:$0x1] }
 0x3c0   : > { %v12727_v5 = vpack.c.bf16 %v6102_v59, %v6102_v59  ;;  %v6026_v20 = vpop.permute.xlu0 %6025  ;;  %v6471_v49 = vrot.slane %v6469_v44, 7  ;;  %v12732_v30 = vpack.c.bf16 %v6107_v16, %v6107_v16  ;;  %v6447_v60 = vshll.u32 %v12726_v27, 16 }
 0x3c1   : > { %6647 = vrot.lane.b32.xlu1 %v6442_v32, %s14127_s9  ;;  %v6032_v39 = vpop.permute.xlu1 %6031  ;;  %6641 = vrot.lane.b32.xlu0 %v6425_v15, %s14127_s9  ;;  %v6105_v0 = vmul.f32 %v6026_v20, %v16708_v40  ;;  %v6424_v19 = vsel %vm17041_vm1, %v6416_v6, %v6423_v62  ;;  %v6155_v45 = vsel %vm16995_vm12, 0, %v6154_v3  ;;  %v6467_v40 = vrot.slane %v6463_v57, 4  ;;  %v6160_v62 = vld [vmem:[#allocation2 + $0x6c] sm:$0x1] }
 0x3c2   : > { %v6108_v29 = vmul.f32 %v6032_v39, %v16701_v24  ;;  %v6452_v52 = vshrl.u32 %v12727_v5, 16  ;;  %v6474_v10 = vor.u32 %v6472_v36, %v6471_v49  ;;  %6156 = vst [vmem:[#allocation2 + $0x54] sm:$0x1] %v6155_v45  ;;  %v6211_v24 = vsel %vm17011_vm14, 0, %v6210_v34 }
 0x3c3   : > { %v6449_v27 = vor.u32 %v6447_v60, %v17131_v33  ;;  %v6495_v55 = vshrl.u32 %v12732_v30, 16  ;;  %v12730_v41 = vpack.c.bf16 %v6105_v0, %v6105_v0  ;;  %6212 = vst [vmem:[#allocation2 + $0x5c] sm:$0x1] %v6211_v24  ;;  %v6214_v59 = vsel %vm17011_vm14, 0, %v6213_v50 }
 0x3c4   : > { %v12733_v13 = vpack.c.bf16 %v6108_v29, %v6108_v29  ;;  %v6038_v37 = vpop.permute.xlu0 %6037  ;;  %v6454_v12 = vrot.slane %v6452_v52, 7  ;;  %v6475_v51 = vsel %vm17041_vm1, %v6467_v40, %v6474_v10  ;;  %v6164_v15 = vsel %vm16995_vm12, 0, %v6163_v9  ;;  %6215 = vst [vmem:[#allocation2 + $0x68] sm:$0x1] %v6214_v59  ;;  %v17163_v29 = vld [vmem:[%s19858_s5 + $0x28] sm:$0xff]  }
 0x3c5   : > { %6655 = vrot.lane.b32.xlu1 %v6466_v4, %s14127_s9  ;;  %v6028_v46 = vpop.permute.xlu1 %6027  ;;  %6639 = vrot.lane.b32.xlu0 %v6424_v19, %s14127_s9  ;;  %v6111_v54 = vmul.f32 %v6038_v37, %v16718_v25  ;;  %v6476_v43 = vrot.slane %v6471_v49, 4  ;;  %v6455_v44 = vshll.u32 %v12727_v5, 16  ;;  %v6478_v16 = vshrl.u32 %v12730_v41, 16  ;;  %6165 = vst [vmem:[#allocation2 + $0x78] sm:$0x1] %v6164_v15 }
 0x3c6   : > { %v6503_v11 = vshrl.u32 %v12733_v13, 16  ;;  %v6106_v47 = vmul.f32 %v6028_v46, %v16723_v28  ;;  %v6497_v28 = vrot.slane %v6495_v55, 7  ;;  %v6459_v20 = vrot.slane %v6454_v12, 4  ;;  %13517 = vmatprep.subr.bf16.mxu1 %v17163_v29  ;;  %v6169_v55 = vld [vmem:[#allocation2 + $0x90] sm:$0x1] }
 0x3c7   : > { %v6457_v14 = vor.u32 %v6455_v44, %v6454_v12  ;;  %v6498_v25 = vshll.u32 %v12732_v30, 16  ;;  %v6450_v36 = vrot.slane %v17131_v33, 4  ;;  %v12736_v39 = vpack.c.bf16 %v6111_v54, %v6111_v54  ;;  %v6216_v33 = vld [vmem:[#allocation2 + $0x74] sm:$0x1]  ;;  %v6166_v54 = vld [vmem:[#allocation2 + $0x84] sm:$0x1] }
 0x3c8   : > { %v6034_v32 = vpop.permute.xlu0 %6033  ;;  %v12731_v2 = vpack.c.bf16 %v6106_v47, %v6106_v47  ;;  %v6505_v6 = vrot.slane %v6503_v11, 7  ;;  %v6161_v5 = vsel %vm16995_vm12, 0, %v6160_v62  ;;  %v6506_v0 = vshll.u32 %v12733_v13, 16 }
 0x3c9   : > { %6649 = vrot.lane.b32.xlu1 %v6449_v27, %s14127_s9  ;;  %v6040_v57 = vpop.permute.xlu1 %6039  ;;  %6657 = vrot.lane.b32.xlu0 %v6475_v51, %s14127_s9  ;;  %v6500_v30 = vor.u32 %v6498_v25, %v6497_v28  ;;  %v6109_v34 = vmul.f32 %v6034_v32, %v16737_v42  ;;  %6162 = vst [vmem:[#allocation2 + $0x6c] sm:$0x1] %v6161_v5  ;;  %v6481_v10 = vshll.u32 %v12730_v41, 16  ;;  %v6529_v45 = vshrl.u32 %v12736_v39, 16  ;;  %v6219_v27 = vld [vmem:[#allocation2 + $0x80] sm:$0x1] }
 0x3ca   : > { %v6112_v4 = vmul.f32 %v6040_v57, %v16733_v23  ;;  %v17165_v23 = vrot.slane %v6478_v16, 7  ;;  %v6486_v60 = vshrl.u32 %v12731_v2, 16  ;;  %v6508_v52 = vor.u32 %v6506_v0, %v6505_v6 }
 0x3cb   : > { %v6458_v19 = vsel %vm17041_vm1, %v6450_v36, %v6457_v14  ;;  %v6217_v13 = vsel %vm17011_vm14, 0, %v6216_v33  ;;  %v6501_v42 = vrot.slane %v6497_v28, 4  ;;  %v12734_v24 = vpack.c.bf16 %v6109_v34, %v6109_v34  ;;  %v6225_v36 = vld [vmem:[#allocation2 + $0x98] sm:$0x1] }
 0x3cc   : > { %v6046_v49 = vpop.permute.xlu0 %6045  ;;  %v12737_v37 = vpack.c.bf16 %v6112_v4, %v6112_v4  ;;  %v6483_v46 = vor.u32 %v6481_v10, %v17165_v23  ;;  %6218 = vst [vmem:[#allocation2 + $0x74] sm:$0x1] %v6217_v13  ;;  %v6488_v41 = vrot.slane %v6486_v60, 7  ;;  %v6531_v47 = vrot.slane %v6529_v45, 7  ;;  %v6172_v60 = vld [vmem:[#allocation2 + $0x9c] sm:$0x1] }
 0x3cd   : > { %6659 = vrot.lane.b32.xlu1 %v6476_v43, %s14127_s9  ;;  %v6036_v3 = vpop.permute.xlu1 %6035  ;;  %6653 = vrot.lane.b32.xlu0 %v6459_v20, %s14127_s9  ;;  %v6509_v11 = vsel %vm17041_vm1, %v6501_v42, %v6508_v52  ;;  %v6220_v32 = vsel %vm17011_vm14, 0, %v6219_v27  ;;  %v6170_v51 = vsel %vm16995_vm12, 0, %v6169_v55  ;;  %v6510_v57 = vrot.slane %v6505_v6, 4  ;;  %v6222_v43 = vld [vmem:[#allocation2 + $0x8c] sm:$0x1] }
 0x3ce   : > { %v6110_v50 = vmul.f32 %v6036_v3, %v20043_v31  ;;  %v6537_v12 = vshrl.u32 %v12737_v37, 16  ;;  %v6489_v59 = vshll.u32 %v12731_v2, 16  ;;  %v6512_v31 = vshrl.u32 %v12734_v24, 16  ;;  %6221 = vst [vmem:[#allocation2 + $0x80] sm:$0x1] %v6220_v32 }
 0x3cf   : > { %6171 = vst [vmem:[#allocation2 + $0x90] sm:$0x1] %v6170_v51  ;;  %v6493_v44 = vrot.slane %v6488_v41, 4  ;;  %v6532_v28 = vshll.u32 %v12736_v39, 16  ;;  %v6167_v25 = vsel %vm16995_vm12, 0, %v6166_v54  ;;  %v6484_v6 = vrot.slane %v17165_v23, 4 }
 0x3d0   : > { %v6042_v9 = vpop.permute.xlu0 %6041  ;;  %v12735_v16 = vpack.c.bf16 %v6110_v50, %v6110_v50  ;;  %v6491_v62 = vor.u32 %v6489_v59, %v6488_v41  ;;  %v6539_v20 = vrot.slane %v6537_v12, 7  ;;  %v6115_v4 = vmul.f32 %v6046_v49, %v16749_v26  ;;  %6168 = vst [vmem:[#allocation2 + $0x84] sm:$0x1] %v6167_v25  ;;  %v6228_v52 = vld [vmem:[#allocation2 + $0xa4] sm:$0x1]  ;;  %v20058_v51 = vld [vmem:[#allocation6_spill] sm:$0xff] }
 0x3d1   : > { %6667 = vrot.lane.b32.xlu1 %v6500_v30, %s14127_s9  ;;  %6651 = vrot.lane.b32.xlu0 %v6458_v19, %s14127_s9  ;;  %v17176_v40 = vpop.permute.xlu1 %6047  ;;  %v6113_v15 = vmul.f32 %v6042_v9, %v16767_v48  ;;  %v6534_v2 = vor.u32 %v6532_v28, %v6531_v47  ;;  %v6223_v48 = vsel %vm17011_vm14, 0, %v6222_v43  ;;  %v6540_v39 = vshll.u32 %v12737_v37, 16  ;;  %v6178_v43 = vld [vmem:[#allocation2 + $0xb4] sm:$0x1] }
 0x3d2   : > { %v6514_v3 = vrot.slane %v6512_v31, 7  ;;  %6224 = vst [vmem:[#allocation2 + $0x8c] sm:$0x1] %v6223_v48  ;;  %v6226_v30 = vsel %vm17011_vm14, 0, %v6225_v36  ;;  %v6520_v0 = vshrl.u32 %v12735_v16, 16  ;;  %v6515_v49 = vshll.u32 %v12734_v24, 16 }
 0x3d3   : > { %v12738_v5 = vpack.c.bf16 %v6113_v15, %v6113_v15  ;;  %6227 = vst [vmem:[#allocation2 + $0x98] sm:$0x1] %v6226_v30  ;;  %v6542_v26 = vor.u32 %v6540_v39, %v6539_v20  ;;  %v6492_v33 = vsel %vm17041_vm1, %v6484_v6, %v6491_v62  ;;  %v6535_v10 = vrot.slane %v6531_v47, 4 }
 0x3d4   : > { %v12740_v37 = vpack.c.bf16 %v6115_v4, %v6115_v4  ;;  %v6173_v19 = vsel %vm16995_vm12, 0, %v6172_v60  ;;  %v6517_v45 = vor.u32 %v6515_v49, %v6514_v3  ;;  %v6229_v42 = vsel %vm17011_vm14, 0, %v6228_v52 }
 0x3d5   : > { %6661 = vrot.lane.b32.xlu1 %v6483_v46, %s14127_s9  ;;  %6669 = vrot.lane.b32.xlu0 %v6509_v11, %s14127_s9  ;;  %v6044_v14 = vpop.permute.xlu1 %6043  ;;  %6174 = vst [vmem:[#allocation2 + $0x9c] sm:$0x1] %v6173_v19  ;;  %v6522_v46 = vrot.slane %v6520_v0, 7  ;;  %6230 = vst [vmem:[#allocation2 + $0xa4] sm:$0x1] %v6229_v42  ;;  %v6116_v27 = vmul.f32 %v17176_v40, %v16761_v22  ;;  %v6543_v55 = vsel %vm17041_vm1, %v6535_v10, %v6542_v26  ;;  %v20059_v26 = vld [vmem:[#allocation12_spill] sm:$0xff] }
 0x3d6   : > { %v6114_v23 = vmul.f32 %v6044_v14, %v16781_v35  ;;  %v6546_v35 = vshrl.u32 %v12738_v5, 16  ;;  %v6544_v41 = vrot.slane %v6539_v20, 4  ;;  %v6563_v50 = vshrl.u32 %v12740_v37, 16 }
 0x3d7   : > { %v6523_v12 = vshll.u32 %v12735_v16, 16  ;;  %v5607_v22 = vmul.f32 %v20058_v51, %v16777_v53  ;;  %v6527_v40 = vrot.slane %v6522_v46, 4  ;;  %v12741_v59 = vpack.c.bf16 %v6116_v27, %v6116_v27 }
 0x3d8   : > { %v6050_v34 = vpop.permute.xlu0 %6049  ;;  %v12739_v24 = vpack.c.bf16 %v6114_v23, %v6114_v23  ;;  %v6548_v11 = vrot.slane %v6546_v35, 7  ;;  %v6549_v31 = vshll.u32 %v12738_v5, 16  ;;  %v6179_v28 = vsel %vm16995_vm12, 0, %v6178_v43  ;;  %v6234_v35 = vld [vmem:[#allocation2 + $0xbc] sm:$0x1] }
 0x3d9   : > { %6671 = vrot.lane.b32.xlu1 %v6510_v57, %s14127_s9  ;;  %6665 = vrot.lane.b32.xlu0 %v6493_v44, %s14127_s9  ;;  %v6117_v13 = vmul.f32 %v6050_v34, %v16797_v56  ;;  %v6175_v56 = vld [vmem:[#allocation2 + $0xa8] sm:$0x1]  ;;  %v6525_v57 = vor.u32 %v6523_v12, %v6522_v46  ;;  %v5927_v44 = vadd.f32 %v16980_v58, %v5607_v22  ;;  %v6518_v16 = vrot.slane %v6514_v3, 4  ;;  %v6231_v58 = vld [vmem:[#allocation2 + $0xb0] sm:$0x1] }
 0x3da   : > { %v6176_v32 = vsel %vm16995_vm12, 0, %v6175_v56  ;;  %v6554_v54 = vshrl.u32 %v12739_v24, 16  ;;  %v6565_v62 = vrot.slane %v6563_v50, 7  ;;  %v6551_v20 = vor.u32 %v6549_v31, %v6548_v11  ;;  %6180 = vst [vmem:[#allocation2 + $0xb4] sm:$0x1] %v6179_v28  ;;  %v17252_v56 = vld [vmem:[%s19858_s5 + $0x38] sm:$0xff]  }
 0x3db   : > { %v12742_v47 = vpack.c.bf16 %v6117_v13, %v6117_v13  ;;  %6177 = vst [vmem:[#allocation2 + $0xa8] sm:$0x1] %v6176_v32  ;;  %v6566_v6 = vshll.u32 %v12740_v37, 16  ;;  %v6232_v48 = vsel %vm17011_vm14, 0, %v6231_v58  ;;  %14110 = vtanh.f32 %v5927_v44  ;;  %13553 = vmatprep.subr.bf16.mxu0 %v17252_v56  ;;  %v6760_v22 = vld [vmem:[#allocation2 + $0xc] sm:$0xf] }
 0x3dc   : > { %v6556_v25 = vrot.slane %v6554_v54, 7  ;;  %v6557_v39 = vshll.u32 %v12739_v24, 16  ;;  %6233 = vst [vmem:[#allocation2 + $0xb0] sm:$0x1] %v6232_v48  ;;  %v5608_v49 = vmul.f32 %v20059_v26, %v16791_v21  ;;  %v6552_v60 = vrot.slane %v6548_v11, 4 }
 0x3dd   : > { %6679 = vrot.lane.b32.xlu1 %v6534_v2, %s14127_s9  ;;  %6663 = vrot.lane.b32.xlu0 %v6492_v33, %s14127_s9  ;;  %v6052_v9 = vpop.permute.xlu1 %6051  ;;  %v6580_v14 = vshrl.u32 %v12742_v47, 16  ;;  %v6571_v2 = vshrl.u32 %v12741_v59, 16  ;;  %v6568_v36 = vor.u32 %v6566_v6, %v6565_v62  ;;  %v6583_v23 = vshll.u32 %v12742_v47, 16  ;;  %v6767_v47 = vld [vmem:[#allocation2 + $0x18] sm:$0xf] }
 0x3de   : > { %v6118_v15 = vmul.f32 %v6052_v9, %v16807_v1  ;;  %v6526_v1 = vsel %vm17041_vm1, %v6518_v16, %v6525_v57  ;;  %v6561_v5 = vrot.slane %v6556_v25, 4  ;;  %v6559_v0 = vor.u32 %v6557_v39, %v6556_v25  ;;  %v6771_v57 = vld [vmem:[#allocation2 + $0x20] sm:$0x1]  ;;  %v6764_v44 = vld [vmem:[#allocation2 + $0x14] sm:$0x1] }
 0x3df   : > { %v6582_v3 = vrot.slane %v6580_v14, 7  ;;  %v6573_v30 = vrot.slane %v6571_v2, 7  ;;  %v6574_v33 = vshll.u32 %v12741_v59, 16  ;;  %v5928_v10 = vadd.f32 %v17004_v17, %v5608_v49 }
 0x3e0   : > { %v12743_v4 = vpack.c.bf16 %v6118_v15, %v6118_v15  ;;  %v6569_v13 = vrot.slane %v6565_v62, 4  ;;  %v6235_v24 = vsel %vm17011_vm14, 0, %v6234_v35  ;;  %v20060_v11 = vmov 0 }
 0x3e1   : > { %6673 = vrot.lane.b32.xlu1 %v6517_v45, %s14127_s9  ;;  %6681 = vrot.lane.b32.xlu0 %v6543_v55, %s14127_s9  ;;  %v6585_v52 = vor.u32 %v6583_v23, %v6582_v3  ;;  %v6576_v37 = vor.u32 %v6574_v33, %v6573_v30  ;;  %v6560_v45 = vsel %vm17041_vm1, %v6552_v60, %v6559_v0  ;;  %v6578_v42 = vrot.slane %v6573_v30, 4 }
 0x3e2   : > { %v6588_v34 = vshrl.u32 %v12743_v4, 16  ;;  %v6591_v46 = vshll.u32 %v12743_v4, 16  ;;  %14112 = vtanh.f32 %v5928_v10  ;;  %6236 = vst [vmem:[#allocation2 + $0xbc] sm:$0x1] %v6235_v24  ;;  %v6586_v55 = vrot.slane %v6582_v3, 4 }
 0x3e3   : > { %v6577_v17 = vsel %vm17041_vm1, %v6569_v13, %v6576_v37  ;;  %v20061_v11 = vsel %vm17259_vm3, 4294967295, %v20060_v11  ;;  %v7934_v4 = vrot.slane %v17057_v38, 5  ;;  %v7937_v39 = vrot.slane %v17090_v7, 5  ;;  %v6774_v37 = vld [vmem:[#allocation2 + $0x24] sm:$0xf] }
 0x3e4   : > { %v6590_v19 = vrot.slane %v6588_v34, 7  ;;  %20062 = vst [vmem:[#allocation14_spill] sm:$0xff] %v20061_v11 }
 0x3e5   : > { %6683 = vrot.lane.b32.xlu1 %v6544_v41, %s14127_s9  ;;  %6677 = vrot.lane.b32.xlu0 %v6527_v40, %s14127_s9  ;;  %v17290_v10 = vrot.slane %v7934_v4, 4 }
 0x3e6   : > { %v6593_v27 = vor.u32 %v6591_v46, %v6590_v19  ;;  %v6595_v9 = vrot.slane %v6590_v19, 4  ;;  %v6778_v46 = vld [vmem:[#allocation2 + $0x2c] sm:$0x1] }
 0x3e8   : > { %v14111_v41 = vpop.eup %14110  ;;  %v6594_v50 = vsel %vm17041_vm1, %v6586_v55, %v6593_v27 }
 0x3e9   : > { %6685 = vrot.lane.b32.xlu1 %v6551_v20, %s14127_s9  ;;  %6675 = vrot.lane.b32.xlu0 %v6526_v1, %s14127_s9  ;;  %v6781_v1 = vld [vmem:[#allocation2 + $0x30] sm:$0xf] }
 0x3ed   : > { %6691 = vrot.lane.b32.xlu1 %v6568_v36, %s14127_s9  ;;  %6689 = vrot.lane.b32.xlu0 %v6561_v5, %s14127_s9  ;;  %v17278_v36 = vld [vmem:[#allocation2] sm:$0xe] }
 0x3ef   : > { %v14113_v12 = vpop.eup %14112 }
 0x3f1   : > { %6697 = vrot.lane.b32.xlu1 %v6585_v52, %s14127_s9  ;;  %6687 = vrot.lane.b32.xlu0 %v6560_v45, %s14127_s9  ;;  %v12395_v52 = vrot.slane %v17278_v36, 9 }
 0x3f5   : > { %6695 = vrot.lane.b32.xlu1 %v6578_v42, %s14127_s9  ;;  %6693 = vrot.lane.b32.xlu0 %v6577_v17, %s14127_s9  ;;  %v13880_v17 = vld [vmem:[%s19858_s5 + $0x30] sm:$0xff]  }
 0x3f9   : > { %6053 = vrot.lane.b32.xlu1 %v14111_v41, %s14126_s24  ;;  %6699 = vrot.lane.b32.xlu0 %v6594_v50, %s14127_s9 }
 0x3fd   : > { %6701 = vrot.lane.b32.xlu0 %v6595_v9, %s14127_s9 }
 0x401   : > { %6055 = vrot.lane.b32.xlu0 %v14113_v12, %s14126_s24 }
 0x40f   : > { %v6620_v32 = vpop.permute.xlu1 %6619 }
 0x410   : > { %v6768_v51 = vsel %vm17259_vm3, %v6620_v32, %v6767_v47 }
 0x411   : > { %6769 = vst [vmem:[#allocation2 + $0x18] sm:$0xf] %v6768_v51 }
 0x413   : > { %v6614_v40 = vpop.permute.xlu0 %6613 }
 0x414   : > { %v6761_v54 = vsel %vm17259_vm3, %v6614_v40, %v6760_v22 }
 0x415   : > { %6762 = vst [vmem:[#allocation2 + $0xc] sm:$0xf] %v6761_v54 }
 0x416   : > { %v6624_v59 = vpop.permute.xlu1 %6623 }
 0x417   : > { %v6772_v31 = vsel %vm16995_vm12, %v6624_v59, %v6771_v57  ;;  %v6622_v15 = vpop.permute.xlu0 %6621 }
 0x418   : > { %6773 = vst [vmem:[#allocation2 + $0x20] sm:$0x1] %v6772_v31  ;;  %6770 = vst.msk [vmem:[#allocation2 + $0x1c] sm:$0xf] %vm6121_vm15, %v6622_v15  ;;  %v17270_v43 = vld [vmem:[#allocation2 + $0x18] sm:$0xf] }
 0x419   : > { %v6973_v28 = vshrl.u32 %v17270_v43, 16  ;;  %v6976_v16 = vshll.u32 %v17270_v43, 16  ;;  %v7886_v5 = vld [vmem:[#allocation2 + $0x18] sm:$0xe]  ;;  %v6785_v31 = vld [vmem:[#allocation2 + $0x38] sm:$0x1] }
 0x41a   : > { %v12397_v13 = vrot.slane %v7886_v5, 9 }
 0x41b   : > { %v6616_v62 = vpop.permute.xlu1 %6615  ;;  %v6618_v20 = vpop.permute.xlu0 %6617  ;;  %v6975_v14 = vrot.slane %v6973_v28, 4  ;;  %v6978_v25 = vrot.slane %v6976_v16, 5 }
 0x41c   : > { %6763 = vst.msk [vmem:[#allocation2 + $0x10] sm:$0xf] %vm6121_vm15, %v6616_v62  ;;  %v6765_v6 = vsel %vm16995_vm12, %v6618_v20, %v6764_v44  ;;  %v6874_v2 = vld [vmem:[#allocation2 + $0xc] sm:$0xf] }
 0x41d   : > { %6766 = vst [vmem:[#allocation2 + $0x14] sm:$0x1] %v6765_v6  ;;  %v6949_v58 = vshrl.u32 %v6874_v2, 16  ;;  %v6952_v48 = vshll.u32 %v6874_v2, 16  ;;  %v17281_v3 = vld [vmem:[#allocation2 + $0xc] sm:$0xe]  ;;  %v6979_v49 = vor.u32 %v6978_v25, %v6975_v14 }
 0x41e   : > { %v12396_v55 = vrot.slane %v17281_v3, 9 }
 0x41f   : > { %v6632_v30 = vpop.permute.xlu1 %6631  ;;  %v6951_v0 = vrot.slane %v6949_v58, 4  ;;  %v6954_v23 = vrot.slane %v6952_v48, 5  ;;  %v6877_v34 = vld [vmem:[#allocation2 + $0x1c] sm:$0xf]  ;;  %v17283_v26 = vld [vmem:[#allocation2 + $0x20] sm:$0x1] }
 0x420   : > { %v6782_v33 = vsel %vm17259_vm3, %v6632_v30, %v6781_v1  ;;  %v6986_v60 = vshrl.u32 %v6877_v34, 16  ;;  %v6982_v45 = vshll.u32 %v6877_v34, 16  ;;  %v6992_v35 = vshll.u32 %v17283_v26, 16 }
 0x421   : > { %6783 = vst [vmem:[#allocation2 + $0x30] sm:$0xf] %v6782_v33  ;;  %v6955_v19 = vor.u32 %v6954_v23, %v6951_v0  ;;  %v12363_v24 = vcombine.low %v17270_v43, %v6877_v34  ;;  %v7948_v41 = vrot.slane %v6877_v34, 5  ;;  %v17299_v47 = vrot.slane %v6979_v49, 4 }
 0x422   : > { %v6634_v42 = vpop.permute.xlu0 %6633  ;;  %v6988_v27 = vrot.slane %v6986_v60, 4  ;;  %v17301_v32 = vrot.slane %v6982_v45, 5  ;;  %v7951_v51 = vrot.slane %v17283_v26, 5  ;;  %v6994_v44 = vrot.slane %v6992_v35, 5  ;;  %v6795_v26 = vld [vmem:[#allocation2 + $0x48] sm:$0xf] }
 0x423   : > { %6784 = vst.msk [vmem:[#allocation2 + $0x34] sm:$0xf] %vm6121_vm15, %v6634_v42  ;;  %v6626_v50 = vpop.permute.xlu1 %6625  ;;  %v6875_v9 = vld [vmem:[#allocation2 + $0x10] sm:$0xf]  ;;  %v6956_v12 = vrot.slane %v6955_v19, 4  ;;  %v7950_v25 = vrot.slane %v7948_v41, 4  ;;  %v17318_v3 = vsel %vm14547_vm8, %v12397_v13, %v7948_v41 }
 0x424   : > { %v6775_v22 = vsel %vm17259_vm3, %v6626_v50, %v6774_v37  ;;  %v6962_v40 = vshrl.u32 %v6875_v9, 16  ;;  %v12362_v54 = vcombine.low %v6874_v2, %v6875_v9  ;;  %v6909_v57 = vld [vmem:[#allocation2 + $0x14] sm:$0x1]  ;;  %v6958_v59 = vshll.u32 %v6875_v9, 16 }
 0x425   : > { %6776 = vst [vmem:[#allocation2 + $0x24] sm:$0xf] %v6775_v22  ;;  %v6968_v15 = vshll.u32 %v6909_v57, 16  ;;  %v6989_v43 = vor.u32 %v6988_v27, %v17301_v32  ;;  %v7941_v28 = vrot.slane %v6875_v9, 5  ;;  %v7944_v14 = vrot.slane %v6909_v57, 5 }
 0x426   : > { %v6630_v16 = vpop.permute.xlu0 %6629  ;;  %13486 = vmatmul.mubr.msk.bf16.vlgmr.msra.gmra.mxu0 %vm7373_vm2, %v12362_v54  ;;  %v6960_v62 = vrot.slane %v6958_v59, 5  ;;  %v6964_v20 = vrot.slane %v6962_v40, 4  ;;  %v6985_v1 = vsel %vm14264_vm5, %v17299_v47, %v17301_v32  ;;  %v17332_v60 = vsel %vm14547_vm8, %v7950_v25, %v7951_v51 }
 0x427   : > { %v6779_v6 = vsel %vm16995_vm12, %v6630_v16, %v6778_v46  ;;  %13489 = vmatprep.mubr.msk.bf16.mxu0 %vm7373_vm2, %v12363_v24  ;;  %v6636_v2 = vpop.permute.xlu1 %6635  ;;  %v6990_v58 = vrot.slane %v6989_v43, 4  ;;  %13554 = vmatpush3.bf16.msra.mxu0 %v17252_v56  ;;  %v6970_v0 = vrot.slane %v6968_v15, 5  ;;  %v7943_v34 = vrot.slane %v7941_v28, 4  ;;  %v6788_v24 = vld [vmem:[#allocation2 + $0x3c] sm:$0xf] }
 0x428   : > { %6780 = vst [vmem:[#allocation2 + $0x2c] sm:$0x1] %v6779_v6  ;;  %v6786_v5 = vsel %vm16995_vm12, %v6636_v2, %v6785_v31  ;;  %v6965_v30 = vor.u32 %v6964_v20, %v6960_v62  ;;  %v17322_v23 = vld [vmem:[#allocation2 + $0x30] sm:$0xf]  ;;  %13555 = vmatprep.subr.bf16.mxu0 %v13880_v17  ;;  %v17328_v33 = vsel %vm14547_vm8, %v12396_v55, %v7941_v28  ;;  %v6792_v6 = vld [vmem:[#allocation2 + $0x44] sm:$0x1] }
 0x429   : > { %6787 = vst [vmem:[#allocation2 + $0x38] sm:$0x1] %v6786_v5  ;;  %v7021_v49 = vshrl.u32 %v17322_v23, 16  ;;  %v7024_v56 = vshll.u32 %v17322_v23, 16  ;;  %v6961_v19 = vsel %vm14264_vm5, %v6956_v12, %v6960_v62  ;;  %v17340_v13 = vsel %vm14547_vm8, %v7943_v34, %v7944_v14  ;;  %v6799_v2 = vld [vmem:[#allocation2 + $0x50] sm:$0x1] }
 0x42a   : > { %v6628_v37 = vpop.permute.xlu0 %6627  ;;  %v6966_v45 = vrot.slane %v6965_v30, 4  ;;  %v17336_v35 = vld [vmem:[#allocation2 + $0x34] sm:$0xf]  ;;  %v6995_v27 = vsel %vm14264_vm5, %v6990_v58, %v6994_v44  ;;  %v17362_v44 = vld [vmem:[#allocation2 + $0x30] sm:$0xe]  ;;  %v17380_v5 = vsel %vm14547_vm8, %v12395_v52, %v7934_v4  ;;  %v13885_v30 = vld [vmem:[%s19858_s5 + $0x48] sm:$0xff]  }
 0x42b   : > { %6777 = vst.msk [vmem:[#allocation2 + $0x28] sm:$0xf] %vm6121_vm15, %v6628_v37  ;;  %v6644_v46 = vpop.permute.xlu1 %6643  ;;  %v7023_v55 = vrot.slane %v7021_v49, 4  ;;  %v7026_v41 = vrot.slane %v7024_v56, 5  ;;  %v7034_v50 = vshrl.u32 %v17336_v35, 16  ;;  %13556 = vmatpush3.bf16.msra.mxu0 %v13880_v17  ;;  %v7030_v32 = vshll.u32 %v17336_v35, 16 }
 0x42c   : > { %v6796_v9 = vsel %vm17259_vm3, %v6644_v46, %v6795_v26  ;;  %v6971_v12 = vsel %vm14264_vm5, %v6966_v45, %v6970_v0  ;;  %v6878_v47 = vld [vmem:[#allocation2 + $0x24] sm:$0xf]  ;;  %v12329_v31 = vcombine.low %v6985_v1, %v6995_v27  ;;  %v12399_v38 = vrot.slane %v17362_v44, 9 }
 0x42d   : > { %6797 = vst [vmem:[#allocation2 + $0x48] sm:$0xf] %v6796_v9  ;;  %v12328_v22 = vcombine.low %v6961_v19, %v6971_v12  ;;  %v6997_v40 = vshrl.u32 %v6878_v47, 16  ;;  %v7000_v54 = vshll.u32 %v6878_v47, 16  ;;  %v7027_v57 = vor.u32 %v7026_v41, %v7023_v55  ;;  %v13874_v17 = vld [vmem:[%s19858_s5 + $0x20] sm:$0xff]  }
 0x42e   : > { %v17358_v59 = vld [vmem:[#allocation2 + $0x24] sm:$0xe]  ;;  %v17360_v15 = vrot.slane %v7030_v32, 5  ;;  %v7036_v43 = vrot.slane %v7034_v50, 4  ;;  %v7962_v36 = vrot.slane %v17336_v35, 5  ;;  %v17398_v49 = vsel %vm14547_vm8, %v17290_v10, %v7937_v39 }
 0x42f   : > { %13450 = vmatmul.mubr.msk.bf16.vlgmr.msra.gmra.mxu1 %vm7373_vm2, %v12328_v22  ;;  %v6638_v28 = vpop.permute.xlu1 %6637  ;;  %v6999_v16 = vrot.slane %v6997_v40, 4  ;;  %v7002_v62 = vrot.slane %v7000_v54, 5  ;;  %v17365_v20 = vld [vmem:[#allocation2 + $0x2c] sm:$0x1]  ;;  %v6646_v14 = vpop.permute.xlu0 %6645  ;;  %v12398_v0 = vrot.slane %v17358_v59, 9  ;;  %v17387_v34 = vrot.slane %v7027_v57, 4 }
 0x430   : > { %v6789_v25 = vsel %vm17259_vm3, %v6638_v28, %v6788_v24  ;;  %13453 = vmatprep.mubr.msk.bf16.mxu1 %vm7373_vm2, %v12329_v31  ;;  %v17370_v1 = vld [vmem:[#allocation2 + $0x38] sm:$0x1]  ;;  %v7037_v58 = vor.u32 %v7036_v43, %v17360_v15  ;;  %13518 = vmatpush3.bf16.msra.mxu1 %v17163_v29  ;;  %6798 = vst.msk [vmem:[#allocation2 + $0x4c] sm:$0xf] %vm6121_vm15, %v6646_v14  ;;  %v7016_v26 = vshll.u32 %v17365_v20, 16  ;;  %v7958_v56 = vrot.slane %v17365_v20, 5 }
 0x431   : > { %6790 = vst [vmem:[#allocation2 + $0x3c] sm:$0xf] %v6789_v25  ;;  %v7040_v29 = vshll.u32 %v17370_v1, 16  ;;  %13519 = vmatprep.subr.bf16.mxu1 %v13874_v17  ;;  %v7003_v52 = vor.u32 %v7002_v62, %v6999_v16  ;;  %v12365_v41 = vcombine.low %v17322_v23, %v17336_v35  ;;  %v6809_v9 = vld [vmem:[#allocation2 + $0x60] sm:$0xf]  ;;  %v7033_v22 = vsel %vm14264_vm5, %v17387_v34, %v17360_v15 }
 0x432   : > { %v6879_v4 = vld [vmem:[#allocation2 + $0x28] sm:$0xf]  ;;  %v7038_v24 = vrot.slane %v7037_v58, 4  ;;  %v7018_v23 = vrot.slane %v7016_v26, 5 }
 0x433   : > { %v6648_v37 = vpop.permute.xlu1 %6647  ;;  %v7010_v19 = vshrl.u32 %v6879_v4, 16  ;;  %v12364_v45 = vcombine.low %v6878_v47, %v6879_v4  ;;  %v7006_v46 = vshll.u32 %v6879_v4, 16  ;;  %v6642_v27 = vpop.permute.xlu0 %6641  ;;  %v7042_v7 = vrot.slane %v7040_v29, 5 }
 0x434   : > { %v6800_v55 = vsel %vm16995_vm12, %v6648_v37, %v6799_v2  ;;  %v17405_v50 = vld [vmem:[#allocation2 + $0x48] sm:$0xf]  ;;  %13520 = vmatpush3.bf16.msra.mxu1 %v13874_v17  ;;  %v7955_v39 = vrot.slane %v6879_v4, 5  ;;  %v6793_v10 = vsel %vm16995_vm12, %v6642_v27, %v6792_v6  ;;  %v6802_v17 = vld [vmem:[#allocation2 + $0x54] sm:$0xf]  ;;  %v7004_v59 = vrot.slane %v7003_v52, 4 }
 0x435   : > { %6801 = vst [vmem:[#allocation2 + $0x50] sm:$0x1] %v6800_v55  ;;  %13490 = vmatmul.mubr.msk.bf16.gmra.mxu0 %vm7373_vm2, %v12364_v45  ;;  %v7008_v12 = vrot.slane %v7006_v46, 5  ;;  %v7012_v47 = vrot.slane %v7010_v19, 4  ;;  %v7069_v32 = vshrl.u32 %v17405_v50, 16  ;;  %13589 = vmatprep.subr.bf16.mxu1 %v13885_v30  ;;  %v7072_v40 = vshll.u32 %v17405_v50, 16 }
 0x436   : > { %6794 = vst [vmem:[#allocation2 + $0x44] sm:$0x1] %v6793_v10  ;;  %13493 = vmatprep.mubr.msk.bf16.mxu0 %vm7373_vm2, %v12365_v41  ;;  %v7957_v54 = vrot.slane %v7955_v39, 4  ;;  %v7043_v43 = vsel %vm14264_vm5, %v7038_v24, %v7042_v7  ;;  %v17427_v25 = vsel %vm14547_vm8, %v12398_v0, %v7955_v39  ;;  %v6813_v37 = vld [vmem:[#allocation2 + $0x68] sm:$0x1] }
 0x437   : > { %v6656_v57 = vpop.permute.xlu1 %6655  ;;  %v7013_v31 = vor.u32 %v7012_v47, %v7008_v12  ;;  %v7071_v28 = vrot.slane %v7069_v32, 4  ;;  %v6640_v16 = vpop.permute.xlu0 %6639  ;;  %v17423_v14 = vld [vmem:[#allocation2 + $0x4c] sm:$0xf]  ;;  %v7074_v15 = vrot.slane %v7072_v40, 5  ;;  %v7009_v29 = vsel %vm14264_vm5, %v7004_v59, %v7008_v12  ;;  %v6806_v40 = vld [vmem:[#allocation2 + $0x5c] sm:$0x1] }
 0x438   : > { %v6810_v62 = vsel %vm17259_vm3, %v6656_v57, %v6809_v9  ;;  %v17421_v20 = vld [vmem:[#allocation2 + $0x3c] sm:$0xf]  ;;  %v17431_v6 = vsel %vm14547_vm8, %v7957_v54, %v7958_v56  ;;  %6791 = vst.msk [vmem:[#allocation2 + $0x40] sm:$0xf] %vm6121_vm15, %v6640_v16  ;;  %v7082_v34 = vshrl.u32 %v17423_v14, 16  ;;  %v7078_v0 = vshll.u32 %v17423_v14, 16 }
 0x439   : > { %6811 = vst [vmem:[#allocation2 + $0x60] sm:$0xf] %v6810_v62  ;;  %v7014_v2 = vrot.slane %v7013_v31, 4  ;;  %v7045_v58 = vshrl.u32 %v17421_v20, 16  ;;  %v7048_v30 = vshll.u32 %v17421_v20, 16  ;;  %v7075_v4 = vor.u32 %v7074_v15, %v7071_v28 }
 0x43a   : > { %v7084_v46 = vrot.slane %v7082_v34, 4  ;;  %v12331_v41 = vcombine.low %v7033_v22, %v7043_v43  ;;  %v7080_v39 = vrot.slane %v7078_v0, 5  ;;  %v17448_v10 = vld [vmem:[#allocation2 + $0x3c] sm:$0xe]  ;;  %v7964_v32 = vrot.slane %v7962_v36, 4 }
 0x43b   : > { %v6650_v26 = vpop.permute.xlu1 %6649  ;;  %v7019_v56 = vsel %vm14264_vm5, %v7014_v2, %v7018_v23  ;;  %v7047_v19 = vrot.slane %v7045_v58, 4  ;;  %v7050_v45 = vrot.slane %v7048_v30, 5  ;;  %v6658_v24 = vpop.permute.xlu0 %6657  ;;  %v7965_v23 = vrot.slane %v17370_v1, 5  ;;  %v6823_v30 = vld [vmem:[#allocation2 + $0x78] sm:$0xf] }
 0x43c   : > { %v6803_v27 = vsel %vm17259_vm3, %v6650_v26, %v6802_v17  ;;  %v12330_v55 = vcombine.low %v7009_v29, %v7019_v56  ;;  %v17446_v7 = vld [vmem:[#allocation2 + $0x50] sm:$0x1]  ;;  %6812 = vst.msk [vmem:[#allocation2 + $0x64] sm:$0xf] %vm6121_vm15, %v6658_v24  ;;  %v12367_v22 = vcombine.low %v17405_v50, %v17423_v14  ;;  %v7085_v57 = vor.u32 %v7084_v46, %v7080_v39 }
 0x43d   : > { %6804 = vst [vmem:[#allocation2 + $0x54] sm:$0xf] %v6803_v27  ;;  %v17451_v9 = vld [vmem:[#allocation2 + $0x44] sm:$0x1]  ;;  %v7051_v12 = vor.u32 %v7050_v45, %v7047_v19  ;;  %v7088_v47 = vshll.u32 %v17446_v7, 16  ;;  %v17467_v17 = vsel %vm14547_vm8, %v12399_v38, %v7962_v36  ;;  %v7076_v59 = vrot.slane %v7075_v4, 4 }
 0x43e   : > { %13454 = vmatmul.mubr.msk.bf16.gmra.mxu1 %vm7373_vm2, %v12330_v55  ;;  %v7064_v54 = vshll.u32 %v17451_v9, 16  ;;  %v17472_v43 = vsel %vm14547_vm8, %v7964_v32, %v7965_v23  ;;  %v12400_v50 = vrot.slane %v17448_v10, 9  ;;  %v7086_v38 = vrot.slane %v7085_v57, 4 }
 0x43f   : > { %13457 = vmatprep.mubr.msk.bf16.mxu1 %vm7373_vm2, %v12331_v41  ;;  %v6660_v1 = vpop.permute.xlu1 %6659  ;;  %v7090_v31 = vrot.slane %v7088_v47, 5  ;;  %v6654_v28 = vpop.permute.xlu0 %6653  ;;  %v17477_v44 = vld [vmem:[#allocation2 + $0x40] sm:$0xf]  ;;  %v7052_v16 = vrot.slane %v7051_v12, 4  ;;  %v7972_v26 = vrot.slane %v17451_v9, 5  ;;  %v7081_v23 = vsel %vm14264_vm5, %v7076_v59, %v7080_v39 }
 0x440   : > { %v6814_v35 = vsel %vm16995_vm12, %v6660_v1, %v6813_v37  ;;  %v17479_v36 = vld [vmem:[#allocation2 + $0x60] sm:$0xf]  ;;  %v6807_v15 = vsel %vm16995_vm12, %v6654_v28, %v6806_v40  ;;  %v7058_v2 = vshrl.u32 %v17477_v44, 16  ;;  %v12366_v58 = vcombine.low %v17421_v20, %v17477_v44  ;;  %v6816_v37 = vld [vmem:[#allocation2 + $0x6c] sm:$0xf] }
 0x441   : > { %6815 = vst [vmem:[#allocation2 + $0x68] sm:$0x1] %v6814_v35  ;;  %v7054_v34 = vshll.u32 %v17477_v44, 16  ;;  %6808 = vst [vmem:[#allocation2 + $0x5c] sm:$0x1] %v6807_v15  ;;  %v7066_v29 = vrot.slane %v7064_v54, 5  ;;  %v7091_v20 = vsel %vm14264_vm5, %v7086_v38, %v7090_v31 }
 0x442   : > { %v7117_v4 = vshrl.u32 %v17479_v36, 16  ;;  %v7120_v0 = vshll.u32 %v17479_v36, 16  ;;  %13494 = vmatmul.mubr.msk.bf16.gmra.mxu0 %vm7373_vm2, %v12366_v58  ;;  %v7060_v45 = vrot.slane %v7058_v2, 4  ;;  %v7969_v46 = vrot.slane %v17477_v44, 5  ;;  %v17512_v2 = vld [vmem:[#allocation2 + $0x48] sm:$0xe] }
 0x443   : > { %v6668_v56 = vpop.permute.xlu1 %6667  ;;  %v7056_v19 = vrot.slane %v7054_v34, 5  ;;  %v6652_v24 = vpop.permute.xlu0 %6651  ;;  %13497 = vmatprep.mubr.msk.bf16.mxu0 %vm7373_vm2, %v12367_v22  ;;  %v17501_v41 = vld [vmem:[#allocation2 + $0x64] sm:$0xf]  ;;  %v12333_v54 = vcombine.low %v7081_v23, %v7091_v20 }
 0x444   : > { %v6824_v27 = vsel %vm17259_vm3, %v6668_v56, %v6823_v30  ;;  %v17499_v55 = vld [vmem:[#allocation2 + $0x54] sm:$0xf]  ;;  %v7119_v9 = vrot.slane %v7117_v4, 4  ;;  %v7122_v12 = vrot.slane %v7120_v0, 5  ;;  %6805 = vst.msk [vmem:[#allocation2 + $0x58] sm:$0xf] %vm6121_vm15, %v6652_v24 }
 0x445   : > { %6825 = vst [vmem:[#allocation2 + $0x78] sm:$0xf] %v6824_v27  ;;  %v7061_v32 = vor.u32 %v7060_v45, %v7056_v19  ;;  %v7093_v40 = vshrl.u32 %v17499_v55, 16  ;;  %v7096_v22 = vshll.u32 %v17499_v55, 16  ;;  %v7130_v57 = vshrl.u32 %v17501_v41, 16 }
 0x446   : > { %v7123_v1 = vor.u32 %v7122_v12, %v7119_v9  ;;  %v7126_v31 = vshll.u32 %v17501_v41, 16  ;;  %v7971_v15 = vrot.slane %v7969_v46, 4  ;;  %v7057_v0 = vsel %vm14264_vm5, %v7052_v16, %v7056_v19  ;;  %v6827_v45 = vld [vmem:[#allocation2 + $0x80] sm:$0x1]  ;;  %v6820_v27 = vld [vmem:[#allocation2 + $0x74] sm:$0x1] }
 0x447   : > { %v6662_v28 = vpop.permute.xlu1 %6661  ;;  %v7062_v35 = vrot.slane %v7061_v32, 4  ;;  %v7095_v44 = vrot.slane %v7093_v40, 4  ;;  %v7098_v38 = vrot.slane %v7096_v22, 5  ;;  %v6670_v58 = vpop.permute.xlu0 %6669  ;;  %v7132_v4 = vrot.slane %v7130_v57, 4 }
 0x448   : > { %v6817_v39 = vsel %vm17259_vm3, %v6662_v28, %v6816_v37  ;;  %v17516_v59 = vld [vmem:[#allocation2 + $0x68] sm:$0x1]  ;;  %v17518_v30 = vrot.slane %v7123_v1, 4  ;;  %v17520_v34 = vrot.slane %v7126_v31, 5  ;;  %6826 = vst.msk [vmem:[#allocation2 + $0x7c] sm:$0xf] %vm6121_vm15, %v6670_v58  ;;  %v17532_v24 = vsel %vm14547_vm8, %v7971_v15, %v7972_v26 }
 0x449   : > { %6818 = vst [vmem:[#allocation2 + $0x6c] sm:$0xf] %v6817_v39  ;;  %v7067_v56 = vsel %vm14264_vm5, %v7062_v35, %v7066_v29  ;;  %v17527_v20 = vld [vmem:[#allocation2 + $0x5c] sm:$0x1]  ;;  %v7136_v37 = vshll.u32 %v17516_v59, 16  ;;  %v7099_v12 = vor.u32 %v7098_v38, %v7095_v44  ;;  %v17539_v16 = vsel %vm14547_vm8, %v12400_v50, %v7969_v46 }
 0x44a   : > { %v12332_v9 = vcombine.low %v7057_v0, %v7067_v56  ;;  %v7133_v32 = vor.u32 %v7132_v4, %v17520_v34  ;;  %v17544_v29 = vld [vmem:[%s19858_s5 + $0x58] sm:$0xff]   ;;  %v7112_v26 = vshll.u32 %v17527_v20, 16  ;;  %v12401_v40 = vrot.slane %v17512_v2, 9  ;;  %v6837_v44 = vld [vmem:[#allocation2 + $0x90] sm:$0xf] }
 0x44b   : > { %v6672_v19 = vpop.permute.xlu1 %6671  ;;  %v7976_v22 = vrot.slane %v17423_v14, 5  ;;  %v6666_v10 = vpop.permute.xlu0 %6665  ;;  %v17554_v46 = vld [vmem:[#allocation2 + $0x58] sm:$0xf]  ;;  %v12369_v57 = vcombine.low %v17479_v36, %v17501_v41  ;;  %v7129_v1 = vsel %vm14264_vm5, %v17518_v30, %v17520_v34  ;;  %v17562_v31 = vrot.slane %v7136_v37, 5  ;;  %13625 = vmatprep.subr.bf16.mxu0 %v17544_v29 }
 0x44c   : > { %13458 = vmatmul.mubr.msk.bf16.gmra.mxu1 %vm7373_vm2, %v12332_v9  ;;  %v6828_v50 = vsel %vm16995_vm12, %v6672_v19, %v6827_v45  ;;  %v17564_v28 = vld [vmem:[#allocation2 + $0x78] sm:$0xf]  ;;  %v6821_v14 = vsel %vm16995_vm12, %v6666_v10, %v6820_v27  ;;  %v7106_v35 = vshrl.u32 %v17554_v46, 16  ;;  %v12368_v36 = vcombine.low %v17499_v55, %v17554_v46 }
 0x44d   : > { %13461 = vmatprep.mubr.msk.bf16.mxu1 %vm7373_vm2, %v12333_v54  ;;  %6829 = vst [vmem:[#allocation2 + $0x80] sm:$0x1] %v6828_v50  ;;  %v7102_v38 = vshll.u32 %v17554_v46, 16  ;;  %6822 = vst [vmem:[#allocation2 + $0x74] sm:$0x1] %v6821_v14  ;;  %v7100_v15 = vrot.slane %v7099_v12, 4  ;;  %v17592_v14 = vsel %vm14547_vm8, %v12401_v40, %v7976_v22 }
 0x44e   : > { %v7134_v2 = vrot.slane %v7133_v32, 4  ;;  %v7165_v58 = vshrl.u32 %v17564_v28, 16  ;;  %v7168_v39 = vshll.u32 %v17564_v28, 16  ;;  %13498 = vmatmul.mubr.msk.bf16.gmra.mxu0 %vm7373_vm2, %v12368_v36  ;;  %v6830_v54 = vld [vmem:[#allocation2 + $0x84] sm:$0xf]  ;;  %v7108_v56 = vrot.slane %v7106_v35, 4 }
 0x44f   : > { %v6680_v4 = vpop.permute.xlu1 %6679  ;;  %v7104_v0 = vrot.slane %v7102_v38, 5  ;;  %v7114_v45 = vrot.slane %v7112_v26, 5  ;;  %v7978_v37 = vrot.slane %v7976_v22, 4  ;;  %v6664_v27 = vpop.permute.xlu0 %6663  ;;  %13501 = vmatprep.mubr.msk.bf16.mxu0 %vm7373_vm2, %v12369_v57  ;;  %v17585_v32 = vld [vmem:[#allocation2 + $0x7c] sm:$0xf] }
 0x450   : > { %v6838_v55 = vsel %vm17259_vm3, %v6680_v4, %v6837_v44  ;;  %v7139_v9 = vsel %vm14264_vm5, %v7134_v2, %v17562_v31  ;;  %v17583_v12 = vld [vmem:[#allocation2 + $0x6c] sm:$0xf]  ;;  %v7167_v19 = vrot.slane %v7165_v58, 4  ;;  %v7170_v10 = vrot.slane %v7168_v39, 5  ;;  %6819 = vst.msk [vmem:[#allocation2 + $0x70] sm:$0xf] %vm6121_vm15, %v6664_v27 }
 0x451   : > { %6839 = vst [vmem:[#allocation2 + $0x90] sm:$0xf] %v6838_v55  ;;  %v7109_v26 = vor.u32 %v7108_v56, %v7104_v0  ;;  %v7141_v50 = vshrl.u32 %v17583_v12, 16  ;;  %v7144_v57 = vshll.u32 %v17583_v12, 16  ;;  %v7105_v31 = vsel %vm14264_vm5, %v7100_v15, %v7104_v0  ;;  %v6841_v58 = vld [vmem:[#allocation2 + $0x98] sm:$0x1] }
 0x452   : > { %v7178_v35 = vshrl.u32 %v17585_v32, 16  ;;  %v7171_v36 = vor.u32 %v7170_v10, %v7167_v19  ;;  %v7174_v44 = vshll.u32 %v17585_v32, 16  ;;  %v7979_v56 = vrot.slane %v17446_v7, 5 }
 0x453   : > { %v6674_v38 = vpop.permute.xlu1 %6673  ;;  %v7110_v2 = vrot.slane %v7109_v26, 4  ;;  %v7143_v39 = vrot.slane %v7141_v50, 4  ;;  %v7146_v4 = vrot.slane %v7144_v57, 5  ;;  %v6682_v27 = vpop.permute.xlu0 %6681  ;;  %v6834_v57 = vld [vmem:[#allocation2 + $0x8c] sm:$0x1] }
 0x454   : > { %v6831_v40 = vsel %vm17259_vm3, %v6674_v38, %v6830_v54  ;;  %v17601_v22 = vld [vmem:[#allocation2 + $0x80] sm:$0x1]  ;;  %v7172_v55 = vrot.slane %v7171_v36, 4  ;;  %v7176_v15 = vrot.slane %v7174_v44, 5  ;;  %v7180_v0 = vrot.slane %v7178_v35, 4 }
 0x455   : > { %6840 = vst.msk [vmem:[#allocation2 + $0x94] sm:$0xf] %vm6121_vm15, %v6682_v27  ;;  %6832 = vst [vmem:[#allocation2 + $0x84] sm:$0xf] %v6831_v40  ;;  %v7115_v19 = vsel %vm14264_vm5, %v7110_v2, %v7114_v45  ;;  %v17606_v10 = vld [vmem:[#allocation2 + $0x74] sm:$0x1]  ;;  %v7147_v26 = vor.u32 %v7146_v4, %v7143_v39  ;;  %v17611_v50 = vsel %vm14547_vm8, %v7978_v37, %v7979_v56 }
 0x456   : > { %v7184_v7 = vshll.u32 %v17601_v22, 16  ;;  %v7891_v54 = vld [vmem:[#allocation2 + $0x54] sm:$0xe]  ;;  %v12334_v36 = vcombine.low %v7105_v31, %v7115_v19  ;;  %v12335_v35 = vcombine.low %v7129_v1, %v7139_v9  ;;  %v12371_v45 = vcombine.low %v17564_v28, %v17585_v32 }
 0x457   : > { %v7181_v44 = vor.u32 %v7180_v0, %v7176_v15  ;;  %v6684_v38 = vpop.permute.xlu1 %6683  ;;  %v17620_v2 = vrot.slane %v7147_v26, 4  ;;  %v7160_v39 = vshll.u32 %v17606_v10, 16  ;;  %v6678_v31 = vpop.permute.xlu0 %6677  ;;  %v17628_v34 = vld [vmem:[#allocation2 + $0x70] sm:$0xf]  ;;  %v7177_v1 = vsel %vm14264_vm5, %v7172_v55, %v7176_v15  ;;  %v6844_v0 = vld [vmem:[#allocation2 + $0x9c] sm:$0xf] }
 0x458   : > { %v7186_v37 = vrot.slane %v7184_v7, 5  ;;  %13462 = vmatmul.mubr.msk.bf16.gmra.mxu1 %vm7373_vm2, %v12334_v36  ;;  %v6842_v30 = vsel %vm16995_vm12, %v6684_v38, %v6841_v58  ;;  %v17632_v9 = vld [vmem:[#allocation2 + $0x90] sm:$0xf]  ;;  %v12402_v56 = vrot.slane %v7891_v54, 9  ;;  %v6835_v27 = vsel %vm16995_vm12, %v6678_v31, %v6834_v57  ;;  %v6851_v57 = vld [vmem:[#allocation2 + $0xa8] sm:$0xf] }
 0x459   : > { %v7182_v28 = vrot.slane %v7181_v44, 4  ;;  %13465 = vmatprep.mubr.msk.bf16.mxu1 %vm7373_vm2, %v12335_v35  ;;  %6843 = vst [vmem:[#allocation2 + $0x98] sm:$0x1] %v6842_v30  ;;  %v7154_v40 = vshrl.u32 %v17628_v34, 16  ;;  %v12370_v58 = vcombine.low %v17583_v12, %v17628_v34  ;;  %v7150_v19 = vshll.u32 %v17628_v34, 16 }
 0x45a   : > { %6836 = vst [vmem:[#allocation2 + $0x8c] sm:$0x1] %v6835_v27  ;;  %v7213_v15 = vshrl.u32 %v17632_v9, 16  ;;  %v7216_v26 = vshll.u32 %v17632_v9, 16  ;;  %v7983_v7 = vrot.slane %v17554_v46, 5  ;;  %v7162_v12 = vrot.slane %v7160_v39, 5 }
 0x45b   : > { %v7187_v55 = vsel %vm14264_vm5, %v7182_v28, %v7186_v37  ;;  %13502 = vmatmul.mubr.msk.bf16.gmra.mxu0 %vm7373_vm2, %v12370_v58  ;;  %v6686_v54 = vpop.permute.xlu1 %6685  ;;  %v7152_v36 = vrot.slane %v7150_v19, 5  ;;  %v7156_v35 = vrot.slane %v7154_v40, 4  ;;  %v7986_v44 = vrot.slane %v17527_v20, 5  ;;  %v6676_v38 = vpop.permute.xlu0 %6675  ;;  %v6848_v58 = vld [vmem:[#allocation2 + $0xa4] sm:$0x1] }
 0x45c   : > { %13505 = vmatprep.mubr.msk.bf16.mxu0 %vm7373_vm2, %v12371_v45  ;;  %v6845_v37 = vsel %vm17259_vm3, %v6686_v54, %v6844_v0  ;;  %v12337_v31 = vcombine.low %v7177_v1, %v7187_v55  ;;  %v17651_v30 = vld [vmem:[#allocation2 + $0x84] sm:$0xf]  ;;  %v17653_v28 = vld [vmem:[#allocation2 + $0x94] sm:$0xf]  ;;  %v7215_v46 = vrot.slane %v7213_v15, 4  ;;  %v7218_v27 = vrot.slane %v7216_v26, 5 }
 0x45d   : > { %6833 = vst.msk [vmem:[#allocation2 + $0x88] sm:$0xf] %vm6121_vm15, %v6676_v38  ;;  %6846 = vst [vmem:[#allocation2 + $0x9c] sm:$0xf] %v6845_v37  ;;  %v7157_v40 = vor.u32 %v7156_v35, %v7152_v36  ;;  %v7189_v39 = vshrl.u32 %v17651_v30, 16  ;;  %v7192_v20 = vshll.u32 %v17651_v30, 16  ;;  %v17660_v45 = vsel %vm14547_vm8, %v12402_v56, %v7983_v7 }
 0x45e   : > { %v7153_v1 = vsel %vm14264_vm5, %v17620_v2, %v7152_v36  ;;  %v7226_v0 = vshrl.u32 %v17653_v28, 16  ;;  %v7219_v19 = vor.u32 %v7218_v27, %v7215_v46  ;;  %v7222_v55 = vshll.u32 %v17653_v28, 16  ;;  %v6858_v54 = vld [vmem:[#allocation2 + $0xb4] sm:$0xf] }
 0x45f   : > { %v6692_v15 = vpop.permute.xlu1 %6691  ;;  %v7158_v26 = vrot.slane %v7157_v40, 4  ;;  %v7191_v35 = vrot.slane %v7189_v39, 4  ;;  %v7194_v38 = vrot.slane %v7192_v20, 5  ;;  %v7985_v37 = vrot.slane %v7983_v7, 4  ;;  %v6690_v4 = vpop.permute.xlu0 %6689  ;;  %v7892_v39 = vld [vmem:[#allocation2 + $0x60] sm:$0xe] }
 0x460   : > { %v6852_v56 = vsel %vm17259_vm3, %v6692_v15, %v6851_v57  ;;  %v17669_v23 = vld [vmem:[#allocation2 + $0x98] sm:$0x1]  ;;  %v7220_v62 = vrot.slane %v7219_v19, 4  ;;  %v7224_v52 = vrot.slane %v7222_v55, 5  ;;  %v7228_v2 = vrot.slane %v7226_v0, 4 }
 0x461   : > { %v6849_v36 = vsel %vm16995_vm12, %v6690_v4, %v6848_v58  ;;  %6853 = vst [vmem:[#allocation2 + $0xa8] sm:$0xf] %v6852_v56  ;;  %v7163_v46 = vsel %vm14264_vm5, %v7158_v26, %v7162_v12  ;;  %v17675_v27 = vld [vmem:[#allocation2 + $0x8c] sm:$0x1]  ;;  %v7195_v40 = vor.u32 %v7194_v38, %v7191_v35  ;;  %v7232_v7 = vshll.u32 %v17669_v23, 16 }
 0x462   : > { %6850 = vst [vmem:[#allocation2 + $0xa4] sm:$0x1] %v6849_v36  ;;  %v12336_v57 = vcombine.low %v7153_v1, %v7163_v46  ;;  %v12373_v20 = vcombine.low %v17632_v9, %v17653_v28  ;;  %v7208_v0 = vshll.u32 %v17675_v27, 16  ;;  %v7229_v19 = vor.u32 %v7228_v2, %v7224_v52  ;;  %v6855_v4 = vld [vmem:[#allocation2 + $0xb0] sm:$0x1] }
 0x463   : > { %v6698_v55 = vpop.permute.xlu1 %6697  ;;  %v17681_v58 = vrot.slane %v7195_v40, 4  ;;  %v7225_v12 = vsel %vm14264_vm5, %v7220_v62, %v7224_v52  ;;  %v7234_v15 = vrot.slane %v7232_v7, 5  ;;  %v17687_v26 = vsel %vm14547_vm8, %v7985_v37, %v7986_v44  ;;  %v6688_v35 = vpop.permute.xlu0 %6687 }
 0x464   : > { %13466 = vmatmul.mubr.msk.bf16.gmra.mxu1 %vm7373_vm2, %v12336_v57  ;;  %v6859_v9 = vsel %vm17259_vm3, %v6698_v55, %v6858_v54  ;;  %v17692_v1 = vld [vmem:[#allocation2 + $0x88] sm:$0xf]  ;;  %v17694_v38 = vld [vmem:[#allocation2 + $0x9c] sm:$0xf]  ;;  %v7230_v56 = vrot.slane %v7229_v19, 4  ;;  %v12403_v52 = vrot.slane %v7892_v39, 9 }
 0x465   : > { %6847 = vst.msk [vmem:[#allocation2 + $0xa0] sm:$0xf] %vm6121_vm15, %v6688_v35  ;;  %13469 = vmatprep.mubr.msk.bf16.mxu1 %vm7373_vm2, %v12337_v31  ;;  %6860 = vst [vmem:[#allocation2 + $0xb4] sm:$0xf] %v6859_v9  ;;  %v7202_v62 = vshrl.u32 %v17692_v1, 16  ;;  %v12372_v44 = vcombine.low %v17651_v30, %v17692_v1  ;;  %v7237_v54 = vshrl.u32 %v17694_v38, 16 }
 0x466   : > { %v7240_v37 = vshll.u32 %v17694_v38, 16  ;;  %v7198_v36 = vshll.u32 %v17692_v1, 16  ;;  %v7235_v46 = vsel %vm14264_vm5, %v7230_v56, %v7234_v15  ;;  %v7990_v40 = vrot.slane %v17501_v41, 5  ;;  %v17711_v55 = vld [vmem:[#allocation2 + $0x6c] sm:$0xe] }
 0x467   : > { %v7993_v7 = vrot.slane %v17516_v59, 5  ;;  %13506 = vmatmul.mubr.msk.bf16.gmra.mxu0 %vm7373_vm2, %v12372_v44  ;;  %v6696_v31 = vpop.permute.xlu1 %6695  ;;  %v7239_v39 = vrot.slane %v7237_v54, 4  ;;  %v7204_v19 = vrot.slane %v7202_v62, 4  ;;  %v7210_v30 = vrot.slane %v7208_v0, 5  ;;  %v6694_v35 = vpop.permute.xlu0 %6693 }
 0x468   : > { %v7242_v57 = vrot.slane %v7240_v37, 5  ;;  %13509 = vmatprep.mubr.msk.bf16.mxu0 %vm7373_vm2, %v12373_v20  ;;  %v6856_v9 = vsel %vm16995_vm12, %v6696_v31, %v6855_v4  ;;  %v7200_v15 = vrot.slane %v7198_v36, 5  ;;  %v12339_v56 = vcombine.low %v7225_v12, %v7235_v46  ;;  %v6900_v41 = vld [vmem:[#allocation2 + $0xa8] sm:$0xf]  ;;  %6854 = vst.msk [vmem:[#allocation2 + $0xac] sm:$0xf] %vm6121_vm15, %v6694_v35 }
 0x469   : > { %v7992_v2 = vrot.slane %v7990_v40, 4  ;;  %6857 = vst [vmem:[#allocation2 + $0xb0] sm:$0x1] %v6856_v9  ;;  %v7261_v59 = vshrl.u32 %v6900_v41, 16  ;;  %v7264_v44 = vshll.u32 %v6900_v41, 16  ;;  %v17721_v62 = vsel %vm14547_vm8, %v12403_v52, %v7990_v40 }
 0x46a   : > { %v17717_v54 = vld [vmem:[#allocation2 + $0xa4] sm:$0x1]  ;;  %v7243_v0 = vor.u32 %v7242_v57, %v7239_v39  ;;  %v7205_v20 = vor.u32 %v7204_v19, %v7200_v15 }
 0x46b   : > { %v7256_v37 = vshll.u32 %v17717_v54, 16  ;;  %v17726_v4 = vsel %vm14547_vm8, %v7992_v2, %v7993_v7  ;;  %v6054_v36 = vpop.permute.xlu1 %6053  ;;  %v7263_v46 = vrot.slane %v7261_v59, 4  ;;  %v7266_v31 = vrot.slane %v7264_v44, 5  ;;  %v6700_v57 = vpop.permute.xlu0 %6699 }
 0x46c   : > { %20064 = vst [vmem:[#allocation8_spill] sm:$0xff] %v17726_v4  ;;  %v17729_v35 = vrot.slane %v7243_v0, 4  ;;  %v6119_v52 = vmul.f32 %v6054_v36, %v16777_v53  ;;  %v17734_v40 = vld [vmem:[#allocation2 + $0xa0] sm:$0xf]  ;;  %v7201_v2 = vsel %vm14264_vm5, %v17681_v58, %v7200_v15  ;;  %v7206_v7 = vrot.slane %v7205_v20, 4 }
 0x46d   : > { %v6902_v19 = vld [vmem:[#allocation2 + $0xb4] sm:$0xf]  ;;  %v7258_v9 = vrot.slane %v7256_v37, 5  ;;  %6861 = vst.msk [vmem:[#allocation2 + $0xb8] sm:$0xf] %vm6121_vm15, %v6700_v57  ;;  %v7250_v59 = vshrl.u32 %v17734_v40, 16  ;;  %v12374_v44 = vcombine.low %v17694_v38, %v17734_v40  ;;  %v7267_v58 = vor.u32 %v7266_v31, %v7263_v46 }
 0x46e   : > { %v7285_v0 = vshrl.u32 %v6902_v19, 16  ;;  %v7288_v39 = vshll.u32 %v6902_v19, 16  ;;  %v12744_v42 = vpack.c.bf16 %v6119_v52, %v6119_v52  ;;  %v6862_v53 = vld [vmem:[#allocation2 + $0xbc] sm:$0x1]  ;;  %v7211_v36 = vsel %vm14264_vm5, %v7206_v7, %v7210_v30 }
 0x46f   : > { %v7246_v51 = vshll.u32 %v17734_v40, 16  ;;  %13510 = vmatmul.mubr.msk.bf16.gmra.mxu0 %vm7373_vm2, %v12374_v44  ;;  %v12338_v15 = vcombine.low %v7201_v2, %v7211_v36  ;;  %v7252_v57 = vrot.slane %v7250_v59, 4  ;;  %v6702_v11 = vpop.permute.xlu0 %6701  ;;  %v17747_v38 = vld [vmem:[#allocation2 + $0xac] sm:$0xf]  ;;  %v7268_v52 = vrot.slane %v7267_v58, 4 }
 0x470   : > { %v7287_v20 = vrot.slane %v7285_v0, 4  ;;  %v7290_v37 = vrot.slane %v7288_v39, 5  ;;  %v6597_v47 = vshrl.u32 %v12744_v42, 16  ;;  %v6600_v12 = vshll.u32 %v12744_v42, 16  ;;  %v17754_v31 = vld [vmem:[#allocation2 + $0xb0] sm:$0x1] }
 0x471   : > { %v7248_v61 = vrot.slane %v7246_v51, 5  ;;  %v6863_v4 = vsel %vm16995_vm12, %v6702_v11, %v6862_v53  ;;  %13470 = vmatmul.mubr.msk.bf16.gmra.mxu1 %vm7373_vm2, %v12338_v15  ;;  %v7274_v30 = vshrl.u32 %v17747_v38, 16  ;;  %v12375_v46 = vcombine.low %v6900_v41, %v17747_v38 }
 0x472   : > { %v7270_v39 = vshll.u32 %v17747_v38, 16  ;;  %v17757_v2 = vrot.slane %v6597_v47, 7  ;;  %6864 = vst [vmem:[#allocation2 + $0xbc] sm:$0x1] %v6863_v4  ;;  %13473 = vmatprep.mubr.msk.bf16.mxu1 %vm7373_vm2, %v12339_v56  ;;  %v7280_v51 = vshll.u32 %v17754_v31, 16  ;;  %v7291_v59 = vor.u32 %v7290_v37, %v7287_v20 }
 0x473   : > { %v7249_v42 = vsel %vm14264_vm5, %v17729_v35, %v7248_v61  ;;  %v7253_v11 = vor.u32 %v7252_v57, %v7248_v61  ;;  %13513 = vmatprep.mubr.msk.bf16.mxu0 %vm7373_vm2, %v12375_v46  ;;  %v7276_v41 = vrot.slane %v7274_v30, 4  ;;  %v7997_v44 = vrot.slane %v17628_v34, 5  ;;  %v6056_v0 = vpop.permute.xlu0 %6055  ;;  %v7894_v30 = vld [vmem:[#allocation2 + $0x78] sm:$0xe] }
 0x474   : > { %v7272_v7 = vrot.slane %v7270_v39, 5  ;;  %v6602_v47 = vor.u32 %v6600_v12, %v17757_v2  ;;  %v6603_v4 = vrot.slane %v17757_v2, 4  ;;  %v17768_v56 = vld [vmem:[#allocation2 + $0xb8] sm:$0xf]  ;;  %v7282_v36 = vrot.slane %v7280_v51, 5  ;;  %v13879_v12 = vld [vmem:[#allocation2 + $0xc] sm:$0xff]  }
 0x475   : > { %v7254_v53 = vrot.slane %v7253_v11, 4  ;;  %v6120_v61 = vmul.f32 %v6056_v0, %v16791_v21  ;;  %v7298_v35 = vshrl.u32 %v17768_v56, 16  ;;  %v12376_v58 = vcombine.low %v6902_v19, %v17768_v56 }
 0x476   : > { %v7273_v15 = vsel %vm14264_vm5, %v7268_v52, %v7272_v7  ;;  %6703 = vrot.lane.b32.xlu1 %v6602_v47, %s14127_s9  ;;  %v7277_v20 = vor.u32 %v7276_v41, %v7272_v7  ;;  %v7292_v37 = vrot.slane %v7291_v59, 4  ;;  %v7294_v57 = vshll.u32 %v17768_v56, 16 }
 0x477   : > { %v7259_v34 = vsel %vm14264_vm5, %v7254_v53, %v7258_v9  ;;  %v12745_v46 = vpack.c.bf16 %v6120_v61, %v6120_v61  ;;  %13514 = vmatmul.mubr.msk.bf16.gmra.mxu0 %vm7373_vm2, %v12376_v58  ;;  %v7300_v39 = vrot.slane %v7298_v35, 4  ;;  %v20065_v19 = vrot.slane %v17711_v55, 9  ;;  %v7895_v61 = vld [vmem:[#allocation2 + $0x84] sm:$0xe] }
 0x478   : > { %v12340_v21 = vcombine.low %v7249_v42, %v7259_v34  ;;  %13557 = vmatprep.mubr.msk.bf16.mxu0 %vm7373_vm2, %v13879_v12  ;;  %v7278_v9 = vrot.slane %v7277_v20, 4  ;;  %v7296_v2 = vrot.slane %v7294_v57, 5  ;;  %v7999_v11 = vrot.slane %v7997_v44, 4 }
 0x479   : > { %v17784_v52 = vsel %vm14547_vm8, %v20065_v19, %v7997_v44  ;;  %v8000_v51 = vrot.slane %v17606_v10, 5  ;;  %v6605_v7 = vshrl.u32 %v12745_v46, 16  ;;  %v6608_v41 = vshll.u32 %v12745_v46, 16  ;;  %v17789_v59 = vld [vmem:[#allocation2 + $0xbc] sm:$0x1] }
 0x47a   : > { %13474 = vmatmul.mubr.msk.bf16.gmra.mxu1 %vm7373_vm2, %v12340_v21  ;;  %v12405_v42 = vrot.slane %v7894_v30, 9  ;;  %v8004_v55 = vrot.slane %v17585_v32, 5  ;;  %v7283_v47 = vsel %vm14264_vm5, %v7278_v9, %v7282_v36  ;;  %v7297_v0 = vsel %vm14264_vm5, %v7292_v37, %v7296_v2  ;;  %v7896_v32 = vld [vmem:[#allocation2 + $0x90] sm:$0xe] }
 0x47b   : > { %v7301_v53 = vor.u32 %v7300_v39, %v7296_v2  ;;  %v7304_v44 = vshll.u32 %v17789_v59, 16  ;;  %v6607_v10 = vrot.slane %v6605_v7, 7  ;;  %v12341_v35 = vcombine.low %v7273_v15, %v7283_v47  ;;  %v13881_v15 = vld [vmem:[#allocation2 + $0x18] sm:$0xff]   ;;  %v13882_v39 = vld [vmem:[#allocation2 + $0x24] sm:$0xff]  }
 0x47c   : > { %v17799_v58 = vsel %vm14547_vm8, %v7999_v11, %v8000_v51  ;;  %v17803_v34 = vsel %vm14547_vm8, %v12405_v42, %v8004_v55  ;;  %v8006_v37 = vrot.slane %v8004_v55, 4  ;;  %v8007_v46 = vrot.slane %v17601_v22, 5  ;;  %v13899_v51 = vld [vmem:[%s19858_s5 + $0x50] sm:$0xff]  }
 0x47d   : > { %v7302_v12 = vrot.slane %v7301_v53, 4  ;;  %v7306_v36 = vrot.slane %v7304_v44, 5  ;;  %v12424_v20 = vcombine.low %v17784_v52, %v17799_v58  ;;  %v6610_v57 = vor.u32 %v6608_v41, %v6607_v10  ;;  %13477 = vmatprep.mubr.msk.bf16.mxu1 %vm7373_vm2, %v12341_v35  ;;  %v13883_v35 = vld [vmem:[#allocation2 + $0x30] sm:$0xff]  }
 0x47e   : > { %v6612_v30 = vrot.slane %v6607_v10, 4  ;;  %v12406_v21 = vrot.slane %v7895_v61, 9  ;;  %v8011_v9 = vrot.slane %v17692_v1, 5  ;;  %v8014_v2 = vrot.slane %v17675_v27, 5  ;;  %v7897_v27 = vld [vmem:[#allocation2 + $0x9c] sm:$0xe] }
 0x47f   : > { %v7307_v19 = vsel %vm14264_vm5, %v7302_v12, %v7306_v36  ;;  %v12407_v11 = vrot.slane %v7896_v32, 9  ;;  %13558 = vmatmul.mubr.msk.bf16.vlgmr.msra.gmra.mxu0 %vm7373_vm2, %v13881_v15  ;;  %v6611_v22 = vsel %vm17041_vm1, %v6603_v4, %v6610_v57  ;;  %v17822_v41 = vsel %vm14547_vm8, %v8006_v37, %v8007_v46  ;;  %v7899_v10 = vld [vmem:[#allocation2 + $0xb4] sm:$0xe]  ;;  %v13884_v57 = vld [vmem:[#allocation2 + $0x3c] sm:$0xff]  }
 0x480   : > { %6707 = vrot.lane.b32.xlu1 %v6612_v30, %s14127_s9  ;;  %v12342_v7 = vcombine.low %v7297_v0, %v7307_v19  ;;  %v8018_v1 = vrot.slane %v17653_v28, 5  ;;  %13561 = vmatprep.mubr.msk.bf16.mxu0 %vm7373_vm2, %v13882_v39  ;;  %v12425_v42 = vcombine.low %v17803_v34, %v17822_v41  ;;  %v8013_v55 = vrot.slane %v8011_v9, 4  ;;  %v13903_v39 = vld [vmem:[%s19858_s5 + $0x78] sm:$0xff]   ;;  %v17971_v58 = vld [vmem:[#allocation2 + $0x34] sm:$0xf] }
 0x481   : > { %6705 = vrot.lane.b32.xlu0 %v6611_v22, %s14127_s9  ;;  %v8021_v47 = vrot.slane %v17669_v23, 5  ;;  %v8025_v4 = vrot.slane %v17734_v40, 5  ;;  %13626 = vmatpush3.bf16.msra.mxu0 %v17544_v29  ;;  %v20066_v28 = vcombine.low %v17380_v5, %v17398_v49  ;;  %v17839_v0 = vsel %vm14547_vm8, %v12406_v21, %v8011_v9  ;;  %v17902_v9 = vld [vmem:[%s19858_s5 + $0x68] sm:$0xff]   ;;  %v17981_v41 = vld [vmem:[#allocation2 + $0x20] sm:$0x1] }
 0x482   : > { %13478 = vmatmul.mubr.msk.bf16.gmra.mxu1 %vm7373_vm2, %v12342_v7  ;;  %v8020_v63 = vrot.slane %v8018_v1, 4  ;;  %v17843_v53 = vsel %vm14547_vm8, %v8013_v55, %v8014_v2  ;;  %v17847_v23 = vsel %vm14547_vm8, %v12407_v11, %v8018_v1  ;;  %v12408_v40 = vrot.slane %v7897_v27, 9  ;;  %13627 = vmatprep.subr.bf16.mxu0 %v13899_v51  ;;  %v13886_v2 = vld [vmem:[#allocation2 + $0x48] sm:$0xff]   ;;  %v13887_v11 = vld [vmem:[#allocation2 + $0x54] sm:$0xff]  }
 0x483   : > { %13521 = vmatprep.mubr.msk.bf16.mxu1 %vm7373_vm2, %v20066_v28  ;;  %v12426_v29 = vcombine.low %v17839_v0, %v17843_v53  ;;  %v8027_v49 = vrot.slane %v8025_v4, 4  ;;  %v8028_v44 = vrot.slane %v17717_v54, 5  ;;  %v8039_v36 = vrot.slane %v17768_v56, 5  ;;  %v13894_v54 = vld [vmem:[%s19858_s5 + $0x40] sm:$0xff]   ;;  %v13889_v22 = vld [vmem:[#allocation2 + $0x6c] sm:$0xff]  }
 0x484   : > { %v17853_v5 = vsel %vm14547_vm8, %v8020_v63, %v8021_v47  ;;  %v17860_v32 = vsel %vm14547_vm8, %v12408_v40, %v8025_v4  ;;  %v8042_v37 = vrot.slane %v17789_v59, 5  ;;  %v12410_v15 = vrot.slane %v7899_v10, 9  ;;  %v8723_v55 = vld [vmem:[#allocation2 + $0x18] sm:$0xf]  ;;  %v17939_v28 = vld [vmem:[#allocation2 + $0x28] sm:$0xf] }
 0x485   : > { %v12427_v61 = vcombine.low %v17847_v23, %v17853_v5  ;;  %v17864_v12 = vsel %vm14547_vm8, %v8027_v49, %v8028_v44  ;;  %13628 = vmatpush3.bf16.msra.mxu0 %v13899_v51  ;;  %v8041_v46 = vrot.slane %v8039_v36, 4  ;;  %v20067_v56 = vcombine.low %v17328_v33, %v17340_v13  ;;  %v14116_v33 = vld [vmem:[%s19858_s5 + $0x48] sm:$0xff]   ;;  %v13888_v51 = vld [vmem:[#allocation2 + $0x60] sm:$0xff]  }
 0x486   : > { %v12428_v30 = vcombine.low %v17860_v32, %v17864_v12  ;;  %v17881_v59 = vsel %vm14547_vm8, %v12410_v15, %v8039_v36  ;;  %v20068_v19 = vcombine.low %v17318_v3, %v17332_v60  ;;  %13697 = vmatprep.subr.bf16.mxu0 %v13903_v39  ;;  %v20069_v3 = vcombine.low %v17427_v25, %v17431_v6  ;;  %v8720_v6 = vld [vmem:[#allocation2 + $0xc] sm:$0xf]  ;;  %v6237_v0 = vld [vmem:[#allocation2 + $0xc8] sm:$0x1]  ;;  %v8738_v12 = vld [vmem:[#allocation2 + $0x54] sm:$0xf] }
 0x487   : > { %13562 = vmatmul.mubr.msk.bf16.gmra.mxu0 %vm7373_vm2, %v13883_v35  ;;  %v17885_v21 = vsel %vm14547_vm8, %v8041_v46, %v8042_v37  ;;  %v20070_v60 = vcombine.low %v17467_v17, %v17472_v43  ;;  %v20071_v7 = vcombine.low %v17539_v16, %v17532_v24  ;;  %v20072_v25 = vcombine.low %v17592_v14, %v17611_v50  ;;  %v13890_v17 = vld [vmem:[#allocation2 + $0x78] sm:$0xff]   ;;  %v13891_v43 = vld [vmem:[#allocation2 + $0x84] sm:$0xff]   ;;  %v17931_v16 = vld [vmem:[#allocation2 + $0x10] sm:$0xf] }
 0x488   : > { %13565 = vmatprep.mubr.msk.bf16.mxu0 %vm7373_vm2, %v13884_v57  ;;  %v12430_v13 = vcombine.low %v17881_v59, %v17885_v21  ;;  %v8769_v1 = vshrl.u32 %v8720_v6, 16  ;;  %v8772_v27 = vshll.u32 %v8720_v6, 16  ;;  %v20073_v24 = vcombine.low %v17660_v45, %v17687_v26  ;;  %v17933_v14 = vld [vmem:[#allocation2 + $0x1c] sm:$0xf]  ;;  %v7898_v45 = vld [vmem:[#allocation2 + $0xa8] sm:$0xe] }
 0x489   : > { %v20074_v50 = vld [vmem:[#allocation8_spill] sm:$0xff]  ;;  %v8793_v63 = vshrl.u32 %v8723_v55, 16  ;;  %v8796_v4 = vshll.u32 %v8723_v55, 16  ;;  %v8032_v40 = vrot.slane %v17747_v38, 5  ;;  %v8778_v26 = vshll.u32 %v17931_v16, 16 }
 0x48a   : > { %13522 = vmatmul.mubr.msk.bf16.vlgmr.msra.gmra.mxu1 %vm7373_vm2, %v20067_v56  ;;  %v20075_v47 = vcombine.low %v17721_v62, %v20074_v50  ;;  %v8771_v49 = vrot.slane %v8769_v1, 4  ;;  %v8774_v44 = vrot.slane %v8772_v27, 5  ;;  %v8782_v10 = vshrl.u32 %v17931_v16, 16  ;;  %v13892_v62 = vld [vmem:[#allocation2 + $0x90] sm:$0xff]   ;;  %v8726_v38 = vld [vmem:[#allocation2 + $0x24] sm:$0xf] }
 0x48b   : > { %13525 = vmatprep.mubr.msk.bf16.mxu1 %vm7373_vm2, %v20068_v19  ;;  %13590 = vmatpush3.bf16.msra.mxu1 %v14116_v33  ;;  %v8802_v35 = vshll.u32 %v17933_v14, 16  ;;  %v8806_v36 = vshrl.u32 %v17933_v14, 16  ;;  %v8826_v37 = vshll.u32 %v17939_v28, 16  ;;  %v8830_v57 = vshrl.u32 %v17939_v28, 16 }
 0x48c   : > { %13591 = vmatprep.subr.bf16.mxu1 %v13894_v54  ;;  %v8795_v15 = vrot.slane %v8793_v63, 4  ;;  %v8798_v46 = vrot.slane %v8796_v4, 5  ;;  %v12409_v56 = vrot.slane %v7898_v45, 9  ;;  %v8034_v39 = vrot.slane %v8032_v40, 4 }
 0x48d   : > { %v8035_v19 = vrot.slane %v17754_v31, 5  ;;  %v8775_v33 = vor.u32 %v8774_v44, %v8771_v49  ;;  %v17961_v31 = vrot.slane %v8826_v37, 5  ;;  %v8832_v6 = vrot.slane %v8830_v57, 4  ;;  %v13896_v49 = vld [vmem:[#allocation2 + $0xb4] sm:$0xff]   ;;  %v8732_v57 = vld [vmem:[#allocation2 + $0x3c] sm:$0xf] }
 0x48e   : > { %v17969_v1 = vsel %vm14547_vm8, %v12409_v56, %v8032_v40  ;;  %v8799_v52 = vor.u32 %v8798_v46, %v8795_v15  ;;  %v6181_v40 = vld [vmem:[#allocation2 + $0xc0] sm:$0x1]  ;;  %v17993_v37 = vld [vmem:[#allocation2 + $0x38] sm:$0x1] }
 0x48f   : > { %13592 = vmatpush3.bf16.msra.mxu1 %v13894_v54  ;;  %13566 = vmatmul.mubr.msk.bf16.gmra.mxu0 %vm7373_vm2, %v13886_v2  ;;  %v13893_v54 = vld [vmem:[#allocation2 + $0x9c] sm:$0xff]   ;;  %v8729_v2 = vld [vmem:[#allocation2 + $0x30] sm:$0xf]  ;;  %v17977_v27 = vrot.slane %v8775_v33, 4  ;;  %v8833_v4 = vor.u32 %v8832_v6, %v17961_v31  ;;  %v6182_v56 = vsel %vm16995_vm12, 0, %v6181_v40  ;;  %v8868_v6 = vshll.u32 %v8732_v57, 16 }
 0x490   : > { %13661 = vmatprep.subr.bf16.mxu1 %v17902_v9  ;;  %13569 = vmatprep.mubr.msk.bf16.mxu0 %vm7373_vm2, %v13887_v11  ;;  %v17951_v11 = vrot.slane %v8778_v26, 5  ;;  %v8850_v26 = vshll.u32 %v17971_v58, 16  ;;  %6183 = vst [vmem:[#allocation2 + $0xc0] sm:$0x1] %v6182_v56  ;;  %v18031_v40 = vld [vmem:[#allocation2 + $0x58] sm:$0xf] }
 0x492   : > { %13526 = vmatmul.mubr.msk.bf16.gmra.mxu1 %vm7373_vm2, %v20069_v3  ;;  %v8784_v3 = vrot.slane %v8782_v10, 4  ;;  %v8854_v10 = vshrl.u32 %v17971_v58, 16 }
 0x493   : > { %13529 = vmatprep.mubr.msk.bf16.mxu1 %vm7373_vm2, %v20070_v60  ;;  %v17953_v60 = vrot.slane %v8802_v35, 5 }
 0x494   : > { %v8785_v55 = vor.u32 %v8784_v3, %v17951_v11  ;;  %v8735_v3 = vld [vmem:[#allocation2 + $0x48] sm:$0xf] }
 0x495   : > { %v8889_v23 = vshrl.u32 %v8735_v3, 16  ;;  %v8892_v5 = vshll.u32 %v8735_v3, 16 }
 0x497   : > { %13570 = vmatmul.mubr.msk.bf16.gmra.mxu0 %vm7373_vm2, %v13888_v51  ;;  %v8808_v51 = vrot.slane %v8806_v36, 4  ;;  %v8800_v36 = vrot.slane %v8799_v52, 4 }
 0x498   : > { %13573 = vmatprep.mubr.msk.bf16.mxu0 %vm7373_vm2, %v13889_v22  ;;  %v17959_v22 = vld [vmem:[#allocation2 + $0x14] sm:$0x1] }
 0x499   : > { %v8788_v34 = vshll.u32 %v17959_v22, 16  ;;  %v8809_v50 = vor.u32 %v8808_v51, %v17953_v60  ;;  %v18013_v51 = vrot.slane %v8850_v26, 5  ;;  %v8805_v56 = vsel %vm14264_vm5, %v8800_v36, %v17953_v60 }
 0x49a   : > { %13530 = vmatmul.mubr.msk.bf16.gmra.mxu1 %vm7373_vm2, %v20071_v7  ;;  %v8817_v7 = vshrl.u32 %v8726_v38, 16 }
 0x49b   : > { %13533 = vmatprep.mubr.msk.bf16.mxu1 %vm7373_vm2, %v20072_v25  ;;  %v8820_v25 = vshll.u32 %v8726_v38, 16  ;;  %v8790_v15 = vrot.slane %v8788_v34, 5  ;;  %v18001_v38 = vld [vmem:[#allocation2 + $0x40] sm:$0xf]  ;;  %v8753_v34 = vld [vmem:[#allocation2 + $0x90] sm:$0xf] }
 0x49c   : > { %v8878_v52 = vshrl.u32 %v18001_v38, 16 }
 0x49d   : > { %v8822_v63 = vrot.slane %v8820_v25, 5  ;;  %v8860_v25 = vshll.u32 %v17993_v37, 16 }
 0x49f   : > { %13574 = vmatmul.mubr.msk.bf16.gmra.mxu0 %vm7373_vm2, %v13890_v17  ;;  %v8841_v17 = vshrl.u32 %v8729_v2, 16 }
 0x4a0   : > { %13577 = vmatprep.mubr.msk.bf16.mxu0 %vm7373_vm2, %v13891_v43  ;;  %v8844_v43 = vshll.u32 %v8729_v2, 16  ;;  %v8834_v2 = vrot.slane %v8833_v4, 4  ;;  %v8862_v4 = vrot.slane %v8860_v25, 5  ;;  %v18065_v25 = vld [vmem:[#allocation2 + $0x50] sm:$0x1] }
 0x4a1   : > { %v8843_v44 = vrot.slane %v8841_v17, 4  ;;  %v8874_v17 = vshll.u32 %v18001_v38, 16 }
 0x4a2   : > { %13534 = vmatmul.mubr.msk.bf16.gmra.mxu1 %vm7373_vm2, %v20073_v24  ;;  %v13895_v24 = vld [vmem:[#allocation2 + $0xa8] sm:$0xff]   ;;  %v8846_v45 = vrot.slane %v8844_v43, 5 }
 0x4a3   : > { %13537 = vmatprep.mubr.msk.bf16.mxu1 %vm7373_vm2, %v20075_v47  ;;  %v8819_v47 = vrot.slane %v8817_v7, 4  ;;  %v8856_v7 = vrot.slane %v8854_v10, 4  ;;  %v8880_v10 = vrot.slane %v8878_v52, 4  ;;  %v18073_v52 = vld [vmem:[#allocation2 + $0x5c] sm:$0x1] }
 0x4a5   : > { %v8823_v33 = vor.u32 %v8822_v63, %v8819_v47  ;;  %v8857_v63 = vor.u32 %v8856_v7, %v18013_v51 }
 0x4a7   : > { %13578 = vmatmul.mubr.msk.bf16.gmra.mxu0 %vm7373_vm2, %v13892_v62  ;;  %v8812_v62 = vshll.u32 %v17981_v41, 16  ;;  %v8858_v32 = vrot.slane %v8857_v63, 4 }
 0x4a8   : > { %13581 = vmatprep.mubr.msk.bf16.mxu0 %vm7373_vm2, %v13893_v54  ;;  %v8781_v54 = vsel %vm14264_vm5, %v17977_v27, %v17951_v11  ;;  %v8847_v11 = vor.u32 %v8846_v45, %v8843_v44  ;;  %v8824_v27 = vrot.slane %v8823_v33, 4  ;;  %v8870_v44 = vrot.slane %v8868_v6, 5 }
 0x4a9   : > { %v8814_v53 = vrot.slane %v8812_v62, 5  ;;  %v18033_v45 = vrot.slane %v8874_v17, 5  ;;  %v8891_v62 = vrot.slane %v8889_v23, 4  ;;  %v8863_v7 = vsel %vm14264_vm5, %v8858_v32, %v8862_v4 }
 0x4aa   : > { %13538 = vmatmul.mubr.msk.bf16.gmra.mxu1 %vm7373_vm2, %v12424_v20  ;;  %v17975_v20 = vsel %vm14547_vm8, %v8034_v39, %v8035_v19  ;;  %v8786_v39 = vrot.slane %v8785_v55, 4  ;;  %v8810_v19 = vrot.slane %v8809_v50, 4  ;;  %v18024_v55 = vld [vmem:[#allocation2 + $0x4c] sm:$0xf]  ;;  %v8848_v47 = vrot.slane %v8847_v11, 4 }
 0x4ab   : > { %13541 = vmatprep.mubr.msk.bf16.mxu1 %vm7373_vm2, %v12425_v42  ;;  %v17983_v42 = vld [vmem:[#allocation2 + $0x2c] sm:$0x1]  ;;  %v12429_v35 = vcombine.low %v17969_v1, %v17975_v20  ;;  %v18017_v1 = vld [vmem:[#allocation2 + $0x44] sm:$0x1]  ;;  %v8913_v6 = vshrl.u32 %v8738_v12, 16  ;;  %v8916_v17 = vshll.u32 %v8738_v12, 16 }
 0x4ac   : > { %v8836_v46 = vshll.u32 %v17983_v42, 16  ;;  %v8815_v20 = vsel %vm14264_vm5, %v8810_v19, %v8814_v53  ;;  %v8884_v26 = vshll.u32 %v18017_v1, 16  ;;  %v8922_v19 = vshll.u32 %v18031_v40, 16  ;;  %v18060_v11 = vld [vmem:[#allocation2 + $0x64] sm:$0xf] }
 0x4ad   : > { %v18047_v33 = vcombine.low %v8805_v56, %v8815_v20  ;;  %v8853_v60 = vsel %vm14264_vm5, %v8848_v47, %v18013_v51  ;;  %v8950_v20 = vshrl.u32 %v18060_v11, 16  ;;  %v18082_v47 = vld [vmem:[#allocation2 + $0x68] sm:$0x1]  ;;  %v8932_v56 = vshll.u32 %v18073_v52, 16 }
 0x4ae   : > { %v8838_v43 = vrot.slane %v8836_v46, 5  ;;  %v18058_v3 = vrot.slane %v8884_v26, 5  ;;  %v18069_v51 = vrot.slane %v8922_v19, 5  ;;  %v8956_v59 = vshll.u32 %v18082_v47, 16 }
 0x4af   : > { %13582 = vmatmul.mubr.msk.bf16.gmra.mxu0 %vm7373_vm2, %v13895_v24  ;;  %v6238_v24 = vsel %vm17011_vm14, 0, %v6237_v0  ;;  %v8952_v12 = vrot.slane %v8950_v20, 4  ;;  %v8750_v20 = vld [vmem:[#allocation2 + $0x84] sm:$0xf] }
 0x4b0   : > { %13585 = vmatprep.mubr.msk.bf16.mxu0 %vm7373_vm2, %v13896_v49  ;;  %v8839_v50 = vsel %vm14264_vm5, %v8834_v2, %v8838_v43  ;;  %6239 = vst [vmem:[#allocation2 + $0xc8] sm:$0x1] %v6238_v24  ;;  %v8829_v2 = vsel %vm14264_vm5, %v8824_v27, %v17961_v31  ;;  %v8881_v31 = vor.u32 %v8880_v10, %v18033_v45  ;;  %v18071_v43 = vld [vmem:[#allocation2 + $0x70] sm:$0xf] }
 0x4b1   : > { %v18077_v27 = vcombine.low %v8853_v60, %v8863_v7  ;;  %v8970_v26 = vshll.u32 %v18071_v43, 16  ;;  %v8974_v10 = vshrl.u32 %v18071_v43, 16 }
 0x4b2   : > { %13542 = vmatmul.mubr.msk.bf16.gmra.mxu1 %vm7373_vm2, %v12426_v29  ;;  %v8865_v29 = vshrl.u32 %v8732_v57, 16  ;;  %v8894_v57 = vrot.slane %v8892_v5, 5  ;;  %v18084_v4 = vrot.slane %v8881_v31, 4 }
 0x4b3   : > { %13545 = vmatprep.mubr.msk.bf16.mxu1 %vm7373_vm2, %v12427_v61  ;;  %v8791_v61 = vsel %vm14264_vm5, %v8786_v39, %v8790_v15  ;;  %v8898_v15 = vshll.u32 %v18024_v55, 16  ;;  %v8902_v39 = vshrl.u32 %v18024_v55, 16  ;;  %v18101_v60 = vrot.slane %v8970_v26, 5 }
 0x4b4   : > { %v8867_v49 = vrot.slane %v8865_v29, 4  ;;  %v12491_v46 = vcombine.low %v8781_v54, %v8791_v61  ;;  %v18053_v54 = vcombine.low %v8829_v2, %v8839_v50  ;;  %v8895_v0 = vor.u32 %v8894_v57, %v8891_v62 }
 0x4b5   : > { %v18067_v53 = vrot.slane %v8898_v15, 5  ;;  %v8904_v29 = vrot.slane %v8902_v39, 4  ;;  %v8946_v61 = vshll.u32 %v18060_v11, 16  ;;  %v8908_v50 = vshll.u32 %v18065_v25, 16  ;;  %v8747_v39 = vld [vmem:[#allocation2 + $0x78] sm:$0xf] }
 0x4b6   : > { %v8871_v36 = vor.u32 %v8870_v44, %v8867_v49  ;;  %v18086_v49 = vrot.slane %v8895_v0, 4  ;;  %v8744_v44 = vld [vmem:[#allocation2 + $0x6c] sm:$0xf]  ;;  %v8915_v57 = vrot.slane %v8913_v6, 4  ;;  %v8918_v15 = vrot.slane %v8916_v17, 5 }
 0x4b7   : > { %v8905_v62 = vor.u32 %v8904_v29, %v18067_v53  ;;  %v18098_v32 = vrot.slane %v8946_v61, 5  ;;  %v8961_v21 = vshrl.u32 %v8744_v44, 16  ;;  %v8988_v7 = vshll.u32 %v8747_v39, 16  ;;  %v18116_v61 = vld [vmem:[#allocation2 + $0x7c] sm:$0xf] }
 0x4b8   : > { %v18079_v24 = vrot.slane %v8871_v36, 4  ;;  %v8976_v36 = vrot.slane %v8974_v10, 4  ;;  %v8887_v31 = vsel %vm14264_vm5, %v18084_v4, %v18058_v3  ;;  %v8901_v0 = vsel %vm14264_vm5, %v18086_v49, %v18067_v53  ;;  %v13900_v4 = vld [vmem:[%s19858_s5 + $0x60] sm:$0xff]   ;;  %v18124_v10 = vld [vmem:[#allocation2 + $0x88] sm:$0xf] }
 0x4b9   : > { %v8910_v29 = vrot.slane %v8908_v50, 5  ;;  %v8906_v6 = vrot.slane %v8905_v62, 4  ;;  %v8919_v17 = vor.u32 %v8918_v15, %v8915_v57  ;;  %v8963_v3 = vrot.slane %v8961_v21, 4  ;;  %20077 = vst [vmem:[#allocation10_spill] sm:$0xff] %v18124_v10 }
 0x4ba   : > { %13546 = vmatmul.mubr.msk.bf16.gmra.mxu1 %vm7373_vm2, %v12428_v30  ;;  %v8926_v30 = vshrl.u32 %v18031_v40, 16  ;;  %v8977_v50 = vor.u32 %v8976_v36, %v18101_v60  ;;  %v8990_v26 = vrot.slane %v8988_v7, 5  ;;  %v8994_v62 = vshll.u32 %v18116_v61, 16 }
 0x4bb   : > { %13549 = vmatprep.mubr.msk.bf16.mxu1 %vm7373_vm2, %v12429_v35  ;;  %v8741_v35 = vld [vmem:[#allocation2 + $0x60] sm:$0xf]  ;;  %v8998_v57 = vshrl.u32 %v18116_v61, 16  ;;  %v9009_v15 = vshrl.u32 %v8750_v20, 16  ;;  %v9018_v21 = vshll.u32 %v18124_v10, 16 }
 0x4bc   : > { %v8928_v23 = vrot.slane %v8926_v30, 4  ;;  %v8937_v5 = vshrl.u32 %v8741_v35, 16  ;;  %v8940_v63 = vshll.u32 %v8741_v35, 16  ;;  %v8985_v35 = vshrl.u32 %v8747_v39, 16 }
 0x4bd   : > { %v8911_v39 = vsel %vm14264_vm5, %v8906_v6, %v8910_v29  ;;  %v18149_v29 = vrot.slane %v8994_v62, 5  ;;  %v9000_v6 = vrot.slane %v8998_v57, 4  ;;  %v9033_v57 = vshrl.u32 %v8753_v34, 16 }
 0x4be   : > { %v8929_v19 = vor.u32 %v8928_v23, %v18069_v51  ;;  %v8939_v2 = vrot.slane %v8937_v5, 4  ;;  %v8942_v30 = vrot.slane %v8940_v63, 5  ;;  %v8934_v23 = vrot.slane %v8932_v56, 5 }
 0x4bf   : > { %v8953_v5 = vor.u32 %v8952_v12, %v18098_v32  ;;  %v8958_v63 = vrot.slane %v8956_v59, 5  ;;  %v8987_v49 = vrot.slane %v8985_v35, 4  ;;  %v9012_v56 = vshll.u32 %v8750_v20, 16  ;;  %v18138_v59 = vld [vmem:[#allocation2 + $0x80] sm:$0x1] }
 0x4c0   : > { %v8978_v35 = vrot.slane %v8977_v50, 4  ;;  %v12496_v20 = vcombine.low %v8901_v0, %v8911_v39  ;;  %v18160_v50 = vld [vmem:[#allocation2 + $0x94] sm:$0xf]  ;;  %v9036_v39 = vshll.u32 %v8753_v34, 16 }
 0x4c1   : > { %v8991_v7 = vor.u32 %v8990_v26, %v8987_v49  ;;  %v18167_v49 = vld [vmem:[#allocation2 + $0xa0] sm:$0xf]  ;;  %v18172_v26 = vld [vmem:[#allocation2 + $0x8c] sm:$0x1] }
 0x4c2   : > { %13550 = vmatmul.mubr.msk.bf16.gmra.mxu1 %vm7373_vm2, %v12430_v13  ;;  %v8964_v13 = vshll.u32 %v8744_v44, 16  ;;  %v18118_v44 = vld [vmem:[#allocation2 + $0x74] sm:$0x1]  ;;  %20079 = vst [vmem:[#allocation21_spill] sm:$0xff] %v18167_v49 }
 0x4c3   : > { %13593 = vmatprep.mubr.msk.bf16.mxu1 %vm7373_vm2, %v12491_v46  ;;  %v8877_v46 = vsel %vm14264_vm5, %v18079_v24, %v18033_v45  ;;  %v8930_v45 = vrot.slane %v8929_v19, 4  ;;  %v8943_v24 = vor.u32 %v8942_v30, %v8939_v2  ;;  %v8920_v19 = vrot.slane %v8919_v17, 4 }
 0x4c4   : > { %v8966_v53 = vrot.slane %v8964_v13, 5  ;;  %v8954_v2 = vrot.slane %v8953_v5, 4  ;;  %v8980_v12 = vshll.u32 %v18118_v44, 16  ;;  %v9022_v13 = vshrl.u32 %v18124_v10, 16 }
 0x4c5   : > { %v8944_v30 = vrot.slane %v8943_v24, 4  ;;  %v9011_v17 = vrot.slane %v9009_v15, 4  ;;  %v12495_v5 = vcombine.low %v8877_v46, %v8887_v31  ;;  %v9004_v24 = vshll.u32 %v18138_v59, 16  ;;  %v8756_v15 = vld [vmem:[#allocation2 + $0x9c] sm:$0xf] }
 0x4c6   : > { %v8967_v36 = vor.u32 %v8966_v53, %v8963_v3  ;;  %v8925_v10 = vsel %vm14264_vm5, %v8920_v19, %v18069_v51  ;;  %v18158_v3 = vrot.slane %v9018_v21, 5  ;;  %v9024_v53 = vrot.slane %v9022_v13, 4 }
 0x4c7   : > { %v8992_v51 = vrot.slane %v8991_v7, 4  ;;  %v9042_v19 = vshll.u32 %v18160_v50, 16  ;;  %v9028_v13 = vshll.u32 %v18172_v26, 16  ;;  %v9035_v7 = vrot.slane %v9033_v57, 4 }
 0x4c8   : > { %v8968_v0 = vrot.slane %v8967_v36, 4 }
 0x4c9   : > { %v8997_v34 = vsel %vm14264_vm5, %v8992_v51, %v18149_v29 }
 0x4ca   : > { %13594 = vmatmul.mubr.msk.bf16.vlgmr.msra.gmra.mxu1 %vm7373_vm2, %v18047_v33  ;;  %v8935_v33 = vsel %vm14264_vm5, %v8930_v45, %v8934_v23  ;;  %v9014_v23 = vrot.slane %v9012_v56, 5  ;;  %v8982_v45 = vrot.slane %v8980_v12, 5  ;;  %v9006_v56 = vrot.slane %v9004_v24, 5  ;;  %v18195_v24 = vld [vmem:[#allocation2 + $0xb8] sm:$0xf] }
 0x4cb   : > { %13597 = vmatprep.mubr.msk.bf16.mxu1 %vm7373_vm2, %v18053_v54  ;;  %13662 = vmatpush3.bf16.msra.mxu1 %v17902_v9  ;;  %v18145_v9 = vld [vmem:[%s19858_s5 + $0x88] sm:$0xff]   ;;  %v8959_v54 = vsel %vm14264_vm5, %v8954_v2, %v8958_v63  ;;  %v8949_v63 = vsel %vm14264_vm5, %v8944_v30, %v18098_v32  ;;  %v12497_v46 = vcombine.low %v8925_v10, %v8935_v33  ;;  %v9046_v2 = vshrl.u32 %v18160_v50, 16 }
 0x4cc   : > { %13663 = vmatprep.subr.bf16.mxu1 %v13900_v4  ;;  %20078 = vst [vmem:[#allocation11_spill] sm:$0xff] %v18145_v9  ;;  %v18163_v31 = vcombine.low %v8949_v63, %v8959_v54  ;;  %v9001_v32 = vor.u32 %v9000_v6, %v18149_v29  ;;  %v9015_v62 = vor.u32 %v9014_v23, %v9011_v17  ;;  %v9066_v12 = vshll.u32 %v18167_v49, 16  ;;  %v18183_v30 = vld [vmem:[#allocation2 + $0xac] sm:$0xf]  ;;  %v8759_v6 = vld [vmem:[#allocation2 + $0xa8] sm:$0xf] }
 0x4cd   : > { %v8973_v10 = vsel %vm14264_vm5, %v8968_v0, %v18101_v60  ;;  %v9070_v33 = vshrl.u32 %v18167_v49, 16  ;;  %20080 = vst [vmem:[#allocation23_spill] sm:$0xff] %v18183_v30  ;;  %v9057_v54 = vshrl.u32 %v8756_v15, 16  ;;  %v9060_v60 = vshll.u32 %v8756_v15, 16  ;;  %20081 = vst [vmem:[#allocation17_spill] sm:$0xff] %v18195_v24 }
 0x4ce   : > { %v9002_v36 = vrot.slane %v9001_v32, 4  ;;  %v9038_v17 = vrot.slane %v9036_v39, 5  ;;  %v18191_v23 = vrot.slane %v9042_v19, 5  ;;  %v9048_v0 = vrot.slane %v9046_v2, 4  ;;  %v8762_v15 = vld [vmem:[#allocation2 + $0xb4] sm:$0xf] }
 0x4cf   : > { %13664 = vmatpush3.bf16.msra.mxu1 %v13900_v4  ;;  %v8983_v4 = vsel %vm14264_vm5, %v8978_v35, %v8982_v45  ;;  %v9016_v35 = vrot.slane %v9015_v62, 4  ;;  %v9094_v45 = vshrl.u32 %v18183_v30, 16  ;;  %v9072_v29 = vrot.slane %v9070_v33, 4  ;;  %v18208_v33 = vld [vmem:[#allocation2 + $0xa4] sm:$0x1] }
 0x4d0   : > { %13733 = vmatprep.subr.bf16.mxu1 %v18145_v9  ;;  %v18185_v21 = vcombine.low %v8973_v10, %v8983_v4  ;;  %v18199_v4 = vrot.slane %v9066_v12, 5  ;;  %v9059_v51 = vrot.slane %v9057_v54, 4  ;;  %v9062_v32 = vrot.slane %v9060_v60, 5 }
 0x4d1   : > { %v9081_v62 = vshrl.u32 %v8759_v6, 16  ;;  %v9084_v57 = vshll.u32 %v8759_v6, 16  ;;  %v9007_v10 = vsel %vm14264_vm5, %v9002_v36, %v9006_v56  ;;  %v9030_v39 = vrot.slane %v9028_v13, 5 }
 0x4d2   : > { %13598 = vmatmul.mubr.msk.bf16.gmra.mxu1 %vm7373_vm2, %v18077_v27  ;;  %v9025_v27 = vor.u32 %v9024_v53, %v18158_v3  ;;  %v18197_v53 = vld [vmem:[#allocation2 + $0x98] sm:$0x1]  ;;  %v9114_v19 = vshll.u32 %v18195_v24, 16  ;;  %v9039_v2 = vor.u32 %v9038_v17, %v9035_v7  ;;  %v9096_v60 = vrot.slane %v9094_v45, 4 }
 0x4d3   : > { %13601 = vmatprep.mubr.msk.bf16.mxu1 %vm7373_vm2, %v12495_v5  ;;  %v9090_v5 = vshll.u32 %v18183_v30, 16  ;;  %v9052_v12 = vshll.u32 %v18197_v53, 16  ;;  %v9073_v6 = vor.u32 %v9072_v29, %v18199_v4  ;;  %v9105_v56 = vshrl.u32 %v8762_v15, 16  ;;  %v18217_v30 = vld [vmem:[#allocation2 + $0xb0] sm:$0x1] }
 0x4d4   : > { %v9026_v63 = vrot.slane %v9025_v27, 4  ;;  %v9118_v27 = vshrl.u32 %v18195_v24, 16  ;;  %v9108_v13 = vshll.u32 %v8762_v15, 16  ;;  %v9063_v9 = vor.u32 %v9062_v32, %v9059_v51 }
 0x4d5   : > { %v18210_v54 = vrot.slane %v9090_v5, 5  ;;  %v9083_v24 = vrot.slane %v9081_v62, 4  ;;  %v12500_v7 = vcombine.low %v8997_v34, %v9007_v10  ;;  %v9076_v17 = vshll.u32 %v18208_v33, 16 }
 0x4d6   : > { %v9031_v36 = vsel %vm14264_vm5, %v9026_v63, %v9030_v39  ;;  %v18219_v5 = vrot.slane %v9114_v19, 5  ;;  %v9120_v45 = vrot.slane %v9118_v27, 4  ;;  %v9040_v29 = vrot.slane %v9039_v2, 4  ;;  %v18225_v63 = vld [vmem:[#allocation2 + $0xbc] sm:$0x1] }
 0x4d7   : > { %v9054_v15 = vrot.slane %v9052_v12, 5  ;;  %v9097_v49 = vor.u32 %v9096_v60, %v18210_v54  ;;  %v9074_v32 = vrot.slane %v9073_v6, 4  ;;  %v9107_v34 = vrot.slane %v9105_v56, 4  ;;  %v6184_v12 = vld [vmem:[#allocation2 + $0xcc] sm:$0x1] }
 0x4d8   : > { %v9110_v62 = vrot.slane %v9108_v13, 5  ;;  %v9064_v10 = vrot.slane %v9063_v9, 4  ;;  %v9100_v19 = vshll.u32 %v18217_v30, 16  ;;  %v9078_v27 = vrot.slane %v9076_v17, 5 }
 0x4d9   : > { %v9524_v2 = vrot.slane %v17931_v16, 5  ;;  %v9045_v9 = vsel %vm14264_vm5, %v9040_v29, %v18191_v23  ;;  %v9098_v60 = vrot.slane %v9097_v49, 4  ;;  %v6185_v49 = vsel %vm16995_vm12, 0, %v6184_v12 }
 0x4da   : > { %13602 = vmatmul.mubr.msk.bf16.gmra.mxu1 %vm7373_vm2, %v12496_v20  ;;  %v9049_v20 = vor.u32 %v9048_v0, %v18191_v23  ;;  %v9021_v0 = vsel %vm14264_vm5, %v9016_v35, %v18158_v3  ;;  %v9121_v3 = vor.u32 %v9120_v45, %v18219_v5  ;;  %v9124_v35 = vshll.u32 %v18225_v63, 16  ;;  %6186 = vst [vmem:[#allocation2 + $0xcc] sm:$0x1] %v6185_v49 }
 0x4db   : > { %13605 = vmatprep.mubr.msk.bf16.mxu1 %vm7373_vm2, %v12497_v46  ;;  %v9086_v46 = vrot.slane %v9084_v57, 5  ;;  %v12501_v51 = vcombine.low %v9021_v0, %v9031_v36  ;;  %v9069_v6 = vsel %vm14264_vm5, %v9064_v10, %v18199_v4  ;;  %v9079_v16 = vsel %vm14264_vm5, %v9074_v32, %v9078_v27  ;;  %v6865_v0 = vld [vmem:[#allocation2 + $0xc0] sm:$0xf] }
 0x4dc   : > { %v9050_v57 = vrot.slane %v9049_v20, 4  ;;  %v9531_v20 = vrot.slane %v17933_v14, 5  ;;  %v9111_v56 = vor.u32 %v9110_v62, %v9107_v34  ;;  %v9102_v36 = vrot.slane %v9100_v19, 5 }
 0x4dd   : > { %v9087_v39 = vor.u32 %v9086_v46, %v9083_v24  ;;  %v9538_v23 = vrot.slane %v17939_v28, 5  ;;  %v9122_v46 = vrot.slane %v9121_v3, 4  ;;  %v9126_v17 = vrot.slane %v9124_v35, 5  ;;  %v9461_v35 = vld [vmem:[#allocation2 + $0x30] sm:$0xe] }
 0x4de   : > { %v9055_v24 = vsel %vm14264_vm5, %v9050_v57, %v9054_v15  ;;  %v9526_v45 = vrot.slane %v9524_v2, 4  ;;  %v18250_v29 = vcombine.low %v9069_v6, %v9079_v16  ;;  %v9103_v15 = vsel %vm14264_vm5, %v9098_v60, %v9102_v36  ;;  %v9462_v6 = vld [vmem:[#allocation2 + $0x3c] sm:$0xe] }
 0x4df   : > { %v9088_v13 = vrot.slane %v9087_v39, 4  ;;  %v12502_v4 = vcombine.low %v9045_v9, %v9055_v24  ;;  %v9533_v32 = vrot.slane %v9531_v20, 4  ;;  %v9112_v62 = vrot.slane %v9111_v56, 4  ;;  %v9460_v39 = vld [vmem:[#allocation2 + $0x24] sm:$0xe] }
 0x4e0   : > { %v9534_v27 = vrot.slane %v17981_v41, 5  ;;  %v9540_v3 = vrot.slane %v9538_v23, 4  ;;  %v9545_v12 = vrot.slane %v17971_v58, 5  ;;  %v9552_v9 = vrot.slane %v18001_v38, 5 }
 0x4e1   : > { %v9093_v28 = vsel %vm14264_vm5, %v9088_v13, %v18210_v54  ;;  %v9127_v60 = vsel %vm14264_vm5, %v9122_v46, %v9126_v17  ;;  %v9117_v58 = vsel %vm14264_vm5, %v9112_v62, %v18219_v5  ;;  %v9541_v38 = vrot.slane %v17983_v42, 5  ;;  %v6869_v62 = vld [vmem:[#allocation2 + $0xc8] sm:$0x1] }
 0x4e2   : > { %13606 = vmatmul.mubr.msk.bf16.gmra.mxu1 %vm7373_vm2, %v18163_v31  ;;  %v9458_v31 = vld [vmem:[#allocation2 + $0xc] sm:$0xe]  ;;  %v18271_v24 = vcombine.low %v9093_v28, %v9103_v15  ;;  %v18281_v41 = vsel %vm14547_vm8, %v9533_v32, %v9534_v27  ;;  %v12528_v13 = vrot.slane %v9461_v35, 9  ;;  %v18291_v5 = vcombine.low %v9117_v58, %v9127_v60  ;;  %v9465_v60 = vld [vmem:[#allocation2 + $0x60] sm:$0xe] }
 0x4e3   : > { %13609 = vmatprep.mubr.msk.bf16.mxu1 %vm7373_vm2, %v18185_v21  ;;  %v9527_v21 = vrot.slane %v17959_v22, 5  ;;  %v12525_v14 = vrot.slane %v9458_v31, 9  ;;  %v9459_v22 = vld [vmem:[#allocation2 + $0x18] sm:$0xe]  ;;  %v18295_v36 = vsel %vm14547_vm8, %v9540_v3, %v9541_v38  ;;  %v9547_v42 = vrot.slane %v9545_v12, 4 }
 0x4e4   : > { %v12526_v31 = vrot.slane %v9459_v22, 9  ;;  %v9554_v49 = vrot.slane %v9552_v9, 4  ;;  %v12529_v17 = vrot.slane %v9462_v6, 9  ;;  %v9555_v22 = vrot.slane %v18017_v1, 5  ;;  %v18467_v46 = vld [vmem:[#allocation2 + $0x28] sm:$0xf] }
 0x4e5   : > { %v18259_v57 = vsel %vm14547_vm8, %v12525_v14, %v9524_v2  ;;  %v18263_v10 = vsel %vm14547_vm8, %v9526_v45, %v9527_v21  ;;  %v12527_v21 = vrot.slane %v9460_v39, 9  ;;  %v9559_v14 = vrot.slane %v18024_v55, 5 }
 0x4e6   : > { %v13487_v34 = vpop.f32.mrf.mxu0  ;;  %v12545_v56 = vcombine.low %v18259_v57, %v18263_v10  ;;  %v9562_v39 = vrot.slane %v18065_v25, 5  ;;  %v18325_v3 = vsel %vm14547_vm8, %v9554_v49, %v9555_v22  ;;  %v9573_v1 = vrot.slane %v18060_v11, 5 }
 0x4e7   : > { %v18303_v45 = vsel %vm14547_vm8, %v12527_v21, %v9538_v23  ;;  %v9580_v35 = vrot.slane %v18071_v43, 5  ;;  %v9569_v38 = vrot.slane %v18073_v52, 5  ;;  %v12532_v52 = vrot.slane %v9465_v60, 9 }
 0x4e8   : > { %v6704_v19 = vpop.permute.xlu1 %6703  ;;  %v7757_v16 = vpop.f32.mrf.mxu0  ;;  %v9575_v49 = vrot.slane %v9573_v1, 4 }
 0x4e9   : > { %v6866_v2 = vsel %vm17259_vm3, %v6704_v19, %v6865_v0  ;;  %v18307_v0 = vsel %vm14547_vm8, %v12528_v13, %v9545_v12  ;;  %v9464_v19 = vld [vmem:[#allocation2 + $0x54] sm:$0xe]  ;;  %v9587_v13 = vrot.slane %v18116_v61, 5 }
 0x4ea   : > { %13610 = vmatmul.mubr.msk.bf16.gmra.mxu1 %vm7373_vm2, %v12500_v7  ;;  %6867 = vst [vmem:[#allocation2 + $0xc0] sm:$0xf] %v6866_v2  ;;  %v9548_v7 = vrot.slane %v17993_v37, 5  ;;  %v9463_v37 = vld [vmem:[#allocation2 + $0x48] sm:$0xe]  ;;  %v13488_v32 = vpop.f32.mrf.mxu0  ;;  %v12531_v58 = vrot.slane %v9464_v19, 9 }
 0x4eb   : > { %13613 = vmatprep.mubr.msk.bf16.mxu1 %vm7373_vm2, %v12501_v51  ;;  %v18289_v51 = vsel %vm14547_vm8, %v12526_v31, %v9531_v20  ;;  %v9566_v20 = vrot.slane %v18031_v40, 5  ;;  %v18318_v40 = vsel %vm14547_vm8, %v12529_v17, %v9552_v9  ;;  %v12530_v23 = vrot.slane %v9463_v37, 9  ;;  %v9467_v17 = vld [vmem:[#allocation2 + $0x78] sm:$0xe]  ;;  %v20092_v9 = vld [vmem:[#allocation23_spill] sm:$0xff] }
 0x4ec   : > { %v18311_v15 = vsel %vm14547_vm8, %v9547_v42, %v9548_v7  ;;  %v18343_v7 = vpop.f32.mrf.mxu0  ;;  %v9582_v37 = vrot.slane %v9580_v35, 4  ;;  %v9583_v19 = vrot.slane %v18118_v44, 5  ;;  %v9615_v55 = vrot.slane %v20092_v9, 5 }
 0x4ed   : > { %v18334_v25 = vsel %vm14547_vm8, %v12530_v23, %v9559_v14  ;;  %v9568_v2 = vrot.slane %v9566_v20, 4  ;;  %v9590_v23 = vrot.slane %v18138_v59, 5  ;;  %v18365_v61 = vsel %vm14547_vm8, %v12531_v58, %v9566_v20 }
 0x4ee   : > { %v9589_v59 = vrot.slane %v9587_v13, 4  ;;  %v18381_v20 = vsel %vm14547_vm8, %v9582_v37, %v9583_v19  ;;  %v9604_v19 = vrot.slane %v18197_v53, 5 }
 0x4ef   : > { %v13451_v28 = vpop.f32.mrf.mxu1 }
 0x4f0   : > { %v18321_v27 = vadd.f32 %v13487_v34, %v13451_v28  ;;  %v9561_v34 = vrot.slane %v9559_v14, 4 }
 0x4f1   : > { %v7456_v54 = vpop.f32.mrf.mxu1 }
 0x4f2   : > { %20083 = vst [vmem:[#allocation13_spill] sm:$0xff] %v18321_v27  ;;  %13614 = vmatmul.mubr.msk.bf16.gmra.mxu1 %vm7373_vm2, %v12502_v4  ;;  %v6708_v12 = vpop.permute.xlu1 %6707  ;;  %v18340_v43 = vadd.f32 %v7757_v16, %v7456_v54  ;;  %v8765_v4 = vld [vmem:[#allocation2 + $0xc0] sm:$0xf]  ;;  %v18350_v21 = vsel %vm14547_vm8, %v9561_v34, %v9562_v39  ;;  %v9466_v16 = vld [vmem:[#allocation2 + $0x6c] sm:$0xe] }
 0x4f3   : > { %v6870_v31 = vsel %vm16995_vm12, %v6708_v12, %v6869_v62  ;;  %13617 = vmatprep.mubr.msk.bf16.mxu1 %vm7373_vm2, %v18250_v29  ;;  %v6706_v11 = vpop.permute.xlu0 %6705  ;;  %v13452_v6 = vpop.f32.mrf.mxu1  ;;  %v9576_v29 = vrot.slane %v18082_v47, 5  ;;  %v9129_v22 = vshrl.u32 %v8765_v4, 16  ;;  %v9132_v28 = vshll.u32 %v8765_v4, 16  ;;  %v9468_v39 = vld [vmem:[#allocation2 + $0x84] sm:$0xe]  ;;  %v20086_v34 = vld [vmem:[#allocation10_spill] sm:$0xff] }
 0x4f4   : > { %20084 = vst [vmem:[#allocation26_spill] sm:$0xff] %v18340_v43  ;;  %6871 = vst [vmem:[#allocation2 + $0xc8] sm:$0x1] %v6870_v31  ;;  %v18354_v42 = vadd.f32 %v13488_v32, %v13452_v6  ;;  %v18358_v62 = vsel %vm14547_vm8, %v9568_v2, %v9569_v38  ;;  %v18369_v32 = vsel %vm14547_vm8, %v12532_v52, %v9573_v1  ;;  %v12533_v54 = vrot.slane %v9466_v16, 9 }
 0x4f5   : > { %6868 = vst.msk [vmem:[#allocation2 + $0xc4] sm:$0xf] %vm6121_vm15, %v6706_v11  ;;  %v13491_v14 = vpop.f32.mrf.mxu0  ;;  %v18374_v12 = vsel %vm14547_vm8, %v9575_v49, %v9576_v29  ;;  %v9594_v2 = vrot.slane %v20086_v34, 5  ;;  %v12534_v31 = vrot.slane %v9467_v17, 9  ;;  %v12535_v1 = vrot.slane %v9468_v39, 9  ;;  %v18413_v39 = vpop.f32.mrf.mxu1 }
 0x4f6   : > { %20085 = vst [vmem:[#allocation18_spill] sm:$0xff] %v18354_v42  ;;  %v9469_v11 = vld [vmem:[#allocation2 + $0x90] sm:$0xe]  ;;  %v9131_v44 = vrot.slane %v9129_v22, 4  ;;  %v9134_v58 = vrot.slane %v9132_v28, 5  ;;  %v18387_v38 = vsel %vm14547_vm8, %v9589_v59, %v9590_v23  ;;  %v9597_v6 = vrot.slane %v18172_v26, 5 }
 0x4f7   : > { %v7773_v4 = vpop.f32.mrf.mxu0  ;;  %v18390_v29 = vld [vmem:[#allocation2 + $0x9c] sm:$0xe]  ;;  %v18404_v37 = vsel %vm14547_vm8, %v12534_v31, %v9587_v13  ;;  %v9601_v26 = vrot.slane %v18160_v50, 5  ;;  %v9596_v23 = vrot.slane %v9594_v2, 4  ;;  %v18420_v50 = vsel %vm14547_vm8, %v12535_v1, %v9594_v2 }
 0x4f8   : > { %v12536_v13 = vrot.slane %v9469_v11, 9  ;;  %v9135_v34 = vor.u32 %v9134_v58, %v9131_v44  ;;  %v12537_v1 = vrot.slane %v18390_v29, 9  ;;  %v20088_v11 = vld [vmem:[#allocation21_spill] sm:$0xff]  ;;  %v9611_v44 = vrot.slane %v18208_v33, 5  ;;  %v9471_v58 = vld [vmem:[#allocation2 + $0xa8] sm:$0xe] }
 0x4f9   : > { %v13492_v59 = vpop.f32.mrf.mxu0  ;;  %v9603_v53 = vrot.slane %v9601_v26, 4  ;;  %v9608_v60 = vrot.slane %v20088_v11, 5  ;;  %v13913_v33 = vld [vmem:[%s19858_s5 + $0x70] sm:$0xff]  }
 0x4fa   : > { %13618 = vmatmul.mubr.msk.bf16.gmra.mxu1 %vm7373_vm2, %v18271_v24  ;;  %v18400_v24 = vsel %vm14547_vm8, %v12533_v54, %v9580_v35  ;;  %v10311_v54 = vld [vmem:[#allocation2 + $0x18] sm:$0xf]  ;;  %v18428_v35 = vld [vmem:[#allocation2 + $0x1c] sm:$0xf]  ;;  %v18432_v2 = vsel %vm14547_vm8, %v12536_v13, %v9601_v26 }
 0x4fb   : > { %13621 = vmatprep.mubr.msk.bf16.mxu1 %vm7373_vm2, %v18291_v5  ;;  %v18407_v17 = vld [vmem:[#allocation2 + $0xc8] sm:$0x1]  ;;  %20087 = vst [vmem:[#allocation31_spill] sm:$0xff] %v18432_v2  ;;  %v10363_v47 = vshll.u32 %v10311_v54, 16  ;;  %v10369_v13 = vshll.u32 %v18428_v35, 16  ;;  %v10373_v26 = vshrl.u32 %v18428_v35, 16  ;;  %v18445_v29 = vpop.f32.mrf.mxu0 }
 0x4fc   : > { %v13901_v16 = vld [vmem:[#allocation2 + $0xc0] sm:$0xff]   ;;  %v9148_v28 = vshll.u32 %v18407_v17, 16  ;;  %v18557_v2 = vld [vmem:[#allocation2 + $0x38] sm:$0x1] }
 0x4fd   : > { %v18394_v52 = vld [vmem:[#allocation2 + $0xc4] sm:$0xf]  ;;  %13586 = vmatmul.mubr.msk.bf16.gmra.mxu0 %vm7373_vm2, %v13901_v16 }
 0x4fe   : > { %v9138_v5 = vshll.u32 %v18394_v52, 16  ;;  %v9142_v22 = vshrl.u32 %v18394_v52, 16  ;;  %13629 = vmatprep.mubr.msk.bf16.mxu0 %vm7373_vm2, %v12545_v56  ;;  %v13455_v49 = vpop.f32.mrf.mxu1  ;;  %v18440_v56 = vsel %vm14547_vm8, %v9596_v23, %v9597_v6  ;;  %v18456_v23 = vsel %vm14547_vm8, %v9603_v53, %v9604_v19  ;;  %v13902_v53 = vld [vmem:[#allocation2 + $0x18] sm:$0xff]  }
 0x4ff   : > { %v18436_v57 = vadd.f32 %v13491_v14, %v13455_v49  ;;  %v9136_v14 = vrot.slane %v9135_v34, 4  ;;  %20091 = vst [vmem:[#allocation20_spill] sm:$0xff] %v18456_v23  ;;  %v9610_v6 = vrot.slane %v9608_v60, 4  ;;  %v20094_v19 = vcombine.low %v18289_v51, %v18281_v41  ;;  %v14117_v41 = vld [vmem:[%s19858_s5 + $0x78] sm:$0xff]   ;;  %v18485_v51 = vld [vmem:[#allocation2 + $0x20] sm:$0x1] }
 0x500   : > { %v9140_v31 = vrot.slane %v9138_v5, 5  ;;  %v9144_v16 = vrot.slane %v9142_v22, 4  ;;  %v7472_v5 = vpop.f32.mrf.mxu1  ;;  %v10360_v22 = vshrl.u32 %v10311_v54, 16  ;;  %v12538_v54 = vrot.slane %v9471_v58, 9  ;;  %v18473_v58 = vld [vmem:[#allocation2 + $0xb4] sm:$0xe] }
 0x501   : > { %20089 = vst [vmem:[#allocation19_spill] sm:$0xff] %v18436_v57  ;;  %v18447_v11 = vadd.f32 %v7773_v4, %v7472_v5  ;;  %v10314_v4 = vld [vmem:[#allocation2 + $0x24] sm:$0xf] }
 0x502   : > { %v9145_v10 = vor.u32 %v9144_v16, %v9140_v31  ;;  %v9150_v16 = vrot.slane %v9148_v28, 5  ;;  %v13456_v8 = vpop.f32.mrf.mxu1  ;;  %v18459_v5 = vpop.f32.mrf.mxu0  ;;  %v9141_v28 = vsel %vm14264_vm5, %v9136_v14, %v9140_v31  ;;  %v20096_v14 = vcombine.low %v18303_v45, %v18295_v36 }
 0x503   : > { %20090 = vst [vmem:[#allocation32_spill] sm:$0xff] %v18447_v11  ;;  %v18461_v34 = vadd.f32 %v13492_v59, %v13456_v8  ;;  %v20095_v8 = vld [vmem:[#allocation17_spill] sm:$0xff]  ;;  %v10365_v11 = vrot.slane %v10363_v47, 5  ;;  %v18494_v45 = vsel %vm14547_vm8, %v12537_v1, %v9608_v60  ;;  %v10393_v47 = vshll.u32 %v18467_v46, 16 }
 0x504   : > { %v9146_v49 = vrot.slane %v9145_v10, 4  ;;  %v19887_v59 = vrot.slane %v20095_v8, 5  ;;  %v18476_v31 = vpop.f32.mrf.mxu0  ;;  %20097 = vst [vmem:[#allocation34_spill] sm:$0xff] %v18494_v45  ;;  %v12539_v60 = vrot.slane %v18473_v58, 9  ;;  %v18518_v57 = vpop.f32.mrf.mxu1  ;;  %v18520_v58 = vld [vmem:[#allocation2 + $0x2c] sm:$0x1] }
 0x505   : > { %20093 = vst [vmem:[#allocation27_spill] sm:$0xff] %v18461_v34  ;;  %13630 = vmatmul.mubr.msk.bf16.vlgmr.msra.gmra.mxu0 %vm7373_vm2, %v20094_v19  ;;  %v10362_v34 = vrot.slane %v10360_v22, 4  ;;  %v10387_v22 = vshll.u32 %v10314_v4, 16  ;;  %v9618_v19 = vrot.slane %v18217_v30, 5  ;;  %v18516_v30 = vld [vmem:[#allocation2 + $0x40] sm:$0xf] }
 0x506   : > { %v9151_v10 = vsel %vm14264_vm5, %v9146_v49, %v9150_v16  ;;  %13633 = vmatprep.mubr.msk.bf16.mxu0 %vm7373_vm2, %v20096_v14  ;;  %13698 = vmatpush3.bf16.msra.mxu0 %v14117_v41  ;;  %v18487_v49 = vrot.slane %v10369_v13, 5  ;;  %v10375_v16 = vrot.slane %v10373_v26, 4  ;;  %v18501_v13 = vsel %vm14547_vm8, %v9610_v6, %v9611_v44  ;;  %v18513_v41 = vld [vmem:[#allocation2 + $0x34] sm:$0xf]  ;;  %v13496_v44 = vpop.f32.mrf.mxu0 }
 0x507   : > { %v12506_v9 = vcombine.low %v9141_v28, %v9151_v10  ;;  %v10384_v28 = vshrl.u32 %v10314_v4, 16  ;;  %13699 = vmatprep.subr.bf16.mxu0 %v13913_v33  ;;  %v10397_v10 = vshrl.u32 %v18467_v46, 16  ;;  %20098 = vst [vmem:[#allocation25_spill] sm:$0xff] %v18501_v13  ;;  %v18505_v26 = vsel %vm14547_vm8, %v12538_v54, %v9615_v55 }
 0x508   : > { %v9617_v4 = vrot.slane %v9615_v55, 4  ;;  %v9624_v1 = vrot.slane %v19887_v59, 4  ;;  %v9625_v14 = vrot.slane %v18225_v63, 5  ;;  %v10366_v6 = vor.u32 %v10365_v11, %v10362_v34  ;;  %v18545_v27 = vpop.f32.mrf.mxu0 }
 0x509   : > { %13622 = vmatmul.mubr.msk.bf16.gmra.mxu1 %vm7373_vm2, %v12506_v9  ;;  %v10317_v9 = vld [vmem:[#allocation2 + $0x30] sm:$0xf]  ;;  %v10376_v54 = vor.u32 %v10375_v16, %v18487_v49  ;;  %v10386_v55 = vrot.slane %v10384_v28, 4  ;;  %v10389_v36 = vrot.slane %v10387_v22, 5  ;;  %v18522_v59 = vrot.slane %v10393_v47, 5  ;;  %v13905_v22 = vld [vmem:[#allocation2 + $0x24] sm:$0xff]  }
 0x50a   : > { %13665 = vmatprep.mubr.msk.bf16.mxu1 %vm7373_vm2, %v13902_v53  ;;  %v10379_v53 = vshll.u32 %v18485_v51, 16  ;;  %13700 = vmatpush3.bf16.msra.mxu0 %v13913_v33  ;;  %v10399_v63 = vrot.slane %v10397_v10, 4  ;;  %v10408_v42 = vshrl.u32 %v10317_v9, 16  ;;  %v10411_v43 = vshll.u32 %v10317_v9, 16  ;;  %v13914_v47 = vld [vmem:[%s19858_s5 + $0x80] sm:$0xff]   ;;  %20100 = vst [vmem:[#allocation28_spill] sm:$0xff] %v18545_v27 }
 0x50b   : > { %v18528_v11 = vsel %vm14547_vm8, %v9617_v4, %v9618_v19  ;;  %v10417_v33 = vshll.u32 %v18513_v41, 16  ;;  %v10421_v34 = vshrl.u32 %v18513_v41, 16  ;;  %v20099_v28 = vcombine.low %v18307_v0, %v18311_v15 }
 0x50c   : > { %v13459_v16 = vpop.f32.mrf.mxu1  ;;  %v18541_v10 = vsel %vm14547_vm8, %v9624_v1, %v9625_v14  ;;  %v10381_v4 = vrot.slane %v10379_v53, 5  ;;  %v10441_v19 = vshll.u32 %v18516_v30, 16  ;;  %v10445_v9 = vshrl.u32 %v18516_v30, 16  ;;  %v10320_v14 = vld [vmem:[#allocation2 + $0x3c] sm:$0xf] }
 0x50d   : > { %13634 = vmatmul.mubr.msk.bf16.gmra.mxu0 %vm7373_vm2, %v20099_v28  ;;  %v18548_v0 = vadd.f32 %v18459_v5, %v13459_v16  ;;  %v20102_v15 = vcombine.low %v18318_v40, %v18325_v3  ;;  %v13906_v28 = vld [vmem:[#allocation2 + $0x30] sm:$0xff]   ;;  %v10367_v13 = vrot.slane %v10366_v6, 4  ;;  %v10390_v45 = vor.u32 %v10389_v36, %v10386_v55 }
 0x50e   : > { %v10403_v1 = vshll.u32 %v18520_v58, 16  ;;  %v7488_v53 = vpop.f32.mrf.mxu1  ;;  %v10377_v23 = vrot.slane %v10376_v54, 4  ;;  %v10400_v27 = vor.u32 %v10399_v63, %v18522_v59  ;;  %v10410_v5 = vrot.slane %v10408_v42, 4  ;;  %v20104_v3 = vld [vmem:[#allocation11_spill] sm:$0xff]  ;;  %v13499_v6 = vpop.f32.mrf.mxu0 }
 0x50f   : > { %20101 = vst [vmem:[#allocation29_spill] sm:$0xff] %v18548_v0  ;;  %13637 = vmatprep.mubr.msk.bf16.mxu0 %vm7373_vm2, %v20102_v15  ;;  %v10413_v16 = vrot.slane %v10411_v43, 5  ;;  %v18560_v40 = vadd.f32 %v18476_v31, %v7488_v53  ;;  %v18564_v36 = vrot.slane %v10417_v33, 5  ;;  %v10423_v55 = vrot.slane %v10421_v34, 4 }
 0x510   : > { %v13460_v54 = vpop.f32.mrf.mxu1  ;;  %v10432_v63 = vshrl.u32 %v10320_v14, 16  ;;  %v10435_v15 = vshll.u32 %v10320_v14, 16  ;;  %v18567_v0 = vrot.slane %v10441_v19, 5  ;;  %v10447_v43 = vrot.slane %v10445_v9, 4  ;;  %v7805_v31 = vpop.f32.mrf.mxu0 }
 0x511   : > { %13666 = vmatmul.mubr.msk.bf16.vlgmr.msra.gmra.mxu1 %vm7373_vm2, %v13905_v22  ;;  %20103 = vst [vmem:[#allocation40_spill] sm:$0xff] %v18560_v40  ;;  %v18569_v42 = vadd.f32 %v13496_v44, %v13460_v54  ;;  %v10427_v34 = vshll.u32 %v18557_v2, 16  ;;  %v10372_v44 = vsel %vm14264_vm5, %v10367_v13, %v18487_v49  ;;  %v10382_v19 = vsel %vm14264_vm5, %v10377_v23, %v10381_v4  ;;  %v18590_v22 = vld [vmem:[#allocation2 + $0x4c] sm:$0xf]  ;;  %v13907_v49 = vld [vmem:[#allocation2 + $0x3c] sm:$0xff]  }
 0x512   : > { %13734 = vmatpush3.bf16.msra.mxu1 %v20104_v3  ;;  %13669 = vmatprep.mubr.msk.bf16.mxu1 %vm7373_vm2, %v13906_v28  ;;  %v20106_v28 = vrot.slane %v20095_v8, 5  ;;  %v10405_v9 = vrot.slane %v10403_v1, 5  ;;  %v10323_v3 = vld [vmem:[#allocation2 + $0x48] sm:$0xf]  ;;  %v10391_v8 = vrot.slane %v10390_v45, 4  ;;  %v10401_v54 = vrot.slane %v10400_v27, 4  ;;  %v13500_v45 = vpop.f32.mrf.mxu0 }
 0x513   : > { %13735 = vmatprep.subr.bf16.mxu1 %v13914_v47  ;;  %20105 = vst [vmem:[#allocation35_spill] sm:$0xff] %v18569_v42  ;;  %v10414_v53 = vor.u32 %v10413_v16, %v10410_v5  ;;  %v20107_v14 = vcombine.low %v18334_v25, %v18350_v21  ;;  %v20108_v23 = vrot.slane %v18428_v35, 5  ;;  %v10434_v4 = vrot.slane %v10432_v63, 4  ;;  %v13908_v5 = vld [vmem:[#allocation2 + $0x48] sm:$0xff]   ;;  %v11049_v21 = vld [vmem:[#allocation2 + $0x18] sm:$0xe]  ;;  %v18605_v42 = vpop.f32.mrf.mxu1 }
 0x514   : > { %v18577_v33 = vsel %vm14547_vm8, %v12539_v60, %v20106_v28  ;;  %v10424_v60 = vor.u32 %v10423_v55, %v18564_v36  ;;  %v18588_v28 = vld [vmem:[#allocation2 + $0x44] sm:$0x1]  ;;  %v10448_v27 = vor.u32 %v10447_v43, %v18567_v0  ;;  %v20109_v1 = vcombine.low %v18365_v61, %v18358_v62  ;;  %v18622_v40 = vpop.f32.mrf.mxu0 }
 0x515   : > { %13638 = vmatmul.mubr.msk.bf16.gmra.mxu0 %vm7373_vm2, %v20107_v14  ;;  %v11117_v13 = vrot.slane %v20108_v23, 4  ;;  %v18603_v16 = vcombine.low %v10372_v44, %v10382_v19  ;;  %v10429_v25 = vrot.slane %v10427_v34, 5  ;;  %v10456_v55 = vshrl.u32 %v10323_v3, 16 }
 0x516   : > { %13736 = vmatpush3.bf16.msra.mxu1 %v13914_v47  ;;  %v10437_v47 = vrot.slane %v10435_v15, 5  ;;  %13641 = vmatprep.mubr.msk.bf16.mxu0 %vm7373_vm2, %v20109_v1  ;;  %v10459_v14 = vshll.u32 %v10323_v3, 16  ;;  %v11118_v63 = vrot.slane %v18485_v51, 5  ;;  %v10451_v15 = vshll.u32 %v18588_v28, 16 }
 0x517   : > { %v10465_v43 = vshll.u32 %v18590_v22, 16  ;;  %v10469_v62 = vshrl.u32 %v18590_v22, 16  ;;  %v10396_v61 = vsel %vm14264_vm5, %v10391_v8, %v18522_v59  ;;  %v10406_v34 = vsel %vm14264_vm5, %v10401_v54, %v10405_v9  ;;  %v18628_v8 = vld [vmem:[#allocation2 + $0x50] sm:$0x1] }
 0x518   : > { %v10415_v44 = vrot.slane %v10414_v53, 4  ;;  %v10425_v19 = vrot.slane %v10424_v60, 4  ;;  %v13463_v3 = vpop.f32.mrf.mxu1  ;;  %v18620_v51 = vsel %vm14547_vm8, %v11117_v13, %v11118_v63  ;;  %v10438_v23 = vor.u32 %v10437_v47, %v10434_v4  ;;  %v18630_v60 = vld [vmem:[#allocation2 + $0xc0] sm:$0xe] }
 0x519   : > { %13670 = vmatmul.mubr.msk.bf16.gmra.mxu1 %vm7373_vm2, %v13907_v49  ;;  %v12655_v49 = vrot.slane %v11049_v21, 9  ;;  %v10449_v1 = vrot.slane %v10448_v27, 4  ;;  %v10458_v9 = vrot.slane %v10456_v55, 4  ;;  %v10461_v53 = vrot.slane %v10459_v14, 5 }
 0x51a   : > { %13673 = vmatprep.mubr.msk.bf16.mxu1 %vm7373_vm2, %v13908_v5  ;;  %v18624_v5 = vadd.f32 %v13499_v6, %v13463_v3  ;;  %v10430_v59 = vsel %vm14264_vm5, %v10425_v19, %v10429_v25  ;;  %v7504_v54 = vpop.f32.mrf.mxu1  ;;  %v19892_v21 = vrot.slane %v18394_v52, 5  ;;  %v10453_v13 = vrot.slane %v10451_v15, 5 }
 0x51b   : > { %v18633_v63 = vrot.slane %v10465_v43, 5  ;;  %v10471_v4 = vrot.slane %v10469_v62, 4  ;;  %v18635_v47 = vadd.f32 %v7805_v31, %v7504_v54  ;;  %v13503_v6 = vpop.f32.mrf.mxu0  ;;  %v18637_v27 = vcombine.low %v10396_v61, %v10406_v34  ;;  %v13909_v31 = vld [vmem:[#allocation2 + $0x54] sm:$0xff]   ;;  %v13910_v43 = vld [vmem:[#allocation2 + $0x60] sm:$0xff]  }
 0x51c   : > { %20110 = vst [vmem:[#allocation36_spill] sm:$0xff] %v18624_v5  ;;  %v10420_v25 = vsel %vm14264_vm5, %v10415_v44, %v18564_v36  ;;  %v20112_v55 = vrot.slane %v18428_v35, 5  ;;  %v13464_v19 = vpop.f32.mrf.mxu1  ;;  %v20113_v15 = vcombine.low %v18369_v32, %v18374_v12  ;;  %v10439_v36 = vrot.slane %v10438_v23, 4  ;;  %v10326_v34 = vld [vmem:[#allocation2 + $0x54] sm:$0xf] }
 0x51d   : > { %20111 = vst [vmem:[#allocation39_spill] sm:$0xff] %v18635_v47  ;;  %v18652_v62 = vcombine.low %v10420_v25, %v10430_v59  ;;  %v10454_v35 = vsel %vm14264_vm5, %v10449_v1, %v10453_v13  ;;  %v18658_v44 = vadd.f32 %v13500_v45, %v13464_v19  ;;  %v7821_v3 = vpop.f32.mrf.mxu0  ;;  %v20115_v32 = vcombine.low %v18400_v24, %v18381_v20  ;;  %v11050_v54 = vld [vmem:[#allocation2 + $0x24] sm:$0xe]  ;;  %v18666_v25 = vld [vmem:[#allocation2 + $0x58] sm:$0xf] }
 0x51e   : > { %v18646_v14 = vsel %vm14547_vm8, %v12655_v49, %v20112_v55  ;;  %13642 = vmatmul.mubr.msk.bf16.gmra.mxu0 %vm7373_vm2, %v20113_v15  ;;  %v12540_v12 = vrot.slane %v18630_v60, 9  ;;  %v10462_v49 = vor.u32 %v10461_v53, %v10458_v9  ;;  %v10475_v59 = vshll.u32 %v18628_v8, 16  ;;  %v18676_v1 = vld [vmem:[#allocation2 + $0x30] sm:$0xe] }
 0x51f   : > { %20114 = vst [vmem:[#allocation41_spill] sm:$0xff] %v18658_v44  ;;  %13645 = vmatprep.mubr.msk.bf16.mxu0 %vm7373_vm2, %v20115_v32  ;;  %v9631_v45 = vrot.slane %v19892_v21, 4  ;;  %v10444_v23 = vsel %vm14264_vm5, %v10439_v36, %v18567_v0  ;;  %v10472_v20 = vor.u32 %v10471_v4, %v18633_v63  ;;  %v11122_v24 = vrot.slane %v18467_v46, 5  ;;  %v18688_v46 = vld [vmem:[#allocation2 + $0x64] sm:$0xf]  ;;  %v13504_v15 = vpop.f32.mrf.mxu0  ;;  %v13911_v21 = vld [vmem:[#allocation2 + $0x6c] sm:$0xff]  }
 0x520   : > { %v18680_v9 = vadd.f32 %v18343_v7, %v18413_v39  ;;  %v18683_v53 = vcombine.low %v10444_v23, %v10454_v35  ;;  %v10480_v60 = vshrl.u32 %v10326_v34, 16  ;;  %v10483_v13 = vshll.u32 %v10326_v34, 16  ;;  %v18692_v35 = vpop.f32.mrf.mxu1 }
 0x521   : > { %13674 = vmatmul.mubr.msk.bf16.gmra.mxu1 %vm7373_vm2, %v13909_v31  ;;  %v9632_v55 = vrot.slane %v18407_v17, 5  ;;  %v12656_v19 = vrot.slane %v11050_v54, 9  ;;  %v10489_v0 = vshll.u32 %v18666_v25, 16  ;;  %v10493_v4 = vshrl.u32 %v18666_v25, 16  ;;  %v7824_v47 = vpop.f32.mrf.mxu0 }
 0x522   : > { %20116 = vst [vmem:[#allocation42_spill] sm:$0xff] %v18680_v9  ;;  %13677 = vmatprep.mubr.msk.bf16.mxu1 %vm7373_vm2, %v13910_v43  ;;  %v10463_v31 = vrot.slane %v10462_v49, 4  ;;  %v10477_v36 = vrot.slane %v10475_v59, 5  ;;  %v11125_v7 = vrot.slane %v18520_v58, 5  ;;  %v12657_v39 = vrot.slane %v18676_v1, 9 }
 0x523   : > { %v10329_v43 = vld [vmem:[#allocation2 + $0x60] sm:$0xf]  ;;  %v18696_v17 = vsel %vm14547_vm8, %v9631_v45, %v9632_v55  ;;  %v10473_v34 = vrot.slane %v10472_v20, 4  ;;  %v11124_v32 = vrot.slane %v11122_v24, 4  ;;  %v11129_v54 = vrot.slane %v18513_v41, 5 }
 0x524   : > { %v10482_v23 = vrot.slane %v10480_v60, 4  ;;  %v10485_v61 = vrot.slane %v10483_v13, 5  ;;  %v10513_v49 = vshll.u32 %v18688_v46, 16  ;;  %v10517_v59 = vshrl.u32 %v18688_v46, 16  ;;  %v13467_v58 = vpop.f32.mrf.mxu1  ;;  %v13912_v13 = vld [vmem:[#allocation2 + $0x78] sm:$0xff]  }
 0x525   : > { %v20117_v1 = vcombine.low %v18404_v37, %v18387_v38  ;;  %v18705_v44 = vrot.slane %v10489_v0, 5  ;;  %v10495_v45 = vrot.slane %v10493_v4, 4  ;;  %v10504_v20 = vshrl.u32 %v10329_v43, 16 }
 0x526   : > { %v10507_v55 = vshll.u32 %v10329_v43, 16  ;;  %v18707_v41 = vadd.f32 %v13503_v6, %v13467_v58  ;;  %v20119_v60 = vcombine.low %v18420_v50, %v18440_v56  ;;  %v20120_v5 = vrot.slane %v18394_v52, 5  ;;  %v7520_v0 = vpop.f32.mrf.mxu1 }
 0x527   : > { %13646 = vmatmul.mubr.msk.bf16.gmra.mxu0 %vm7373_vm2, %v20117_v1  ;;  %v10468_v37 = vsel %vm14264_vm5, %v10463_v31, %v18633_v63  ;;  %v18724_v6 = vsel %vm14547_vm8, %v12656_v19, %v11122_v24  ;;  %v10478_v52 = vsel %vm14264_vm5, %v10473_v34, %v10477_v36  ;;  %v18733_v56 = vsel %vm14547_vm8, %v11124_v32, %v11125_v7  ;;  %v18736_v63 = vld [vmem:[#allocation2 + $0x68] sm:$0x1]  ;;  %v18740_v24 = vpop.f32.mrf.mxu0  ;;  %v18743_v19 = vld [vmem:[#allocation2 + $0x5c] sm:$0x1]  ;;  %v10332_v32 = vld [vmem:[#allocation2 + $0x6c] sm:$0xf] }
 0x528   : > { %20118 = vst [vmem:[#allocation43_spill] sm:$0xff] %v18707_v41  ;;  %13649 = vmatprep.mubr.msk.bf16.mxu0 %vm7373_vm2, %v20119_v60  ;;  %v18717_v38 = vsel %vm14547_vm8, %v12540_v12, %v20120_v5  ;;  %v11132_v5 = vrot.slane %v18557_v2, 5  ;;  %v18738_v12 = vadd.f32 %v7821_v3, %v7520_v0  ;;  %v18745_v4 = vrot.slane %v10513_v49, 5  ;;  %v13468_v36 = vpop.f32.mrf.mxu1 }
 0x529   : > { %13678 = vmatmul.mubr.msk.bf16.gmra.mxu1 %vm7373_vm2, %v13911_v21  ;;  %v11131_v21 = vrot.slane %v11129_v54, 4  ;;  %v10519_v31 = vrot.slane %v10517_v59, 4  ;;  %v10486_v43 = vor.u32 %v10485_v61, %v10482_v23  ;;  %v10496_v7 = vor.u32 %v10495_v45, %v18705_v44  ;;  %v18750_v3 = vpop.f32.mrf.mxu0  ;;  %v18767_v45 = vld [vmem:[#allocation2 + $0x70] sm:$0xf] }
 0x52a   : > { %20121 = vst [vmem:[#allocation22_spill] sm:$0xff] %v18738_v12  ;;  %13681 = vmatprep.mubr.msk.bf16.mxu1 %vm7373_vm2, %v13912_v13  ;;  %v10506_v34 = vrot.slane %v10504_v20, 4  ;;  %v10509_v2 = vrot.slane %v10507_v55, 5  ;;  %v18748_v58 = vadd.f32 %v13504_v15, %v13468_v36  ;;  %v18752_v1 = vcombine.low %v10468_v37, %v10478_v52  ;;  %v7523_v49 = vpop.f32.mrf.mxu1  ;;  %v20126_v36 = vld [vmem:[#allocation20_spill] sm:$0xff] }
 0x52b   : > { %v10523_v60 = vshll.u32 %v18736_v63, 16  ;;  %v18760_v61 = vsel %vm14547_vm8, %v12657_v39, %v11129_v54  ;;  %v18764_v15 = vsel %vm14547_vm8, %v11131_v21, %v11132_v5  ;;  %v10499_v23 = vshll.u32 %v18743_v19, 16  ;;  %v18771_v55 = vpop.f32.mrf.mxu0  ;;  %v20125_v54 = vld [vmem:[#allocation31_spill] sm:$0xff]  ;;  %v13915_v21 = vld [vmem:[#allocation2 + $0x84] sm:$0xff]   ;;  %v18803_v12 = vld [vmem:[#allocation2 + $0x7c] sm:$0xf] }
 0x52c   : > { %20122 = vst [vmem:[#allocation16_spill] sm:$0xff] %v18748_v58  ;;  %v18769_v20 = vadd.f32 %v7824_v47, %v7523_v49  ;;  %v10520_v37 = vor.u32 %v10519_v31, %v18745_v4  ;;  %v10528_v0 = vshrl.u32 %v10332_v32, 16  ;;  %v10531_v52 = vshll.u32 %v10332_v32, 16  ;;  %v11052_v49 = vld [vmem:[#allocation2 + $0x3c] sm:$0xe]  ;;  %v20129_v31 = vld [vmem:[#allocation25_spill] sm:$0xff] }
 0x52d   : > { %v18776_v39 = vadd.f32 %v18445_v29, %v18518_v57  ;;  %v20127_v5 = vcombine.low %v20125_v54, %v20126_v36  ;;  %v10487_v59 = vrot.slane %v10486_v43, 4  ;;  %v10497_v50 = vrot.slane %v10496_v7, 4  ;;  %v18782_v13 = vpop.f32.mrf.mxu0  ;;  %v13916_v32 = vld [vmem:[#allocation2 + $0x90] sm:$0xff]  }
 0x52e   : > { %20123 = vst [vmem:[#allocation15_spill] sm:$0xff] %v18769_v20  ;;  %v10510_v47 = vor.u32 %v10509_v2, %v10506_v34  ;;  %v20128_v20 = vld [vmem:[#allocation34_spill] sm:$0xff]  ;;  %v10525_v29 = vrot.slane %v10523_v60, 5  ;;  %v20131_v54 = vrot.slane %v18516_v30, 5  ;;  %v10537_v43 = vshll.u32 %v18767_v45, 16 }
 0x52f   : > { %20124 = vst [vmem:[#allocation9_spill] sm:$0xff] %v18776_v39  ;;  %13650 = vmatmul.mubr.msk.bf16.gmra.mxu0 %vm7373_vm2, %v20127_v5  ;;  %v20130_v58 = vcombine.low %v20128_v20, %v20129_v31  ;;  %v11053_v5 = vld [vmem:[#allocation2 + $0x48] sm:$0xe]  ;;  %v10492_v7 = vsel %vm14264_vm5, %v10487_v59, %v18705_v44  ;;  %v10501_v34 = vrot.slane %v10499_v23, 5  ;;  %v11139_v2 = vrot.slane %v18588_v28, 5  ;;  %v18799_v20 = vpop.f32.mrf.mxu0 }
 0x530   : > { %v11138_v36 = vrot.slane %v20131_v54, 4  ;;  %v10521_v60 = vrot.slane %v10520_v37, 4  ;;  %v11143_v31 = vrot.slane %v18590_v22, 5  ;;  %v10530_v54 = vrot.slane %v10528_v0, 4  ;;  %v10335_v28 = vld [vmem:[#allocation2 + $0x78] sm:$0xf] }
 0x531   : > { %13653 = vmatprep.mubr.msk.bf16.mxu0 %vm7373_vm2, %v20130_v58  ;;  %13682 = vmatmul.mubr.msk.bf16.gmra.mxu1 %vm7373_vm2, %v13915_v21  ;;  %v10541_v58 = vshrl.u32 %v18767_v45, 16  ;;  %v10533_v57 = vrot.slane %v10531_v52, 5  ;;  %v10502_v21 = vsel %vm14264_vm5, %v10497_v50, %v10501_v34  ;;  %v10511_v44 = vrot.slane %v10510_v47, 4  ;;  %v13471_v41 = vpop.f32.mrf.mxu1  ;;  %v18807_v39 = vpop.f32.mrf.mxu0  ;;  %v18821_v52 = vld [vmem:[#allocation2 + $0x74] sm:$0x1] }
 0x532   : > { %13685 = vmatprep.mubr.msk.bf16.mxu1 %vm7373_vm2, %v13916_v32  ;;  %v12658_v59 = vrot.slane %v11052_v49, 9  ;;  %v12659_v23 = vrot.slane %v11053_v5, 9  ;;  %v10526_v32 = vsel %vm14264_vm5, %v10521_v60, %v10525_v29  ;;  %v18813_v22 = vsel %vm14547_vm8, %v11138_v36, %v11139_v2 }
 0x533   : > { %v11146_v37 = vrot.slane %v18628_v8, 5  ;;  %v18816_v0 = vrot.slane %v10537_v43, 5  ;;  %v18819_v50 = vadd.f32 %v18740_v24, %v13471_v41  ;;  %v10543_v47 = vrot.slane %v10541_v58, 4  ;;  %v7536_v34 = vpop.f32.mrf.mxu1  ;;  %v18825_v29 = vpop.f32.mrf.mxu0  ;;  %v13917_v24 = vld [vmem:[#allocation2 + $0x9c] sm:$0xff]  }
 0x534   : > { %v10561_v49 = vshll.u32 %v18803_v12, 16  ;;  %v10565_v5 = vshrl.u32 %v18803_v12, 16  ;;  %v11145_v60 = vrot.slane %v11143_v31, 4  ;;  %v10534_v36 = vor.u32 %v10533_v57, %v10530_v54 }
 0x535   : > { %20132 = vst [vmem:[#allocation30_spill] sm:$0xff] %v18819_v50  ;;  %v10552_v2 = vshrl.u32 %v10335_v28, 16  ;;  %v10555_v9 = vshll.u32 %v10335_v28, 16  ;;  %v18828_v8 = vadd.f32 %v18750_v3, %v7536_v34  ;;  %v20134_v41 = vcombine.low %v18505_v26, %v18528_v11  ;;  %v13472_v3 = vpop.f32.mrf.mxu1  ;;  %v18845_v54 = vpop.f32.mrf.mxu0  ;;  %v13918_v11 = vld [vmem:[#allocation2 + $0xa8] sm:$0xff]  }
 0x536   : > { %v18834_v43 = vcombine.low %v10492_v7, %v10502_v21  ;;  %v10516_v58 = vsel %vm14264_vm5, %v10511_v44, %v18745_v4  ;;  %v20135_v50 = vrot.slane %v18516_v30, 5  ;;  %v20136_v26 = vcombine.low %v18577_v33, %v18541_v10  ;;  %v18860_v44 = vld [vmem:[#allocation2 + $0x80] sm:$0x1] }
 0x537   : > { %20133 = vst [vmem:[#allocation24_spill] sm:$0xff] %v18828_v8  ;;  %13654 = vmatmul.mubr.msk.bf16.gmra.mxu0 %vm7373_vm2, %v20134_v41  ;;  %v18851_v7 = vcombine.low %v10516_v58, %v10526_v32  ;;  %v18857_v30 = vsel %vm14547_vm8, %v11145_v60, %v11146_v37  ;;  %v10547_v21 = vshll.u32 %v18821_v52, 16  ;;  %v18865_v10 = vadd.f32 %v18771_v55, %v13472_v3  ;;  %v18871_v34 = vpop.f32.mrf.mxu0  ;;  %v11054_v58 = vld [vmem:[#allocation2 + $0x54] sm:$0xe] }
 0x538   : > { %v18843_v57 = vsel %vm14547_vm8, %v12658_v59, %v20135_v50  ;;  %13657 = vmatprep.mubr.msk.bf16.mxu0 %vm7373_vm2, %v20136_v26  ;;  %v18862_v59 = vld [vmem:[#allocation2 + $0x88] sm:$0xf]  ;;  %v10544_v33 = vor.u32 %v10543_v47, %v18816_v0  ;;  %v18869_v28 = vrot.slane %v10561_v49, 5  ;;  %v10567_v32 = vrot.slane %v10565_v5, 4  ;;  %v7539_v50 = vpop.f32.mrf.mxu1  ;;  %v10338_v49 = vld [vmem:[#allocation2 + $0x84] sm:$0xf] }
 0x539   : > { %20137 = vst [vmem:[#allocation38_spill] sm:$0xff] %v18865_v10  ;;  %13686 = vmatmul.mubr.msk.bf16.gmra.mxu1 %vm7373_vm2, %v13917_v24  ;;  %v18876_v37 = vsel %vm14547_vm8, %v12659_v23, %v11143_v31  ;;  %v18878_v60 = vrot.slane %v10534_v36, 4  ;;  %v10554_v55 = vrot.slane %v10552_v2, 4  ;;  %v10557_v41 = vrot.slane %v10555_v9, 5  ;;  %v20139_v26 = vld [vmem:[#allocation28_spill] sm:$0xff]  ;;  %v18890_v23 = vpop.f32.mrf.mxu0 }
 0x53a   : > { %13689 = vmatprep.mubr.msk.bf16.mxu1 %vm7373_vm2, %v13918_v11  ;;  %v18881_v24 = vadd.f32 %v18782_v13, %v7539_v50  ;;  %v10571_v47 = vshll.u32 %v18860_v44, 16  ;;  %v10585_v5 = vshll.u32 %v18862_v59, 16  ;;  %v10589_v3 = vshrl.u32 %v18862_v59, 16  ;;  %v13475_v31 = vpop.f32.mrf.mxu1 }
 0x53b   : > { %v18888_v11 = vadd.f32 %v20139_v26, %v18605_v42  ;;  %v10549_v36 = vrot.slane %v10547_v21, 5  ;;  %v11150_v13 = vrot.slane %v18666_v25, 5  ;;  %v18896_v2 = vadd.f32 %v18799_v20, %v13475_v31  ;;  %v18903_v26 = vld [vmem:[#allocation2 + $0x60] sm:$0xe]  ;;  %v18905_v10 = vpop.f32.mrf.mxu0 }
 0x53c   : > { %20138 = vst [vmem:[#allocation33_spill] sm:$0xff] %v18881_v24  ;;  %v10540_v50 = vsel %vm14264_vm5, %v18878_v60, %v18816_v0  ;;  %v10545_v4 = vrot.slane %v10544_v33, 4  ;;  %v10568_v42 = vor.u32 %v10567_v32, %v18869_v28  ;;  %v7552_v24 = vpop.f32.mrf.mxu1  ;;  %v10558_v9 = vor.u32 %v10557_v41, %v10554_v55  ;;  %v13919_v0 = vld [vmem:[#allocation2 + $0xb4] sm:$0xff]  }
 0x53d   : > { %20140 = vst [vmem:[#allocation37_spill] sm:$0xff] %v18888_v11  ;;  %20141 = vst [vmem:[#allocation4_spill] sm:$0xff] %v18896_v2  ;;  %v12660_v21 = vrot.slane %v11054_v58, 9  ;;  %v10576_v8 = vshrl.u32 %v10338_v49, 16  ;;  %v10579_v25 = vshll.u32 %v10338_v49, 16  ;;  %v18908_v20 = vadd.f32 %v18807_v39, %v7552_v24  ;;  %v18918_v55 = vpop.f32.mrf.mxu0  ;;  %v13920_v39 = vld [vmem:[#allocation2 + $0xc0] sm:$0xff]  }
 0x53e   : > { %v20143_v31 = vcombine.low %v18717_v38, %v18696_v17  ;;  %v18914_v33 = vrot.slane %v10571_v47, 5  ;;  %v18916_v32 = vrot.slane %v10585_v5, 5  ;;  %v10591_v60 = vrot.slane %v10589_v3, 4  ;;  %v10341_v2 = vld [vmem:[#allocation2 + $0x90] sm:$0xf]  ;;  %v13476_v11 = vpop.f32.mrf.mxu1 }
 0x53f   : > { %20142 = vst [vmem:[#allocation6_spill] sm:$0xff] %v18908_v20  ;;  %v18924_v41 = vsel %vm14547_vm8, %v12660_v21, %v11150_v13  ;;  %v11152_v17 = vrot.slane %v11150_v13, 4  ;;  %v11153_v38 = vrot.slane %v18743_v19, 5  ;;  %v12661_v58 = vrot.slane %v18903_v26, 9  ;;  %v18928_v24 = vld [vmem:[#allocation2 + $0x94] sm:$0xf]  ;;  %v18937_v21 = vpop.f32.mrf.mxu0 }
 0x540   : > { %13658 = vmatmul.mubr.msk.bf16.gmra.mxu0 %vm7373_vm2, %v20143_v31  ;;  %20144 = vst [vmem:[#allocation12_spill] sm:$0xff] %v18928_v24  ;;  %v18931_v47 = vadd.f32 %v18825_v29, %v13476_v11  ;;  %v10569_v49 = vrot.slane %v10568_v42, 4  ;;  %v11157_v5 = vrot.slane %v18688_v46, 5  ;;  %v7555_v3 = vpop.f32.mrf.mxu1  ;;  %v18940_v19 = vld [vmem:[#allocation2 + $0x8c] sm:$0x1]  ;;  %v10578_v13 = vrot.slane %v10576_v8, 4 }
 0x541   : > { %13701 = vmatprep.mubr.msk.bf16.mxu0 %vm7373_vm2, %v18603_v16  ;;  %13690 = vmatmul.mubr.msk.bf16.gmra.mxu1 %vm7373_vm2, %v13919_v0  ;;  %v10550_v16 = vsel %vm14264_vm5, %v10545_v4, %v10549_v36  ;;  %v10581_v26 = vrot.slane %v10579_v25, 5  ;;  %v10600_v31 = vshrl.u32 %v10341_v2, 16  ;;  %v10603_v29 = vshll.u32 %v10341_v2, 16  ;;  %v6240_v36 = vld [vmem:[#allocation2 + $0xd4] sm:$0x1]  ;;  %v13921_v25 = vld [vmem:[#allocation2 + $0xcc] sm:$0xff]  }
 0x542   : > { %20145 = vst [vmem:[#allocation5_spill] sm:$0xff] %v18931_v47  ;;  %13693 = vmatprep.mubr.msk.bf16.mxu1 %vm7373_vm2, %v13920_v39  ;;  %v18943_v11 = vadd.f32 %v18845_v54, %v7555_v3  ;;  %v10592_v0 = vor.u32 %v10591_v60, %v18916_v32  ;;  %v10609_v4 = vshll.u32 %v18928_v24, 16  ;;  %v10613_v46 = vshrl.u32 %v18928_v24, 16  ;;  %v13479_v42 = vpop.f32.mrf.mxu1  ;;  %v18948_v47 = vpop.f32.mrf.mxu0 }
 0x543   : > { %v18950_v39 = vcombine.low %v10540_v50, %v10550_v16  ;;  %v10559_v20 = vrot.slane %v10558_v9, 4  ;;  %v18954_v8 = vsel %vm14547_vm8, %v11152_v17, %v11153_v38  ;;  %v11160_v54 = vrot.slane %v18736_v63, 5  ;;  %v11057_v38 = vld [vmem:[#allocation2 + $0x78] sm:$0xe]  ;;  %v20193_v18 = vld [vmem:[#allocation33_spill] sm:$0xff] }
 0x544   : > { %20146 = vst [vmem:[#allocation8_spill] sm:$0xff] %v18943_v11  ;;  %v18958_v2 = vadd.f32 %v18871_v34, %v13479_v42  ;;  %v10574_v60 = vsel %vm14264_vm5, %v10569_v49, %v18914_v33  ;;  %v11159_v3 = vrot.slane %v11157_v5, 4  ;;  %v10595_v11 = vshll.u32 %v18940_v19, 16  ;;  %v7568_v50 = vpop.f32.mrf.mxu1  ;;  %v18964_v16 = vpop.f32.mrf.mxu0  ;;  %v18973_v33 = vld [vmem:[#allocation2 + $0x98] sm:$0x1] }
 0x545   : > { %20147 = vst [vmem:[#allocation14_spill] sm:$0xff] %v18950_v39  ;;  %v10582_v9 = vor.u32 %v10581_v26, %v10578_v13  ;;  %v10602_v24 = vrot.slane %v10600_v31, 4  ;;  %v10605_v17 = vrot.slane %v10603_v29, 5  ;;  %v6241_v63 = vsel %vm17011_vm14, 0, %v6240_v36 }
 0x546   : > { %20148 = vst [vmem:[#allocation10_spill] sm:$0xff] %v18958_v2  ;;  %v18969_v34 = vadd.f32 %v18890_v23, %v7568_v50  ;;  %v10593_v42 = vrot.slane %v10592_v0, 4  ;;  %v18975_v49 = vrot.slane %v10609_v4, 5  ;;  %v10615_v2 = vrot.slane %v10613_v46, 4  ;;  %6242 = vst [vmem:[#allocation2 + $0xd4] sm:$0x1] %v6241_v63  ;;  %v13480_v39 = vpop.f32.mrf.mxu1  ;;  %v18977_v13 = vpop.f32.mrf.mxu0 }
 0x547   : > { %v10564_v23 = vsel %vm14264_vm5, %v10559_v20, %v18869_v28  ;;  %v18988_v26 = vsel %vm14547_vm8, %v11159_v3, %v11160_v54  ;;  %v11164_v31 = vrot.slane %v18767_v45, 5  ;;  %v18992_v29 = vadd.f32 %v18905_v10, %v13480_v39  ;;  %v19001_v20 = vld [vmem:[#allocation2 + $0xa0] sm:$0xf] }
 0x548   : > { %13702 = vmatmul.mubr.msk.bf16.vlgmr.msra.gmra.mxu0 %vm7373_vm2, %v18637_v27  ;;  %v18995_v0 = vcombine.low %v10564_v23, %v10574_v60  ;;  %v10597_v28 = vrot.slane %v10595_v11, 5  ;;  %v19005_v4 = vadd.f32 %v18622_v40, %v18692_v35  ;;  %v7571_v46 = vpop.f32.mrf.mxu1  ;;  %v19007_v45 = vpop.f32.mrf.mxu0  ;;  %v20150_v10 = vcombine.low %v18646_v14, %v18620_v51  ;;  %v10344_v11 = vld [vmem:[#allocation2 + $0x9c] sm:$0xf]  ;;  %v20151_v50 = vld [vmem:[#allocation13_spill] sm:$0xff] }
 0x549   : > { %13705 = vmatprep.mubr.msk.bf16.mxu0 %vm7373_vm2, %v18652_v62  ;;  %13694 = vmatmul.mubr.msk.bf16.gmra.mxu1 %vm7373_vm2, %v13921_v25  ;;  %v18999_v62 = vsel %vm14547_vm8, %v12661_v58, %v11157_v5  ;;  %v10583_v36 = vrot.slane %v10582_v9, 4  ;;  %v10606_v39 = vor.u32 %v10605_v17, %v10602_v24  ;;  %v10619_v58 = vshll.u32 %v18973_v33, 16  ;;  %v11056_v5 = vld [vmem:[#allocation2 + $0x6c] sm:$0xe] }
 0x54a   : > { %13737 = vmatprep.mubr.msk.bf16.mxu1 %vm7373_vm2, %v20150_v10  ;;  %v19015_v54 = vadd.f32 %v18918_v55, %v7571_v46  ;;  %v10598_v35 = vsel %vm14264_vm5, %v10593_v42, %v10597_v28  ;;  %v10616_v25 = vor.u32 %v10615_v2, %v18975_v49  ;;  %v13523_v51 = vpop.f32.mrf.mxu1  ;;  %v19022_v14 = vpop.f32.mrf.mxu0  ;;  %v11166_v60 = vrot.slane %v11164_v31, 4 }
 0x54b   : > { %v10588_v24 = vsel %vm14264_vm5, %v10583_v36, %v18916_v32  ;;  %v10633_v3 = vshll.u32 %v19001_v20, 16  ;;  %v10637_v55 = vshrl.u32 %v19001_v20, 16  ;;  %v8320_v9 = vadd.f32 %v13523_v51, %v20151_v50  ;;  %v20152_v36 = vld [vmem:[#allocation26_spill] sm:$0xff] }
 0x54c   : > { %v12662_v17 = vrot.slane %v11056_v5, 9  ;;  %v10624_v63 = vshrl.u32 %v10344_v11, 16  ;;  %v10627_v42 = vshll.u32 %v10344_v11, 16  ;;  %v8191_v23 = vpop.f32.mrf.mxu1  ;;  %v19030_v2 = vpop.f32.mrf.mxu0  ;;  %v19032_v28 = vcombine.low %v10588_v24, %v10598_v35  ;;  %v10347_v35 = vld [vmem:[#allocation2 + $0xa8] sm:$0xf] }
 0x54d   : > { %v19034_v46 = vrot.slane %v10606_v39, 4  ;;  %v19036_v10 = vrot.slane %v10619_v58, 5  ;;  %v11167_v32 = vrot.slane %v18821_v52, 5  ;;  %v8318_v40 = vadd.f32 %v8191_v23, %v20152_v36  ;;  %v20153_v50 = vld [vmem:[#allocation18_spill] sm:$0xff] }
 0x54e   : > { %v10617_v5 = vrot.slane %v10616_v25, 4  ;;  %v19044_v11 = vsel %vm14547_vm8, %v12662_v17, %v11164_v31  ;;  %v11171_v51 = vrot.slane %v18803_v12, 5  ;;  %v13524_v24 = vpop.f32.mrf.mxu1  ;;  %v19047_v39 = vpop.f32.mrf.mxu0  ;;  %v12663_v58 = vrot.slane %v11057_v38, 9 }
 0x54f   : > { %v19053_v52 = vsel %vm14547_vm8, %v11166_v60, %v11167_v32  ;;  %v10639_v25 = vrot.slane %v10637_v55, 4  ;;  %v8321_v31 = vadd.f32 %v13524_v24, %v20153_v50  ;;  %v20154_v12 = vcombine.low %v18724_v6, %v18733_v56  ;;  %v19071_v55 = vld [vmem:[#allocation2 + $0xa4] sm:$0x1] }
 0x550   : > { %13706 = vmatmul.mubr.msk.bf16.gmra.mxu0 %vm7373_vm2, %v18683_v53  ;;  %v19055_v53 = vrot.slane %v10633_v3, 5  ;;  %v11174_v17 = vrot.slane %v18860_v44, 5  ;;  %v10626_v23 = vrot.slane %v10624_v63, 4  ;;  %v10629_v36 = vrot.slane %v10627_v42, 5  ;;  %v8194_v27 = vpop.f32.mrf.mxu1  ;;  %v19065_v60 = vpop.f32.mrf.mxu0  ;;  %v20156_v63 = vld [vmem:[#allocation42_spill] sm:$0xff] }
 0x551   : > { %13709 = vmatprep.mubr.msk.bf16.mxu0 %vm7373_vm2, %v18752_v1  ;;  %13738 = vmatmul.mubr.msk.bf16.vlgmr.msra.gmra.mxu1 %vm7373_vm2, %v20154_v12  ;;  %v19063_v1 = vld [vmem:[#allocation2 + $0xac] sm:$0xf]  ;;  %v20155_v3 = vcombine.low %v18760_v61, %v18764_v15  ;;  %v10648_v38 = vshrl.u32 %v10347_v35, 16  ;;  %v10651_v6 = vshll.u32 %v10347_v35, 16  ;;  %v19074_v56 = vadd.f32 %v18937_v21, %v8320_v9  ;;  %v19090_v9 = vld [vmem:[#allocation2 + $0xb0] sm:$0x1] }
 0x552   : > { %v19077_v44 = vadd.f32 %v18948_v47, %v8318_v40  ;;  %v8319_v42 = vadd.f32 %v8194_v27, %v20156_v63  ;;  %v10612_v32 = vsel %vm14264_vm5, %v19034_v46, %v18975_v49  ;;  %v10622_v61 = vsel %vm14264_vm5, %v10617_v5, %v19036_v10  ;;  %v13527_v24 = vpop.f32.mrf.mxu1  ;;  %v19087_v35 = vpop.f32.mrf.mxu0  ;;  %v20158_v49 = vld [vmem:[#allocation19_spill] sm:$0xff] }
 0x553   : > { %13741 = vmatprep.mubr.msk.bf16.mxu1 %vm7373_vm2, %v20155_v3  ;;  %v11173_v15 = vrot.slane %v11171_v51, 4  ;;  %v10640_v21 = vor.u32 %v10639_v25, %v19055_v53  ;;  %v10657_v47 = vshll.u32 %v19063_v1, 16  ;;  %v10661_v27 = vshrl.u32 %v19063_v1, 16 }
 0x554   : > { %v19095_v40 = vadd.f32 %v18964_v16, %v8321_v31  ;;  %v8324_v46 = vadd.f32 %v13527_v24, %v20158_v49  ;;  %v10643_v5 = vshll.u32 %v19071_v55, 16  ;;  %v19102_v50 = vadd.f32 %v18977_v13, %v8319_v42  ;;  %v8207_v25 = vpop.f32.mrf.mxu1  ;;  %v19104_v12 = vpop.f32.mrf.mxu0  ;;  %v11058_v42 = vld [vmem:[#allocation2 + $0x84] sm:$0xe] }
 0x555   : > { %v19108_v3 = vsel %vm14547_vm8, %v11173_v15, %v11174_v17  ;;  %v10630_v63 = vor.u32 %v10629_v36, %v10626_v23  ;;  %v10650_v16 = vrot.slane %v10648_v38, 4  ;;  %v10653_v31 = vrot.slane %v10651_v6, 5 }
 0x556   : > { %20157 = vst [vmem:[#allocation21_spill] sm:$0xff] %v19095_v40  ;;  %v20159_v40 = vld [vmem:[#allocation32_spill] sm:$0xff]  ;;  %v19115_v49 = vsel %vm14547_vm8, %v12663_v58, %v11171_v51  ;;  %v10667_v13 = vshll.u32 %v19090_v9, 16  ;;  %v19119_v10 = vadd.f32 %v19007_v45, %v8324_v46  ;;  %v13528_v17 = vpop.f32.mrf.mxu1  ;;  %v19121_v15 = vpop.f32.mrf.mxu0  ;;  %v10641_v23 = vrot.slane %v10640_v21, 4  ;;  %v20160_v51 = vld [vmem:[#allocation27_spill] sm:$0xff] }
 0x557   : > { %v8322_v24 = vadd.f32 %v8207_v25, %v20159_v40  ;;  %v19125_v36 = vrot.slane %v10657_v47, 5  ;;  %v11178_v38 = vrot.slane %v18862_v59, 5  ;;  %v8325_v58 = vadd.f32 %v13528_v17, %v20160_v51 }
 0x558   : > { %13710 = vmatmul.mubr.msk.bf16.gmra.mxu0 %vm7373_vm2, %v18834_v43  ;;  %v10663_v43 = vrot.slane %v10661_v27, 4  ;;  %v20161_v6 = vcombine.low %v18843_v57, %v18813_v22  ;;  %v19133_v45 = vcombine.low %v10612_v32, %v10622_v61  ;;  %v8210_v21 = vpop.f32.mrf.mxu1  ;;  %v19140_v47 = vpop.f32.mrf.mxu0  ;;  %v20163_v59 = vcombine.low %v18876_v37, %v18857_v30  ;;  %v10350_v32 = vld [vmem:[#allocation2 + $0xb4] sm:$0xf]  ;;  %v20164_v61 = vld [vmem:[#allocation9_spill] sm:$0xff] }
 0x559   : > { %13713 = vmatprep.mubr.msk.bf16.mxu0 %vm7373_vm2, %v18851_v7  ;;  %v19138_v7 = vadd.f32 %v19022_v14, %v8322_v24  ;;  %v10631_v27 = vrot.slane %v10630_v63, 4  ;;  %v10645_v22 = vrot.slane %v10643_v5, 5  ;;  %v10654_v57 = vor.u32 %v10653_v31, %v10650_v16  ;;  %v19150_v24 = vld [vmem:[#allocation2 + $0xb8] sm:$0xf]  ;;  %v11059_v31 = vld [vmem:[#allocation2 + $0x90] sm:$0xe] }
 0x55a   : > { %13742 = vmatmul.mubr.msk.bf16.gmra.mxu1 %vm7373_vm2, %v20161_v6  ;;  %v12664_v46 = vrot.slane %v11058_v42, 9  ;;  %v8323_v25 = vadd.f32 %v8210_v21, %v20164_v61  ;;  %v19147_v17 = vrot.slane %v10667_v13, 5  ;;  %v11181_v14 = vrot.slane %v18940_v19, 5  ;;  %v13531_v6 = vpop.f32.mrf.mxu1  ;;  %v19155_v30 = vpop.f32.mrf.mxu0  ;;  %v20166_v19 = vld [vmem:[#allocation29_spill] sm:$0xff] }
 0x55b   : > { %20162 = vst [vmem:[#allocation23_spill] sm:$0xff] %v19138_v7  ;;  %13745 = vmatprep.mubr.msk.bf16.mxu1 %vm7373_vm2, %v20163_v59  ;;  %v19153_v51 = vadd.f32 %v19030_v2, %v8325_v58  ;;  %v10636_v37 = vsel %vm14264_vm5, %v10631_v27, %v19055_v53  ;;  %v10646_v5 = vsel %vm14264_vm5, %v10641_v23, %v10645_v22  ;;  %v11180_v16 = vrot.slane %v11178_v38, 4  ;;  %v20168_v27 = vld [vmem:[#allocation40_spill] sm:$0xff] }
 0x55c   : > { %v10664_v63 = vor.u32 %v10663_v43, %v19125_v36  ;;  %v8328_v13 = vadd.f32 %v13531_v6, %v20166_v19  ;;  %v10672_v42 = vshrl.u32 %v10350_v32, 16  ;;  %v10675_v21 = vshll.u32 %v10350_v32, 16  ;;  %v8223_v58 = vpop.f32.mrf.mxu1  ;;  %v19167_v59 = vpop.f32.mrf.mxu0  ;;  %v20169_v6 = vld [vmem:[#allocation14_spill] sm:$0xff] }
 0x55d   : > { %20165 = vst [vmem:[#allocation17_spill] sm:$0xff] %v19153_v51  ;;  %v19165_v2 = vadd.f32 %v19047_v39, %v8323_v25  ;;  %v19169_v61 = vrot.slane %v10654_v57, 4  ;;  %v19173_v53 = vsel %vm14547_vm8, %v12664_v46, %v11178_v38  ;;  %v10681_v23 = vshll.u32 %v19150_v24, 16  ;;  %v10353_v25 = vld [vmem:[#allocation2 + $0xc0] sm:$0xf] }
 0x55e   : > { %v10685_v43 = vshrl.u32 %v19150_v24, 16  ;;  %v8326_v22 = vadd.f32 %v8223_v58, %v20168_v27  ;;  %v19180_v39 = vcombine.low %v10636_v37, %v10646_v5  ;;  %v12665_v32 = vrot.slane %v11059_v31, 9  ;;  %v13532_v19 = vpop.f32.mrf.mxu1  ;;  %v19185_v40 = vpop.f32.mrf.mxu0  ;;  %v20171_v5 = vld [vmem:[#allocation12_spill] sm:$0xff]  ;;  %v19200_v31 = vld [vmem:[#allocation2 + $0xc4] sm:$0xf] }
 0x55f   : > { %20167 = vst [vmem:[#allocation11_spill] sm:$0xff] %v19165_v2  ;;  %v19183_v57 = vadd.f32 %v19065_v60, %v8328_v13  ;;  %v19193_v46 = vrot.slane %v10664_v63, 4  ;;  %v19197_v37 = vsel %vm14547_vm8, %v11180_v16, %v11181_v14  ;;  %v11185_v60 = vrot.slane %v20171_v5, 5  ;;  %v20172_v13 = vld [vmem:[#allocation35_spill] sm:$0xff]  ;;  %v19216_v16 = vld [vmem:[#allocation2 + $0xbc] sm:$0x1] }
 0x560   : > { %13714 = vmatmul.mubr.msk.bf16.gmra.mxu0 %vm7373_vm2, %v20169_v6  ;;  %v8329_v58 = vadd.f32 %v13532_v19, %v20172_v13  ;;  %v10674_v27 = vrot.slane %v10672_v42, 4  ;;  %v10677_v6 = vrot.slane %v10675_v21, 5  ;;  %v19208_v63 = vadd.f32 %v19087_v35, %v8326_v22  ;;  %v8226_v38 = vpop.f32.mrf.mxu1  ;;  %v20176_v42 = vld [vmem:[#allocation37_spill] sm:$0xff]  ;;  %v20180_v2 = vld [vmem:[#allocation39_spill] sm:$0xff] }
 0x561   : > { %20170 = vst [vmem:[#allocation31_spill] sm:$0xff] %v19183_v57  ;;  %13717 = vmatprep.mubr.msk.bf16.mxu0 %vm7373_vm2, %v18995_v0  ;;  %v20173_v0 = vcombine.low %v18924_v41, %v18954_v8  ;;  %v19210_v57 = vpop.f32.mrf.mxu0  ;;  %v20175_v14 = vcombine.low %v18999_v62, %v18988_v26  ;;  %v19218_v19 = vrot.slane %v10681_v23, 5  ;;  %v10687_v41 = vrot.slane %v10685_v43, 4 }
 0x562   : > { %20174 = vst [vmem:[#allocation20_spill] sm:$0xff] %v19208_v63  ;;  %v10696_v8 = vshrl.u32 %v10353_v25, 16  ;;  %v10699_v5 = vshll.u32 %v10353_v25, 16  ;;  %v8327_v21 = vadd.f32 %v8226_v38, %v20176_v42  ;;  %v10705_v35 = vshll.u32 %v19200_v31, 16  ;;  %v20178_v38 = vld [vmem:[#allocation36_spill] sm:$0xff] }
 0x563   : > { %13746 = vmatmul.mubr.msk.bf16.gmra.mxu1 %vm7373_vm2, %v20173_v0  ;;  %v10709_v22 = vshrl.u32 %v19200_v31, 16  ;;  %v19224_v13 = vadd.f32 %v19104_v12, %v8329_v58  ;;  %v13535_v0 = vpop.f32.mrf.mxu1  ;;  %v19226_v26 = vpop.f32.mrf.mxu0  ;;  %v19232_v23 = vsel %vm14547_vm8, %v12665_v32, %v11185_v60  ;;  %v11187_v43 = vrot.slane %v11185_v60, 4  ;;  %v10356_v42 = vld [vmem:[#allocation2 + $0xcc] sm:$0xf] }
 0x564   : > { %13749 = vmatprep.mubr.msk.bf16.mxu1 %vm7373_vm2, %v20175_v14  ;;  %v11188_v25 = vrot.slane %v18973_v33, 5  ;;  %v8332_v14 = vadd.f32 %v13535_v0, %v20178_v38  ;;  %v10670_v12 = vsel %vm14264_vm5, %v19193_v46, %v19147_v17  ;;  %v10691_v58 = vshll.u32 %v19216_v16, 16  ;;  %v19252_v17 = vld [vmem:[#allocation2 + $0xc8] sm:$0x1] }
 0x565   : > { %20177 = vst [vmem:[#allocation34_spill] sm:$0xff] %v19224_v13  ;;  %v19241_v13 = vld [vmem:[#allocation2 + $0xd0] sm:$0xf]  ;;  %v19244_v62 = vadd.f32 %v19121_v15, %v8327_v21  ;;  %v8239_v32 = vpop.f32.mrf.mxu1  ;;  %v19246_v63 = vpop.f32.mrf.mxu0  ;;  %v10678_v60 = vor.u32 %v10677_v6, %v10674_v27  ;;  %v10688_v33 = vor.u32 %v10687_v41, %v19218_v19  ;;  %v10698_v0 = vrot.slane %v10696_v8, 4  ;;  %v20181_v41 = vld [vmem:[#allocation41_spill] sm:$0xff] }
 0x566   : > { %v10701_v38 = vrot.slane %v10699_v5, 5  ;;  %v8330_v51 = vadd.f32 %v8239_v32, %v20180_v2  ;;  %v19254_v46 = vrot.slane %v10705_v35, 5  ;;  %v10711_v7 = vrot.slane %v10709_v22, 4 }
 0x567   : > { %20179 = vst [vmem:[#allocation25_spill] sm:$0xff] %v19244_v62  ;;  %v19257_v15 = vadd.f32 %v19140_v47, %v8332_v14  ;;  %v13536_v21 = vpop.f32.mrf.mxu1  ;;  %v19259_v62 = vpop.f32.mrf.mxu0  ;;  %v10720_v27 = vshrl.u32 %v10356_v42, 16  ;;  %v10723_v6 = vshll.u32 %v10356_v42, 16  ;;  %v10729_v2 = vshll.u32 %v19241_v13, 16 }
 0x568   : > { %13718 = vmatmul.mubr.msk.bf16.gmra.mxu0 %vm7373_vm2, %v19032_v28  ;;  %v10733_v28 = vshrl.u32 %v19241_v13, 16  ;;  %v8333_v8 = vadd.f32 %v13536_v21, %v20181_v41  ;;  %v20182_v5 = vcombine.low %v19044_v11, %v19053_v52  ;;  %v11189_v47 = vsel %vm14547_vm8, %v11187_v43, %v11188_v25 }
 0x569   : > { %13721 = vmatprep.mubr.msk.bf16.mxu0 %vm7373_vm2, %v19133_v45  ;;  %v10693_v35 = vrot.slane %v10691_v58, 5  ;;  %v19273_v22 = vadd.f32 %v19155_v30, %v8330_v51  ;;  %v8242_v45 = vpop.f32.mrf.mxu1  ;;  %v19275_v14 = vpop.f32.mrf.mxu0  ;;  %v20183_v42 = vcombine.low %v19115_v49, %v19108_v3  ;;  %v10679_v32 = vrot.slane %v10678_v60, 4 }
 0x56a   : > { %v10689_v21 = vrot.slane %v10688_v33, 4  ;;  %v10702_v11 = vor.u32 %v10701_v38, %v10698_v0  ;;  %v10715_v52 = vshll.u32 %v19252_v17, 16  ;;  %v8331_v41 = vadd.f32 %v8242_v45, %v19005_v4  ;;  %v20184_v33 = vld [vmem:[#allocation43_spill] sm:$0xff] }
 0x56b   : > { %13750 = vmatmul.mubr.msk.bf16.gmra.mxu1 %vm7373_vm2, %v20182_v5  ;;  %v10712_v43 = vor.u32 %v10711_v7, %v19254_v46  ;;  %v11192_v51 = vrot.slane %v19001_v20, 5  ;;  %v19286_v30 = vadd.f32 %v19167_v59, %v8333_v8  ;;  %v13539_v25 = vpop.f32.mrf.mxu1  ;;  %v19288_v58 = vpop.f32.mrf.mxu0  ;;  %v10722_v3 = vrot.slane %v10720_v27, 4  ;;  %v19299_v59 = vld [vmem:[#allocation2 + $0xd4] sm:$0x1] }
 0x56c   : > { %13753 = vmatprep.mubr.msk.bf16.mxu1 %vm7373_vm2, %v20183_v42  ;;  %v10725_v49 = vrot.slane %v10723_v6, 5  ;;  %v19290_v5 = vrot.slane %v10729_v2, 5  ;;  %v10735_v60 = vrot.slane %v10733_v28, 4  ;;  %v8336_v0 = vadd.f32 %v13539_v25, %v20184_v33  ;;  %v11061_v42 = vld [vmem:[#allocation2 + $0xa8] sm:$0xe] }
 0x56d   : > { %v20185_v4 = vsel %vm14264_vm5, %v19169_v61, %v19125_v36  ;;  %v11199_v20 = vrot.slane %v19063_v1, 5  ;;  %v19302_v38 = vadd.f32 %v19185_v40, %v8331_v41  ;;  %v8255_v27 = vpop.f32.mrf.mxu1  ;;  %v12685_v6 = vcombine.low %v19232_v23, %v11189_v47  ;;  %v20186_v36 = vld [vmem:[#allocation22_spill] sm:$0xff]  ;;  %v11060_v40 = vld [vmem:[#allocation2 + $0x9c] sm:$0xe]  ;;  %v19316_v23 = vpop.f32.mrf.mxu0 }
 0x56e   : > { %v12633_v7 = vcombine.low %v20185_v4, %v10670_v12  ;;  %v10684_v2 = vsel %vm14264_vm5, %v10679_v32, %v19218_v19  ;;  %v10694_v28 = vsel %vm14264_vm5, %v10689_v21, %v10693_v35  ;;  %v10717_v8 = vrot.slane %v10715_v52, 5  ;;  %v20187_v52 = vld [vmem:[#allocation16_spill] sm:$0xff] }
 0x56f   : > { %v8334_v61 = vadd.f32 %v8255_v27, %v20186_v36  ;;  %v10703_v1 = vrot.slane %v10702_v11, 4  ;;  %v10713_v12 = vrot.slane %v10712_v43, 4  ;;  %v19314_v45 = vadd.f32 %v19210_v57, %v8336_v0  ;;  %v13540_v47 = vpop.f32.mrf.mxu1  ;;  %v8644_v4 = vpop.f32.mrf.mxu0 }
 0x570   : > { %13722 = vmatmul.mubr.msk.bf16.gmra.mxu0 %vm7373_vm2, %v19180_v39  ;;  %v11194_v19 = vrot.slane %v11192_v51, 4  ;;  %v10726_v35 = vor.u32 %v10725_v49, %v10722_v3  ;;  %v10736_v32 = vor.u32 %v10735_v60, %v19290_v5  ;;  %v10739_v21 = vshll.u32 %v19299_v59, 16 }
 0x571   : > { %13725 = vmatprep.mubr.msk.bf16.mxu0 %vm7373_vm2, %v12633_v7  ;;  %v8337_v39 = vadd.f32 %v13540_v47, %v20187_v52  ;;  %v20188_v11 = vcombine.low %v19173_v53, %v19197_v37  ;;  %v11201_v57 = vrot.slane %v11199_v20, 4  ;;  %v11202_v41 = vrot.slane %v19090_v9, 5  ;;  %v8258_v25 = vpop.f32.mrf.mxu1  ;;  %v20189_v53 = vld [vmem:[#allocation15_spill] sm:$0xff]  ;;  %v20191_v47 = vld [vmem:[#allocation24_spill] sm:$0xff] }
 0x572   : > { %v19328_v43 = vadd.f32 %v19226_v26, %v8334_v61  ;;  %v12634_v3 = vcombine.low %v10684_v2, %v10694_v28  ;;  %v10708_v49 = vsel %vm14264_vm5, %v10703_v1, %v19254_v46  ;;  %v12666_v60 = vrot.slane %v11060_v40, 9  ;;  %v20190_v28 = vld [vmem:[#allocation30_spill] sm:$0xff] }
 0x573   : > { %13754 = vmatmul.mubr.msk.bf16.gmra.mxu1 %vm7373_vm2, %v20188_v11  ;;  %v11195_v33 = vrot.slane %v19071_v55, 5  ;;  %v8335_v37 = vadd.f32 %v8258_v25, %v20189_v53  ;;  %v10718_v0 = vsel %vm14264_vm5, %v10713_v12, %v10717_v8  ;;  %v12667_v9 = vrot.slane %v11061_v42, 9  ;;  %v13543_v7 = vpop.f32.mrf.mxu1 }
 0x574   : > { %13757 = vmatprep.mubr.msk.bf16.mxu1 %vm7373_vm2, %v12685_v6  ;;  %v19339_v26 = vadd.f32 %v19246_v63, %v8337_v39  ;;  %v10727_v6 = vrot.slane %v10726_v35, 4  ;;  %v10737_v2 = vrot.slane %v10736_v32, 4  ;;  %v10741_v46 = vrot.slane %v10739_v21, 5  ;;  %v20192_v39 = vld [vmem:[#allocation38_spill] sm:$0xff] }
 0x575   : > { %v11196_v27 = vsel %vm14547_vm8, %v11194_v19, %v11195_v33  ;;  %v8340_v36 = vadd.f32 %v13543_v7, %v20190_v28  ;;  %v11203_v55 = vsel %vm14547_vm8, %v11201_v57, %v11202_v41  ;;  %v11213_v61 = vrot.slane %v19200_v31, 5  ;;  %v8271_v63 = vpop.f32.mrf.mxu1  ;;  %v11064_v33 = vld [vmem:[#allocation2 + $0xcc] sm:$0xe]  ;;  %v20194_v7 = vld [vmem:[#allocation4_spill] sm:$0xff] }
 0x576   : > { %v19348_v8 = vadd.f32 %v19259_v62, %v8335_v37  ;;  %v12635_v1 = vcombine.low %v10708_v49, %v10718_v0  ;;  %v11193_v12 = vsel %vm14547_vm8, %v12666_v60, %v11192_v51  ;;  %v11206_v40 = vrot.slane %v19150_v24, 5  ;;  %v13583_v62 = vpop.f32.mrf.mxu0 }
 0x577   : > { %v8338_v19 = vadd.f32 %v8271_v63, %v20191_v47  ;;  %v12686_v42 = vcombine.low %v11193_v12, %v11196_v27  ;;  %v11200_v35 = vsel %vm14547_vm8, %v12667_v9, %v11199_v20  ;;  %v19358_v31 = vadd.f32 %v19275_v14, %v8340_v36  ;;  %v13544_v32 = vpop.f32.mrf.mxu1  ;;  %v11062_v14 = vld [vmem:[#allocation2 + $0xb4] sm:$0xe] }
 0x578   : > { %13726 = vmatmul.mubr.msk.bf16.gmra.mxu0 %vm7373_vm2, %v12634_v3  ;;  %v12687_v21 = vcombine.low %v11200_v35, %v11203_v55  ;;  %v10732_v24 = vsel %vm14264_vm5, %v10727_v6, %v19290_v5  ;;  %v10742_v51 = vsel %vm14264_vm5, %v10737_v2, %v10741_v46  ;;  %v11209_v52 = vrot.slane %v19216_v16, 5  ;;  %v11063_v3 = vld [vmem:[#allocation2 + $0xc0] sm:$0xe]  ;;  %v8657_v37 = vpop.f32.mrf.mxu0  ;;  %v20195_v55 = vld [vmem:[#allocation6_spill] sm:$0xff] }
 0x579   : > { %13729 = vmatprep.mubr.msk.bf16.mxu0 %vm7373_vm2, %v12635_v1  ;;  %v8341_v11 = vadd.f32 %v13544_v32, %v20192_v39  ;;  %v11215_v20 = vrot.slane %v11213_v61, 4  ;;  %v19370_v57 = vadd.f32 %v19288_v58, %v8338_v19  ;;  %v8274_v41 = vpop.f32.mrf.mxu1  ;;  %v11208_v25 = vrot.slane %v11206_v40, 4  ;;  %v20196_v35 = vld [vmem:[#allocation5_spill] sm:$0xff] }
 0x57a   : > { %v11220_v5 = vrot.slane %v19241_v13, 5  ;;  %v8339_v49 = vadd.f32 %v8274_v41, %v20193_v18  ;;  %v12636_v60 = vcombine.low %v10732_v24, %v10742_v51  ;;  %v11216_v16 = vrot.slane %v19252_v17, 5 }
 0x57b   : > { %13758 = vmatmul.mubr.msk.bf16.gmra.mxu1 %vm7373_vm2, %v12686_v42  ;;  %v19377_v53 = vadd.f32 %v19316_v23, %v8341_v11  ;;  %v13547_v0 = vpop.f32.mrf.mxu1  ;;  %v12668_v58 = vrot.slane %v11062_v14, 9  ;;  %v11210_v9 = vsel %vm14547_vm8, %v11208_v25, %v11209_v52  ;;  %v12669_v6 = vrot.slane %v11063_v3, 9  ;;  %v20198_v11 = vld [vmem:[#allocation10_spill] sm:$0xff] }
 0x57c   : > { %13761 = vmatprep.mubr.msk.bf16.mxu1 %vm7373_vm2, %v12687_v21  ;;  %v8344_v27 = vadd.f32 %v13547_v0, %v20194_v7  ;;  %v11217_v13 = vsel %vm14547_vm8, %v11215_v20, %v11216_v16  ;;  %v19384_v2 = vadd.f32 %v8644_v4, %v8339_v49  ;;  %v12670_v23 = vrot.slane %v11064_v33, 9  ;;  %v13584_v4 = vpop.f32.mrf.mxu0  ;;  %v20199_v0 = vld [vmem:[#allocation21_spill] sm:$0xff] }
 0x57d   : > { %v8287_v46 = vpop.f32.mrf.mxu1  ;;  %v11207_v17 = vsel %vm14547_vm8, %v12668_v58, %v11206_v40  ;;  %v11222_v28 = vrot.slane %v11220_v5, 4  ;;  %v11223_v36 = vrot.slane %v19299_v59, 5  ;;  %v11214_v12 = vsel %vm14547_vm8, %v12669_v6, %v11213_v61  ;;  %v20200_v6 = vld [vmem:[#allocation23_spill] sm:$0xff] }
 0x57e   : > { %v8342_v63 = vadd.f32 %v8287_v46, %v20195_v55  ;;  %v12688_v1 = vcombine.low %v11207_v17, %v11210_v9  ;;  %v19393_v47 = vadd.f32 %v13583_v62, %v8344_v27  ;;  %v12689_v42 = vcombine.low %v11214_v12, %v11217_v13  ;;  %v20197_v62 = vld [vmem:[#allocation8_spill] sm:$0xff]  ;;  %v8660_v52 = vpop.f32.mrf.mxu0  ;;  %v20201_v46 = vld [vmem:[#allocation17_spill] sm:$0xff]  ;;  %v20203_v55 = vld [vmem:[#allocation31_spill] sm:$0xff] }
 0x57f   : > { %v13548_v19 = vpop.f32.mrf.mxu1  ;;  %v11221_v21 = vsel %vm14547_vm8, %v12670_v23, %v11220_v5  ;;  %v11224_v61 = vsel %vm14547_vm8, %v11222_v28, %v11223_v36  ;;  %v20202_v23 = vld [vmem:[#allocation11_spill] sm:$0xff] }
 0x580   : > { %13730 = vmatmul.mubr.msk.bf16.gmra.mxu0 %vm7373_vm2, %v12636_v60  ;;  %v8345_v32 = vadd.f32 %v13548_v19, %v20196_v35  ;;  %v19397_v40 = vadd.f32 %v8657_v37, %v8342_v63  ;;  %v12690_v20 = vcombine.low %v11221_v21, %v11224_v61  ;;  %v20206_v35 = vld [vmem:[#allocation25_spill] sm:$0xff] }
 0x581   : > { %v8290_v59 = vpop.f32.mrf.mxu1 }
 0x582   : > { %v8343_v24 = vadd.f32 %v8290_v59, %v20197_v62  ;;  %v19405_v51 = vadd.f32 %v13584_v4, %v8345_v32  ;;  %v20205_v4 = vld [vmem:[#allocation34_spill] sm:$0xff] }
 0x583   : > { %13762 = vmatmul.mubr.msk.bf16.gmra.mxu1 %vm7373_vm2, %v12688_v1  ;;  %v13551_v39 = vpop.f32.mrf.mxu1  ;;  %v20204_v1 = vld [vmem:[#allocation20_spill] sm:$0xff] }
 0x584   : > { %13765 = vmatprep.mubr.msk.bf16.mxu1 %vm7373_vm2, %v12689_v42  ;;  %v19408_v14 = vadd.f32 %v13551_v39, %v20198_v11  ;;  %v19410_v41 = vadd.f32 %v8660_v52, %v8343_v24 }
 0x585   : > { %v8303_v25 = vpop.f32.mrf.mxu1 }
 0x586   : > { %v19413_v3 = vadd.f32 %v8303_v25, %v18969_v34 }
 0x587   : > { %v13552_v5 = vpop.f32.mrf.mxu1 }
 0x588   : > { %v19416_v48 = vadd.f32 %v13552_v5, %v18992_v29 }
 0x589   : > { %v8306_v18 = vpop.f32.mrf.mxu1 }
 0x58a   : > { %v19420_v49 = vadd.f32 %v8306_v18, %v19015_v54 }
 0x58b   : > { %13766 = vmatmul.mubr.msk.bf16.gmra.mxu1 %vm7373_vm2, %v12690_v20  ;;  %v13595_v60 = vpop.f32.mrf.mxu1 }
 0x58c   : > { %v19423_v16 = vadd.f32 %v13595_v60, %v19074_v56 }
 0x58d   : > { %v9299_v33 = vpop.f32.mrf.mxu1 }
 0x58e   : > { %v19426_v37 = vadd.f32 %v9299_v33, %v19077_v44 }
 0x58f   : > { %v13596_v34 = vpop.f32.mrf.mxu1 }
 0x590   : > { %v19429_v58 = vadd.f32 %v13596_v34, %v20199_v0 }
 0x591   : > { %v9302_v29 = vpop.f32.mrf.mxu1 }
 0x592   : > { %v19432_v9 = vadd.f32 %v9302_v29, %v19102_v50 }
 0x593   : > { %v13599_v7 = vpop.f32.mrf.mxu1 }
 0x594   : > { %v19435_v54 = vadd.f32 %v13599_v7, %v19119_v10 }
 0x595   : > { %v9315_v27 = vpop.f32.mrf.mxu1 }
 0x596   : > { %v19438_v56 = vadd.f32 %v9315_v27, %v20200_v6 }
 0x597   : > { %v13600_v13 = vpop.f32.mrf.mxu1 }
 0x598   : > { %v19441_v44 = vadd.f32 %v13600_v13, %v20201_v46 }
 0x599   : > { %v9318_v17 = vpop.f32.mrf.mxu1 }
 0x59a   : > { %v19444_v28 = vadd.f32 %v9318_v17, %v20202_v23 }
 0x59b   : > { %v13603_v36 = vpop.f32.mrf.mxu1 }
 0x59c   : > { %v19447_v50 = vadd.f32 %v13603_v36, %v20203_v55 }
 0x59d   : > { %v9331_v63 = vpop.f32.mrf.mxu1 }
 0x59e   : > { %v19450_v10 = vadd.f32 %v9331_v63, %v20204_v1 }
 0x59f   : > { %v13604_v12 = vpop.f32.mrf.mxu1 }
 0x5a0   : > { %v19453_v19 = vadd.f32 %v13604_v12, %v20205_v4 }
 0x5a1   : > { %v9334_v42 = vpop.f32.mrf.mxu1 }
 0x5a2   : > { %v19456_v32 = vadd.f32 %v9334_v42, %v20206_v35 }
 0x5a3   : > { %v13607_v59 = vpop.f32.mrf.mxu1 }
 0x5a4   : > { %v19459_v21 = vadd.f32 %v13607_v59, %v19257_v15 }
 0x5a5   : > { %v9347_v61 = vpop.f32.mrf.mxu1 }
 0x5a6   : > { %v19462_v62 = vadd.f32 %v9347_v61, %v19273_v22 }
 0x5a7   : > { %v13608_v24 = vpop.f32.mrf.mxu1 }
 0x5a8   : > { %v19465_v52 = vadd.f32 %v13608_v24, %v19286_v30 }
 0x5a9   : > { %v9350_v39 = vpop.f32.mrf.mxu1 }
 0x5aa   : > { %v19468_v11 = vadd.f32 %v9350_v39, %v19302_v38 }
 0x5ab   : > { %v13611_v20 = vpop.f32.mrf.mxu1 }
 0x5ac   : > { %v19471_v25 = vadd.f32 %v13611_v20, %v19314_v45 }
 0x5ad   : > { %v9363_v5 = vpop.f32.mrf.mxu1 }
 0x5ae   : > { %v19474_v15 = vadd.f32 %v9363_v5, %v19328_v43 }
 0x5af   : > { %v13612_v18 = vpop.f32.mrf.mxu1 }
 0x5b0   : > { %20207 = vst [vmem:[#allocation28_spill] sm:$0xff] %v19474_v15  ;;  %v19477_v22 = vadd.f32 %v13612_v18, %v19339_v26 }
 0x5b1   : > { %v9366_v60 = vpop.f32.mrf.mxu1 }
 0x5b2   : > { %20208 = vst [vmem:[#allocation7_spill] sm:$0xff] %v19477_v22  ;;  %v19480_v30 = vadd.f32 %v9366_v60, %v19348_v8 }
 0x5b3   : > { %v13615_v33 = vpop.f32.mrf.mxu1 }
 0x5b4   : > { %20209 = vst [vmem:[#allocation13_spill] sm:$0xff] %v19480_v30  ;;  %v19483_v38 = vadd.f32 %v13615_v33, %v19358_v31 }
 0x5b5   : > { %v9379_v34 = vpop.f32.mrf.mxu1 }
 0x5b6   : > { %20210 = vst [vmem:[#allocation26_spill] sm:$0xff] %v19483_v38  ;;  %v19486_v45 = vadd.f32 %v9379_v34, %v19370_v57 }
 0x5b7   : > { %v13616_v0 = vpop.f32.mrf.mxu1 }
 0x5b8   : > { %20211 = vst [vmem:[#allocation18_spill] sm:$0xff] %v19486_v45  ;;  %v19489_v43 = vadd.f32 %v13616_v0, %v19377_v53 }
 0x5b9   : > { %v9382_v29 = vpop.f32.mrf.mxu1 }
 0x5ba   : > { %20212 = vst [vmem:[#allocation42_spill] sm:$0xff] %v19489_v43  ;;  %v19492_v26 = vadd.f32 %v9382_v29, %v19384_v2 }
 0x5bb   : > { %v13619_v7 = vpop.f32.mrf.mxu1 }
 0x5bc   : > { %20213 = vst [vmem:[#allocation19_spill] sm:$0xff] %v19492_v26  ;;  %v19495_v8 = vadd.f32 %v13619_v7, %v19393_v47 }
 0x5bd   : > { %v9395_v27 = vpop.f32.mrf.mxu1  ;;  %v13587_v6 = vpop.f32.mrf.mxu0 }
 0x5be   : > { %20214 = vst [vmem:[#allocation32_spill] sm:$0xff] %v19495_v8  ;;  %v19498_v31 = vadd.f32 %v9395_v27, %v19397_v40  ;;  %v8718_v57 = vadd.f32 %v13587_v6, %v19408_v14 }
 0x5bf   : > { %v13620_v13 = vpop.f32.mrf.mxu1  ;;  %v8673_v53 = vpop.f32.mrf.mxu0 }
 0x5c0   : > { %20215 = vst [vmem:[#allocation27_spill] sm:$0xff] %v19498_v31  ;;  %v19502_v46 = vadd.f32 %v13620_v13, %v19405_v51  ;;  %v8716_v17 = vadd.f32 %v8673_v53, %v19413_v3 }
 0x5c1   : > { %v9398_v2 = vpop.f32.mrf.mxu1  ;;  %v13588_v47 = vpop.f32.mrf.mxu0 }
 0x5c2   : > { %20216 = vst [vmem:[#allocation9_spill] sm:$0xff] %v19502_v46  ;;  %v19506_v23 = vadd.f32 %v9398_v2, %v19410_v41  ;;  %v8719_v36 = vadd.f32 %v13588_v47, %v19416_v48 }
 0x5c3   : > { %v8676_v55 = vpop.f32.mrf.mxu0 }
 0x5c4   : > { %20217 = vst [vmem:[#allocation29_spill] sm:$0xff] %v19506_v23  ;;  %v8717_v40 = vadd.f32 %v8676_v55, %v19420_v49 }
 0x5c5   : > { %v19510_v63 = vpop.f32.mrf.mxu0 }
 0x5c7   : > { %v19512_v1 = vpop.f32.mrf.mxu0 }
 0x5c9   : > { %v13623_v14 = vpop.f32.mrf.mxu1  ;;  %v19516_v4 = vpop.f32.mrf.mxu0 }
 0x5ca   : > { %v19514_v51 = vadd.f32 %v13623_v14, %v8718_v57 }
 0x5cb   : > { %v9411_v12 = vpop.f32.mrf.mxu1  ;;  %v19520_v42 = vpop.f32.mrf.mxu0 }
 0x5cc   : > { %20218 = vst [vmem:[#allocation40_spill] sm:$0xff] %v19514_v51  ;;  %v19518_v3 = vadd.f32 %v9411_v12, %v8716_v17 }
 0x5cd   : > { %v13624_v41 = vpop.f32.mrf.mxu1  ;;  %v19524_v59 = vpop.f32.mrf.mxu0 }
 0x5ce   : > { %20219 = vst [vmem:[#allocation14_spill] sm:$0xff] %v19518_v3  ;;  %v19522_v35 = vadd.f32 %v13624_v41, %v8719_v36 }
 0x5cf   : > { %v9414_v48 = vpop.f32.mrf.mxu1  ;;  %v19530_v24 = vpop.f32.mrf.mxu0 }
 0x5d0   : > { %20220 = vst [vmem:[#allocation12_spill] sm:$0xff] %v19522_v35  ;;  %v19526_v49 = vadd.f32 %v9414_v48, %v8717_v40 }
 0x5d1   : > { %v19528_v61 = vpop.f32.mrf.mxu1  ;;  %v19534_v20 = vpop.f32.mrf.mxu0 }
 0x5d2   : > { %20221 = vst [vmem:[#allocation35_spill] sm:$0xff] %v19526_v49 }
 0x5d3   : > { %v19532_v39 = vpop.f32.mrf.mxu1  ;;  %v19538_v18 = vpop.f32.mrf.mxu0 }
 0x5d5   : > { %v19536_v5 = vpop.f32.mrf.mxu1  ;;  %v19542_v33 = vpop.f32.mrf.mxu0 }
 0x5d7   : > { %v19540_v60 = vpop.f32.mrf.mxu1  ;;  %v19546_v0 = vpop.f32.mrf.mxu0 }
 0x5d9   : > { %v19544_v34 = vpop.f32.mrf.mxu1  ;;  %v19550_v7 = vpop.f32.mrf.mxu0 }
 0x5db   : > { %v19548_v29 = vpop.f32.mrf.mxu1  ;;  %v19554_v6 = vpop.f32.mrf.mxu0 }
 0x5dd   : > { %v19552_v27 = vpop.f32.mrf.mxu1 }
 0x5de   : > { %v19558_v13 = vpop.f32.mrf.mxu0 }
 0x5df   : > { %v19556_v57 = vpop.f32.mrf.mxu1 }
 0x5e0   : > { %v19562_v17 = vpop.f32.mrf.mxu0 }
 0x5e1   : > { %v19560_v53 = vpop.f32.mrf.mxu1 }
 0x5e2   : > { %v19566_v47 = vpop.f32.mrf.mxu0 }
 0x5e3   : > { %v19564_v2 = vpop.f32.mrf.mxu1 }
 0x5e4   : > { %v19570_v55 = vpop.f32.mrf.mxu0 }
 0x5e5   : > { %v19568_v36 = vpop.f32.mrf.mxu1 }
 0x5e7   : > { %v19572_v40 = vpop.f32.mrf.mxu1  ;;  %v19574_v14 = vpop.f32.mrf.mxu0 }
 0x5e9   : > { %v19576_v12 = vpop.f32.mrf.mxu1  ;;  %v19578_v41 = vpop.f32.mrf.mxu0 }
 0x5ea   : > { %20222 = vst [vmem:[#allocation37_spill] sm:$0xff] %v19578_v41 }
 0x5eb   : > { %v19580_v48 = vpop.f32.mrf.mxu1  ;;  %v19582_v49 = vpop.f32.mrf.mxu0 }
 0x5ec   : > { %20223 = vst [vmem:[#allocation36_spill] sm:$0xff] %v19582_v49 }
 0x5ed   : > { %v19584_v35 = vpop.f32.mrf.mxu1  ;;  %v19586_v3 = vpop.f32.mrf.mxu0 }
 0x5ee   : > { %20224 = vst [vmem:[#allocation39_spill] sm:$0xff] %v19586_v3 }
 0x5ef   : > { %v19588_v51 = vpop.f32.mrf.mxu1  ;;  %v19590_v23 = vpop.f32.mrf.mxu0 }
 0x5f0   : > { %20225 = vst [vmem:[#allocation41_spill] sm:$0xff] %v19590_v23 }
 0x5f1   : > { %v19592_v46 = vpop.f32.mrf.mxu1  ;;  %v19594_v31 = vpop.f32.mrf.mxu0 }
 0x5f2   : > { %20226 = vst [vmem:[#allocation43_spill] sm:$0xff] %v19592_v46  ;;  %20227 = vst [vmem:[#allocation22_spill] sm:$0xff] %v19594_v31 }
 0x5f3   : > { %v19596_v8 = vpop.f32.mrf.mxu1  ;;  %v19598_v26 = vpop.f32.mrf.mxu0 }
 0x5f4   : > { %20228 = vst [vmem:[#allocation16_spill] sm:$0xff] %v19596_v8  ;;  %20229 = vst [vmem:[#allocation15_spill] sm:$0xff] %v19598_v26 }
 0x5f5   : > { %v19600_v43 = vpop.f32.mrf.mxu1  ;;  %v19602_v45 = vpop.f32.mrf.mxu0 }
 0x5f6   : > { %20230 = vst [vmem:[#allocation30_spill] sm:$0xff] %v19600_v43  ;;  %20231 = vst [vmem:[#allocation24_spill] sm:$0xff] %v19602_v45 }
 0x5f7   : > { %v19604_v38 = vpop.f32.mrf.mxu1  ;;  %v19606_v30 = vpop.f32.mrf.mxu0 }
 0x5f8   : > { %20232 = vst [vmem:[#allocation38_spill] sm:$0xff] %v19604_v38  ;;  %20233 = vst [vmem:[#allocation33_spill] sm:$0xff] %v19606_v30 }
 0x5f9   : > { %v19608_v3 = vpop.f32.mrf.mxu1  ;;  %v19610_v49 = vpop.f32.mrf.mxu0 }
 0x5fa   : > { %20234 = vst [vmem:[#allocation4_spill] sm:$0xff] %v19608_v3  ;;  %20235 = vst [vmem:[#allocation6_spill] sm:$0xff] %v19610_v49 }
 0x5fb   : > { %v19612_v23 = vpop.f32.mrf.mxu1  ;;  %v19614_v22 = vpop.f32.mrf.mxu0 }
 0x5fc   : > { %20236 = vst [vmem:[#allocation5_spill] sm:$0xff] %v19612_v23  ;;  %20237 = vst [vmem:[#allocation8_spill] sm:$0xff] %v19614_v22 }
 0x5fd   : > { %v19616_v31 = vpop.f32.mrf.mxu1  ;;  %v19618_v8 = vpop.f32.mrf.mxu0 }
 0x5fe   : > { %20238 = vst [vmem:[#allocation10_spill] sm:$0xff] %v19616_v31  ;;  %20239 = vst [vmem:[#allocation21_spill] sm:$0xff] %v19618_v8 }
 0x5ff   : > { %v19620_v26 = vpop.f32.mrf.mxu1 }
 0x600   : > { %20240 = vst [vmem:[#allocation23_spill] sm:$0xff] %v19620_v26  ;;  %v19622_v43 = vpop.f32.mrf.mxu0 }
 0x601   : > { %20241 = vst [vmem:[#allocation17_spill] sm:$0xff] %v19622_v43  ;;  %v19624_v45 = vpop.f32.mrf.mxu1 }
 0x602   : > { %20242 = vst [vmem:[#allocation11_spill] sm:$0xff] %v19624_v45  ;;  %v19626_v38 = vpop.f32.mrf.mxu0 }
 0x603   : > { %20243 = vst [vmem:[#allocation31_spill] sm:$0xff] %v19626_v38  ;;  %v19628_v30 = vpop.f32.mrf.mxu1  ;;  %v9910_v38 = vadd.f32 %v19510_v63, %v19423_v16  ;;  %v19657_v16 = vld [vmem:[%s19859_s6] ss:$0 sm:$0xff] }
 0x604   : > { %20244 = vst [vmem:[#allocation20_spill] sm:$0xff] %v19628_v30  ;;  %v19630_v3 = vpop.f32.mrf.mxu0 }
 0x605   : > { %20245 = vst [vmem:[#allocation34_spill] sm:$0xff] %v19630_v3  ;;  %v19632_v49 = vpop.f32.mrf.mxu1 }
 0x606   : > { %20246 = vst [vmem:[#allocation25_spill] sm:$0xff] %v19632_v49  ;;  %v19634_v23 = vpop.f32.mrf.mxu0  ;;  %v9908_v49 = vadd.f32 %v19512_v1, %v19426_v37  ;;  %v9909_v37 = vadd.f32 %v19520_v42, %v19432_v9 }
 0x607   : > { %20247 = vst [vmem:[#allocation44_spill] sm:$0xff] %v19634_v23  ;;  %v19636_v22 = vpop.f32.mrf.mxu1  ;;  %v10281_v23 = vadd.f32 %v19528_v61, %v9910_v38 }
 0x608   : > { %20248 = vst [vmem:[#allocation45_spill] sm:$0xff] %v19636_v22  ;;  %v13703_v31 = vpop.f32.mrf.mxu0 }
 0x609   : > { %v19638_v8 = vpop.f32.mrf.mxu1  ;;  %v11019_v41 = vadd.f32 %v13703_v31, %v10281_v23 }
 0x60a   : > { %20249 = vst [vmem:[#allocation46_spill] sm:$0xff] %v19638_v8  ;;  %v10890_v26 = vpop.f32.mrf.mxu0  ;;  %v9911_v8 = vadd.f32 %v19516_v4, %v19429_v58  ;;  %v9914_v58 = vadd.f32 %v19524_v59, %v19435_v54  ;;  %v10280_v4 = vadd.f32 %v19540_v60, %v9909_v37 }
 0x60b   : > { %v19640_v46 = vpop.f32.mrf.mxu1 }
 0x60c   : > { %20250 = vst [vmem:[#allocation47_spill] sm:$0xff] %v19640_v46  ;;  %v13704_v43 = vpop.f32.mrf.mxu0  ;;  %v10279_v46 = vadd.f32 %v19532_v39, %v9908_v49  ;;  %v10282_v38 = vadd.f32 %v19536_v5, %v9911_v8  ;;  %v9912_v8 = vadd.f32 %v19530_v24, %v19438_v56  ;;  %v10285_v49 = vadd.f32 %v19544_v34, %v9914_v58 }
 0x60d   : > { %v19644_v45 = vpop.f32.mrf.mxu1  ;;  %v9913_v24 = vadd.f32 %v19538_v18, %v19444_v28 }
 0x60e   : > { %v10893_v3 = vpop.f32.mrf.mxu0  ;;  %v11017_v1 = vadd.f32 %v10890_v26, %v10279_v46  ;;  %v11020_v9 = vadd.f32 %v13704_v43, %v10282_v38  ;;  %v9915_v43 = vadd.f32 %v19534_v20, %v19441_v44  ;;  %v9918_v20 = vadd.f32 %v19542_v33, %v19447_v50 }
 0x60f   : > { %v19649_v22 = vpop.f32.mrf.mxu1  ;;  %v11018_v39 = vadd.f32 %v10893_v3, %v10280_v4 }
 0x610   : > { %v13707_v30 = vpop.f32.mrf.mxu0 }
 0x611   : > { %v13739_v15 = vpop.f32.mrf.mxu1  ;;  %v11023_v37 = vadd.f32 %v13707_v30, %v10285_v49 }
 0x612   : > { %v10906_v63 = vpop.f32.mrf.mxu0  ;;  %v11501_v61 = vadd.f32 %v13739_v15, %v11019_v41  ;;  %v10283_v41 = vadd.f32 %v19548_v29, %v9912_v8 }
 0x613   : > { %v11372_v31 = vpop.f32.mrf.mxu1 }
 0x614   : > { %v13708_v23 = vpop.f32.mrf.mxu0  ;;  %v11540_v26 = vadd.f32 %v19657_v16, %v11501_v61  ;;  %v11499_v15 = vadd.f32 %v11372_v31, %v11017_v1  ;;  %v10286_v1 = vadd.f32 %v19552_v27, %v9915_v43  ;;  %v11021_v61 = vadd.f32 %v10906_v63, %v10283_v41 }
 0x615   : > { %v13740_v46 = vpop.f32.mrf.mxu1  ;;  %v10284_v31 = vadd.f32 %v19556_v57, %v9913_v24  ;;  %v9916_v27 = vadd.f32 %v19546_v0, %v19450_v10  ;;  %v9919_v57 = vadd.f32 %v19550_v7, %v19453_v19 }
 0x616   : > { %v10909_v42 = vpop.f32.mrf.mxu0  ;;  %11573 = vst.msk [vmem:[%s19667_s8 + $0x10] sm:$0xff] %vm11570_vm4, %v11540_v26  ;;  %v11538_v54 = vadd.f32 %v19657_v16, %v11499_v15  ;;  %v11502_v59 = vadd.f32 %v13740_v46, %v11020_v9  ;;  %v11024_v4 = vadd.f32 %v13708_v23, %v10286_v1  ;;  %v10289_v26 = vadd.f32 %v19560_v53, %v9918_v20 }
 0x617   : > { %v11375_v5 = vpop.f32.mrf.mxu1  ;;  %v11022_v15 = vadd.f32 %v10909_v42, %v10284_v31  ;;  %v10287_v46 = vadd.f32 %v19564_v2, %v9916_v27  ;;  %v9917_v53 = vadd.f32 %v19554_v6, %v19456_v32  ;;  %v9922_v2 = vadd.f32 %v19558_v13, %v19459_v21 }
 0x618   : > { %v13711_v60 = vpop.f32.mrf.mxu0  ;;  %11571 = vst.msk [vmem:[%s19667_s8] sm:$0xff] %vm11570_vm4, %v11538_v54  ;;  %v11541_v56 = vadd.f32 %v19657_v16, %v11502_v59  ;;  %v11500_v3 = vadd.f32 %v11375_v5, %v11018_v39  ;;  %v10290_v54 = vadd.f32 %v19568_v36, %v9919_v57  ;;  %v9920_v36 = vadd.f32 %v19562_v17, %v19462_v62 }
 0x619   : > { %v11027_v49 = vadd.f32 %v13711_v60, %v10289_v26  ;;  %v10288_v60 = vadd.f32 %v19572_v40, %v9917_v53  ;;  %v9923_v40 = vadd.f32 %v19566_v47, %v19465_v52  ;;  %v20253_v26 = vld [vmem:[#allocation43_spill] sm:$0xff] }
 0x61a   : > { %v13743_v34 = vpop.f32.mrf.mxu1  ;;  %v10922_v38 = vpop.f32.mrf.mxu0  ;;  %11574 = vst.msk [vmem:[%s19667_s8 + $0x18] sm:$0xff] %vm11570_vm4, %v11541_v56  ;;  %v11539_v44 = vadd.f32 %v19657_v16, %v11500_v3  ;;  %v10293_v3 = vadd.f32 %v19576_v12, %v9922_v2  ;;  %v10291_v1 = vadd.f32 %v19580_v48, %v9920_v36  ;;  %v9921_v12 = vadd.f32 %v19570_v55, %v19468_v11  ;;  %v20251_v55 = vld [vmem:[#allocation28_spill] sm:$0xff] }
 0x61b   : > { %v11505_v30 = vadd.f32 %v13743_v34, %v11023_v37  ;;  %v11025_v59 = vadd.f32 %v10922_v38, %v10287_v46  ;;  %v10294_v20 = vadd.f32 %v19584_v35, %v9923_v40  ;;  %v9926_v48 = vadd.f32 %v19574_v14, %v19471_v25  ;;  %v20254_v14 = vld [vmem:[#allocation7_spill] sm:$0xff]  ;;  %v20256_v46 = vld [vmem:[#allocation16_spill] sm:$0xff]  ;;  %v20263_v40 = vld [vmem:[#allocation18_spill] sm:$0xff] }
 0x61c   : > { %v11388_v29 = vpop.f32.mrf.mxu1  ;;  %v13712_v58 = vpop.f32.mrf.mxu0  ;;  %11572 = vst.msk [vmem:[%s19667_s8 + $0x8] sm:$0xff] %vm11570_vm4, %v11539_v44 }
 0x61d   : > { %v11544_v28 = vadd.f32 %v19657_v16, %v11505_v30  ;;  %v11503_v18 = vadd.f32 %v11388_v29, %v11021_v61  ;;  %v11028_v41 = vadd.f32 %v13712_v58, %v10290_v54 }
 0x61e   : > { %v13744_v63 = vpop.f32.mrf.mxu1  ;;  %v10925_v9 = vpop.f32.mrf.mxu0 }
 0x61f   : > { %11577 = vst.msk [vmem:[%s19667_s8 + $0x30] sm:$0xff] %vm11570_vm4, %v11544_v28  ;;  %v11542_v50 = vadd.f32 %v19657_v16, %v11503_v18  ;;  %v11506_v33 = vadd.f32 %v13744_v63, %v11024_v4  ;;  %v11026_v24 = vadd.f32 %v10925_v9, %v10288_v60  ;;  %v10292_v4 = vadd.f32 %v19588_v51, %v9921_v12  ;;  %v20252_v18 = vld [vmem:[#allocation37_spill] sm:$0xff] }
 0x620   : > { %v11391_v23 = vpop.f32.mrf.mxu1  ;;  %v13715_v8 = vpop.f32.mrf.mxu0  ;;  %v9924_v27 = vadd.f32 %v20252_v18, %v20251_v55  ;;  %v20270_v55 = vld [vmem:[#allocation24_spill] sm:$0xff] }
 0x621   : > { %11575 = vst.msk [vmem:[%s19667_s8 + $0x20] sm:$0xff] %vm11570_vm4, %v11542_v50  ;;  %v11545_v10 = vadd.f32 %v19657_v16, %v11506_v33  ;;  %v11504_v0 = vadd.f32 %v11391_v23, %v11022_v15  ;;  %v11031_v61 = vadd.f32 %v13715_v8, %v10293_v3  ;;  %v10297_v15 = vadd.f32 %v20253_v26, %v9926_v48  ;;  %v20255_v33 = vld [vmem:[#allocation36_spill] sm:$0xff] }
 0x622   : > { %v10938_v39 = vpop.f32.mrf.mxu0  ;;  %v9927_v57 = vadd.f32 %v20255_v33, %v20254_v14  ;;  %v20273_v14 = vld [vmem:[#allocation33_spill] sm:$0xff] }
 0x623   : > { %v13747_v42 = vpop.f32.mrf.mxu1  ;;  %11578 = vst.msk [vmem:[%s19667_s8 + $0x38] sm:$0xff] %vm11570_vm4, %v11545_v10  ;;  %v11543_v19 = vadd.f32 %v19657_v16, %v11504_v0  ;;  %v11029_v29 = vadd.f32 %v10938_v39, %v10291_v1  ;;  %v20258_v39 = vld [vmem:[#allocation39_spill] sm:$0xff] }
 0x624   : > { %v11509_v7 = vadd.f32 %v13747_v42, %v11027_v49  ;;  %v13716_v5 = vpop.f32.mrf.mxu0  ;;  %v10295_v49 = vadd.f32 %v20256_v46, %v9924_v27  ;;  %v20257_v42 = vld [vmem:[#allocation13_spill] sm:$0xff] }
 0x625   : > { %v11404_v43 = vpop.f32.mrf.mxu1  ;;  %11576 = vst.msk [vmem:[%s19667_s8 + $0x28] sm:$0xff] %vm11570_vm4, %v11543_v19  ;;  %v11032_v28 = vadd.f32 %v13716_v5, %v10294_v20  ;;  %v9925_v54 = vadd.f32 %v20258_v39, %v20257_v42  ;;  %v20266_v20 = vld [vmem:[#allocation42_spill] sm:$0xff] }
 0x626   : > { %v11548_v32 = vadd.f32 %v19657_v16, %v11509_v7  ;;  %v11507_v6 = vadd.f32 %v11404_v43, %v11025_v59  ;;  %v10941_v56 = vpop.f32.mrf.mxu0  ;;  %v20259_v7 = vld [vmem:[#allocation30_spill] sm:$0xff] }
 0x627   : > { %v13748_v37 = vpop.f32.mrf.mxu1  ;;  %v11030_v50 = vadd.f32 %v10941_v56, %v10292_v4  ;;  %v10298_v2 = vadd.f32 %v20259_v7, %v9927_v57  ;;  %v20262_v56 = vld [vmem:[#allocation38_spill] sm:$0xff] }
 0x628   : > { %11581 = vst.msk [vmem:[%s19667_s8 + $0x50] sm:$0xff] %vm11570_vm4, %v11548_v32  ;;  %v11546_v21 = vadd.f32 %v19657_v16, %v11507_v6  ;;  %v11510_v13 = vadd.f32 %v13748_v37, %v11028_v41  ;;  %v13719_v38 = vpop.f32.mrf.mxu0  ;;  %v20260_v41 = vld [vmem:[#allocation26_spill] sm:$0xff]  ;;  %v20261_v32 = vld [vmem:[#allocation41_spill] sm:$0xff]  ;;  %v10296_v3 = vadd.f32 %v20262_v56, %v9925_v54 }
 0x629   : > { %v11407_v34 = vpop.f32.mrf.mxu1  ;;  %v11035_v10 = vadd.f32 %v13719_v38, %v10297_v15  ;;  %v9930_v6 = vadd.f32 %v20261_v32, %v20260_v41  ;;  %v20276_v42 = vld [vmem:[#allocation6_spill] sm:$0xff]  ;;  %v20279_v41 = vld [vmem:[#allocation8_spill] sm:$0xff] }
 0x62a   : > { %11579 = vst.msk [vmem:[%s19667_s8 + $0x40] sm:$0xff] %vm11570_vm4, %v11546_v21  ;;  %v11549_v62 = vadd.f32 %v19657_v16, %v11510_v13  ;;  %v11508_v17 = vadd.f32 %v11407_v34, %v11026_v24  ;;  %v10954_v30 = vpop.f32.mrf.mxu0  ;;  %v20264_v34 = vld [vmem:[#allocation22_spill] sm:$0xff] }
 0x62b   : > { %v13751_v44 = vpop.f32.mrf.mxu1  ;;  %v11033_v43 = vadd.f32 %v10954_v30, %v10295_v49  ;;  %v9928_v38 = vadd.f32 %v20264_v34, %v20263_v40  ;;  %v20282_v40 = vld [vmem:[#allocation21_spill] sm:$0xff] }
 0x62c   : > { %11582 = vst.msk [vmem:[%s19667_s8 + $0x58] sm:$0xff] %vm11570_vm4, %v11549_v62  ;;  %v11547_v52 = vadd.f32 %v19657_v16, %v11508_v17  ;;  %v11513_v47 = vadd.f32 %v13751_v44, %v11031_v61  ;;  %v13720_v31 = vpop.f32.mrf.mxu0  ;;  %v20265_v62 = vld [vmem:[#allocation4_spill] sm:$0xff] }
 0x62d   : > { %v11420_v58 = vpop.f32.mrf.mxu1  ;;  %v11036_v24 = vadd.f32 %v13720_v31, %v10298_v2  ;;  %v10301_v17 = vadd.f32 %v20265_v62, %v9930_v6 }
 0x62e   : > { %11580 = vst.msk [vmem:[%s19667_s8 + $0x48] sm:$0xff] %vm11570_vm4, %v11547_v52  ;;  %v11552_v11 = vadd.f32 %v19657_v16, %v11513_v47  ;;  %v11511_v35 = vadd.f32 %v11420_v58, %v11029_v29  ;;  %v10957_v9 = vpop.f32.mrf.mxu0  ;;  %v20267_v29 = vld [vmem:[#allocation15_spill] sm:$0xff]  ;;  %v20268_v58 = vld [vmem:[#allocation5_spill] sm:$0xff] }
 0x62f   : > { %v13752_v63 = vpop.f32.mrf.mxu1  ;;  %v11034_v12 = vadd.f32 %v10957_v9, %v10296_v3  ;;  %v9931_v52 = vadd.f32 %v20267_v29, %v20266_v20  ;;  %v10299_v31 = vadd.f32 %v20268_v58, %v9928_v38  ;;  %v20271_v9 = vld [vmem:[#allocation10_spill] sm:$0xff] }
 0x630   : > { %11585 = vst.msk [vmem:[%s19667_s8 + $0x70] sm:$0xff] %vm11570_vm4, %v11552_v11  ;;  %v11550_v25 = vadd.f32 %v19657_v16, %v11511_v35  ;;  %v11514_v51 = vadd.f32 %v13752_v63, %v11032_v28  ;;  %v13723_v8 = vpop.f32.mrf.mxu0  ;;  %v20269_v35 = vld [vmem:[#allocation19_spill] sm:$0xff] }
 0x631   : > { %v11423_v23 = vpop.f32.mrf.mxu1  ;;  %v11039_v4 = vadd.f32 %v13723_v8, %v10301_v17  ;;  %v9929_v18 = vadd.f32 %v20270_v55, %v20269_v35  ;;  %v10302_v26 = vadd.f32 %v20271_v9, %v9931_v52  ;;  %v20274_v8 = vld [vmem:[#allocation23_spill] sm:$0xff] }
 0x632   : > { %11583 = vst.msk [vmem:[%s19667_s8 + $0x60] sm:$0xff] %vm11570_vm4, %v11550_v25  ;;  %v11553_v0 = vadd.f32 %v19657_v16, %v11514_v51  ;;  %v11512_v53 = vadd.f32 %v11423_v23, %v11030_v50  ;;  %v10970_v19 = vpop.f32.mrf.mxu0  ;;  %v20272_v51 = vld [vmem:[#allocation32_spill] sm:$0xff] }
 0x633   : > { %v13755_v59 = vpop.f32.mrf.mxu1  ;;  %v11037_v15 = vadd.f32 %v10970_v19, %v10299_v31  ;;  %v9934_v33 = vadd.f32 %v20273_v14, %v20272_v51  ;;  %v10300_v46 = vadd.f32 %v20274_v8, %v9929_v18  ;;  %v20277_v19 = vld [vmem:[#allocation11_spill] sm:$0xff]  ;;  %v20289_v18 = vld [vmem:[#allocation46_spill] sm:$0xff] }
 0x634   : > { %11586 = vst.msk [vmem:[%s19667_s8 + $0x78] sm:$0xff] %vm11570_vm4, %v11553_v0  ;;  %v11551_v5 = vadd.f32 %v19657_v16, %v11512_v53  ;;  %v11517_v60 = vadd.f32 %v13755_v59, %v11035_v10  ;;  %v13724_v37 = vpop.f32.mrf.mxu0  ;;  %v20275_v53 = vld [vmem:[#allocation27_spill] sm:$0xff] }
 0x635   : > { %v11436_v36 = vpop.f32.mrf.mxu1  ;;  %v11040_v49 = vadd.f32 %v13724_v37, %v10302_v26  ;;  %v9932_v39 = vadd.f32 %v20276_v42, %v20275_v53  ;;  %v10305_v7 = vadd.f32 %v20277_v19, %v9934_v33  ;;  %v20280_v37 = vld [vmem:[#allocation20_spill] sm:$0xff]  ;;  %v20292_v33 = vld [vmem:[#allocation47_spill] sm:$0xff] }
 0x636   : > { %11584 = vst.msk [vmem:[%s19667_s8 + $0x68] sm:$0xff] %vm11570_vm4, %v11551_v5  ;;  %v11556_v21 = vadd.f32 %v19657_v16, %v11517_v60  ;;  %v11515_v13 = vadd.f32 %v11436_v36, %v11033_v43  ;;  %v10973_v61 = vpop.f32.mrf.mxu0  ;;  %v20278_v60 = vld [vmem:[#allocation9_spill] sm:$0xff] }
 0x637   : > { %v13756_v1 = vpop.f32.mrf.mxu1  ;;  %v11038_v2 = vadd.f32 %v10973_v61, %v10300_v46  ;;  %v9935_v32 = vadd.f32 %v20279_v41, %v20278_v60  ;;  %v10303_v56 = vadd.f32 %v20280_v37, %v9932_v39 }
 0x638   : > { %11589 = vst.msk [vmem:[%s19667_s8 + $0x90] sm:$0xff] %vm11570_vm4, %v11556_v21  ;;  %v11554_v44 = vadd.f32 %v19657_v16, %v11515_v13  ;;  %v11518_v30 = vadd.f32 %v13756_v1, %v11036_v24  ;;  %v13727_v48 = vpop.f32.mrf.mxu0  ;;  %v20281_v13 = vld [vmem:[#allocation29_spill] sm:$0xff] }
 0x639   : > { %v11439_v47 = vpop.f32.mrf.mxu1  ;;  %v11043_v3 = vadd.f32 %v13727_v48, %v10305_v7  ;;  %v9933_v34 = vadd.f32 %v20282_v40, %v20281_v13  ;;  %v20283_v1 = vld [vmem:[#allocation25_spill] sm:$0xff] }
 0x63a   : > { %11587 = vst.msk [vmem:[%s19667_s8 + $0x80] sm:$0xff] %vm11570_vm4, %v11554_v44  ;;  %v11557_v28 = vadd.f32 %v19657_v16, %v11518_v30  ;;  %v11516_v11 = vadd.f32 %v11439_v47, %v11034_v12  ;;  %v10986_v63 = vpop.f32.mrf.mxu0  ;;  %v10306_v61 = vadd.f32 %v20283_v1, %v9935_v32  ;;  %v20284_v44 = vld [vmem:[#allocation40_spill] sm:$0xff]  ;;  %v20285_v30 = vld [vmem:[#allocation17_spill] sm:$0xff] }
 0x63b   : > { %v13759_v27 = vpop.f32.mrf.mxu1  ;;  %v11041_v62 = vadd.f32 %v10986_v63, %v10303_v56  ;;  %v9938_v20 = vadd.f32 %v20285_v30, %v20284_v44  ;;  %v20286_v47 = vld [vmem:[#allocation45_spill] sm:$0xff] }
 0x63c   : > { %11590 = vst.msk [vmem:[%s19667_s8 + $0x98] sm:$0xff] %vm11570_vm4, %v11557_v28  ;;  %v11555_v50 = vadd.f32 %v19657_v16, %v11516_v11  ;;  %v11521_v25 = vadd.f32 %v13759_v27, %v11039_v4  ;;  %v13728_v23 = vpop.f32.mrf.mxu0  ;;  %v10304_v48 = vadd.f32 %v20286_v47, %v9933_v34  ;;  %v20287_v28 = vld [vmem:[#allocation14_spill] sm:$0xff]  ;;  %v20288_v11 = vld [vmem:[#allocation31_spill] sm:$0xff] }
 0x63d   : > { %v11452_v57 = vpop.f32.mrf.mxu1  ;;  %v11044_v58 = vadd.f32 %v13728_v23, %v10306_v61  ;;  %v9936_v35 = vadd.f32 %v20288_v11, %v20287_v28  ;;  %v10309_v27 = vadd.f32 %v20289_v18, %v9938_v20 }
 0x63e   : > { %11588 = vst.msk [vmem:[%s19667_s8 + $0x88] sm:$0xff] %vm11570_vm4, %v11555_v50  ;;  %v11560_v10 = vadd.f32 %v19657_v16, %v11521_v25  ;;  %v11519_v0 = vadd.f32 %v11452_v57, %v11037_v15  ;;  %v10989_v59 = vpop.f32.mrf.mxu0  ;;  %v20290_v15 = vld [vmem:[#allocation12_spill] sm:$0xff]  ;;  %v20291_v50 = vld [vmem:[#allocation34_spill] sm:$0xff] }
 0x63f   : > { %v13760_v54 = vpop.f32.mrf.mxu1  ;;  %v11042_v63 = vadd.f32 %v10989_v59, %v10304_v48  ;;  %v9939_v25 = vadd.f32 %v20291_v50, %v20290_v15  ;;  %v10307_v57 = vadd.f32 %v20292_v33, %v9936_v35 }
 0x640   : > { %11593 = vst.msk [vmem:[%s19667_s8 + $0xb0] sm:$0xff] %vm11570_vm4, %v11560_v10  ;;  %v11558_v43 = vadd.f32 %v19657_v16, %v11519_v0  ;;  %v11522_v5 = vadd.f32 %v13760_v54, %v11040_v49  ;;  %v13731_v36 = vpop.f32.mrf.mxu0  ;;  %v20293_v49 = vld [vmem:[#allocation35_spill] sm:$0xff]  ;;  %v20294_v10 = vld [vmem:[#allocation44_spill] sm:$0xff] }
 0x641   : > { %v11455_v6 = vpop.f32.mrf.mxu1  ;;  %v11047_v23 = vadd.f32 %v13731_v36, %v10309_v27  ;;  %v9937_v0 = vadd.f32 %v20294_v10, %v20293_v49  ;;  %v10310_v42 = vadd.f32 %v19644_v45, %v9939_v25 }
 0x642   : > { %11591 = vst.msk [vmem:[%s19667_s8 + $0xa0] sm:$0xff] %vm11570_vm4, %v11558_v43  ;;  %v11561_v24 = vadd.f32 %v19657_v16, %v11522_v5  ;;  %v11520_v21 = vadd.f32 %v11455_v6, %v11038_v2  ;;  %v11002_v29 = vpop.f32.mrf.mxu0 }
 0x643   : > { %v13763_v38 = vpop.f32.mrf.mxu1  ;;  %v11045_v39 = vadd.f32 %v11002_v29, %v10307_v57  ;;  %v10308_v2 = vadd.f32 %v19649_v22, %v9937_v0 }
 0x644   : > { %11594 = vst.msk [vmem:[%s19667_s8 + $0xb8] sm:$0xff] %vm11570_vm4, %v11561_v24  ;;  %v11559_v17 = vadd.f32 %v19657_v16, %v11520_v21  ;;  %v11525_v12 = vadd.f32 %v13763_v38, %v11043_v3  ;;  %v13732_v51 = vpop.f32.mrf.mxu0 }
 0x645   : > { %v11468_v52 = vpop.f32.mrf.mxu1  ;;  %v11048_v43 = vadd.f32 %v13732_v51, %v10310_v42 }
 0x646   : > { %11592 = vst.msk [vmem:[%s19667_s8 + $0xa8] sm:$0xff] %vm11570_vm4, %v11559_v17  ;;  %v11564_v31 = vadd.f32 %v19657_v16, %v11525_v12  ;;  %v11523_v4 = vadd.f32 %v11468_v52, %v11041_v62  ;;  %v11005_v19 = vpop.f32.mrf.mxu0 }
 0x647   : > { %v13764_v55 = vpop.f32.mrf.mxu1  ;;  %v11046_v41 = vadd.f32 %v11005_v19, %v10308_v2 }
 0x648   : > { %11597 = vst.msk [vmem:[%s19667_s8 + $0xd0] sm:$0xff] %vm11570_vm4, %v11564_v31  ;;  %v11562_v9 = vadd.f32 %v19657_v16, %v11523_v4  ;;  %v11526_v26 = vadd.f32 %v13764_v55, %v11044_v58 }
 0x649   : > { %v11471_v14 = vpop.f32.mrf.mxu1 }
 0x64a   : > { %11595 = vst.msk [vmem:[%s19667_s8 + $0xc0] sm:$0xff] %vm11570_vm4, %v11562_v9  ;;  %v11565_v8 = vadd.f32 %v19657_v16, %v11526_v26  ;;  %v11524_v46 = vadd.f32 %v11471_v14, %v11042_v63 }
 0x64b   : > { %v13767_v53 = vpop.f32.mrf.mxu1 }
 0x64c   : > { %11598 = vst.msk [vmem:[%s19667_s8 + $0xd8] sm:$0xff] %vm11570_vm4, %v11565_v8  ;;  %v11563_v54 = vadd.f32 %v19657_v16, %v11524_v46  ;;  %v11529_v59 = vadd.f32 %v13767_v53, %v11047_v23 }
 0x64d   : > { %v11484_v7 = vpop.f32.mrf.mxu1 }
 0x64e   : > { %11596 = vst.msk [vmem:[%s19667_s8 + $0xc8] sm:$0xff] %vm11570_vm4, %v11563_v54  ;;  %v11568_v5 = vadd.f32 %v19657_v16, %v11529_v59  ;;  %v11527_v60 = vadd.f32 %v11484_v7, %v11045_v39 }
 0x64f   : > { %v13768_v45 = vpop.f32.mrf.mxu1 }
 0x650   : > { %11601 = vst.msk [vmem:[%s19667_s8 + $0xf0] sm:$0xff] %vm11570_vm4, %v11568_v5  ;;  %v11566_v32 = vadd.f32 %v19657_v16, %v11527_v60  ;;  %v11530_v6 = vadd.f32 %v13768_v45, %v11048_v43 }
 0x651   : > { %v11487_v36 = vpop.f32.mrf.mxu1 }
 0x652   : > { %11599 = vst.msk [vmem:[%s19667_s8 + $0xe0] sm:$0xff] %vm11570_vm4, %v11566_v32  ;;  %v11569_v37 = vadd.f32 %v19657_v16, %v11530_v6  ;;  %v11528_v22 = vadd.f32 %v11487_v36, %v11046_v41 }
 0x654   : > { %11602 = vst.msk [vmem:[%s19667_s8 + $0xf8] sm:$0xff] %vm11570_vm4, %v11569_v37  ;;  %v11567_v56 = vadd.f32 %v19657_v16, %v11528_v22 }
 0x656   : > { %11600 = vst.msk [vmem:[%s19667_s8 + $0xe8] sm:$0xff] %vm11570_vm4, %v11567_v56 }
 0x657 PF: > { %s18_s26 = sadd.s32 1, %s14124_s26  }
 0x658   : > { %p15_p4 = scmp.ge.s32.totalorder %s18_s26, 4  }
 0x65a   :  { %17 = sbr.rel (!%p15_p4) target bundleno = 2 (0x2), region = 94 }

</bundles_post_ra>
